<compile_context>
chip_gen: v5e
topology: v5e:2x2
jax: 0.10.0
libtpu: 0.0.40
codegen_flags: <defaults>
</compile_context>

<pallas_src>
import numpy as np
import jax
import jax.numpy as jnp
from jax import lax
from jax.experimental import pallas as pl
from jax.experimental.pallas import tpu as pltpu


# Parity-grid geometry (28x28 input, 3x3 valid convs, 2x2 pool).
_PG = 13              # parity-plane side: 26/2
_PROWS = _PG * _PG    # 169 rows per parity plane
_PPAD = 176           # rows padded to a sublane multiple (covers shifted slices)
_ACC_ROWS = 12 * 13   # 156 rows per pooled output (the pw==12 column is garbage)
_STARTS = (0, 1, 13, 14)   # flat row shift for (qh, qw) in {0,1}^2


# ----------------------------- Pallas kernels ------------------------------

def _conv_stage_kernel(xcol_ref, w1b_ref, b1b_ref, w2b_ref, b2_ref, o_ref, y1_scr):
    # xcol_ref: (B, 176, 36) f32   parity-decomposed im2col of the 28x28 input
    # w1b_ref : (36, 128)   f32    block-diagonal conv1 weights (4 parity blocks)
    # b1b_ref : (1, 128)    f32    conv1 bias tiled over the 4 parity blocks
    # w2b_ref : (4, 128, 256) bf16 block-Toeplitz conv2 weights (4 shifts x 4 corners)
    # b2_ref  : (1, 64)     f32
    # o_ref   : (B, 156, 64) bf16  pooled conv2 output (rows = ph*13+pw; pw==12 rows
    #                              are garbage, zeroed by the padded fc1 weight rows)
    # y1_scr  : (176, 128)  f32    per-sample conv1 output, parities side by side
    nb = o_ref.shape[0]
    w1b = w1b_ref[...]
    b1b = b1b_ref[...]
    bias2 = b2_ref[...]
    for i in range(nb):
        # conv1 + bias + ReLU: one GEMM lands parity p in lanes [p*32, p*32+32).
        y1 = jnp.dot(xcol_ref[i], w1b, preferred_element_type=jnp.float32)  # (176,128)
        y1_scr[...] = jnp.maximum(y1 + b1b, 0.0)
        # conv2: 4 shifted dense dots; output columns = 4 pool corners x 64 channels.
        acc = None
        for s in range(4):
            lhs = y1_scr[pl.ds(_STARTS[s], _ACC_ROWS), :].astype(jnp.bfloat16)  # (156,128)
            d = jnp.dot(lhs, w2b_ref[s], preferred_element_type=jnp.float32)    # (156,256)
            acc = d if acc is None else acc + d
        # 2x2 max-pool == max over the 4 corner column blocks; then bias + ReLU.
        pooled = jnp.maximum(jnp.maximum(acc[:, 0:64], acc[:, 64:128]),
                             jnp.maximum(acc[:, 128:192], acc[:, 192:256]))      # (156,64)
        o_ref[i] = jnp.maximum(pooled + bias2, 0.0).astype(o_ref.dtype)


def _head_kernel(x_ref, w1_ref, b1_ref, w2_ref, b2_ref, o_ref):
    # fc1 (bf16 x bf16 -> f32 accumulate on the MXU) + ReLU + fc2 + log_softmax.
    h = jnp.dot(x_ref[...], w1_ref[...], preferred_element_type=jnp.float32)
    h = jnp.maximum(h + b1_ref[...], 0.0)
    logits = jnp.dot(h, w2_ref[...], preferred_element_type=jnp.float32) + b2_ref[...]
    m = jnp.max(logits, axis=1, keepdims=True)
    lse = jnp.log(jnp.sum(jnp.exp(logits - m), axis=1, keepdims=True)) + m
    o_ref[...] = logits - lse


# --------------------------- pallas_call wrappers ---------------------------

def conv_stage(xcol, w1b, b1b, w2b, b2r):
    N = xcol.shape[0]
    B = next(b for b in (8, 4, 2, 1) if N % b == 0)
    flops = N * (2 * _PPAD * 36 * 128 + 2 * 4 * _ACC_ROWS * 128 * 256)
    bytes_acc = (N * _PPAD * 36 * 4 + N * _ACC_ROWS * 64 * 2
                 + 36 * 128 * 4 + 128 * 4 + 4 * 128 * 256 * 2 + 64 * 4)
    return pl.pallas_call(
        _conv_stage_kernel,
        out_shape=jax.ShapeDtypeStruct((N, _ACC_ROWS, 64), jnp.bfloat16),
        grid=(N // B,),
        in_specs=[
            pl.BlockSpec((B, _PPAD, 36), lambda n: (n, 0, 0)),
            pl.BlockSpec((36, 128), lambda n: (0, 0)),
            pl.BlockSpec((1, 128), lambda n: (0, 0)),
            pl.BlockSpec((4, 128, 256), lambda n: (0, 0, 0)),
            pl.BlockSpec((1, 64), lambda n: (0, 0)),
        ],
        out_specs=pl.BlockSpec((B, _ACC_ROWS, 64), lambda n: (n, 0, 0)),
        scratch_shapes=[pltpu.VMEM((_PPAD, 128), jnp.float32)],
        compiler_params=pltpu.CompilerParams(dimension_semantics=("parallel",)),
        cost_estimate=pl.CostEstimate(flops=flops, transcendentals=0,
                                      bytes_accessed=bytes_acc),
    )(xcol, w1b, b1b, w2b, b2r)


def mlp_head(x, w1e, b1, w2, b2):
    N, K = x.shape
    H = w1e.shape[1]
    C = w2.shape[1]
    BN = next(b for b in (256, 128, 64, 32, 16, 8, 4, 2, 1) if N % b == 0)
    flops = N * (2 * K * H + 2 * H * C)
    bytes_acc = N * K * 2 + K * H * 2 + H * 4 + H * C * 4 + C * 4 + N * C * 4
    return pl.pallas_call(
        _head_kernel,
        out_shape=jax.ShapeDtypeStruct((N, C), jnp.float32),
        grid=(N // BN,),
        in_specs=[
            pl.BlockSpec((BN, K), lambda i: (i, 0)),
            pl.BlockSpec((K, H), lambda i: (0, 0)),
            pl.BlockSpec((1, H), lambda i: (0, 0)),
            pl.BlockSpec((H, C), lambda i: (0, 0)),
            pl.BlockSpec((1, C), lambda i: (0, 0)),
        ],
        out_specs=pl.BlockSpec((BN, C), lambda i: (i, 0)),
        compiler_params=pltpu.CompilerParams(
            dimension_semantics=("parallel",),
            vmem_limit_bytes=32 * 1024 * 1024),
        cost_estimate=pl.CostEstimate(flops=flops, transcendentals=N * C,
                                      bytes_accessed=bytes_acc),
    )(x, w1e, b1, w2, b2)


# --------------------------------- forward ----------------------------------

def _build_xcol(x_nchw):
    # Parity-decomposed im2col of the 28x28 input (cheap XLA glue on a 3 KB/sample
    # tensor).  Column order (parity p = 2*(h%2)+(w%2), tap t = 3*dh+dw) matches the
    # block-diagonal conv1 weight matrix; rows padded 169 -> 176 with zeros.
    N = x_nchw.shape[0]
    img = x_nchw[:, 0]                                   # (N, 28, 28)
    cols = []
    for p in range(4):
        pa, pb = p // 2, p % 2
        for t in range(9):
            dh, dw = t // 3, t % 3
            sub = img[:, pa + dh: pa + dh + 25: 2, pb + dw: pb + dw + 25: 2]  # (N,13,13)
            cols.append(sub.reshape(N, _PROWS))
    xc = jnp.stack(cols, axis=-1)                        # (N, 169, 36)
    return jnp.pad(xc, ((0, 0), (0, _PPAD - _PROWS), (0, 0)))  # (N, 176, 36)


def net_forward(x_nchw, params):
    N = x_nchw.shape[0]
    xcol = _build_xcol(x_nchw)
    pooled = conv_stage(xcol, params["w1b"], params["b1b"],
                        params["w2b"], params["b2r"])    # (N, 156, 64) bf16
    # dropout1 / dropout2: identity (eval-mode nn.Dropout).
    feat = pooled.reshape(N, _ACC_ROWS * 64)             # free metadata reshape
    return mlp_head(feat, params["wf1e"], params["bf1r"],
                    params["wf2"], params["bf2r"])


# --------------------------- params & reference ------------------------------

def init_params(key):
    ks = jax.random.split(key, 8)

    def rnd(k, shape, fan_in):
        return (jax.random.normal(k, shape, jnp.float32) / np.sqrt(fan_in)).astype(jnp.float32)

    w1 = rnd(ks[0], (3, 3, 1, 32), 9)          # HWIO
    b1 = rnd(ks[1], (32,), 9)
    w2 = rnd(ks[2], (3, 3, 32, 64), 288)
    b2 = rnd(ks[3], (64,), 288)
    wf1 = rnd(ks[4], (9216, 128), 9216)        # rows in torch (C, H, W) flatten order
    bf1 = rnd(ks[5], (128,), 9216)
    wf2 = rnd(ks[6], (128, 10), 128)
    bf2 = rnd(ks[7], (10,), 128)

    # Offline weight rearrangements for the fused conv kernel.
    w1_np = np.asarray(w1).reshape(9, 32)                     # (tap, cout)
    w1b = np.zeros((36, 128), np.float32)
    for p in range(4):
        w1b[p * 9:(p + 1) * 9, p * 32:(p + 1) * 32] = w1_np
    b1b = np.tile(np.asarray(b1), 4).reshape(1, 128)

    w2_np = np.asarray(w2)                                    # (dh, dw, cin, cout)
    w2b = np.zeros((4, 128, 256), np.float32)
    for qh in range(2):
        for qw in range(2):
            s = 2 * qh + qw
            for rh in range(2):
                for rw in range(2):
                    p = 2 * rh + rw
                    for a in range(2):
                        for b in range(2):
                            corner = 2 * a + b
                            dh = 2 * qh + rh - a
                            dw = 2 * qw + rw - b
                            if 0 <= dh < 3 and 0 <= dw < 3:
                                w2b[s, p * 32:(p + 1) * 32,
                                    corner * 64:(corner + 1) * 64] = w2_np[dh, dw]

    # fc1 weights: rows permuted from torch (C=64, H=12, W=12) flatten order to the
    # kernel's (ph, pw padded to 13, c) order; pw==12 rows are zero so the garbage
    # rows of the pooled output contribute nothing.
    wf1_np = np.asarray(wf1).reshape(64, 12, 12, 128)
    ext = np.zeros((12, 13, 64, 128), np.float32)
    ext[:, :12] = np.transpose(wf1_np, (1, 2, 0, 3))
    wf1e = ext.reshape(_ACC_ROWS * 64, 128)

    return {
        # plain weights (reference path)
        "w1": w1, "b1": b1, "w2": w2, "b2": b2,
        "wf1": wf1, "bf1": bf1, "wf2": wf2, "bf2": bf2,
        # kernel-side layouts
        "w1b": jnp.asarray(w1b),
        "b1b": jnp.asarray(b1b),
        "w2b": jnp.asarray(w2b, dtype=jnp.bfloat16),
        "b2r": jnp.asarray(np.asarray(b2).reshape(1, 64)),
        "wf1e": jnp.asarray(wf1e, dtype=jnp.bfloat16),
        "bf1r": jnp.asarray(np.asarray(bf1).reshape(1, 128)),
        "bf2r": jnp.asarray(np.asarray(bf2).reshape(1, 10)),
    }


def reference_forward(x_nchw, params):
    # Pure-JAX f32 (HIGHEST precision) reference of the PyTorch forward (eval mode).
    N = x_nchw.shape[0]
    x = jnp.transpose(x_nchw, (0, 2, 3, 1))
    dn = ("NHWC", "HWIO", "NHWC")
    hp = lax.Precision.HIGHEST
    y = lax.conv_general_dilated(x, params["w1"], (1, 1), "VALID",
                                 dimension_numbers=dn, precision=hp)
    y = jnp.maximum(y + params["b1"].reshape(1, 1, 1, 32), 0.0)
    y = lax.conv_general_dilated(y, params["w2"], (1, 1), "VALID",
                                 dimension_numbers=dn, precision=hp)
    y = jnp.maximum(y + params["b2"].reshape(1, 1, 1, 64), 0.0)
    y = lax.reduce_window(y, -jnp.inf, lax.max, (1, 2, 2, 1), (1, 2, 2, 1), "VALID")
    feat = y.transpose(0, 3, 1, 2).reshape(N, 9216)       # torch flatten order
    h = jnp.maximum(jnp.dot(feat, params["wf1"], precision=hp) + params["bf1"], 0.0)
    logits = jnp.dot(h, params["wf2"], precision=hp) + params["bf2"]
    return jax.nn.log_softmax(logits, axis=1)


# ---------------------------------- main -------------------------------------

if __name__ == "__main__":
    key = jax.random.PRNGKey(0)
    k_x, k_p, k_x2 = jax.random.split(key, 3)
    params = init_params(k_p)
    fwd = jax.jit(net_forward)
    ref = jax.jit(reference_forward)

    # N=2 (primary, tiny) and N=16 (exercises the batched conv block B=8, 2 grid steps).
    for n, kk in ((2, k_x), (16, k_x2)):
        x = jax.random.normal(kk, (n, 1, 28, 28), jnp.float32)
        out = jax.block_until_ready(fwd(x, params))
        assert out.shape == (n, 10) and out.dtype == jnp.float32
        # log_softmax rows must exponentiate-sum to 1 (computed in f32).
        np.testing.assert_allclose(
            np.exp(np.asarray(out, np.float64)).sum(axis=1), 1.0, atol=1e-4)
        # Compare against the pure-f32 reference.  The kernel path uses bf16 for the
        # conv2 lhs/weights, the pooled activations and the fc1 weights, so compare
        # at a bf16-appropriate tolerance.
        expect = np.asarray(ref(x, params))
        np.testing.assert_allclose(np.asarray(out), expect, atol=3e-2, rtol=3e-2)

    print("KERNEL_OK")
</pallas_src>

<mosaic_0001>
module attributes {stable_mosaic.version = 11 : i64} {
  func.func @_conv_stage_kernel(%arg0: i32, %arg1: memref<2x176x36xf32, #tpu.memory_space<vmem>>, %arg2: memref<36x128xf32, #tpu.memory_space<vmem>>, %arg3: memref<1x128xf32, #tpu.memory_space<vmem>>, %arg4: memref<4x128x256xbf16, #tpu.memory_space<vmem>>, %arg5: memref<1x64xf32, #tpu.memory_space<vmem>>, %arg6: memref<2x156x64xbf16, #tpu.memory_space<vmem>>, %arg7: memref<176x128xf32, #tpu.memory_space<vmem>>) attributes {dimension_semantics = [#tpu.dimension_semantics<parallel>], iteration_bounds = array<i64: 1>, scalar_prefetch = 0 : i64, scratch_operands = 1 : i64, tpu.core_type = #tpu.core_type<tc>, window_params = [{transform_indices = @transform_0, window_bounds = array<i64: 2, 176, 36>}, {pipeline_mode = #tpu.pipeline_mode<synchronous>, transform_indices = @transform_1, window_bounds = array<i64: 36, 128>}, {pipeline_mode = #tpu.pipeline_mode<synchronous>, transform_indices = @transform_2, window_bounds = array<i64: 1, 128>}, {pipeline_mode = #tpu.pipeline_mode<synchronous>, transform_indices = @transform_3, window_bounds = array<i64: 4, 128, 256>}, {pipeline_mode = #tpu.pipeline_mode<synchronous>, transform_indices = @transform_4, window_bounds = array<i64: 1, 64>}, {transform_indices = @transform_5, window_bounds = array<i64: 2, 156, 64>}]} {
    %c0 = arith.constant 0 : index
    %c0_0 = arith.constant 0 : index
    %0 = vector.load %arg2[%c0, %c0_0] : memref<36x128xf32, #tpu.memory_space<vmem>>, vector<36x128xf32>
    %c0_1 = arith.constant 0 : index
    %c0_2 = arith.constant 0 : index
    %1 = vector.load %arg3[%c0_1, %c0_2] : memref<1x128xf32, #tpu.memory_space<vmem>>, vector<1x128xf32>
    %c0_3 = arith.constant 0 : index
    %c0_4 = arith.constant 0 : index
    %2 = vector.load %arg5[%c0_3, %c0_4] : memref<1x64xf32, #tpu.memory_space<vmem>>, vector<1x64xf32>
    %c0_5 = arith.constant 0 : index
    %c0_6 = arith.constant 0 : index
    %c0_7 = arith.constant 0 : index
    %3 = vector.load %arg1[%c0_5, %c0_6, %c0_7] : memref<2x176x36xf32, #tpu.memory_space<vmem>>, vector<1x176x36xf32>
    %4 = vector.shape_cast %3 : vector<1x176x36xf32> to vector<176x36xf32>
    %cst = arith.constant dense<0.000000e+00> : vector<176x128xf32>
    %5 = tpu.matmul %4, %0, %cst {dimension_numbers = #tpu.dot_dimension_numbers<[1], [0], [0], [1], [0, 0, 1, 1], [], []>} : vector<176x36xf32>, vector<36x128xf32>, vector<176x128xf32> -> vector<176x128xf32>
    %6 = vector.broadcast %1 : vector<1x128xf32> to vector<176x128xf32>
    %7 = arith.addf %5, %6 : vector<176x128xf32>
    %cst_8 = arith.constant 0.000000e+00 : f32
    %8 = vector.broadcast %cst_8 : f32 to vector<176x128xf32>
    %9 = arith.maximumf %7, %8 : vector<176x128xf32>
    %c0_9 = arith.constant 0 : index
    %c0_10 = arith.constant 0 : index
    %10 = vector.load %arg7[%c0_9, %c0_10] : memref<176x128xf32, #tpu.memory_space<vmem>>, vector<176x128xf32>
    tpu.vector_store %arg7[%c0_9, %c0_10], %9 {strides = array<i32>} : memref<176x128xf32, #tpu.memory_space<vmem>>, vector<176x128xf32>,
    %c0_11 = arith.constant 0 : index
    %c0_12 = arith.constant 0 : index
    %11 = vector.load %arg7[%c0_11, %c0_12] : memref<176x128xf32, #tpu.memory_space<vmem>>, vector<156x128xf32>
    %12 = arith.truncf %11 : vector<156x128xf32> to vector<156x128xbf16>
    %c0_13 = arith.constant 0 : index
    %c0_14 = arith.constant 0 : index
    %c0_15 = arith.constant 0 : index
    %13 = vector.load %arg4[%c0_13, %c0_14, %c0_15] : memref<4x128x256xbf16, #tpu.memory_space<vmem>>, vector<1x128x256xbf16>
    %14 = vector.shape_cast %13 : vector<1x128x256xbf16> to vector<128x256xbf16>
    %cst_16 = arith.constant dense<0.000000e+00> : vector<156x256xf32>
    %15 = tpu.matmul %12, %14, %cst_16 {dimension_numbers = #tpu.dot_dimension_numbers<[1], [0], [0], [1], [0, 0, 1, 1], [], []>} : vector<156x128xbf16>, vector<128x256xbf16>, vector<156x256xf32> -> vector<156x256xf32>
    %c1 = arith.constant 1 : index
    %c0_17 = arith.constant 0 : index
    %16 = vector.load %arg7[%c1, %c0_17] : memref<176x128xf32, #tpu.memory_space<vmem>>, vector<156x128xf32>
    %17 = arith.truncf %16 : vector<156x128xf32> to vector<156x128xbf16>
    %c1_18 = arith.constant 1 : index
    %c0_19 = arith.constant 0 : index
    %c0_20 = arith.constant 0 : index
    %18 = vector.load %arg4[%c1_18, %c0_19, %c0_20] : memref<4x128x256xbf16, #tpu.memory_space<vmem>>, vector<1x128x256xbf16>
    %19 = vector.shape_cast %18 : vector<1x128x256xbf16> to vector<128x256xbf16>
    %cst_21 = arith.constant dense<0.000000e+00> : vector<156x256xf32>
    %20 = tpu.matmul %17, %19, %cst_21 {dimension_numbers = #tpu.dot_dimension_numbers<[1], [0], [0], [1], [0, 0, 1, 1], [], []>} : vector<156x128xbf16>, vector<128x256xbf16>, vector<156x256xf32> -> vector<156x256xf32>
    %21 = arith.addf %15, %20 : vector<156x256xf32>
    %c13 = arith.constant 13 : index
    %c0_22 = arith.constant 0 : index
    %22 = vector.load %arg7[%c13, %c0_22] : memref<176x128xf32, #tpu.memory_space<vmem>>, vector<156x128xf32>
    %23 = arith.truncf %22 : vector<156x128xf32> to vector<156x128xbf16>
    %c2 = arith.constant 2 : index
    %c0_23 = arith.constant 0 : index
    %c0_24 = arith.constant 0 : index
    %24 = vector.load %arg4[%c2, %c0_23, %c0_24] : memref<4x128x256xbf16, #tpu.memory_space<vmem>>, vector<1x128x256xbf16>
    %25 = vector.shape_cast %24 : vector<1x128x256xbf16> to vector<128x256xbf16>
    %cst_25 = arith.constant dense<0.000000e+00> : vector<156x256xf32>
    %26 = tpu.matmul %23, %25, %cst_25 {dimension_numbers = #tpu.dot_dimension_numbers<[1], [0], [0], [1], [0, 0, 1, 1], [], []>} : vector<156x128xbf16>, vector<128x256xbf16>, vector<156x256xf32> -> vector<156x256xf32>
    %27 = arith.addf %21, %26 : vector<156x256xf32>
    %c14 = arith.constant 14 : index
    %c0_26 = arith.constant 0 : index
    %28 = vector.load %arg7[%c14, %c0_26] : memref<176x128xf32, #tpu.memory_space<vmem>>, vector<156x128xf32>
    %29 = arith.truncf %28 : vector<156x128xf32> to vector<156x128xbf16>
    %c3 = arith.constant 3 : index
    %c0_27 = arith.constant 0 : index
    %c0_28 = arith.constant 0 : index
    %30 = vector.load %arg4[%c3, %c0_27, %c0_28] : memref<4x128x256xbf16, #tpu.memory_space<vmem>>, vector<1x128x256xbf16>
    %31 = vector.shape_cast %30 : vector<1x128x256xbf16> to vector<128x256xbf16>
    %cst_29 = arith.constant dense<0.000000e+00> : vector<156x256xf32>
    %32 = tpu.matmul %29, %31, %cst_29 {dimension_numbers = #tpu.dot_dimension_numbers<[1], [0], [0], [1], [0, 0, 1, 1], [], []>} : vector<156x128xbf16>, vector<128x256xbf16>, vector<156x256xf32> -> vector<156x256xf32>
    %33 = arith.addf %27, %32 : vector<156x256xf32>
    %34 = vector.extract_strided_slice %33 {offsets = [0, 0], sizes = [156, 64], strides = [1, 1]} : vector<156x256xf32> to vector<156x64xf32>
    %35 = vector.extract_strided_slice %33 {offsets = [0, 64], sizes = [156, 64], strides = [1, 1]} : vector<156x256xf32> to vector<156x64xf32>
    %36 = arith.maximumf %34, %35 : vector<156x64xf32>
    %37 = vector.extract_strided_slice %33 {offsets = [0, 128], sizes = [156, 64], strides = [1, 1]} : vector<156x256xf32> to vector<156x64xf32>
    %38 = vector.extract_strided_slice %33 {offsets = [0, 192], sizes = [156, 64], strides = [1, 1]} : vector<156x256xf32> to vector<156x64xf32>
    %39 = arith.maximumf %37, %38 : vector<156x64xf32>
    %40 = arith.maximumf %36, %39 : vector<156x64xf32>
    %41 = vector.broadcast %2 : vector<1x64xf32> to vector<156x64xf32>
    %42 = arith.addf %40, %41 : vector<156x64xf32>
    %cst_30 = arith.constant 0.000000e+00 : f32
    %43 = vector.broadcast %cst_30 : f32 to vector<156x64xf32>
    %44 = arith.maximumf %42, %43 : vector<156x64xf32>
    %45 = arith.truncf %44 : vector<156x64xf32> to vector<156x64xbf16>
    %c0_31 = arith.constant 0 : index
    %c0_32 = arith.constant 0 : index
    %c0_33 = arith.constant 0 : index
    %46 = vector.load %arg6[%c0_31, %c0_32, %c0_33] : memref<2x156x64xbf16, #tpu.memory_space<vmem>>, vector<1x156x64xbf16>
    %47 = vector.shape_cast %46 : vector<1x156x64xbf16> to vector<156x64xbf16>
    %48 = vector.shape_cast %45 : vector<156x64xbf16> to vector<1x156x64xbf16>
    tpu.vector_store %arg6[%c0_31, %c0_32, %c0_33], %48 {strides = array<i32>} : memref<2x156x64xbf16, #tpu.memory_space<vmem>>, vector<1x156x64xbf16>,
    %c1_34 = arith.constant 1 : index
    %c0_35 = arith.constant 0 : index
    %c0_36 = arith.constant 0 : index
    %49 = vector.load %arg1[%c1_34, %c0_35, %c0_36] : memref<2x176x36xf32, #tpu.memory_space<vmem>>, vector<1x176x36xf32>
    %50 = vector.shape_cast %49 : vector<1x176x36xf32> to vector<176x36xf32>
    %cst_37 = arith.constant dense<0.000000e+00> : vector<176x128xf32>
    %51 = tpu.matmul %50, %0, %cst_37 {dimension_numbers = #tpu.dot_dimension_numbers<[1], [0], [0], [1], [0, 0, 1, 1], [], []>} : vector<176x36xf32>, vector<36x128xf32>, vector<176x128xf32> -> vector<176x128xf32>
    %52 = vector.broadcast %1 : vector<1x128xf32> to vector<176x128xf32>
    %53 = arith.addf %51, %52 : vector<176x128xf32>
    %cst_38 = arith.constant 0.000000e+00 : f32
    %54 = vector.broadcast %cst_38 : f32 to vector<176x128xf32>
    %55 = arith.maximumf %53, %54 : vector<176x128xf32>
    %c0_39 = arith.constant 0 : index
    %c0_40 = arith.constant 0 : index
    %56 = vector.load %arg7[%c0_39, %c0_40] : memref<176x128xf32, #tpu.memory_space<vmem>>, vector<176x128xf32>
    tpu.vector_store %arg7[%c0_39, %c0_40], %55 {strides = array<i32>} : memref<176x128xf32, #tpu.memory_space<vmem>>, vector<176x128xf32>,
    %c0_41 = arith.constant 0 : index
    %c0_42 = arith.constant 0 : index
    %57 = vector.load %arg7[%c0_41, %c0_42] : memref<176x128xf32, #tpu.memory_space<vmem>>, vector<156x128xf32>
    %58 = arith.truncf %57 : vector<156x128xf32> to vector<156x128xbf16>
    %c0_43 = arith.constant 0 : index
    %c0_44 = arith.constant 0 : index
    %c0_45 = arith.constant 0 : index
    %59 = vector.load %arg4[%c0_43, %c0_44, %c0_45] : memref<4x128x256xbf16, #tpu.memory_space<vmem>>, vector<1x128x256xbf16>
    %60 = vector.shape_cast %59 : vector<1x128x256xbf16> to vector<128x256xbf16>
    %cst_46 = arith.constant dense<0.000000e+00> : vector<156x256xf32>
    %61 = tpu.matmul %58, %60, %cst_46 {dimension_numbers = #tpu.dot_dimension_numbers<[1], [0], [0], [1], [0, 0, 1, 1], [], []>} : vector<156x128xbf16>, vector<128x256xbf16>, vector<156x256xf32> -> vector<156x256xf32>
    %c1_47 = arith.constant 1 : index
    %c0_48 = arith.constant 0 : index
    %62 = vector.load %arg7[%c1_47, %c0_48] : memref<176x128xf32, #tpu.memory_space<vmem>>, vector<156x128xf32>
    %63 = arith.truncf %62 : vector<156x128xf32> to vector<156x128xbf16>
    %c1_49 = arith.constant 1 : index
    %c0_50 = arith.constant 0 : index
    %c0_51 = arith.constant 0 : index
    %64 = vector.load %arg4[%c1_49, %c0_50, %c0_51] : memref<4x128x256xbf16, #tpu.memory_space<vmem>>, vector<1x128x256xbf16>
    %65 = vector.shape_cast %64 : vector<1x128x256xbf16> to vector<128x256xbf16>
    %cst_52 = arith.constant dense<0.000000e+00> : vector<156x256xf32>
    %66 = tpu.matmul %63, %65, %cst_52 {dimension_numbers = #tpu.dot_dimension_numbers<[1], [0], [0], [1], [0, 0, 1, 1], [], []>} : vector<156x128xbf16>, vector<128x256xbf16>, vector<156x256xf32> -> vector<156x256xf32>
    %67 = arith.addf %61, %66 : vector<156x256xf32>
    %c13_53 = arith.constant 13 : index
    %c0_54 = arith.constant 0 : index
    %68 = vector.load %arg7[%c13_53, %c0_54] : memref<176x128xf32, #tpu.memory_space<vmem>>, vector<156x128xf32>
    %69 = arith.truncf %68 : vector<156x128xf32> to vector<156x128xbf16>
    %c2_55 = arith.constant 2 : index
    %c0_56 = arith.constant 0 : index
    %c0_57 = arith.constant 0 : index
    %70 = vector.load %arg4[%c2_55, %c0_56, %c0_57] : memref<4x128x256xbf16, #tpu.memory_space<vmem>>, vector<1x128x256xbf16>
    %71 = vector.shape_cast %70 : vector<1x128x256xbf16> to vector<128x256xbf16>
    %cst_58 = arith.constant dense<0.000000e+00> : vector<156x256xf32>
    %72 = tpu.matmul %69, %71, %cst_58 {dimension_numbers = #tpu.dot_dimension_numbers<[1], [0], [0], [1], [0, 0, 1, 1], [], []>} : vector<156x128xbf16>, vector<128x256xbf16>, vector<156x256xf32> -> vector<156x256xf32>
    %73 = arith.addf %67, %72 : vector<156x256xf32>
    %c14_59 = arith.constant 14 : index
    %c0_60 = arith.constant 0 : index
    %74 = vector.load %arg7[%c14_59, %c0_60] : memref<176x128xf32, #tpu.memory_space<vmem>>, vector<156x128xf32>
    %75 = arith.truncf %74 : vector<156x128xf32> to vector<156x128xbf16>
    %c3_61 = arith.constant 3 : index
    %c0_62 = arith.constant 0 : index
    %c0_63 = arith.constant 0 : index
    %76 = vector.load %arg4[%c3_61, %c0_62, %c0_63] : memref<4x128x256xbf16, #tpu.memory_space<vmem>>, vector<1x128x256xbf16>
    %77 = vector.shape_cast %76 : vector<1x128x256xbf16> to vector<128x256xbf16>
    %cst_64 = arith.constant dense<0.000000e+00> : vector<156x256xf32>
    %78 = tpu.matmul %75, %77, %cst_64 {dimension_numbers = #tpu.dot_dimension_numbers<[1], [0], [0], [1], [0, 0, 1, 1], [], []>} : vector<156x128xbf16>, vector<128x256xbf16>, vector<156x256xf32> -> vector<156x256xf32>
    %79 = arith.addf %73, %78 : vector<156x256xf32>
    %80 = vector.extract_strided_slice %79 {offsets = [0, 0], sizes = [156, 64], strides = [1, 1]} : vector<156x256xf32> to vector<156x64xf32>
    %81 = vector.extract_strided_slice %79 {offsets = [0, 64], sizes = [156, 64], strides = [1, 1]} : vector<156x256xf32> to vector<156x64xf32>
    %82 = arith.maximumf %80, %81 : vector<156x64xf32>
    %83 = vector.extract_strided_slice %79 {offsets = [0, 128], sizes = [156, 64], strides = [1, 1]} : vector<156x256xf32> to vector<156x64xf32>
    %84 = vector.extract_strided_slice %79 {offsets = [0, 192], sizes = [156, 64], strides = [1, 1]} : vector<156x256xf32> to vector<156x64xf32>
    %85 = arith.maximumf %83, %84 : vector<156x64xf32>
    %86 = arith.maximumf %82, %85 : vector<156x64xf32>
    %87 = vector.broadcast %2 : vector<1x64xf32> to vector<156x64xf32>
    %88 = arith.addf %86, %87 : vector<156x64xf32>
    %cst_65 = arith.constant 0.000000e+00 : f32
    %89 = vector.broadcast %cst_65 : f32 to vector<156x64xf32>
    %90 = arith.maximumf %88, %89 : vector<156x64xf32>
    %91 = arith.truncf %90 : vector<156x64xf32> to vector<156x64xbf16>
    %c1_66 = arith.constant 1 : index
    %c0_67 = arith.constant 0 : index
    %c0_68 = arith.constant 0 : index
    %92 = vector.load %arg6[%c1_66, %c0_67, %c0_68] : memref<2x156x64xbf16, #tpu.memory_space<vmem>>, vector<1x156x64xbf16>
    %93 = vector.shape_cast %92 : vector<1x156x64xbf16> to vector<156x64xbf16>
    %94 = vector.shape_cast %91 : vector<156x64xbf16> to vector<1x156x64xbf16>
    tpu.vector_store %arg6[%c1_66, %c0_67, %c0_68], %94 {strides = array<i32>} : memref<2x156x64xbf16, #tpu.memory_space<vmem>>, vector<1x156x64xbf16>,
    return
  }
  func.func @transform_0(%arg0: i32) -> (i32, i32, i32) {
    %c0_i32 = arith.constant 0 : i32
    %c0_i32_0 = arith.constant 0 : i32
    %c0_i32_1 = arith.constant 0 : i32
    return %arg0, %c0_i32, %c0_i32_0 : i32, i32, i32
  }
  func.func @transform_1(%arg0: i32) -> (i32, i32) {
    %c0_i32 = arith.constant 0 : i32
    %c0_i32_0 = arith.constant 0 : i32
    %c0_i32_1 = arith.constant 0 : i32
    return %c0_i32, %c0_i32_0 : i32, i32
  }
  func.func @transform_2(%arg0: i32) -> (i32, i32) {
    %c0_i32 = arith.constant 0 : i32
    %c0_i32_0 = arith.constant 0 : i32
    %c0_i32_1 = arith.constant 0 : i32
    return %c0_i32, %c0_i32_0 : i32, i32
  }
  func.func @transform_3(%arg0: i32) -> (i32, i32, i32) {
    %c0_i32 = arith.constant 0 : i32
    %c0_i32_0 = arith.constant 0 : i32
    %c0_i32_1 = arith.constant 0 : i32
    %c0_i32_2 = arith.constant 0 : i32
    return %c0_i32, %c0_i32_0, %c0_i32_1 : i32, i32, i32
  }
  func.func @transform_4(%arg0: i32) -> (i32, i32) {
    %c0_i32 = arith.constant 0 : i32
    %c0_i32_0 = arith.constant 0 : i32
    %c0_i32_1 = arith.constant 0 : i32
    return %c0_i32, %c0_i32_0 : i32, i32
  }
  func.func @transform_5(%arg0: i32) -> (i32, i32, i32) {
    %c0_i32 = arith.constant 0 : i32
    %c0_i32_0 = arith.constant 0 : i32
    %c0_i32_1 = arith.constant 0 : i32
    return %arg0, %c0_i32, %c0_i32_0 : i32, i32, i32
  }
}

module attributes {stable_mosaic.version = 11 : i64} {
  func.func @_head_kernel(%arg0: i32, %arg1: memref<2x9984xbf16, #tpu.memory_space<vmem>>, %arg2: memref<9984x128xbf16, #tpu.memory_space<vmem>>, %arg3: memref<1x128xf32, #tpu.memory_space<vmem>>, %arg4: memref<128x10xf32, #tpu.memory_space<vmem>>, %arg5: memref<1x10xf32, #tpu.memory_space<vmem>>, %arg6: memref<2x10xf32, #tpu.memory_space<vmem>>) attributes {dimension_semantics = [#tpu.dimension_semantics<parallel>], iteration_bounds = array<i64: 1>, scalar_prefetch = 0 : i64, scratch_operands = 0 : i64, tpu.core_type = #tpu.core_type<tc>, window_params = [{transform_indices = @transform_0, window_bounds = array<i64: 2, 9984>}, {pipeline_mode = #tpu.pipeline_mode<synchronous>, transform_indices = @transform_1, window_bounds = array<i64: 9984, 128>}, {pipeline_mode = #tpu.pipeline_mode<synchronous>, transform_indices = @transform_2, window_bounds = array<i64: 1, 128>}, {pipeline_mode = #tpu.pipeline_mode<synchronous>, transform_indices = @transform_3, window_bounds = array<i64: 128, 10>}, {pipeline_mode = #tpu.pipeline_mode<synchronous>, transform_indices = @transform_4, window_bounds = array<i64: 1, 10>}, {transform_indices = @transform_5, window_bounds = array<i64: 2, 10>}]} {
    %c0 = arith.constant 0 : index
    %c0_0 = arith.constant 0 : index
    %0 = vector.load %arg1[%c0, %c0_0] : memref<2x9984xbf16, #tpu.memory_space<vmem>>, vector<2x9984xbf16>
    %c0_1 = arith.constant 0 : index
    %c0_2 = arith.constant 0 : index
    %1 = vector.load %arg2[%c0_1, %c0_2] : memref<9984x128xbf16, #tpu.memory_space<vmem>>, vector<9984x128xbf16>
    %cst = arith.constant dense<0.000000e+00> : vector<2x128xf32>
    %2 = tpu.matmul %0, %1, %cst {dimension_numbers = #tpu.dot_dimension_numbers<[1], [0], [0], [1], [0, 0, 1, 1], [], []>} : vector<2x9984xbf16>, vector<9984x128xbf16>, vector<2x128xf32> -> vector<2x128xf32>
    %c0_3 = arith.constant 0 : index
    %c0_4 = arith.constant 0 : index
    %3 = vector.load %arg3[%c0_3, %c0_4] : memref<1x128xf32, #tpu.memory_space<vmem>>, vector<1x128xf32>
    %4 = vector.broadcast %3 : vector<1x128xf32> to vector<2x128xf32>
    %5 = arith.addf %2, %4 : vector<2x128xf32>
    %cst_5 = arith.constant 0.000000e+00 : f32
    %6 = vector.broadcast %cst_5 : f32 to vector<2x128xf32>
    %7 = arith.maximumf %5, %6 : vector<2x128xf32>
    %c0_6 = arith.constant 0 : index
    %c0_7 = arith.constant 0 : index
    %8 = vector.load %arg4[%c0_6, %c0_7] : memref<128x10xf32, #tpu.memory_space<vmem>>, vector<128x10xf32>
    %cst_8 = arith.constant dense<0.000000e+00> : vector<2x10xf32>
    %9 = tpu.matmul %7, %8, %cst_8 {dimension_numbers = #tpu.dot_dimension_numbers<[1], [0], [0], [1], [0, 0, 1, 1], [], []>} : vector<2x128xf32>, vector<128x10xf32>, vector<2x10xf32> -> vector<2x10xf32>
    %c0_9 = arith.constant 0 : index
    %c0_10 = arith.constant 0 : index
    %10 = vector.load %arg5[%c0_9, %c0_10] : memref<1x10xf32, #tpu.memory_space<vmem>>, vector<1x10xf32>
    %11 = vector.broadcast %10 : vector<1x10xf32> to vector<2x10xf32>
    %12 = arith.addf %9, %11 : vector<2x10xf32>
    %cst_11 = arith.constant dense<0xFF800000> : vector<2xf32>
    %13 = vector.multi_reduction <maximumf>, %12, %cst_11 [1] : vector<2x10xf32> to vector<2xf32>
    %14 = vector.shape_cast %13 : vector<2xf32> to vector<2x1xf32>
    %15 = vector.broadcast %14 : vector<2x1xf32> to vector<2x10xf32>
    %16 = arith.subf %12, %15 : vector<2x10xf32>
    %17 = math.exp %16 : vector<2x10xf32>
    %cst_12 = arith.constant dense<0.000000e+00> : vector<2xf32>
    %18 = vector.multi_reduction <add>, %17, %cst_12 [1] : vector<2x10xf32> to vector<2xf32>
    %19 = vector.shape_cast %18 : vector<2xf32> to vector<2x1xf32>
    %20 = math.log %19 : vector<2x1xf32>
    %21 = arith.addf %20, %14 : vector<2x1xf32>
    %22 = vector.broadcast %21 : vector<2x1xf32> to vector<2x10xf32>
    %23 = arith.subf %12, %22 : vector<2x10xf32>
    %c0_13 = arith.constant 0 : index
    %c0_14 = arith.constant 0 : index
    %24 = vector.load %arg6[%c0_13, %c0_14] : memref<2x10xf32, #tpu.memory_space<vmem>>, vector<2x10xf32>
    tpu.vector_store %arg6[%c0_13, %c0_14], %23 {strides = array<i32>} : memref<2x10xf32, #tpu.memory_space<vmem>>, vector<2x10xf32>,
    return
  }
  func.func @transform_0(%arg0: i32) -> (i32, i32) {
    %c0_i32 = arith.constant 0 : i32
    %c0_i32_0 = arith.constant 0 : i32
    return %arg0, %c0_i32 : i32, i32
  }
  func.func @transform_1(%arg0: i32) -> (i32, i32) {
    %c0_i32 = arith.constant 0 : i32
    %c0_i32_0 = arith.constant 0 : i32
    %c0_i32_1 = arith.constant 0 : i32
    return %c0_i32, %c0_i32_0 : i32, i32
  }
  func.func @transform_2(%arg0: i32) -> (i32, i32) {
    %c0_i32 = arith.constant 0 : i32
    %c0_i32_0 = arith.constant 0 : i32
    %c0_i32_1 = arith.constant 0 : i32
    return %c0_i32, %c0_i32_0 : i32, i32
  }
  func.func @transform_3(%arg0: i32) -> (i32, i32) {
    %c0_i32 = arith.constant 0 : i32
    %c0_i32_0 = arith.constant 0 : i32
    %c0_i32_1 = arith.constant 0 : i32
    return %c0_i32, %c0_i32_0 : i32, i32
  }
  func.func @transform_4(%arg0: i32) -> (i32, i32) {
    %c0_i32 = arith.constant 0 : i32
    %c0_i32_0 = arith.constant 0 : i32
    %c0_i32_1 = arith.constant 0 : i32
    return %c0_i32, %c0_i32_0 : i32, i32
  }
  func.func @transform_5(%arg0: i32) -> (i32, i32) {
    %c0_i32 = arith.constant 0 : i32
    %c0_i32_0 = arith.constant 0 : i32
    return %arg0, %c0_i32 : i32, i32
  }
}

</mosaic_0001>

<bundles_post_ra>
// kernel: net_forward.2
= control target key start
LH: loop header
LB: loop body
LE: loop exit
PB: predicated region body
PF: predicated region fallthrough
CT: control target
= control target key end

     0   :  { %10 = vsyncpa [#allocation4], 0  ;;  %s5835_s0 = inlined_call_operand.vmem [shape: f32[2,176,36], index: 0, kind: input, shape index: {}]   ;;  %s5836_s1 = inlined_call_operand.hbm [shape: f32[36,128], index: 1, kind: input, shape index: {}]   ;;  %s5837_s2 = inlined_call_operand.hbm [shape: f32[1,128], index: 2, kind: input, shape index: {}]   ;;  %s5838_s3 = inlined_call_operand.hbm [shape: bf16[4,128,256], index: 3, kind: input, shape index: {}]   ;;  %s5839_s4 = inlined_call_operand.hbm [shape: f32[1,64], index: 4, kind: input, shape index: {}]   ;;  %s5840_s5 = inlined_call_operand.vmem [shape: bf16[2,156,64], index: 5, kind: output, shape index: {}]  }
   0x1   :  { %11 = vsyncpa [#allocation6], 0  ;;  %s33_s20 = sshll.u32 %s5837_s2, 4  ;;  %s34_s20 = int_to_ptr.hbm [resolvable:$true] %s33_s20 }
   0x2   :  { %12 = vsyncpa [#allocation9], 0  ;;  %s4115_s21 = smov [#allocation5]   ;;  %s19_s25 = sshll.u32 %s5836_s1, 4  ;;  %s20_s25 = int_to_ptr.hbm [resolvable:$true] %s19_s25 }
   0x3   :  { %s35_s22 = sshll.u32 %s4115_s21, 4  ;;  %s4116_s26 = smov [#allocation3]   ;;  %s36_s22 = int_to_ptr.vmem [resolvable:$true] %s35_s22 }
   0x4   :  { %38 = dma.hbm_to_vmem [thread:$0]  %s34_s20, 16, %s36_s22, [#allocation6]  }
   0x5   :  { %s21_s27 = sshll.u32 %s4116_s26, 4  ;;  %s4117_s28 = smov 128   ;;  %s22_s27 = int_to_ptr.vmem [resolvable:$true] %s21_s27 }
   0x6   :  { %s4118_s29 = smov 8   ;;  %s43_s2 = sshll.u32 %s5838_s3, 4  ;;  %s44_s2 = int_to_ptr.hbm [resolvable:$true] %s43_s2 }
   0x7   :  { %27 = dma.hbm_to_vmem [thread:$0]  %s20_s25, 640, %s22_s27, [#allocation4], %s4117_s28, %s4117_s28, %s4118_s29  }
   0x8   :  { %s4119_s7 = smov [#allocation7]   ;;  %s57_s1 = sshll.u32 %s5839_s4, 4  ;;  %s58_s1 = int_to_ptr.hbm [resolvable:$true] %s57_s1 }
   0x9   :  { %s45_s8 = sshll.u32 %s4119_s7, 4  ;;  %s4120_s11 = smov [#allocation8]   ;;  %s46_s8 = int_to_ptr.vmem [resolvable:$true] %s45_s8 }
   0xa   :  { %51 = dma.hbm_to_vmem [thread:$0]  %s44_s2, 8192, %s46_s8, [#allocation6], %s4117_s28, %s4117_s28, %s4118_s29  }
   0xb   :  { %s59_s12 = sshll.u32 %s4120_s11, 4  ;;  %s60_s12 = int_to_ptr.vmem [resolvable:$true] %s59_s12 }
   0xc   :  { %62 = dma.hbm_to_vmem [thread:$0]  %s58_s1, 16, %s60_s12, [#allocation9]  }
   0xd   :  { %4109 = dma.done.wait [#allocation4], 640  }
   0xe   :  { %4110 = vsyncadd [#allocation4], 4294966656 }
   0xf   :  { %4111 = dma.done.wait [#allocation6], 8208  }
  0x10   :  { %4112 = vsyncadd [#allocation6], 4294959088 }
  0x11   :  { %4113 = dma.done.wait [#allocation9], 16  }
  0x12   :  { %4114 = vsyncadd [#allocation9], 4294967280  ;;  %vm178_vm0 = vcmask 1043456   ;;  %v4164_v0 = vld [vmem:[#allocation3 + $0x20] sm:$0xf]  ;;  %v4166_v1 = vld [vmem:[#allocation3 + $0x18] sm:$0xff] }
  0x13   :  { %3253 = vmatpush.msk.msra.mxu0 %vm178_vm0, %v4164_v0  ;;  %3981 = vmatpush.msk.msra.mxu1 %vm178_vm0, %v4164_v0  ;;  %v4172_v2 = vld [vmem:[#allocation3 + $0x10] sm:$0xff]  ;;  %v4176_v3 = vld [vmem:[#allocation3 + $0x8] sm:$0xff]  ;;  %v4180_v4 = vld [vmem:[#allocation3] sm:$0xff]  ;;  %vm111_vm1 = vcmask 293888   ;;  %s4121_s26 = smov 64   ;;  %vm1651_vm2 = vcmask 519168  }
  0x14   :  { %v86_v5 = vld [vmem:[%s5835_s0] sm:$0xff]  ;;  %v87_v6 = vld [vmem:[%s5835_s0 + $0x8] sm:$0xff]  ;;  %v88_v7 = vld [vmem:[%s5835_s0 + $0x10] sm:$0xff]  ;;  %vm1671_vm3 = vcmask 517120  }
  0x15   :  { %194 = vmatpush.msra.mxu0 %v4166_v1  ;;  %3982 = vmatpush.msra.mxu1 %v4166_v1  ;;  %v89_v8 = vld [vmem:[%s5835_s0 + $0x18] sm:$0xff]  ;;  %v90_v9 = vld [vmem:[%s5835_s0 + $0x20] sm:$0xff]  ;;  %v99_v10 = vld [vmem:[%s5835_s0 + $0x68] sm:$0xff] }
  0x16   :  { %v91_v11 = vld [vmem:[%s5835_s0 + $0x28] sm:$0xff]  ;;  %v100_v12 = vld [vmem:[%s5835_s0 + $0x70] sm:$0xff]  ;;  %v101_v14 = vld [vmem:[%s5835_s0 + $0x78] sm:$0xff] }
  0x17   :  { %195 = vmatpush.msra.mxu0 %v4172_v2  ;;  %3983 = vmatpush.msra.mxu1 %v4172_v2  ;;  %v92_v13 = vld [vmem:[%s5835_s0 + $0x30] sm:$0xff]  ;;  %v3334_v15 = vld [vmem:[#allocation7 + $0xf0] sm:$0xf]  ;;  %v93_v18 = vld [vmem:[%s5835_s0 + $0x38] sm:$0xff] }
  0x18   :  { %v3884_v16 = vld [vmem:[#allocation7 + $0xf4] sm:$0xf0]  ;;  %v102_v19 = vld [vmem:[%s5835_s0 + $0x80] sm:$0xff]  ;;  %v3326_v20 = vld [vmem:[#allocation7 + $0xe0] sm:$0xf] }
  0x19   :  { %196 = vmatpush.msra.mxu0 %v4176_v3  ;;  %3984 = vmatpush.msra.mxu1 %v4176_v3  ;;  %v3335_v17 = vor.u32 %v3884_v16, %v3334_v15  ;;  %v3882_v21 = vld [vmem:[#allocation7 + $0xe4] sm:$0xf0]  ;;  %v103_v24 = vld [vmem:[%s5835_s0 + $0x88] sm:$0xff]  ;;  %v3880_v26 = vld [vmem:[#allocation7 + $0xd4] sm:$0xf0] }
  0x1a   :  { %v3327_v22 = vor.u32 %v3882_v21, %v3326_v20  ;;  %v94_v23 = vld [vmem:[%s5835_s0 + $0x40] sm:$0xff]  ;;  %v3318_v25 = vld [vmem:[#allocation7 + $0xd0] sm:$0xf]  ;;  %v3310_v28 = vld [vmem:[#allocation7 + $0xc0] sm:$0xf] }
  0x1b   :  { %197 = vmatpush.msra.mxu0 %v4180_v4  ;;  %3985 = vmatpush.msra.mxu1 %v4180_v4  ;;  %v3319_v27 = vor.u32 %v3880_v26, %v3318_v25  ;;  %v3878_v29 = vld [vmem:[#allocation7 + $0xc4] sm:$0xf0]  ;;  %v3867_v30 = vld [vmem:[#allocation7 + $0x74] sm:$0xf]  ;;  %v3400_v31 = vld [vmem:[#allocation7 + $0x78] sm:$0xf0] }
  0x1c   :  { %3254 = vmatmul.msk.f32.vlgmr.msra.gmra.mxu0 %vm111_vm1, %v86_v5  ;;  %3267 = vmatmul.msk.f32.vlgmr.msra.gmra.mxu1 %vm111_vm1, %v99_v10  ;;  %v3311_v32 = vor.u32 %v3878_v29, %v3310_v28  ;;  %v3403_v33 = vor.u32 %v3867_v30, %v3400_v31  ;;  %v3865_v34 = vld [vmem:[#allocation7 + $0x64] sm:$0xf]  ;;  %v3302_v35 = vld [vmem:[#allocation7 + $0xb0] sm:$0xf]  ;;  %v3876_v36 = vld [vmem:[#allocation7 + $0xb4] sm:$0xf0] }
  0x1d   :  { %482 = vmatpush.bf16.msrb.mxu1 %v3335_v17  ;;  %v3392_v37 = vld [vmem:[#allocation7 + $0x68] sm:$0xf0]  ;;  %v104_v40 = vld [vmem:[%s5835_s0 + $0x90] sm:$0xff]  ;;  %v3303_v41 = vor.u32 %v3876_v36, %v3302_v35  ;;  %v105_v43 = vld [vmem:[%s5835_s0 + $0x98] sm:$0xff] }
  0x1e   :  { %v95_v38 = vld [vmem:[%s5835_s0 + $0x48] sm:$0xff]  ;;  %739 = vmatpush.bf16.msrb.mxu0 %v3403_v33  ;;  %v3395_v39 = vor.u32 %v3865_v34, %v3392_v37  ;;  %v96_v42 = vld [vmem:[%s5835_s0 + $0x50] sm:$0xff]  ;;  %v97_v47 = vld [vmem:[%s5835_s0 + $0x58] sm:$0xff] }
  0x1f   :  { %v3863_v44 = vld [vmem:[#allocation7 + $0x54] sm:$0xf]  ;;  %v3384_v45 = vld [vmem:[#allocation7 + $0x58] sm:$0xf0]  ;;  %v106_v48 = vld [vmem:[%s5835_s0 + $0xa0] sm:$0xff] }
  0x20   :  { %v3387_v46 = vor.u32 %v3863_v44, %v3384_v45  ;;  %v3861_v49 = vld [vmem:[#allocation7 + $0x44] sm:$0xf]  ;;  %v3376_v50 = vld [vmem:[#allocation7 + $0x48] sm:$0xf0]  ;;  %v3883_v52 = vld [vmem:[#allocation7 + $0xf4] sm:$0xf] }
  0x21   :  { %483 = vmatpush.bf16.msrb.mxu1 %v3327_v22  ;;  %v3379_v51 = vor.u32 %v3861_v49, %v3376_v50  ;;  %v3336_v53 = vld [vmem:[#allocation7 + $0xf8] sm:$0xf0]  ;;  %v3859_v54 = vld [vmem:[#allocation7 + $0x34] sm:$0xf]  ;;  %v98_v58 = vld [vmem:[%s5835_s0 + $0x60] sm:$0xff] }
  0x22   :  { %740 = vmatpush.bf16.msrb.mxu0 %v3395_v39  ;;  %v3339_v55 = vor.u32 %v3883_v52, %v3336_v53  ;;  %v3368_v56 = vld [vmem:[#allocation7 + $0x38] sm:$0xf0]  ;;  %v3881_v59 = vld [vmem:[#allocation7 + $0xe4] sm:$0xf]  ;;  %v3328_v60 = vld [vmem:[#allocation7 + $0xe8] sm:$0xf0] }
  0x23   :  { %v3371_v57 = vor.u32 %v3859_v54, %v3368_v56  ;;  %v3857_v61 = vld [vmem:[#allocation7 + $0x24] sm:$0xf]  ;;  %v3331_v62 = vor.u32 %v3881_v59, %v3328_v60  ;;  %v3360_v63 = vld [vmem:[#allocation7 + $0x28] sm:$0xf0]  ;;  %v3879_v10 = vld [vmem:[#allocation7 + $0xd4] sm:$0xf] }
  0x24   :  { %3255 = vmatmul.msk.f32.gmra.mxu0 %vm111_vm1, %v87_v6  ;;  %3268 = vmatmul.msk.f32.gmra.mxu1 %vm111_vm1, %v100_v12  ;;  %v3363_v5 = vor.u32 %v3857_v61, %v3360_v63  ;;  %v3294_v6 = vld [vmem:[#allocation7 + $0xa0] sm:$0xf]  ;;  %v3855_v12 = vld [vmem:[#allocation7 + $0x14] sm:$0xf]  ;;  %v3877_v16 = vld [vmem:[#allocation7 + $0xc4] sm:$0xf] }
  0x25   :  { %484 = vmatpush.bf16.msrb.mxu1 %v3319_v27  ;;  %541 = vmatpush.bf16.msra.mxu2 %v3339_v55  ;;  %v3312_v17 = vld [vmem:[#allocation7 + $0xc8] sm:$0xf0]  ;;  %v3286_v22 = vld [vmem:[#allocation7 + $0x90] sm:$0xf]  ;;  %v3304_v26 = vld [vmem:[#allocation7 + $0xb8] sm:$0xf0] }
  0x26   :  { %741 = vmatpush.bf16.msrb.mxu0 %v3387_v46  ;;  %3986 = vmatpush.bf16.msra.mxu3 %v3339_v55  ;;  %v3344_v20 = vld [vmem:[#allocation7 + $0x8] sm:$0xf0]  ;;  %v3873_v28 = vld [vmem:[#allocation7 + $0xa4] sm:$0xf]  ;;  %v3278_v31 = vld [vmem:[#allocation7 + $0x80] sm:$0xf] }
  0x27   :  { %v3296_v29 = vld [vmem:[#allocation7 + $0xa8] sm:$0xf0]  ;;  %v3871_v33 = vld [vmem:[#allocation7 + $0x94] sm:$0xf]  ;;  %v3288_v35 = vld [vmem:[#allocation7 + $0x98] sm:$0xf0] }
  0x28   :  { %v3299_v30 = vor.u32 %v3873_v28, %v3296_v29  ;;  %v3291_v36 = vor.u32 %v3871_v33, %v3288_v35  ;;  %v3869_v37 = vld [vmem:[#allocation7 + $0x84] sm:$0xf]  ;;  %v3454_v54 = vld [vmem:[#allocation7 + $0x160] sm:$0xf]  ;;  %v3898_v55 = vld [vmem:[#allocation7 + $0x164] sm:$0xf0] }
  0x29   :  { %485 = vmatpush.bf16.msrb.mxu1 %v3311_v32  ;;  %542 = vmatpush.bf16.msra.mxu2 %v3331_v62  ;;  %v3870_v32 = vld [vmem:[#allocation7 + $0x84] sm:$0xf0]  ;;  %v3455_v56 = vor.u32 %v3898_v55, %v3454_v54 }
  0x2a   :  { %742 = vmatpush.bf16.msrb.mxu0 %v3379_v51  ;;  %3987 = vmatpush.bf16.msra.mxu3 %v3331_v62  ;;  %v3279_v34 = vor.u32 %v3870_v32, %v3278_v31 }
  0x2c   :  { %3256 = vmatmul.msk.f32.gmra.mxu0 %vm111_vm1, %v88_v7  ;;  %3269 = vmatmul.msk.f32.gmra.mxu1 %vm111_vm1, %v101_v14  ;;  %v3874_v7 = vld [vmem:[#allocation7 + $0xa4] sm:$0xf0]  ;;  %v3352_v14 = vld [vmem:[#allocation7 + $0x18] sm:$0xf0] }
  0x2d   :  { %486 = vmatpush.bf16.msrb.mxu1 %v3303_v41  ;;  %v3355_v15 = vor.u32 %v3855_v12, %v3352_v14  ;;  %v3462_v41 = vld [vmem:[#allocation7 + $0x170] sm:$0xf] }
  0x2e   :  { %743 = vmatpush.bf16.msrb.mxu0 %v3371_v57 }
  0x32   :  { %744 = vmatpush.bf16.msrb.mxu0 %v3363_v5 }
  0x34   :  { %3257 = vmatmul.msk.f32.gmra.mxu0 %vm111_vm1, %v89_v8  ;;  %3270 = vmatmul.msk.f32.gmra.mxu1 %vm111_vm1, %v102_v19  ;;  %v107_v8 = vld [vmem:[%s5835_s0 + $0xa8] sm:$0xff]  ;;  %v3315_v19 = vor.u32 %v3877_v16, %v3312_v17 }
  0x36   :  { %745 = vmatpush.bf16.msrb.mxu0 %v3355_v15 }
  0x3c   :  { %3258 = vmatmul.msk.f32.gmra.mxu0 %vm111_vm1, %v90_v9  ;;  %3271 = vmatmul.msk.f32.gmra.mxu1 %vm111_vm1, %v103_v24  ;;  %v3295_v9 = vor.u32 %v3874_v7, %v3294_v6  ;;  %v3875_v24 = vld [vmem:[#allocation7 + $0xb4] sm:$0xf] }
  0x3d   :  { %v3307_v27 = vor.u32 %v3875_v24, %v3304_v26 }
  0x3e   :  { %487 = vmatpush.bf16.msrb.mxu1 %v3295_v9  ;;  %v3446_v9 = vld [vmem:[#allocation7 + $0x150] sm:$0xf] }
  0x44   :  { %3259 = vmatmul.msk.f32.gmra.mxu0 %vm111_vm1, %v91_v11  ;;  %3272 = vmatmul.msk.f32.gmra.mxu1 %vm111_vm1, %v104_v40  ;;  %v3320_v11 = vld [vmem:[#allocation7 + $0xd8] sm:$0xf0] }
  0x45   :  { %v4274_v40 = vld [vmem:[#allocation5] ss:$0 sm:$0xff] }
  0x4c   :  { %3260 = vmatmul.msk.f32.gmra.mxu0 %vm111_vm1, %v92_v13  ;;  %3273 = vmatmul.msk.f32.gmra.mxu1 %vm111_vm1, %v105_v43  ;;  %v3323_v13 = vor.u32 %v3879_v10, %v3320_v11  ;;  %v3896_v10 = vld [vmem:[#allocation7 + $0x154] sm:$0xf0] }
  0x4d   :  { %v3447_v12 = vor.u32 %v3896_v10, %v3446_v9 }
  0x4e   :  { %543 = vmatpush.bf16.msra.mxu2 %v3323_v13  ;;  %3988 = vmatpush.bf16.msra.mxu3 %v3323_v13 }
  0x52   :  { %544 = vmatpush.bf16.msra.mxu2 %v3315_v19  ;;  %3989 = vmatpush.bf16.msra.mxu3 %v3315_v19 }
  0x54   :  { %3261 = vmatmul.msk.f32.gmra.mxu0 %vm111_vm1, %v93_v18  ;;  %3274 = vmatmul.msk.f32.gmra.mxu1 %vm111_vm1, %v106_v48  ;;  %v3853_v18 = vld [vmem:[#allocation7 + $0x4] sm:$0xf] }
  0x55   :  { %v3347_v21 = vor.u32 %v3853_v18, %v3344_v20 }
  0x56   :  { %545 = vmatpush.bf16.msra.mxu2 %v3307_v27  ;;  %3990 = vmatpush.bf16.msra.mxu3 %v3307_v27 }
  0x57   :  { %746 = vmatpush.bf16.msrb.mxu0 %v3347_v21 }
  0x5a   :  { %546 = vmatpush.bf16.msra.mxu2 %v3299_v30  ;;  %3991 = vmatpush.bf16.msra.mxu3 %v3299_v30 }
  0x5c   :  { %3262 = vmatmul.msk.f32.gmra.mxu0 %vm111_vm1, %v94_v23  ;;  %3275 = vmatmul.msk.f32.gmra.mxu1 %vm111_vm1, %v107_v8  ;;  %v3872_v23 = vld [vmem:[#allocation7 + $0x94] sm:$0xf0] }
  0x5d   :  { %v3287_v25 = vor.u32 %v3872_v23, %v3286_v22 }
  0x5e   :  { %547 = vmatpush.bf16.msra.mxu2 %v3291_v36  ;;  %3992 = vmatpush.bf16.msra.mxu3 %v3291_v36 }
  0x5f   :  { %488 = vmatpush.bf16.msrb.mxu1 %v3287_v25 }
  0x63   :  { %489 = vmatpush.bf16.msrb.mxu1 %v3279_v34 }
  0x64   :  { %3263 = vmatmul.msk.f32.gmra.mxu0 %vm111_vm1, %v95_v38  ;;  %v3280_v38 = vld [vmem:[#allocation7 + $0x88] sm:$0xf0] }
  0x65   :  { %v3283_v39 = vor.u32 %v3869_v37, %v3280_v38  ;;  %v3438_v37 = vld [vmem:[#allocation7 + $0x140] sm:$0xf]  ;;  %v3894_v38 = vld [vmem:[#allocation7 + $0x144] sm:$0xf0] }
  0x67   :  { %548 = vmatpush.bf16.msra.mxu2 %v3283_v39  ;;  %3993 = vmatpush.bf16.msra.mxu3 %v3283_v39 }
  0x6c   :  { %3264 = vmatmul.msk.f32.gmra.mxu0 %vm111_vm1, %v96_v42  ;;  %v3900_v42 = vld [vmem:[#allocation7 + $0x174] sm:$0xf0] }
  0x6d   :  { %v3463_v44 = vor.u32 %v3900_v42, %v3462_v41  ;;  %v3439_v41 = vor.u32 %v3894_v38, %v3438_v37  ;;  %v3885_v38 = vld [vmem:[#allocation7 + $0x104] sm:$0xf] }
  0x6f   :  { %925 = vmatpush.bf16.msra.mxu1 %v3463_v44  ;;  %v3464_v44 = vld [vmem:[#allocation7 + $0x178] sm:$0xf0] }
  0x73   :  { %926 = vmatpush.bf16.msra.mxu1 %v3455_v56  ;;  %v3895_v56 = vld [vmem:[#allocation7 + $0x154] sm:$0xf] }
  0x74   :  { %3265 = vmatmul.msk.f32.gmra.mxu0 %vm111_vm1, %v97_v47 }
  0x77   :  { %927 = vmatpush.bf16.msra.mxu1 %v3447_v12 }
  0x7b   :  { %928 = vmatpush.bf16.msra.mxu1 %v3439_v41 }
  0x7c   :  { %3266 = vmatmul.msk.f32.gmra.mxu0 %vm111_vm1, %v98_v58 }
  0x99   :  { %v199_v43 = vpop.f32.mrf.mxu0  ;;  %v238_v8 = vpop.f32.mrf.mxu1 }
  0x9a   :  { %v200_v45 = vadd.f32 %v4274_v40, %v199_v43  ;;  %v4288_v11 = vadd.f32 %v4274_v40, %v238_v8  ;;  %v3899_v43 = vld [vmem:[#allocation7 + $0x174] sm:$0xf] }
  0x9c   :  { %v265_v46 = vmax.f32 %v200_v45, 0.0  ;;  %v278_v14 = vmax.f32 %v4288_v11, 0.0  ;;  %v3467_v45 = vor.u32 %v3899_v43, %v3464_v44  ;;  %v3382_v11 = vld [vmem:[#allocation7 + $0x50] sm:$0xf] }
  0x9e   :  { %287 = vst [vmem:[#allocation2] sm:$0xff] %v265_v46  ;;  %984 = vmatpush.bf16.msrb.mxu2 %v3467_v45 }
  0x9f   :  { %300 = vst [vmem:[#allocation2 + $0x68] sm:$0xff] %v278_v14 }
  0xa1   :  { %v202_v47 = vpop.f32.mrf.mxu0  ;;  %v241_v21 = vpop.f32.mrf.mxu1 }
  0xa2   :  { %v203_v48 = vadd.f32 %v4274_v40, %v202_v47  ;;  %v242_v22 = vadd.f32 %v4274_v40, %v241_v21 }
  0xa4   :  { %v266_v49 = vmax.f32 %v203_v48, 0.0  ;;  %v279_v24 = vmax.f32 %v242_v22, 0.0 }
  0xa6   :  { %288 = vst [vmem:[#allocation2 + $0x8] sm:$0xff] %v266_v49  ;;  %v4278_v50 = vpack.c.bf16 %v266_v49, %v265_v46  ;;  %v3897_v49 = vld [vmem:[#allocation7 + $0x164] sm:$0xf] }
  0xa7   :  { %301 = vst [vmem:[#allocation2 + $0x70] sm:$0xff] %v279_v24 }
  0xa8   :  { %747 = vmatmul.bf16.vlgmr.msrb.gmra.mxu0 %v4278_v50 }
  0xa9   :  { %v205_v51 = vpop.f32.mrf.mxu0  ;;  %v244_v27 = vpop.f32.mrf.mxu1 }
  0xaa   :  { %v206_v52 = vadd.f32 %v4274_v40, %v205_v51  ;;  %v245_v28 = vadd.f32 %v4274_v40, %v244_v27  ;;  %v3456_v51 = vld [vmem:[#allocation7 + $0x168] sm:$0xf0]  ;;  %v3889_v27 = vld [vmem:[#allocation7 + $0x124] sm:$0xf] }
  0xab   :  { %v3459_v54 = vor.u32 %v3897_v49, %v3456_v51 }
  0xac   :  { %v267_v53 = vmax.f32 %v206_v52, 0.0  ;;  %v280_v30 = vmax.f32 %v245_v28, 0.0  ;;  %v3424_v28 = vld [vmem:[#allocation7 + $0x128] sm:$0xf0] }
  0xad   :  { %v355_v60 = vld [vmem:[#allocation2 + $0x1] sm:$0xff]  ;;  %985 = vmatpush.bf16.msrb.mxu2 %v3459_v54 }
  0xae   :  { %289 = vst [vmem:[#allocation2 + $0x10] sm:$0xff] %v267_v53  ;;  %v4306_v52 = vpack.c.bf16 %v280_v30, %v279_v24  ;;  %v3892_v24 = vld [vmem:[#allocation7 + $0x134] sm:$0xf0] }
  0xaf   :  { %302 = vst [vmem:[#allocation2 + $0x78] sm:$0xff] %v280_v30  ;;  %v3887_v30 = vld [vmem:[#allocation7 + $0x114] sm:$0xf] }
  0xb1   :  { %v208_v57 = vpop.f32.mrf.mxu0  ;;  %v247_v39 = vpop.f32.mrf.mxu1 }
  0xb2   :  { %v209_v58 = vadd.f32 %v4274_v40, %v208_v57  ;;  %v248_v42 = vadd.f32 %v4274_v40, %v247_v39  ;;  %v3448_v57 = vld [vmem:[#allocation7 + $0x158] sm:$0xf0]  ;;  %v3408_v39 = vld [vmem:[#allocation7 + $0x108] sm:$0xf0] }
  0xb3   :  { %v3411_v44 = vor.u32 %v3885_v38, %v3408_v39 }
  0xb4   :  { %v268_v59 = vmax.f32 %v209_v58, 0.0  ;;  %v281_v47 = vmax.f32 %v248_v42, 0.0 }
  0xb5   :  { %v356_v61 = vld [vmem:[#allocation2 + $0x9] sm:$0xff] }
  0xb6   :  { %290 = vst [vmem:[#allocation2 + $0x18] sm:$0xff] %v268_v59  ;;  %v375_v62 = vpack.c.bf16 %v356_v61, %v355_v60  ;;  %v4283_v63 = vpack.c.bf16 %v268_v59, %v267_v53  ;;  %v3451_v59 = vor.u32 %v3895_v56, %v3448_v57  ;;  %v3893_v60 = vld [vmem:[#allocation7 + $0x144] sm:$0xf]  ;;  %v3440_v61 = vld [vmem:[#allocation7 + $0x148] sm:$0xf0] }
  0xb7   :  { %303 = vst [vmem:[#allocation2 + $0x80] sm:$0xff] %v281_v47  ;;  %v3422_v56 = vld [vmem:[#allocation7 + $0x120] sm:$0xf]  ;;  %v3890_v57 = vld [vmem:[#allocation7 + $0x124] sm:$0xf0] }
  0xb8   :  { %490 = vmatmul.bf16.vlgmr.msrb.gmra.mxu1 %v375_v62  ;;  %549 = vmatmul.bf16.vlgmr.msra.gmra.mxu2 %v375_v62 }
  0xb9   :  { %v211_v5 = vpop.f32.mrf.mxu0  ;;  %752 = vmatmul.bf16.gmra.mxu0 %v4283_v63  ;;  %v250_v55 = vpop.f32.mrf.mxu1  ;;  %986 = vmatpush.bf16.msrb.mxu2 %v3451_v59  ;;  %v3423_v59 = vor.u32 %v3890_v57, %v3422_v56  ;;  %v3860_v56 = vld [vmem:[#allocation7 + $0x34] sm:$0xf0]  ;;  %v3907_v57 = vld [vmem:[#allocation7 + $0x1b4] sm:$0xf] }
  0xba   :  { %v212_v6 = vadd.f32 %v4274_v40, %v211_v5  ;;  %v251_v58 = vadd.f32 %v4274_v40, %v250_v55 }
  0xbc   :  { %v269_v7 = vmax.f32 %v212_v6, 0.0  ;;  %v282_v5 = vmax.f32 %v251_v58, 0.0 }
  0xbd   :  { %v357_v17 = vld [vmem:[#allocation2 + $0x11] sm:$0xff] }
  0xbe   :  { %291 = vst [vmem:[#allocation2 + $0x20] sm:$0xff] %v269_v7  ;;  %v799_v39 = vld [vmem:[#allocation2 + $0x15] sm:$0xff] }
  0xbf   :  { %304 = vst [vmem:[#allocation2 + $0x88] sm:$0xff] %v282_v5 }
  0xc1   :  { %v214_v13 = vpop.f32.mrf.mxu0 }
  0xc2   :  { %v215_v15 = vadd.f32 %v4274_v40, %v214_v13 }
  0xc4   :  { %v270_v16 = vmax.f32 %v215_v15, 0.0  ;;  %v253_v15 = vpop.f32.mrf.mxu1 }
  0xc5   :  { %v358_v18 = vld [vmem:[#allocation2 + $0x19] sm:$0xff] }
  0xc6   :  { %292 = vst [vmem:[#allocation2 + $0x28] sm:$0xff] %v270_v16  ;;  %v376_v19 = vpack.c.bf16 %v358_v18, %v357_v17  ;;  %v4294_v20 = vpack.c.bf16 %v270_v16, %v269_v7  ;;  %v3443_v7 = vor.u32 %v3893_v60, %v3440_v61  ;;  %v4313_v16 = vadd.f32 %v4274_v40, %v253_v15  ;;  %v3891_v17 = vld [vmem:[#allocation7 + $0x134] sm:$0xf]  ;;  %v3432_v18 = vld [vmem:[#allocation7 + $0x138] sm:$0xf0] }
  0xc8   :  { %495 = vmatmul.bf16.gmra.mxu1 %v376_v19  ;;  %554 = vmatmul.bf16.gmra.mxu2 %v376_v19  ;;  %v3435_v19 = vor.u32 %v3891_v17, %v3432_v18  ;;  %v283_v22 = vmax.f32 %v4313_v16, 0.0  ;;  %v3398_v17 = vld [vmem:[#allocation7 + $0x70] sm:$0xf]  ;;  %v3868_v18 = vld [vmem:[#allocation7 + $0x74] sm:$0xf0] }
  0xc9   :  { %v217_v23 = vpop.f32.mrf.mxu0  ;;  %757 = vmatmul.bf16.gmra.mxu0 %v4294_v20  ;;  %987 = vmatpush.bf16.msrb.mxu2 %v3443_v7 }
  0xca   :  { %v218_v25 = vadd.f32 %v4274_v40, %v217_v23  ;;  %v3430_v23 = vld [vmem:[#allocation7 + $0x130] sm:$0xf]  ;;  %305 = vst [vmem:[#allocation2 + $0x90] sm:$0xff] %v283_v22 }
  0xcc   :  { %v271_v26 = vmax.f32 %v218_v25, 0.0 }
  0xcd   :  { %v359_v33 = vld [vmem:[#allocation2 + $0x21] sm:$0xff]  ;;  %988 = vmatpush.bf16.msrb.mxu2 %v3435_v19  ;;  %v3915_v19 = vld [vmem:[#allocation7 + $0x1f4] sm:$0xf] }
  0xce   :  { %293 = vst [vmem:[#allocation2 + $0x30] sm:$0xff] %v271_v26 }
  0xd1   :  { %v220_v29 = vpop.f32.mrf.mxu0 }
  0xd2   :  { %v221_v31 = vadd.f32 %v4274_v40, %v220_v29  ;;  %v3427_v29 = vor.u32 %v3889_v27, %v3424_v28  ;;  %v3888_v28 = vld [vmem:[#allocation7 + $0x114] sm:$0xf0] }
  0xd4   :  { %v272_v32 = vmax.f32 %v221_v31, 0.0  ;;  %v3416_v31 = vld [vmem:[#allocation7 + $0x118] sm:$0xf0]  ;;  %989 = vmatpush.bf16.msrb.mxu2 %v3427_v29  ;;  %v3864_v29 = vld [vmem:[#allocation7 + $0x54] sm:$0xf0] }
  0xd5   :  { %v360_v34 = vld [vmem:[#allocation2 + $0x29] sm:$0xff] }
  0xd6   :  { %294 = vst [vmem:[#allocation2 + $0x38] sm:$0xff] %v272_v32  ;;  %v377_v35 = vpack.c.bf16 %v360_v34, %v359_v33  ;;  %v4301_v36 = vpack.c.bf16 %v272_v32, %v271_v26  ;;  %v3431_v26 = vor.u32 %v3892_v24, %v3430_v23  ;;  %v4320_v32 = vpack.c.bf16 %v282_v5, %v281_v47  ;;  %v256_v34 = vpop.f32.mrf.mxu1  ;;  %v3528_v23 = vld [vmem:[#allocation7 + $0x1f8] sm:$0xf0]  ;;  %v3866_v24 = vld [vmem:[#allocation7 + $0x64] sm:$0xf0] }
  0xd7   :  { %v257_v37 = vadd.f32 %v4274_v40, %v256_v34  ;;  %v3383_v34 = vor.u32 %v3864_v29, %v3382_v11  ;;  %v800_v29 = vld [vmem:[#allocation2 + $0x1d] sm:$0xff] }
  0xd8   :  { %500 = vmatmul.bf16.gmra.mxu1 %v377_v35  ;;  %559 = vmatmul.bf16.gmra.mxu2 %v377_v35  ;;  %v3419_v35 = vor.u32 %v3887_v30, %v3416_v31  ;;  %v3913_v30 = vld [vmem:[#allocation7 + $0x1e4] sm:$0xf]  ;;  %v3520_v31 = vld [vmem:[#allocation7 + $0x1e8] sm:$0xf0] }
  0xd9   :  { %v223_v46 = vpop.f32.mrf.mxu0  ;;  %762 = vmatmul.bf16.gmra.mxu0 %v4301_v36  ;;  %929 = vmatpush.bf16.msra.mxu1 %v3431_v26  ;;  %v284_v42 = vmax.f32 %v257_v37, 0.0  ;;  %v3531_v26 = vor.u32 %v3915_v19, %v3528_v23  ;;  %v3512_v37 = vld [vmem:[#allocation7 + $0x1d8] sm:$0xf0]  ;;  %v372_v23 = vld [vmem:[#allocation2 + $0x89] sm:$0xff] }
  0xda   :  { %v224_v48 = vadd.f32 %v4274_v40, %v223_v46  ;;  %990 = vmatpush.bf16.msrb.mxu2 %v3419_v35  ;;  %v3911_v35 = vld [vmem:[#allocation7 + $0x1d4] sm:$0xf] }
  0xdb   :  { %306 = vst [vmem:[#allocation2 + $0x98] sm:$0xff] %v284_v42  ;;  %1269 = vmatpush.bf16.msra.mxu0 %v3531_v26  ;;  %v3515_v38 = vor.u32 %v3911_v35, %v3512_v37  ;;  %v3862_v42 = vld [vmem:[#allocation7 + $0x44] sm:$0xf0]  ;;  %v3901_v26 = vld [vmem:[#allocation7 + $0x184] sm:$0xf] }
  0xdc   :  { %v273_v53 = vmax.f32 %v224_v48, 0.0 }
  0xdd   :  { %v361_v9 = vld [vmem:[#allocation2 + $0x31] sm:$0xff]  ;;  %930 = vmatpush.bf16.msra.mxu1 %v3423_v59 }
  0xde   :  { %295 = vst [vmem:[#allocation2 + $0x40] sm:$0xff] %v273_v53  ;;  %v259_v51 = vpop.f32.mrf.mxu1  ;;  %991 = vmatpush.bf16.msrb.mxu2 %v3411_v44  ;;  %v369_v44 = vld [vmem:[#allocation2 + $0x71] sm:$0xff] }
  0xdf   :  { %v3496_v59 = vld [vmem:[#allocation7 + $0x1b8] sm:$0xf0] }
  0xe1   :  { %v226_v62 = vpop.f32.mrf.mxu0 }
  0xe2   :  { %v227_v6 = vadd.f32 %v4274_v40, %v226_v62 }
  0xe4   :  { %v274_v8 = vmax.f32 %v227_v6, 0.0  ;;  %v368_v6 = vld [vmem:[#allocation2 + $0x69] sm:$0xff] }
  0xe5   :  { %v362_v10 = vld [vmem:[#allocation2 + $0x39] sm:$0xff] }
  0xe6   :  { %296 = vst [vmem:[#allocation2 + $0x48] sm:$0xff] %v274_v8  ;;  %v378_v12 = vpack.c.bf16 %v362_v10, %v361_v9  ;;  %v4310_v13 = vpack.c.bf16 %v274_v8, %v273_v53  ;;  %v260_v53 = vadd.f32 %v4274_v40, %v259_v51  ;;  %v262_v61 = vpop.f32.mrf.mxu1 }
  0xe7   :  { %v263_v62 = vadd.f32 %v4274_v40, %v262_v61  ;;  %v3358_v61 = vld [vmem:[#allocation7 + $0x20] sm:$0xf] }
  0xe8   :  { %505 = vmatmul.bf16.gmra.mxu1 %v378_v12  ;;  %564 = vmatmul.bf16.gmra.mxu2 %v378_v12  ;;  %v285_v55 = vmax.f32 %v260_v53, 0.0 }
  0xe9   :  { %v229_v21 = vpop.f32.mrf.mxu0  ;;  %767 = vmatmul.bf16.gmra.mxu0 %v4310_v13  ;;  %v286_v5 = vmax.f32 %v263_v62, 0.0  ;;  %v3858_v62 = vld [vmem:[#allocation7 + $0x24] sm:$0xf0] }
  0xea   :  { %v230_v25 = vadd.f32 %v4274_v40, %v229_v21  ;;  %307 = vst [vmem:[#allocation2 + $0xa0] sm:$0xff] %v285_v55  ;;  %v3399_v21 = vor.u32 %v3868_v18, %v3398_v17  ;;  %v3366_v55 = vld [vmem:[#allocation7 + $0x30] sm:$0xf]  ;;  %v3903_v17 = vld [vmem:[#allocation7 + $0x194] sm:$0xf] }
  0xeb   :  { %308 = vst [vmem:[#allocation2 + $0xa8] sm:$0xff] %v286_v5  ;;  %v3905_v5 = vld [vmem:[#allocation7 + $0x1a4] sm:$0xf]  ;;  %v3480_v18 = vld [vmem:[#allocation7 + $0x198] sm:$0xf0] }
  0xec   :  { %v275_v33 = vmax.f32 %v230_v25, 0.0  ;;  %v3414_v25 = vld [vmem:[#allocation7 + $0x110] sm:$0xf]  ;;  %680 = vmatpush.bf16.msrb.mxu3 %v3399_v21  ;;  %v3483_v19 = vor.u32 %v3903_v17, %v3480_v18  ;;  %v371_v21 = vld [vmem:[#allocation2 + $0x81] sm:$0xff] }
  0xed   :  { %v363_v46 = vld [vmem:[#allocation2 + $0x41] sm:$0xff]  ;;  %v383_v35 = vpack.c.bf16 %v372_v23, %v371_v21 }
  0xee   :  { %297 = vst [vmem:[#allocation2 + $0x50] sm:$0xff] %v275_v33 }
  0xf1   :  { %v232_v41 = vpop.f32.mrf.mxu0 }
  0xf2   :  { %v233_v43 = vadd.f32 %v4274_v40, %v232_v41  ;;  %v3374_v41 = vld [vmem:[#allocation7 + $0x40] sm:$0xf] }
  0xf4   :  { %v276_v45 = vmax.f32 %v233_v43, 0.0  ;;  %v3909_v43 = vld [vmem:[#allocation7 + $0x1c4] sm:$0xf] }
  0xf5   :  { %v364_v47 = vld [vmem:[#allocation2 + $0x49] sm:$0xff] }
  0xf6   :  { %298 = vst [vmem:[#allocation2 + $0x58] sm:$0xff] %v276_v45  ;;  %v379_v48 = vpack.c.bf16 %v364_v47, %v363_v46  ;;  %v4324_v49 = vpack.c.bf16 %v276_v45, %v275_v33  ;;  %v3523_v33 = vor.u32 %v3913_v30, %v3520_v31  ;;  %v370_v45 = vld [vmem:[#allocation2 + $0x79] sm:$0xff]  ;;  %v3375_v46 = vor.u32 %v3862_v42, %v3374_v41  ;;  %v3504_v47 = vld [vmem:[#allocation7 + $0x1c8] sm:$0xf0] }
  0xf7   :  { %v3507_v51 = vor.u32 %v3909_v43, %v3504_v47  ;;  %v374_v41 = vld [vmem:[#allocation2 + $0x99] sm:$0xf] }
  0xf8   :  { %510 = vmatmul.bf16.gmra.mxu1 %v379_v48  ;;  %569 = vmatmul.bf16.gmra.mxu2 %v379_v48  ;;  %v798_v48 = vld [vmem:[#allocation2 + $0xd] sm:$0xff]  ;;  %v328_v42 = vld [vmem:[#allocation2 + $0x98] sm:$0xf] }
  0xf9   :  { %v235_v54 = vpop.f32.mrf.mxu0  ;;  %772 = vmatmul.bf16.gmra.mxu0 %v4324_v49  ;;  %v4335_v53 = vpack.c.bf16 %v799_v39, %v798_v48  ;;  %v373_v39 = vld [vmem:[#allocation2 + $0x91] sm:$0xff] }
  0xfa   :  { %v236_v58 = vadd.f32 %v4274_v40, %v235_v54  ;;  %v3390_v40 = vld [vmem:[#allocation7 + $0x60] sm:$0xf]  ;;  %1270 = vmatpush.bf16.msra.mxu0 %v3523_v33  ;;  %v382_v54 = vpack.c.bf16 %v370_v45, %v369_v44  ;;  %v802_v44 = vld [vmem:[#allocation2 + $0x2d] sm:$0xff] }
  0xfb   :  { %v3391_v27 = vor.u32 %v3866_v24, %v3390_v40  ;;  %v801_v40 = vld [vmem:[#allocation2 + $0x25] sm:$0xff]  ;;  %v3342_v24 = vld [vmem:[#allocation7] sm:$0xf] }
  0xfc   :  { %v277_v60 = vmax.f32 %v236_v58, 0.0  ;;  %v3367_v58 = vor.u32 %v3860_v56, %v3366_v55  ;;  %v1084_v55 = vld [vmem:[#allocation2 + $0x16] sm:$0xff] }
  0xfd   :  { %v365_v7 = vld [vmem:[#allocation2 + $0x51] sm:$0xff]  ;;  %681 = vmatpush.bf16.msrb.mxu3 %v3391_v27  ;;  %v3406_v27 = vld [vmem:[#allocation7 + $0x100] sm:$0xf] }
  0xfe   :  { %299 = vst [vmem:[#allocation2 + $0x60] sm:$0xff] %v277_v60  ;;  %v4332_v15 = vpack.c.bf16 %v278_v14, %v277_v60  ;;  %v3415_v14 = vor.u32 %v3888_v28, %v3414_v25  ;;  %1271 = vmatpush.bf16.msra.mxu0 %v3515_v38  ;;  %v3499_v60 = vor.u32 %v3907_v57, %v3496_v59  ;;  %v3854_v25 = vld [vmem:[#allocation7 + $0x4] sm:$0xf0]  ;;  %v803_v38 = vld [vmem:[#allocation2 + $0x35] sm:$0xff] }
  0xff   :  { %v3886_v28 = vld [vmem:[#allocation7 + $0x104] sm:$0xf0]  ;;  %v3343_v11 = vor.u32 %v3854_v25, %v3342_v24  ;;  %v4351_v45 = vpack.c.bf16 %v803_v38, %v802_v44  ;;  %v1090_v44 = vld [vmem:[#allocation2 + $0x46] sm:$0xff] }
 0x100   :  { %931 = vmatpush.bf16.msra.mxu1 %v3415_v14  ;;  %v3472_v14 = vld [vmem:[#allocation7 + $0x188] sm:$0xf0]  ;;  %v3407_v31 = vor.u32 %v3886_v28, %v3406_v27 }
 0x101   :  { %682 = vmatpush.bf16.msrb.mxu3 %v3383_v34  ;;  %v3475_v33 = vor.u32 %v3901_v26, %v3472_v14  ;;  %v4339_v34 = vpack.c.bf16 %v801_v40, %v800_v29 }
 0x102   :  { %1272 = vmatpush.bf16.msra.mxu0 %v3507_v51  ;;  %v805_v51 = vld [vmem:[#allocation2 + $0x45] sm:$0xff] }
 0x104   :  { %932 = vmatpush.bf16.msra.mxu1 %v3407_v31 }
 0x105   :  { %v366_v8 = vld [vmem:[#allocation2 + $0x59] sm:$0xff]  ;;  %v367_v9 = vld [vmem:[#allocation2 + $0x61] sm:$0xff]  ;;  %683 = vmatpush.bf16.msrb.mxu3 %v3375_v46 }
 0x106   :  { %v380_v10 = vpack.c.bf16 %v366_v8, %v365_v7  ;;  %v381_v12 = vpack.c.bf16 %v368_v6, %v367_v9  ;;  %1273 = vmatpush.bf16.msra.mxu0 %v3499_v60  ;;  %v3359_v6 = vor.u32 %v3858_v62, %v3358_v61  ;;  %v3488_v7 = vld [vmem:[#allocation7 + $0x1a8] sm:$0xf0]  ;;  %v3350_v8 = vld [vmem:[#allocation7 + $0x10] sm:$0xf]  ;;  %v3856_v9 = vld [vmem:[#allocation7 + $0x14] sm:$0xf0] }
 0x107   :  { %v808_v26 = vld [vmem:[#allocation2 + $0x5d] sm:$0xff]  ;;  %v809_v27 = vld [vmem:[#allocation2 + $0x65] sm:$0xff] }
 0x108   :  { %515 = vmatmul.bf16.gmra.mxu1 %v380_v10  ;;  %574 = vmatmul.bf16.gmra.mxu2 %v380_v10  ;;  %v3491_v10 = vor.u32 %v3905_v5, %v3488_v7  ;;  %v807_v7 = vld [vmem:[#allocation2 + $0x55] sm:$0xff] }
 0x109   :  { %579 = vmatmul.bf16.vlgmr.msra.gmra.mxu3 %v381_v12  ;;  %777 = vmatmul.bf16.gmra.mxu0 %v4332_v15 }
 0x10a   :  { %684 = vmatpush.bf16.msrb.mxu3 %v3367_v58  ;;  %1274 = vmatpush.bf16.msra.mxu0 %v3491_v10  ;;  %v1083_v58 = vld [vmem:[#allocation2 + $0xe] sm:$0xff] }
 0x10b   :  { %3554 = vmatpush.msk.msrb.mxu1 %vm178_vm0, %v4164_v0  ;;  %v384_v0 = vpack.c.bf16 %v374_v41, %v373_v39  ;;  %v4369_v59 = vpack.c.bf16 %v1084_v55, %v1083_v58  ;;  %v810_v39 = vld [vmem:[#allocation2 + $0x6d] sm:$0xff]  ;;  %v811_v41 = vld [vmem:[#allocation2 + $0x75] sm:$0xff]  ;;  %v813_v58 = vld [vmem:[#allocation2 + $0x85] sm:$0xff] }
 0x10d   :  { %1774 = vmatpush.msrb.mxu1 %v4166_v1  ;;  %v4355_v1 = vpack.c.bf16 %v328_v42, %v283_v22  ;;  %v804_v22 = vld [vmem:[#allocation2 + $0x3d] sm:$0xff] }
 0x10e   :  { %685 = vmatpush.bf16.msrb.mxu3 %v3359_v6  ;;  %1275 = vmatpush.bf16.msra.mxu0 %v3483_v19  ;;  %v4367_v56 = vpack.c.bf16 %v805_v51, %v804_v22 }
 0x10f   :  { %1775 = vmatpush.msrb.mxu1 %v4172_v2 }
 0x111   :  { %1776 = vmatpush.msrb.mxu1 %v4176_v3 }
 0x112   :  { %1276 = vmatpush.bf16.msra.mxu0 %v3475_v33 }
 0x113   :  { %1777 = vmatpush.msrb.mxu1 %v4180_v4 }
 0x118   :  { %520 = vmatmul.bf16.gmra.mxu1 %v381_v12  ;;  %992 = vmatmul.bf16.vlgmr.msrb.gmra.mxu2 %v4335_v53  ;;  %v3351_v12 = vor.u32 %v3856_v9, %v3350_v8  ;;  %v1086_v9 = vld [vmem:[#allocation2 + $0x26] sm:$0xff] }
 0x119   :  { %584 = vmatmul.bf16.gmra.mxu3 %v382_v54  ;;  %782 = vmatmul.bf16.gmra.mxu0 %v4306_v52 }
 0x11a   :  { %686 = vmatpush.bf16.msrb.mxu3 %v3351_v12  ;;  %v806_v12 = vld [vmem:[#allocation2 + $0x4d] sm:$0xff] }
 0x11b   :  { %v4382_v17 = vpack.c.bf16 %v807_v7, %v806_v12 }
 0x11e   :  { %687 = vmatpush.bf16.msrb.mxu3 %v3343_v11  ;;  %v1088_v11 = vld [vmem:[#allocation2 + $0x36] sm:$0xff] }
 0x125   :  { %v748_v30 = vpop.f32.mrf.mxu0 }
 0x128   :  { %525 = vmatmul.bf16.gmra.mxu1 %v382_v54  ;;  %997 = vmatmul.bf16.gmra.mxu2 %v4339_v34 }
 0x129   :  { %589 = vmatmul.bf16.gmra.mxu3 %v383_v35  ;;  %787 = vmatmul.bf16.gmra.mxu0 %v4320_v32 }
 0x12d   :  { %v750_v37 = vpop.f32.mrf.mxu0 }
 0x135   :  { %v4349_v43 = vpop.f32.mrf.mxu1 }
 0x136   :  { %v753_v46 = vpop.f32.mrf.mxu0 }
 0x138   :  { %530 = vmatmul.bf16.gmra.mxu1 %v383_v35  ;;  %1002 = vmatmul.bf16.gmra.mxu2 %v4351_v45 }
 0x139   :  { %594 = vmatmul.bf16.gmra.mxu3 %v384_v0  ;;  %792 = vmatmul.bf16.gmra.mxu0 %v4355_v1 }
 0x13b   :  { %v550_v2 = vpop.f32.mrf.mxu2 }
 0x13c   :  { %v4359_v3 = vadd.f32 %v748_v30, %v550_v2 }
 0x13d   :  { %v4361_v4 = vpop.f32.mrf.mxu1 }
 0x13e   :  { %v755_v47 = vpop.f32.mrf.mxu0 }
 0x143   :  { %v552_v48 = vpop.f32.mrf.mxu2 }
 0x144   :  { %v4363_v54 = vadd.f32 %v750_v37, %v552_v48 }
 0x145   :  { %v4365_v16 = vpop.f32.mrf.mxu1 }
 0x146   :  { %v758_v57 = vpop.f32.mrf.mxu0 }
 0x148   :  { %535 = vmatmul.bf16.gmra.mxu1 %v384_v0  ;;  %1007 = vmatmul.bf16.gmra.mxu2 %v4367_v56  ;;  %v1089_v0 = vld [vmem:[#allocation2 + $0x3e] sm:$0xff] }
 0x149   :  { %688 = vmatmul.bf16.vlgmr.msrb.gmra.mxu3 %v4278_v50  ;;  %1277 = vmatmul.bf16.vlgmr.msra.gmra.mxu0 %v4369_v59  ;;  %v1085_v50 = vld [vmem:[#allocation2 + $0x1e] sm:$0xff]  ;;  %v4418_v2 = vpack.c.bf16 %v1090_v44, %v1089_v0 }
 0x14a   :  { %v4384_v19 = vpack.c.bf16 %v1086_v9, %v1085_v50 }
 0x14b   :  { %v555_v60 = vpop.f32.mrf.mxu2 }
 0x14c   :  { %v4374_v61 = vadd.f32 %v753_v46, %v555_v60  ;;  %v4416_v46 = vpack.c.bf16 %v811_v41, %v810_v39  ;;  %v1092_v60 = vld [vmem:[#allocation2 + $0x56] sm:$0xff] }
 0x14d   :  { %v4376_v62 = vpop.f32.mrf.mxu1 }
 0x14e   :  { %v760_v5 = vpop.f32.mrf.mxu0 }
 0x153   :  { %v557_v6 = vpop.f32.mrf.mxu2 }
 0x154   :  { %v4378_v8 = vadd.f32 %v755_v47, %v557_v6 }
 0x155   :  { %v4380_v10 = vpop.f32.mrf.mxu1 }
 0x156   :  { %v763_v18 = vpop.f32.mrf.mxu0 }
 0x158   :  { %933 = vmatmul.bf16.vlgmr.msra.gmra.mxu1 %v4335_v53  ;;  %1012 = vmatmul.bf16.gmra.mxu2 %v4382_v17  ;;  %v4398_v53 = vpack.c.bf16 %v809_v27, %v808_v26 }
 0x159   :  { %693 = vmatmul.bf16.gmra.mxu3 %v4283_v63  ;;  %1282 = vmatmul.bf16.gmra.mxu0 %v4384_v19  ;;  %v1087_v63 = vld [vmem:[#allocation2 + $0x2e] sm:$0xff] }
 0x15a   :  { %v4400_v30 = vpack.c.bf16 %v1088_v11, %v1087_v63  ;;  %v814_v11 = vld [vmem:[#allocation2 + $0x8d] sm:$0xff]  ;;  %v1093_v63 = vld [vmem:[#allocation2 + $0x5e] sm:$0xff] }
 0x15b   :  { %v560_v21 = vpop.f32.mrf.mxu2 }
 0x15c   :  { %v4390_v23 = vadd.f32 %v758_v57, %v560_v21  ;;  %v812_v57 = vld [vmem:[#allocation2 + $0x7d] sm:$0xff] }
 0x15d   :  { %v4392_v40 = vpop.f32.mrf.mxu1 }
 0x15e   :  { %v765_v24 = vpop.f32.mrf.mxu0 }
 0x163   :  { %v562_v25 = vpop.f32.mrf.mxu2 }
 0x164   :  { %v4394_v28 = vadd.f32 %v760_v5, %v562_v25  ;;  %v3916_v25 = vld [vmem:[#allocation7 + $0x1f4] sm:$0xf0] }
 0x165   :  { %v4396_v14 = vpop.f32.mrf.mxu1 }
 0x166   :  { %v768_v29 = vpop.f32.mrf.mxu0 }
 0x168   :  { %938 = vmatmul.bf16.gmra.mxu1 %v4339_v34  ;;  %1017 = vmatmul.bf16.gmra.mxu2 %v4398_v53 }
 0x169   :  { %698 = vmatmul.bf16.gmra.mxu3 %v4294_v20  ;;  %1287 = vmatmul.bf16.gmra.mxu0 %v4400_v30 }
 0x16b   :  { %v565_v31 = vpop.f32.mrf.mxu2 }
 0x16c   :  { %v4406_v33 = vadd.f32 %v763_v18, %v565_v31  ;;  %v1094_v31 = vld [vmem:[#allocation2 + $0x66] sm:$0xff] }
 0x16d   :  { %v4408_v35 = vpop.f32.mrf.mxu1 }
 0x16e   :  { %v4410_v37 = vpop.f32.mrf.mxu0 }
 0x173   :  { %v567_v38 = vpop.f32.mrf.mxu2 }
 0x174   :  { %v4412_v42 = vadd.f32 %v765_v24, %v567_v38  ;;  %v3526_v24 = vld [vmem:[#allocation7 + $0x1f0] sm:$0xf] }
 0x175   :  { %v4414_v34 = vpop.f32.mrf.mxu1  ;;  %v3527_v27 = vor.u32 %v3916_v25, %v3526_v24  ;;  %v1096_v24 = vld [vmem:[#allocation2 + $0x76] sm:$0xff] }
 0x176   :  { %5877 = vst [vmem:[#allocation13_spill] sm:$0xff] %v4414_v34  ;;  %v773_v20 = vpop.f32.mrf.mxu0 }
 0x177   :  { %1210 = vmatpush.bf16.msra.mxu3 %v3527_v27 }
 0x178   :  { %943 = vmatmul.bf16.gmra.mxu1 %v4351_v45  ;;  %1022 = vmatmul.bf16.gmra.mxu2 %v4416_v46  ;;  %v4434_v45 = vpack.c.bf16 %v813_v58, %v812_v57 }
 0x179   :  { %703 = vmatmul.bf16.gmra.mxu3 %v4301_v36  ;;  %1292 = vmatmul.bf16.gmra.mxu0 %v4418_v2  ;;  %v1091_v36 = vld [vmem:[#allocation2 + $0x4e] sm:$0xff] }
 0x17a   :  { %v4436_v7 = vpack.c.bf16 %v1092_v60, %v1091_v36  ;;  %v817_v36 = vld [vmem:[#allocation2 + $0xa5] sm:$0xf] }
 0x17b   :  { %v570_v47 = vpop.f32.mrf.mxu2 }
 0x17c   :  { %v4424_v48 = vadd.f32 %v768_v29, %v570_v47  ;;  %v815_v29 = vld [vmem:[#allocation2 + $0x95] sm:$0xff] }
 0x17d   :  { %v4426_v51 = vpop.f32.mrf.mxu1  ;;  %v4454_v41 = vpack.c.bf16 %v815_v29, %v814_v11 }
 0x17e   :  { %5878 = vst [vmem:[#allocation14_spill] sm:$0xff] %v4426_v51  ;;  %v4428_v55 = vpop.f32.mrf.mxu0  ;;  %v3902_v51 = vld [vmem:[#allocation7 + $0x184] sm:$0xf0] }
 0x183   :  { %v4430_v22 = vpop.f32.mrf.mxu2 }
 0x185   :  { %v4432_v5 = vpop.f32.mrf.mxu1 }
 0x186   :  { %5879 = vst [vmem:[#allocation15_spill] sm:$0xff] %v4432_v5  ;;  %v778_v6 = vpop.f32.mrf.mxu0 }
 0x188   :  { %948 = vmatmul.bf16.gmra.mxu1 %v4367_v56  ;;  %1027 = vmatmul.bf16.gmra.mxu2 %v4434_v45 }
 0x189   :  { %708 = vmatmul.bf16.gmra.mxu3 %v4310_v13  ;;  %1297 = vmatmul.bf16.gmra.mxu0 %v4436_v7 }
 0x18b   :  { %v575_v9 = vpop.f32.mrf.mxu2 }
 0x18c   :  { %v4442_v12 = vadd.f32 %v773_v20, %v575_v9  ;;  %v580_v18 = vpop.f32.mrf.mxu3  ;;  %v4456_v20 = vpack.c.bf16 %v1094_v31, %v1093_v63 }
 0x18d   :  { %v4444_v50 = vpop.f32.mrf.mxu1  ;;  %v4446_v21 = vadd.f32 %v778_v6, %v580_v18  ;;  %v816_v6 = vld [vmem:[#allocation2 + $0x9d] sm:$0xff]  ;;  %v1095_v18 = vld [vmem:[#allocation2 + $0x6e] sm:$0xff] }
 0x18e   :  { %5880 = vst [vmem:[#allocation16_spill] sm:$0xff] %v4444_v50  ;;  %v780_v26 = vpop.f32.mrf.mxu0  ;;  %v4474_v11 = vpack.c.bf16 %v817_v36, %v816_v6  ;;  %v4476_v63 = vpack.c.bf16 %v1096_v24, %v1095_v18  ;;  %v3912_v6 = vld [vmem:[#allocation7 + $0x1d4] sm:$0xf0]  ;;  %v3906_v50 = vld [vmem:[#allocation7 + $0x1a4] sm:$0xf0] }
 0x193   :  { %v4448_v56 = vpop.f32.mrf.mxu2 }
 0x194   :  { %v582_v13 = vpop.f32.mrf.mxu3 }
 0x195   :  { %v4450_v38 = vpop.f32.mrf.mxu1  ;;  %v4452_v39 = vadd.f32 %v780_v26, %v582_v13  ;;  %v3914_v26 = vld [vmem:[#allocation7 + $0x1e4] sm:$0xf0] }
 0x196   :  { %5881 = vst [vmem:[#allocation17_spill] sm:$0xff] %v4450_v38  ;;  %v783_v44 = vpop.f32.mrf.mxu0  ;;  %v3486_v38 = vld [vmem:[#allocation7 + $0x1a0] sm:$0xf] }
 0x198   :  { %953 = vmatmul.bf16.gmra.mxu1 %v4382_v17  ;;  %1032 = vmatmul.bf16.gmra.mxu2 %v4454_v41 }
 0x199   :  { %713 = vmatmul.bf16.gmra.mxu3 %v4324_v49  ;;  %1302 = vmatmul.bf16.gmra.mxu0 %v4456_v20  ;;  %v3518_v49 = vld [vmem:[#allocation7 + $0x1e0] sm:$0xf] }
 0x19a   :  { %v3519_v13 = vor.u32 %v3914_v26, %v3518_v49  ;;  %v1098_v49 = vld [vmem:[#allocation2 + $0x86] sm:$0xff]  ;;  %v3910_v26 = vld [vmem:[#allocation7 + $0x1c4] sm:$0xf0] }
 0x19b   :  { %v4462_v47 = vpop.f32.mrf.mxu2 }
 0x19c   :  { %v585_v0 = vpop.f32.mrf.mxu3  ;;  %1211 = vmatpush.bf16.msra.mxu3 %v3519_v13 }
 0x19d   :  { %v4464_v57 = vpop.f32.mrf.mxu1  ;;  %v4466_v58 = vadd.f32 %v783_v44, %v585_v0 }
 0x19e   :  { %5882 = vst [vmem:[#allocation18_spill] sm:$0xff] %v4464_v57  ;;  %v785_v60 = vpop.f32.mrf.mxu0 }
 0x1a3   :  { %v4472_v27 = vpop.f32.mrf.mxu2 }
 0x1a4   :  { %v587_v9 = vpop.f32.mrf.mxu3 }
 0x1a5   :  { %v4468_v17 = vpop.f32.mrf.mxu1  ;;  %v4470_v25 = vadd.f32 %v785_v60, %v587_v9  ;;  %v3510_v60 = vld [vmem:[#allocation7 + $0x1d0] sm:$0xf] }
 0x1a6   :  { %5883 = vst [vmem:[#allocation19_spill] sm:$0xff] %v4468_v17  ;;  %v788_v29 = vpop.f32.mrf.mxu0  ;;  %v3511_v9 = vor.u32 %v3912_v6, %v3510_v60 }
 0x1a8   :  { %958 = vmatmul.bf16.gmra.mxu1 %v4398_v53  ;;  %1037 = vmatmul.bf16.gmra.mxu2 %v4474_v11  ;;  %v1097_v53 = vld [vmem:[#allocation2 + $0x7e] sm:$0xff] }
 0x1a9   :  { %718 = vmatmul.bf16.gmra.mxu3 %v4332_v15  ;;  %1307 = vmatmul.bf16.gmra.mxu0 %v4476_v63  ;;  %v3502_v15 = vld [vmem:[#allocation7 + $0x1c0] sm:$0xf] }
 0x1aa   :  { %1212 = vmatpush.bf16.msra.mxu3 %v3511_v9  ;;  %v3503_v13 = vor.u32 %v3910_v26, %v3502_v15  ;;  %v3904_v26 = vld [vmem:[#allocation7 + $0x194] sm:$0xf0] }
 0x1ab   :  { %v998_v18 = vpop.f32.mrf.mxu2 }
 0x1ac   :  { %v590_v31 = vpop.f32.mrf.mxu3 }
 0x1ad   :  { %v4482_v44 = vpop.f32.mrf.mxu1  ;;  %v4484_v0 = vadd.f32 %v788_v29, %v590_v31  ;;  %v3494_v29 = vld [vmem:[#allocation7 + $0x1b0] sm:$0xf]  ;;  %v3908_v31 = vld [vmem:[#allocation7 + $0x1b4] sm:$0xf0] }
 0x1ae   :  { %5884 = vst [vmem:[#allocation20_spill] sm:$0xff] %v4482_v44  ;;  %v4486_v36 = vpop.f32.mrf.mxu0  ;;  %v4492_v44 = vpack.c.bf16 %v1098_v49, %v1097_v53  ;;  %1213 = vmatpush.bf16.msra.mxu3 %v3503_v13  ;;  %v3495_v60 = vor.u32 %v3908_v31, %v3494_v29  ;;  %v3487_v53 = vor.u32 %v3906_v50, %v3486_v38  ;;  %v1100_v31 = vld [vmem:[#allocation2 + $0x96] sm:$0xff] }
 0x1b2   :  { %1214 = vmatpush.bf16.msra.mxu3 %v3495_v60  ;;  %v3470_v60 = vld [vmem:[#allocation7 + $0x180] sm:$0xf] }
 0x1b3   :  { %v1000_v6 = vpop.f32.mrf.mxu2  ;;  %v3471_v50 = vor.u32 %v3902_v51, %v3470_v60  ;;  %v1046_v51 = vadd.f32 %v4472_v27, %v4363_v54  ;;  %v3948_v60 = vld [vmem:[#allocation7 + $0xf4] sm:$0xf0] }
 0x1b4   :  { %v4488_v24 = vpop.f32.mrf.mxu3 }
 0x1b5   :  { %v4490_v17 = vpop.f32.mrf.mxu1 }
 0x1b6   :  { %5885 = vst [vmem:[#allocation21_spill] sm:$0xff] %v4490_v17  ;;  %v793_v57 = vpop.f32.mrf.mxu0  ;;  %1215 = vmatpush.bf16.msra.mxu3 %v3487_v53 }
 0x1b8   :  { %963 = vmatmul.bf16.gmra.mxu1 %v4416_v46  ;;  %v3478_v46 = vld [vmem:[#allocation7 + $0x190] sm:$0xf] }
 0x1b9   :  { %723 = vmatmul.bf16.gmra.mxu3 %v4306_v52  ;;  %1312 = vmatmul.bf16.gmra.mxu0 %v4492_v44  ;;  %v3479_v13 = vor.u32 %v3904_v26, %v3478_v46  ;;  %v1099_v52 = vld [vmem:[#allocation2 + $0x8e] sm:$0xff]  ;;  %v1102_v26 = vld [vmem:[#allocation2 + $0xa6] sm:$0xf] }
 0x1ba   :  { %v4511_v34 = vpack.c.bf16 %v1100_v31, %v1099_v52  ;;  %v3635_v31 = vld [vmem:[#allocation7 + $0xf0] sm:$0xf] }
 0x1bb   :  { %1216 = vmatpush.bf16.msra.mxu3 %v3479_v13  ;;  %v1003_v5 = vpop.f32.mrf.mxu2  ;;  %v1048_v13 = vadd.f32 %v998_v18, %v4374_v61  ;;  %v3636_v27 = vor.u32 %v3948_v60, %v3635_v31  ;;  %v1050_v18 = vadd.f32 %v1000_v6, %v4378_v8  ;;  %v3627_v8 = vld [vmem:[#allocation7 + $0xe0] sm:$0xf]  ;;  %v3946_v6 = vld [vmem:[#allocation7 + $0xe4] sm:$0xf0] }
 0x1bc   :  { %v595_v9 = vpop.f32.mrf.mxu3 }
 0x1bd   :  { %v4497_v17 = vpop.f32.mrf.mxu1  ;;  %v4499_v15 = vadd.f32 %v793_v57, %v595_v9  ;;  %2061 = vmatpush.bf16.msra.mxu2 %v3636_v27  ;;  %v3628_v27 = vor.u32 %v3946_v6, %v3627_v8  ;;  %v3532_v8 = vld [vmem:[%s5835_s0 + $0xb0] sm:$0xff] }
 0x1be   :  { %5886 = vst [vmem:[#allocation22_spill] sm:$0xff] %v4497_v17  ;;  %v4501_v49 = vpop.f32.mrf.mxu0  ;;  %v1044_v17 = vadd.f32 %v4462_v47, %v4359_v3 }
 0x1bf   :  { %1217 = vmatpush.bf16.msra.mxu3 %v3471_v50 }
 0x1c1   :  { %2062 = vmatpush.bf16.msra.mxu2 %v3628_v27 }
 0x1c4   :  { %v4503_v29 = vpop.f32.mrf.mxu3 }
 0x1c5   :  { %v4507_v57 = vpop.f32.mrf.mxu1 }
 0x1c6   :  { %v1278_v38 = vpop.f32.mrf.mxu0 }
 0x1c7   :  { %v4509_v9 = vadd.f32 %v1278_v38, %v1044_v17  ;;  %v1005_v17 = vpop.f32.mrf.mxu2 }
 0x1c8   :  { %968 = vmatmul.bf16.gmra.mxu1 %v4434_v45  ;;  %v1101_v45 = vld [vmem:[#allocation2 + $0x9e] sm:$0xff] }
 0x1c9   :  { %5887 = vst [vmem:[#allocation23_spill] sm:$0xff] %v4509_v9  ;;  %728 = vmatmul.bf16.gmra.mxu3 %v4320_v32  ;;  %1317 = vmatmul.bf16.gmra.mxu0 %v4511_v34  ;;  %v4535_v38 = vpack.c.bf16 %v1102_v26, %v1101_v45 }
 0x1ca   :  { %1488 = vrot.lane.b32.xlu2 %v4509_v9, %s4121_s26  ;;  %v3936_v9 = vld [vmem:[#allocation7 + $0x94] sm:$0xf0] }
 0x1cc   :  { %v4518_v3 = vpop.f32.mrf.mxu3 }
 0x1cd   :  { %v4522_v47 = vpop.f32.mrf.mxu1 }
 0x1ce   :  { %v1280_v53 = vpop.f32.mrf.mxu0 }
 0x1cf   :  { %v4524_v46 = vadd.f32 %v1280_v53, %v1046_v51  ;;  %v1008_v51 = vpop.f32.mrf.mxu2 }
 0x1d1   :  { %5888 = vst [vmem:[#allocation24_spill] sm:$0xff] %v4524_v46  ;;  %1490 = vrot.lane.b32.xlu0 %v4524_v46, %s4121_s26 }
 0x1d4   :  { %v4528_v32 = vpop.f32.mrf.mxu3 }
 0x1d5   :  { %v4531_v52 = vpop.f32.mrf.mxu1 }
 0x1d6   :  { %v1283_v54 = vpop.f32.mrf.mxu0 }
 0x1d7   :  { %v4533_v50 = vadd.f32 %v1283_v54, %v1048_v13 }
 0x1d8   :  { %973 = vmatmul.bf16.gmra.mxu1 %v4454_v41  ;;  %v1010_v41 = vpop.f32.mrf.mxu2 }
 0x1d9   :  { %5889 = vst [vmem:[#allocation25_spill] sm:$0xff] %v4533_v50  ;;  %733 = vmatmul.bf16.gmra.mxu3 %v4355_v1  ;;  %1322 = vmatmul.bf16.gmra.mxu0 %v4535_v38  ;;  %v1052_v1 = vadd.f32 %v1003_v5, %v4390_v23  ;;  %v1054_v23 = vadd.f32 %v1005_v17, %v4394_v28 }
 0x1da   :  { %1492 = vrot.lane.b32.xlu1 %v4533_v50, %s4121_s26  ;;  %v3534_v50 = vld [vmem:[%s5835_s0 + $0xc0] sm:$0xff] }
 0x1dc   :  { %v4542_v61 = vpop.f32.mrf.mxu3 }
 0x1dd   :  { %v4545_v53 = vpop.f32.mrf.mxu1 }
 0x1de   :  { %v1285_v13 = vpop.f32.mrf.mxu0 }
 0x1df   :  { %v4547_v45 = vadd.f32 %v1285_v13, %v1050_v18 }
 0x1e0   :  { %v1013_v18 = vpop.f32.mrf.mxu2 }
 0x1e1   :  { %5890 = vst [vmem:[#allocation26_spill] sm:$0xff] %v4547_v45  ;;  %1494 = vrot.lane.b32.xlu2 %v4547_v45, %s4121_s26 }
 0x1e4   :  { %v4551_v26 = vpop.f32.mrf.mxu3 }
 0x1e5   :  { %v4554_v31 = vpop.f32.mrf.mxu1 }
 0x1e6   :  { %v1288_v60 = vpop.f32.mrf.mxu0 }
 0x1e7   :  { %v4556_v54 = vadd.f32 %v1288_v60, %v1052_v1 }
 0x1e8   :  { %978 = vmatmul.bf16.gmra.mxu1 %v4474_v11  ;;  %v1015_v6 = vpop.f32.mrf.mxu2 }
 0x1e9   :  { %5891 = vst [vmem:[#allocation27_spill] sm:$0xff] %v4556_v54  ;;  %1218 = vmatmul.bf16.vlgmr.msra.gmra.mxu3 %v4369_v59  ;;  %1496 = vrot.lane.b32.xlu0 %v4556_v54, %s4121_s26  ;;  %v1056_v59 = vadd.f32 %v1008_v51, %v4406_v33  ;;  %v1058_v33 = vadd.f32 %v1010_v41, %v4412_v42 }
 0x1ea   :  { %v1060_v41 = vadd.f32 %v1013_v18, %v4424_v48  ;;  %v771_v48 = vadd.f32 %v4410_v37, %v4430_v22 }
 0x1ec   :  { %v4562_v13 = vpop.f32.mrf.mxu3 }
 0x1ed   :  { %v4565_v5 = vpop.f32.mrf.mxu1 }
 0x1ee   :  { %v1290_v1 = vpop.f32.mrf.mxu0 }
 0x1ef   :  { %v4567_v60 = vadd.f32 %v1290_v1, %v1054_v23  ;;  %v3533_v23 = vld [vmem:[%s5835_s0 + $0xb8] sm:$0xff]  ;;  %v3619_v1 = vld [vmem:[#allocation7 + $0xd0] sm:$0xf] }
 0x1f1   :  { %5892 = vst [vmem:[#allocation28_spill] sm:$0xff] %v4567_v60  ;;  %1498 = vrot.lane.b32.xlu1 %v4567_v60, %s4121_s26 }
 0x1f4   :  { %v4571_v11 = vpop.f32.mrf.mxu3 }
 0x1f5   :  { %v4574_v45 = vpop.f32.mrf.mxu1 }
 0x1f6   :  { %v1293_v28 = vpop.f32.mrf.mxu0 }
 0x1f7   :  { %v4579_v17 = vadd.f32 %v1293_v28, %v1056_v59  ;;  %v3944_v59 = vld [vmem:[#allocation7 + $0xd4] sm:$0xf0] }
 0x1f8   :  { %3555 = vmatmul.msk.f32.vlgmr.msrb.gmra.mxu1 %vm111_vm1, %v3532_v8  ;;  %v3620_v60 = vor.u32 %v3944_v59, %v3619_v1 }
 0x1f9   :  { %5893 = vst [vmem:[#allocation29_spill] sm:$0xff] %v4579_v17  ;;  %1223 = vmatmul.bf16.gmra.mxu3 %v4384_v19  ;;  %1500 = vrot.lane.b32.xlu2 %v4579_v17, %s4121_s26  ;;  %v1018_v19 = vpop.f32.mrf.mxu2 }
 0x1fa   :  { %2063 = vmatpush.bf16.msra.mxu2 %v3620_v60 }
 0x1fc   :  { %v4585_v27 = vpop.f32.mrf.mxu3 }
 0x1fd   :  { %v4588_v51 = vpop.f32.mrf.mxu1 }
 0x1fe   :  { %v1295_v28 = vpop.f32.mrf.mxu0 }
 0x1ff   :  { %v4593_v8 = vadd.f32 %v1295_v28, %v1058_v33  ;;  %v3535_v28 = vld [vmem:[%s5835_s0 + $0xc8] sm:$0xff] }
 0x200   :  { %3556 = vmatmul.msk.f32.gmra.mxu1 %vm111_vm1, %v3533_v23  ;;  %v1062_v23 = vadd.f32 %v1015_v6, %v771_v48  ;;  %v1064_v48 = vadd.f32 %v1018_v19, %v4442_v12 }
 0x201   :  { %5894 = vst [vmem:[#allocation30_spill] sm:$0xff] %v4593_v8  ;;  %1502 = vrot.lane.b32.xlu0 %v4593_v8, %s4121_s26  ;;  %v1020_v60 = vpop.f32.mrf.mxu2 }
 0x204   :  { %v4598_v42 = vpop.f32.mrf.mxu3 }
 0x205   :  { %v4601_v17 = vpop.f32.mrf.mxu1 }
 0x206   :  { %v1298_v1 = vpop.f32.mrf.mxu0 }
 0x207   :  { %v4606_v33 = vadd.f32 %v1298_v1, %v1060_v41  ;;  %v3942_v1 = vld [vmem:[#allocation7 + $0xc4] sm:$0xf0] }
 0x208   :  { %3557 = vmatmul.msk.f32.gmra.mxu1 %vm111_vm1, %v3534_v50 }
 0x209   :  { %5895 = vst [vmem:[#allocation31_spill] sm:$0xff] %v4606_v33  ;;  %1228 = vmatmul.bf16.gmra.mxu3 %v4400_v30  ;;  %1504 = vrot.lane.b32.xlu1 %v4606_v33, %s4121_s26  ;;  %v3611_v30 = vld [vmem:[#allocation7 + $0xc0] sm:$0xf]  ;;  %v1023_v22 = vpop.f32.mrf.mxu2 }
 0x20a   :  { %v3612_v37 = vor.u32 %v3942_v1, %v3611_v30  ;;  %v776_v30 = vadd.f32 %v4428_v55, %v4448_v56  ;;  %v1068_v55 = vadd.f32 %v1023_v22, %v4446_v21  ;;  %v3595_v33 = vld [vmem:[#allocation7 + $0xa0] sm:$0xf] }
 0x20c   :  { %v4614_v18 = vpop.f32.mrf.mxu3  ;;  %2064 = vmatpush.bf16.msra.mxu2 %v3612_v37  ;;  %v1066_v19 = vadd.f32 %v1020_v60, %v776_v30  ;;  %v3537_v37 = vld [vmem:[%s5835_s0 + $0xd8] sm:$0xff]  ;;  %v3538_v60 = vld [vmem:[%s5835_s0 + $0xe0] sm:$0xff]  ;;  %v3603_v30 = vld [vmem:[#allocation7 + $0xb0] sm:$0xf] }
 0x20d   :  { %v4616_v59 = vpop.f32.mrf.mxu1 }
 0x20e   :  { %v1300_v41 = vpop.f32.mrf.mxu0 }
 0x20f   :  { %v4621_v50 = vadd.f32 %v1300_v41, %v1062_v23  ;;  %v3536_v23 = vld [vmem:[%s5835_s0 + $0xd0] sm:$0xff] }
 0x210   :  { %3558 = vmatmul.msk.f32.gmra.mxu1 %vm111_vm1, %v3535_v28 }
 0x211   :  { %5896 = vst [vmem:[#allocation32_spill] sm:$0xff] %v4621_v50  ;;  %1506 = vrot.lane.b32.xlu2 %v4621_v50, %s4121_s26 }
 0x214   :  { %v4626_v6 = vpop.f32.mrf.mxu3 }
 0x215   :  { %v4629_v8 = vpop.f32.mrf.mxu1 }
 0x216   :  { %v1303_v41 = vpop.f32.mrf.mxu0 }
 0x217   :  { %v4634_v28 = vadd.f32 %v1303_v41, %v1064_v48  ;;  %v1025_v48 = vpop.f32.mrf.mxu2 }
 0x218   :  { %3559 = vmatmul.msk.f32.gmra.mxu1 %vm111_vm1, %v3536_v23  ;;  %v1070_v22 = vadd.f32 %v1025_v48, %v4452_v39 }
 0x219   :  { %5897 = vst [vmem:[#allocation33_spill] sm:$0xff] %v4634_v28  ;;  %1233 = vmatmul.bf16.gmra.mxu3 %v4418_v2  ;;  %1508 = vrot.lane.b32.xlu0 %v4634_v28, %s4121_s26  ;;  %v3940_v28 = vld [vmem:[#allocation7 + $0xb4] sm:$0xf0] }
 0x21c   :  { %v4642_v12 = vpop.f32.mrf.mxu3 }
 0x21d   :  { %v4644_v1 = vpop.f32.mrf.mxu1 }
 0x21e   :  { %v1305_v41 = vpop.f32.mrf.mxu0 }
 0x21f   :  { %v4649_v23 = vadd.f32 %v1305_v41, %v1066_v19  ;;  %v3604_v19 = vor.u32 %v3940_v28, %v3603_v30 }
 0x220   :  { %3560 = vmatmul.msk.f32.gmra.mxu1 %vm111_vm1, %v3537_v37  ;;  %v1028_v37 = vpop.f32.mrf.mxu2 }
 0x221   :  { %5898 = vst [vmem:[#allocation34_spill] sm:$0xff] %v4649_v23  ;;  %1510 = vrot.lane.b32.xlu1 %v4649_v23, %s4121_s26  ;;  %2065 = vmatpush.bf16.msra.mxu2 %v3604_v19  ;;  %v1072_v48 = vadd.f32 %v1028_v37, %v4466_v58  ;;  %v3699_v58 = vld [vmem:[#allocation7 + $0x70] sm:$0xf]  ;;  %v3932_v37 = vld [vmem:[#allocation7 + $0x74] sm:$0xf0] }
 0x224   :  { %v4654_v2 = vpop.f32.mrf.mxu3 }
 0x225   :  { %v4657_v56 = vpop.f32.mrf.mxu1 }
 0x226   :  { %v1308_v50 = vpop.f32.mrf.mxu0 }
 0x227   :  { %v4662_v41 = vadd.f32 %v1308_v50, %v1068_v55  ;;  %v3539_v50 = vld [vmem:[%s5835_s0 + $0xe8] sm:$0xff] }
 0x228   :  { %3561 = vmatmul.msk.f32.gmra.mxu1 %vm111_vm1, %v3538_v60  ;;  %v3947_v60 = vld [vmem:[#allocation7 + $0xf4] sm:$0xf]  ;;  %v1030_v19 = vpop.f32.mrf.mxu2 }
 0x229   :  { %5899 = vst [vmem:[#allocation35_spill] sm:$0xff] %v4662_v41  ;;  %1238 = vmatmul.bf16.gmra.mxu3 %v4436_v7  ;;  %1512 = vrot.lane.b32.xlu2 %v4662_v41, %s4121_s26  ;;  %v3637_v7 = vld [vmem:[#allocation7 + $0xf8] sm:$0xf0] }
 0x22a   :  { %v3640_v30 = vor.u32 %v3947_v60, %v3637_v7  ;;  %v3700_v7 = vor.u32 %v3932_v37, %v3699_v58  ;;  %v3945_v37 = vld [vmem:[#allocation7 + $0xe4] sm:$0xf] }
 0x22c   :  { %v4668_v21 = vpop.f32.mrf.mxu3  ;;  %2120 = vmatpush.bf16.msrb.mxu3 %v3640_v30  ;;  %2259 = vmatpush.bf16.msrb.mxu0 %v3700_v7  ;;  %v3629_v7 = vld [vmem:[#allocation7 + $0xe8] sm:$0xf0] }
 0x22d   :  { %v4671_v23 = vpop.f32.mrf.mxu1 }
 0x22e   :  { %v1310_v28 = vpop.f32.mrf.mxu0 }
 0x22f   :  { %v4676_v55 = vadd.f32 %v1310_v28, %v1070_v22  ;;  %v3540_v22 = vld [vmem:[%s5835_s0 + $0xf0] sm:$0xff] }
 0x230   :  { %3562 = vmatmul.msk.f32.gmra.mxu1 %vm111_vm1, %v3539_v50  ;;  %v1033_v30 = vpop.f32.mrf.mxu2 }
 0x231   :  { %5900 = vst [vmem:[#allocation36_spill] sm:$0xff] %v4676_v55  ;;  %1514 = vrot.lane.b32.xlu0 %v4676_v55, %s4121_s26  ;;  %v3938_v55 = vld [vmem:[#allocation7 + $0xa4] sm:$0xf0] }
 0x232   :  { %v3596_v60 = vor.u32 %v3938_v55, %v3595_v33  ;;  %v1076_v55 = vadd.f32 %v1033_v30, %v4484_v0  ;;  %v791_v30 = vadd.f32 %v4486_v36, %v4488_v24  ;;  %v3675_v24 = vld [vmem:[#allocation7 + $0x40] sm:$0xf] }
 0x234   :  { %v4681_v39 = vpop.f32.mrf.mxu3  ;;  %2066 = vmatpush.bf16.msra.mxu2 %v3596_v60 }
 0x235   :  { %v4684_v41 = vpop.f32.mrf.mxu1 }
 0x236   :  { %v1313_v28 = vpop.f32.mrf.mxu0 }
 0x237   :  { %v4689_v50 = vadd.f32 %v1313_v28, %v1072_v48  ;;  %v1074_v48 = vadd.f32 %v1030_v19, %v4470_v25  ;;  %v3542_v25 = vld [vmem:[%s5835_s0 + $0x100] sm:$0xff] }
 0x238   :  { %3563 = vmatmul.msk.f32.gmra.mxu1 %vm111_vm1, %v3540_v22  ;;  %v1035_v19 = vpop.f32.mrf.mxu2 }
 0x239   :  { %5901 = vst [vmem:[#allocation37_spill] sm:$0xff] %v4689_v50  ;;  %1243 = vmatmul.bf16.gmra.mxu3 %v4456_v20  ;;  %1516 = vrot.lane.b32.xlu1 %v4689_v50, %s4121_s26  ;;  %v3541_v20 = vld [vmem:[%s5835_s0 + $0xf8] sm:$0xff] }
 0x23c   :  { %v4695_v54 = vpop.f32.mrf.mxu3 }
 0x23d   :  { %v4698_v28 = vpop.f32.mrf.mxu1 }
 0x23e   :  { %v1315_v22 = vpop.f32.mrf.mxu0 }
 0x23f   :  { %v4703_v46 = vadd.f32 %v1315_v22, %v1074_v48  ;;  %v3691_v22 = vld [vmem:[#allocation7 + $0x60] sm:$0xf] }
 0x240   :  { %3564 = vmatmul.msk.f32.gmra.mxu1 %vm111_vm1, %v3541_v20  ;;  %v3632_v20 = vor.u32 %v3945_v37, %v3629_v7  ;;  %v1078_v37 = vadd.f32 %v1035_v19, %v791_v30  ;;  %v1038_v36 = vpop.f32.mrf.mxu2  ;;  %v3926_v19 = vld [vmem:[#allocation7 + $0x44] sm:$0xf0] }
 0x241   :  { %5902 = vst [vmem:[#allocation38_spill] sm:$0xff] %v4703_v46  ;;  %1518 = vrot.lane.b32.xlu2 %v4703_v46, %s4121_s26  ;;  %v3930_v46 = vld [vmem:[#allocation7 + $0x64] sm:$0xf0] }
 0x242   :  { %v3692_v0 = vor.u32 %v3930_v46, %v3691_v22  ;;  %2121 = vmatpush.bf16.msrb.mxu3 %v3632_v20 }
 0x244   :  { %v4708_v33 = vpop.f32.mrf.mxu3  ;;  %2260 = vmatpush.bf16.msrb.mxu0 %v3692_v0  ;;  %v3676_v0 = vor.u32 %v3926_v19, %v3675_v24  ;;  %v3943_v24 = vld [vmem:[#allocation7 + $0xd4] sm:$0xf]  ;;  %v3621_v19 = vld [vmem:[#allocation7 + $0xd8] sm:$0xf0] }
 0x245   :  { %v4711_v60 = vpop.f32.mrf.mxu1 }
 0x246   :  { %v1318_v58 = vpop.f32.mrf.mxu0 }
 0x247   :  { %v4716_v48 = vadd.f32 %v1318_v58, %v1076_v55  ;;  %v3683_v55 = vld [vmem:[#allocation7 + $0x50] sm:$0xf]  ;;  %v3928_v58 = vld [vmem:[#allocation7 + $0x54] sm:$0xf0] }
 0x248   :  { %3565 = vmatmul.msk.f32.gmra.mxu1 %vm111_vm1, %v3542_v25  ;;  %v3587_v25 = vld [vmem:[#allocation7 + $0x90] sm:$0xf] }
 0x249   :  { %5903 = vst [vmem:[#allocation39_spill] sm:$0xff] %v4716_v48  ;;  %1248 = vmatmul.bf16.gmra.mxu3 %v4476_v63  ;;  %1520 = vrot.lane.b32.xlu0 %v4716_v48, %s4121_s26  ;;  %v3543_v63 = vld [vmem:[%s5835_s0 + $0x108] sm:$0xff]  ;;  %v3684_v48 = vor.u32 %v3928_v58, %v3683_v55  ;;  %v3588_v20 = vor.u32 %v3936_v9, %v3587_v25  ;;  %v3924_v55 = vld [vmem:[#allocation7 + $0x34] sm:$0xf0] }
 0x24a   :  { %v1080_v9 = vadd.f32 %v1038_v36, %v4499_v15  ;;  %v1040_v36 = vpop.f32.mrf.mxu2 }
 0x24b   :  { %2261 = vmatpush.bf16.msrb.mxu0 %v3684_v48  ;;  %2067 = vmatpush.bf16.msra.mxu2 %v3588_v20  ;;  %v3544_v48 = vld [vmem:[%s5835_s0 + $0x110] sm:$0xff]  ;;  %v3922_v20 = vld [vmem:[#allocation7 + $0x24] sm:$0xf0] }
 0x24c   :  { %v4724_v50 = vpop.f32.mrf.mxu3 }
 0x24d   :  { %5904 = vst [vmem:[#allocation40_spill] sm:$0xff] %v4724_v50  ;;  %v4726_v7 = vpop.f32.mrf.mxu1  ;;  %v3667_v50 = vld [vmem:[#allocation7 + $0x30] sm:$0xf] }
 0x24e   :  { %v1320_v46 = vpop.f32.mrf.mxu0 }
 0x24f   :  { %v4731_v22 = vadd.f32 %v1320_v46, %v1078_v37  ;;  %2262 = vmatpush.bf16.msrb.mxu0 %v3676_v0  ;;  %v3668_v37 = vor.u32 %v3924_v55, %v3667_v50  ;;  %v3659_v46 = vld [vmem:[#allocation7 + $0x20] sm:$0xf]  ;;  %v796_v50 = vadd.f32 %v4501_v49, %v4503_v29  ;;  %v3624_v0 = vor.u32 %v3943_v24, %v3621_v19  ;;  %v3941_v49 = vld [vmem:[#allocation7 + $0xc4] sm:$0xf]  ;;  %v3613_v29 = vld [vmem:[#allocation7 + $0xc8] sm:$0xf0] }
 0x250   :  { %3566 = vmatmul.msk.f32.gmra.mxu1 %vm111_vm1, %v3543_v63  ;;  %v3660_v15 = vor.u32 %v3922_v20, %v3659_v46  ;;  %v3918_v24 = vld [vmem:[#allocation7 + $0x4] sm:$0xf0]  ;;  %v3579_v19 = vld [vmem:[#allocation7 + $0x80] sm:$0xf] }
 0x251   :  { %5905 = vst [vmem:[#allocation41_spill] sm:$0xff] %v4731_v22  ;;  %1522 = vrot.lane.b32.xlu1 %v4731_v22, %s4121_s26  ;;  %2122 = vmatpush.bf16.msrb.mxu3 %v3624_v0 }
 0x253   :  { %2263 = vmatpush.bf16.msrb.mxu0 %v3668_v37  ;;  %v3920_v37 = vld [vmem:[#allocation7 + $0x14] sm:$0xf0] }
 0x254   :  { %v4736_v30 = vpop.f32.mrf.mxu3 }
 0x255   :  { %v4739_v58 = vpop.f32.mrf.mxu1 }
 0x256   :  { %v1323_v63 = vpop.f32.mrf.mxu0 }
 0x257   :  { %v4744_v25 = vadd.f32 %v1323_v63, %v1080_v9  ;;  %2264 = vmatpush.bf16.msrb.mxu0 %v3660_v15  ;;  %v3651_v9 = vld [vmem:[#allocation7 + $0x10] sm:$0xf]  ;;  %v3643_v15 = vld [vmem:[#allocation7] sm:$0xf] }
 0x258   :  { %3567 = vmatmul.msk.f32.gmra.mxu1 %vm111_vm1, %v3544_v48  ;;  %v1082_v48 = vadd.f32 %v1040_v36, %v796_v50  ;;  %v3652_v46 = vor.u32 %v3920_v37, %v3651_v9  ;;  %v3616_v36 = vor.u32 %v3941_v49, %v3613_v29  ;;  %v3934_v50 = vld [vmem:[#allocation7 + $0x84] sm:$0xf0]  ;;  %v3644_v22 = vor.u32 %v3918_v24, %v3643_v15  ;;  %v3939_v37 = vld [vmem:[#allocation7 + $0xb4] sm:$0xf]  ;;  %v3937_v29 = vld [vmem:[#allocation7 + $0xa4] sm:$0xf] }
 0x259   :  { %5906 = vst [vmem:[#allocation42_spill] sm:$0xff] %v4744_v25  ;;  %1253 = vmatmul.bf16.gmra.mxu3 %v4492_v44  ;;  %1524 = vrot.lane.b32.xlu2 %v4744_v25, %s4121_s26  ;;  %v3545_v44 = vld [vmem:[%s5835_s0 + $0x118] sm:$0xff]  ;;  %v3597_v15 = vld [vmem:[#allocation7 + $0xa8] sm:$0xf0] }
 0x25a   :  { %2123 = vmatpush.bf16.msrb.mxu3 %v3616_v36  ;;  %v3963_v36 = vld [vmem:[#allocation7 + $0x174] sm:$0xf] }
 0x25b   :  { %2265 = vmatpush.bf16.msrb.mxu0 %v3652_v46  ;;  %v3546_v46 = vld [vmem:[%s5835_s0 + $0x120] sm:$0xff] }
 0x25c   :  { %v734_v55 = vpop.f32.mrf.mxu3 }
 0x25d   :  { %v4752_v63 = vpop.f32.mrf.mxu1  ;;  %v735_v0 = vadd.f32 %v734_v55, %v4507_v57  ;;  %v690_v57 = vadd.f32 %v4518_v3, %v4349_v43  ;;  %v3765_v55 = vld [vmem:[#allocation7 + $0x178] sm:$0xf0]  ;;  %v3547_v43 = vld [vmem:[%s5835_s0 + $0x128] sm:$0xff] }
 0x25e   :  { %5907 = vst [vmem:[#allocation43_spill] sm:$0xff] %v4752_v63  ;;  %v1325_v20 = vpop.f32.mrf.mxu0  ;;  %v3580_v63 = vor.u32 %v3934_v50, %v3579_v19  ;;  %v3768_v24 = vor.u32 %v3963_v36, %v3765_v55  ;;  %v3757_v3 = vld [vmem:[#allocation7 + $0x168] sm:$0xf0] }
 0x25f   :  { %v4757_v25 = vadd.f32 %v1325_v20, %v1082_v48  ;;  %v3605_v48 = vld [vmem:[#allocation7 + $0xb8] sm:$0xf0]  ;;  %2266 = vmatpush.bf16.msrb.mxu0 %v3644_v22  ;;  %v3600_v22 = vor.u32 %v3937_v29, %v3597_v15  ;;  %v1043_v19 = vadd.f32 %v4531_v52, %v690_v57  ;;  %v3959_v29 = vld [vmem:[#allocation7 + $0x154] sm:$0xf]  ;;  %v692_v15 = vadd.f32 %v4528_v32, %v4361_v4 }
 0x260   :  { %3568 = vmatmul.msk.f32.gmra.mxu1 %vm111_vm1, %v3545_v44  ;;  %2068 = vmatpush.bf16.msra.mxu2 %v3580_v63  ;;  %v3608_v20 = vor.u32 %v3939_v37, %v3605_v48  ;;  %v3589_v37 = vld [vmem:[#allocation7 + $0x98] sm:$0xf0]  ;;  %v3961_v48 = vld [vmem:[#allocation7 + $0x164] sm:$0xf] }
 0x261   :  { %5908 = vst [vmem:[#allocation44_spill] sm:$0xff] %v4757_v25  ;;  %1526 = vrot.lane.b32.xlu0 %v4757_v25, %s4121_s26  ;;  %2562 = vmatpush.bf16.msra.mxu1 %v3768_v24  ;;  %v3760_v52 = vor.u32 %v3961_v48, %v3757_v3  ;;  %v3749_v57 = vld [vmem:[#allocation7 + $0x158] sm:$0xf0]  ;;  %v1045_v55 = vadd.f32 %v4545_v53, %v692_v15  ;;  %v3931_v48 = vld [vmem:[#allocation7 + $0x74] sm:$0xf] }
 0x262   :  { %2124 = vmatpush.bf16.msrb.mxu3 %v3608_v20  ;;  %v3701_v4 = vld [vmem:[#allocation7 + $0x78] sm:$0xf0]  ;;  %v3955_v3 = vld [vmem:[#allocation7 + $0x134] sm:$0xf] }
 0x263   :  { %v3704_v53 = vor.u32 %v3931_v48, %v3701_v4 }
 0x264   :  { %v736_v9 = vpop.f32.mrf.mxu3 }
 0x265   :  { %v979_v44 = vpop.f32.mrf.mxu1  ;;  %v737_v63 = vadd.f32 %v736_v9, %v4522_v47  ;;  %v3933_v47 = vld [vmem:[#allocation7 + $0x84] sm:$0xf]  ;;  %v3581_v9 = vld [vmem:[#allocation7 + $0x88] sm:$0xf0]  ;;  %2563 = vmatpush.bf16.msra.mxu1 %v3760_v52  ;;  %2318 = vmatpush.bf16.msrb.mxu2 %v3704_v53  ;;  %v3733_v52 = vld [vmem:[#allocation7 + $0x138] sm:$0xf0] }
 0x266   :  { %v4766_v49 = vadd.f32 %v979_v44, %v735_v0  ;;  %2125 = vmatpush.bf16.msrb.mxu3 %v3600_v22  ;;  %v3935_v0 = vld [vmem:[#allocation7 + $0x94] sm:$0xf]  ;;  %v3584_v36 = vor.u32 %v3933_v47, %v3581_v9  ;;  %v3752_v22 = vor.u32 %v3959_v29, %v3749_v57  ;;  %v695_v47 = vadd.f32 %v4542_v61, %v4365_v16  ;;  %v3725_v57 = vld [vmem:[#allocation7 + $0x128] sm:$0xf0] }
 0x267   :  { %v3736_v9 = vor.u32 %v3955_v3, %v3733_v52  ;;  %v3951_v61 = vld [vmem:[#allocation7 + $0x114] sm:$0xf]  ;;  %v3550_v52 = vld [vmem:[%s5835_s0 + $0x140] sm:$0xff] }
 0x268   :  { %3569 = vmatmul.msk.f32.gmra.mxu1 %vm111_vm1, %v3546_v46  ;;  %v1047_v29 = vadd.f32 %v4554_v31, %v695_v47  ;;  %v3717_v31 = vld [vmem:[#allocation7 + $0x118] sm:$0xf0]  ;;  %v3929_v47 = vld [vmem:[#allocation7 + $0x64] sm:$0xf] }
 0x269   :  { %1258 = vmatmul.bf16.gmra.mxu3 %v4511_v34  ;;  %v3592_v34 = vor.u32 %v3935_v0, %v3589_v37  ;;  %v3548_v37 = vld [vmem:[%s5835_s0 + $0x130] sm:$0xff]  ;;  %2564 = vmatpush.bf16.msra.mxu1 %v3752_v22 }
 0x26b   :  { %2126 = vmatpush.bf16.msrb.mxu3 %v3592_v34 }
 0x26c   :  { %v1219_v50 = vpop.f32.mrf.mxu3 }
 0x26d   :  { %v4774_v44 = vadd.f32 %v1219_v50, %v1043_v19  ;;  %v981_v46 = vpop.f32.mrf.mxu1  ;;  %v3957_v19 = vld [vmem:[#allocation7 + $0x144] sm:$0xf] }
 0x26e   :  { %v4779_v20 = vadd.f32 %v981_v46, %v737_v63  ;;  %v3741_v63 = vld [vmem:[#allocation7 + $0x148] sm:$0xf0]  ;;  %v4792_v46 = vld [vmem:[#allocation5] ss:$0 sm:$0xff] }
 0x26f   :  { %1388 = vrot.lane.b32.xlu0 %v4774_v44, %s4121_s26  ;;  %2127 = vmatpush.bf16.msrb.mxu3 %v3584_v36  ;;  %v3744_v32 = vor.u32 %v3957_v19, %v3741_v63  ;;  %v3953_v36 = vld [vmem:[#allocation7 + $0x124] sm:$0xf]  ;;  %v697_v63 = vadd.f32 %v4551_v26, %v4376_v62 }
 0x270   :  { %3570 = vmatmul.msk.f32.gmra.mxu1 %vm111_vm1, %v3547_v43  ;;  %v3728_v19 = vor.u32 %v3953_v36, %v3725_v57 }
 0x271   :  { %2565 = vmatpush.bf16.msra.mxu1 %v3744_v32  ;;  %v1049_v48 = vadd.f32 %v4565_v5, %v697_v63  ;;  %v3949_v32 = vld [vmem:[#allocation7 + $0x104] sm:$0xf] }
 0x274   :  { %v1221_v24 = vpop.f32.mrf.mxu3 }
 0x275   :  { %v4787_v50 = vadd.f32 %v1221_v24, %v1045_v55  ;;  %v1779_v0 = vpop.f32.mrf.mxu1  ;;  %v3549_v24 = vld [vmem:[%s5835_s0 + $0x138] sm:$0xff]  ;;  %2566 = vmatpush.bf16.msra.mxu1 %v3736_v9  ;;  %v3693_v9 = vld [vmem:[#allocation7 + $0x68] sm:$0xf0] }
 0x276   :  { %v1780_v43 = vadd.f32 %v4792_v46, %v1779_v0  ;;  %v3720_v0 = vor.u32 %v3951_v61, %v3717_v31 }
 0x277   :  { %1390 = vrot.lane.b32.xlu0 %v4787_v50, %s4121_s26 }
 0x278   :  { %v1845_v34 = vmax.f32 %v1780_v43, 0.0  ;;  %3571 = vmatmul.msk.f32.gmra.mxu1 %vm111_vm1, %v3548_v37  ;;  %v3709_v43 = vld [vmem:[#allocation7 + $0x108] sm:$0xf0] }
 0x279   :  { %1263 = vmatmul.bf16.gmra.mxu3 %v4535_v38  ;;  %2567 = vmatpush.bf16.msra.mxu1 %v3728_v19  ;;  %v3712_v62 = vor.u32 %v3949_v32, %v3709_v43 }
 0x27a   :  { %1867 = vst [vmem:[#allocation2] sm:$0xff] %v1845_v34 }
 0x27c   :  { %v1224_v15 = vpop.f32.mrf.mxu3 }
 0x27d   :  { %v4802_v22 = vadd.f32 %v1224_v15, %v1047_v29  ;;  %v1782_v55 = vpop.f32.mrf.mxu1  ;;  %2568 = vmatpush.bf16.msra.mxu1 %v3720_v0  ;;  %v3696_v15 = vor.u32 %v3929_v47, %v3693_v9 }
 0x27e   :  { %v1783_v16 = vadd.f32 %v4792_v46, %v1782_v55 }
 0x27f   :  { %1392 = vrot.lane.b32.xlu1 %v4802_v22, %s4121_s26  ;;  %2319 = vmatpush.bf16.msrb.mxu2 %v3696_v15 }
 0x280   :  { %v1846_v38 = vmax.f32 %v1783_v16, 0.0  ;;  %3572 = vmatmul.msk.f32.gmra.mxu1 %vm111_vm1, %v3549_v24  ;;  %v3551_v24 = vld [vmem:[%s5835_s0 + $0x148] sm:$0xff] }
 0x281   :  { %2569 = vmatpush.bf16.msra.mxu1 %v3712_v62  ;;  %v3553_v62 = vld [vmem:[%s5835_s0 + $0x158] sm:$0xff] }
 0x282   :  { %1868 = vst [vmem:[#allocation2 + $0x8] sm:$0xff] %v1846_v38  ;;  %v4813_v37 = vpack.c.bf16 %v1846_v38, %v1845_v34  ;;  %v700_v34 = vadd.f32 %v4562_v13, %v4380_v10 }
 0x284   :  { %v1226_v4 = vpop.f32.mrf.mxu3  ;;  %2267 = vmatmul.bf16.vlgmr.msrb.gmra.mxu0 %v4813_v37  ;;  %v1051_v29 = vadd.f32 %v4574_v45, %v700_v34  ;;  %v702_v45 = vadd.f32 %v4571_v11, %v4392_v40 }
 0x285   :  { %v4817_v53 = vadd.f32 %v1226_v4, %v1049_v48  ;;  %v1785_v3 = vpop.f32.mrf.mxu1  ;;  %v3552_v4 = vld [vmem:[%s5835_s0 + $0x150] sm:$0xff] }
 0x286   :  { %v1786_v26 = vadd.f32 %v4792_v46, %v1785_v3  ;;  %v1053_v31 = vadd.f32 %v4588_v51, %v702_v45  ;;  %v705_v51 = vadd.f32 %v4585_v27, %v4396_v14 }
 0x287   :  { %1394 = vrot.lane.b32.xlu1 %v4817_v53, %s4121_s26 }
 0x288   :  { %v1847_v5 = vmax.f32 %v1786_v26, 0.0  ;;  %3573 = vmatmul.msk.f32.gmra.mxu1 %vm111_vm1, %v3550_v52  ;;  %v1055_v32 = vadd.f32 %v4601_v17, %v705_v51  ;;  %v3927_v26 = vld [vmem:[#allocation7 + $0x54] sm:$0xf]  ;;  %v707_v17 = vadd.f32 %v4598_v42, %v4408_v35  ;;  %v5910_v51 = vld [vmem:[#allocation14_spill] sm:$0xff] }
 0x289   :  { %v1935_v13 = vld [vmem:[#allocation2 + $0x1] sm:$0xff] }
 0x28a   :  { %1869 = vst [vmem:[#allocation2 + $0x10] sm:$0xff] %v1847_v5 }
 0x28c   :  { %v1229_v36 = vpop.f32.mrf.mxu3 }
 0x28d   :  { %v4829_v57 = vadd.f32 %v1229_v36, %v1051_v29  ;;  %v1788_v55 = vpop.f32.mrf.mxu1  ;;  %v1057_v36 = vadd.f32 %v4616_v59, %v707_v17  ;;  %v5909_v59 = vld [vmem:[#allocation13_spill] sm:$0xff] }
 0x28e   :  { %v1789_v19 = vadd.f32 %v4792_v46, %v1788_v55 }
 0x28f   :  { %1396 = vrot.lane.b32.xlu2 %v4829_v57, %s4121_s26 }
 0x290   :  { %v1848_v10 = vmax.f32 %v1789_v19, 0.0  ;;  %3574 = vmatmul.msk.f32.gmra.mxu1 %vm111_vm1, %v3551_v24 }
 0x291   :  { %v1936_v16 = vld [vmem:[#allocation2 + $0x9] sm:$0xff] }
 0x292   :  { %1870 = vst [vmem:[#allocation2 + $0x18] sm:$0xff] %v1848_v10  ;;  %v1955_v38 = vpack.c.bf16 %v1936_v16, %v1935_v13  ;;  %v4840_v61 = vpack.c.bf16 %v1848_v10, %v1847_v5  ;;  %v3685_v5 = vld [vmem:[#allocation7 + $0x58] sm:$0xf0]  ;;  %v2377_v45 = vld [vmem:[#allocation2 + $0xd] sm:$0xff]  ;;  %v710_v16 = vadd.f32 %v4614_v18, %v5909_v59 }
 0x293   :  { %v3688_v47 = vor.u32 %v3927_v26, %v3685_v5  ;;  %v3925_v5 = vld [vmem:[#allocation7 + $0x44] sm:$0xf] }
 0x294   :  { %v1231_v63 = vpop.f32.mrf.mxu3  ;;  %2069 = vmatmul.bf16.vlgmr.msra.gmra.mxu2 %v1955_v38  ;;  %2128 = vmatmul.bf16.vlgmr.msrb.gmra.mxu3 %v1955_v38  ;;  %v4881_v38 = vpop.permute.xlu0 %1490 }
 0x295   :  { %v4843_v0 = vadd.f32 %v1231_v63, %v1053_v31  ;;  %v1791_v48 = vpop.f32.mrf.mxu1  ;;  %2272 = vmatmul.bf16.gmra.mxu0 %v4840_v61  ;;  %2320 = vmatpush.bf16.msrb.mxu2 %v3688_v47  ;;  %v1059_v31 = vadd.f32 %v4629_v8, %v710_v16 }
 0x296   :  { %v1792_v40 = vadd.f32 %v4792_v46, %v1791_v48 }
 0x297   :  { %1398 = vrot.lane.b32.xlu2 %v4843_v0, %s4121_s26 }
 0x298   :  { %v1849_v11 = vmax.f32 %v1792_v40, 0.0  ;;  %3575 = vmatmul.msk.f32.gmra.mxu1 %vm111_vm1, %v3552_v4 }
 0x299   :  { %v1937_v27 = vld [vmem:[#allocation2 + $0x11] sm:$0xff] }
 0x29a   :  { %1871 = vst [vmem:[#allocation2 + $0x20] sm:$0xff] %v1849_v11  ;;  %v2378_v55 = vld [vmem:[#allocation2 + $0x15] sm:$0xff] }
 0x29b   :  { %v4874_v42 = vpack.c.bf16 %v2378_v55, %v2377_v45 }
 0x29c   :  { %v1234_v43 = vpop.f32.mrf.mxu3  ;;  %v4893_v18 = vpop.permute.xlu0 %1496 }
 0x29d   :  { %v4856_v3 = vadd.f32 %v1234_v43, %v1055_v32  ;;  %v1794_v52 = vpop.f32.mrf.mxu1  ;;  %v712_v32 = vadd.f32 %v4626_v6, %v5910_v51  ;;  %v4891_v43 = vpop.permute.xlu2 %1488 }
 0x29e   :  { %v1795_v34 = vadd.f32 %v4792_v46, %v1794_v52 }
 0x29f   :  { %1400 = vrot.lane.b32.xlu0 %v4856_v3, %s4121_s26  ;;  %v1061_v47 = vadd.f32 %v4644_v1, %v712_v32 }
 0x2a0   :  { %v1850_v14 = vmax.f32 %v1795_v34, 0.0  ;;  %3576 = vmatmul.msk.f32.gmra.mxu1 %vm111_vm1, %v3553_v62  ;;  %v3677_v34 = vld [vmem:[#allocation7 + $0x48] sm:$0xf0] }
 0x2a1   :  { %v1938_v9 = vld [vmem:[#allocation2 + $0x19] sm:$0xff]  ;;  %v3680_v17 = vor.u32 %v3925_v5, %v3677_v34 }
 0x2a2   :  { %1872 = vst [vmem:[#allocation2 + $0x28] sm:$0xff] %v1850_v14  ;;  %v1956_v29 = vpack.c.bf16 %v1938_v9, %v1937_v27  ;;  %v4867_v15 = vpack.c.bf16 %v1850_v14, %v1849_v11 }
 0x2a3   :  { %2321 = vmatpush.bf16.msrb.mxu2 %v3680_v17 }
 0x2a4   :  { %v1236_v24 = vpop.f32.mrf.mxu3  ;;  %2074 = vmatmul.bf16.gmra.mxu2 %v1956_v29  ;;  %2133 = vmatmul.bf16.gmra.mxu3 %v1956_v29  ;;  %v2379_v29 = vld [vmem:[#allocation2 + $0x1d] sm:$0xff] }
 0x2a5   :  { %v4870_v19 = vadd.f32 %v1236_v24, %v1057_v36  ;;  %v1797_v10 = vpop.f32.mrf.mxu1  ;;  %2277 = vmatmul.bf16.gmra.mxu0 %v4867_v15  ;;  %v5912_v24 = vld [vmem:[#allocation15_spill] sm:$0xff]  ;;  %v4909_v45 = vpop.permute.xlu2 %1494 }
 0x2a6   :  { %v1798_v35 = vadd.f32 %v4792_v46, %v1797_v10  ;;  %v715_v10 = vadd.f32 %v4642_v12, %v5912_v24  ;;  %v5913_v12 = vld [vmem:[#allocation16_spill] sm:$0xff] }
 0x2a7   :  { %1402 = vrot.lane.b32.xlu1 %v4870_v19, %s4121_s26 }
 0x2a8   :  { %v1851_v13 = vmax.f32 %v1798_v35, 0.0  ;;  %2570 = vmatmul.bf16.vlgmr.msra.gmra.mxu1 %v4874_v42  ;;  %v4911_v35 = vpop.permute.xlu0 %1502 }
 0x2a9   :  { %v1939_v52 = vld [vmem:[#allocation2 + $0x21] sm:$0xff] }
 0x2aa   :  { %1873 = vst [vmem:[#allocation2 + $0x30] sm:$0xff] %v1851_v13  ;;  %v2380_v14 = vld [vmem:[#allocation2 + $0x25] sm:$0xff] }
 0x2ab   :  { %v4902_v55 = vpack.c.bf16 %v2380_v14, %v2379_v29 }
 0x2ac   :  { %v1239_v63 = vpop.f32.mrf.mxu3 }
 0x2ad   :  { %v4884_v48 = vadd.f32 %v1239_v63, %v1059_v31  ;;  %v1800_v4 = vpop.f32.mrf.mxu1  ;;  %v4923_v51 = vpop.permute.xlu2 %1500 }
 0x2ae   :  { %v1801_v40 = vadd.f32 %v4792_v46, %v1800_v4  ;;  %v4919_v4 = vpop.permute.xlu1 %1492 }
 0x2af   :  { %1404 = vrot.lane.b32.xlu2 %v4884_v48, %s4121_s26 }
 0x2b0   :  { %v1852_v11 = vmax.f32 %v1801_v40, 0.0  ;;  %v4925_v32 = vpop.permute.xlu0 %1508 }
 0x2b1   :  { %v1940_v62 = vld [vmem:[#allocation2 + $0x29] sm:$0xff] }
 0x2b2   :  { %1874 = vst [vmem:[#allocation2 + $0x38] sm:$0xff] %v1852_v11  ;;  %v1957_v8 = vpack.c.bf16 %v1940_v62, %v1939_v52  ;;  %v4895_v26 = vpack.c.bf16 %v1852_v11, %v1851_v13  ;;  %v1063_v13 = vadd.f32 %v4657_v56, %v715_v10  ;;  %v717_v11 = vadd.f32 %v4654_v2, %v5913_v12  ;;  %v2381_v2 = vld [vmem:[#allocation2 + $0x2d] sm:$0xff] }
 0x2b4   :  { %5911 = vst [vmem:[#allocation13_spill] sm:$0xff] %v4895_v26  ;;  %v1241_v27 = vpop.f32.mrf.mxu3  ;;  %2079 = vmatmul.bf16.gmra.mxu2 %v1957_v8  ;;  %2138 = vmatmul.bf16.gmra.mxu3 %v1957_v8  ;;  %v1065_v5 = vadd.f32 %v4671_v23, %v717_v11 }
 0x2b5   :  { %v4898_v6 = vadd.f32 %v1241_v27, %v1061_v47  ;;  %v1803_v9 = vpop.f32.mrf.mxu1  ;;  %2282 = vmatmul.bf16.gmra.mxu0 %v4895_v26  ;;  %v4943_v24 = vpop.permute.xlu2 %1506 }
 0x2b6   :  { %v1804_v36 = vadd.f32 %v4792_v46, %v1803_v9  ;;  %v4938_v29 = vpop.permute.xlu1 %1498 }
 0x2b7   :  { %1406 = vrot.lane.b32.xlu0 %v4898_v6, %s4121_s26 }
 0x2b8   :  { %v1853_v1 = vmax.f32 %v1804_v36, 0.0  ;;  %2575 = vmatmul.bf16.gmra.mxu1 %v4902_v55  ;;  %v5915_v36 = vld [vmem:[#allocation17_spill] sm:$0xff]  ;;  %v4945_v10 = vpop.permute.xlu0 %1514 }
 0x2b9   :  { %v1941_v56 = vld [vmem:[#allocation2 + $0x31] sm:$0xff] }
 0x2ba   :  { %1875 = vst [vmem:[#allocation2 + $0x40] sm:$0xff] %v1853_v1  ;;  %v2382_v34 = vld [vmem:[#allocation2 + $0x35] sm:$0xff] }
 0x2bb   :  { %v4934_v9 = vpack.c.bf16 %v2382_v34, %v2381_v2 }
 0x2bc   :  { %v1244_v59 = vpop.f32.mrf.mxu3 }
 0x2bd   :  { %v4914_v16 = vadd.f32 %v1244_v59, %v1063_v13  ;;  %v1806_v31 = vpop.f32.mrf.mxu1 }
 0x2be   :  { %v1807_v63 = vadd.f32 %v4792_v46, %v1806_v31  ;;  %v3923_v31 = vld [vmem:[#allocation7 + $0x34] sm:$0xf] }
 0x2bf   :  { %1408 = vrot.lane.b32.xlu1 %v4914_v16, %s4121_s26 }
 0x2c0   :  { %v1854_v40 = vmax.f32 %v1807_v63, 0.0  ;;  %v3669_v63 = vld [vmem:[#allocation7 + $0x38] sm:$0xf0]  ;;  %v4959_v34 = vpop.permute.xlu0 %1520 }
 0x2c1   :  { %v1942_v52 = vld [vmem:[#allocation2 + $0x39] sm:$0xff]  ;;  %v3672_v11 = vor.u32 %v3923_v31, %v3669_v63 }
 0x2c2   :  { %1876 = vst [vmem:[#allocation2 + $0x48] sm:$0xff] %v1854_v40  ;;  %v1958_v62 = vpack.c.bf16 %v1942_v52, %v1941_v56  ;;  %v4927_v8 = vpack.c.bf16 %v1854_v40, %v1853_v1  ;;  %v720_v1 = vadd.f32 %v4668_v21, %v5915_v36  ;;  %v4953_v21 = vpop.permute.xlu1 %1504 }
 0x2c3   :  { %2322 = vmatpush.bf16.msrb.mxu2 %v3672_v11  ;;  %v5919_v11 = vld [vmem:[#allocation19_spill] sm:$0xff] }
 0x2c4   :  { %5914 = vst [vmem:[#allocation14_spill] sm:$0xff] %v4927_v8  ;;  %v1246_v47 = vpop.f32.mrf.mxu3  ;;  %2084 = vmatmul.bf16.gmra.mxu2 %v1958_v62  ;;  %2143 = vmatmul.bf16.gmra.mxu3 %v1958_v62  ;;  %v1067_v13 = vadd.f32 %v4684_v41, %v720_v1  ;;  %v5916_v62 = vld [vmem:[#allocation18_spill] sm:$0xff]  ;;  %v4957_v41 = vpop.permute.xlu2 %1512 }
 0x2c5   :  { %v4930_v14 = vadd.f32 %v1246_v47, %v1065_v5  ;;  %v1809_v17 = vpop.f32.mrf.mxu1  ;;  %2287 = vmatmul.bf16.gmra.mxu0 %v4927_v8  ;;  %v722_v5 = vadd.f32 %v4681_v39, %v5916_v62  ;;  %v2383_v39 = vld [vmem:[#allocation2 + $0x3d] sm:$0xff] }
 0x2c6   :  { %v1810_v27 = vadd.f32 %v4792_v46, %v1809_v17 }
 0x2c7   :  { %1410 = vrot.lane.b32.xlu2 %v4930_v14, %s4121_s26  ;;  %v1069_v36 = vadd.f32 %v4698_v28, %v722_v5 }
 0x2c8   :  { %v1855_v23 = vmax.f32 %v1810_v27, 0.0  ;;  %2580 = vmatmul.bf16.gmra.mxu1 %v4934_v9 }
 0x2c9   :  { %v1943_v47 = vld [vmem:[#allocation2 + $0x41] sm:$0xff] }
 0x2ca   :  { %1877 = vst [vmem:[#allocation2 + $0x50] sm:$0xff] %v1855_v23  ;;  %v2384_v1 = vld [vmem:[#allocation2 + $0x45] sm:$0xff] }
 0x2cc   :  { %v1249_v59 = vpop.f32.mrf.mxu3 }
 0x2cd   :  { %v4948_v40 = vadd.f32 %v1249_v59, %v1067_v13  ;;  %v1812_v12 = vpop.f32.mrf.mxu1 }
 0x2ce   :  { %v1813_v56 = vadd.f32 %v4792_v46, %v1812_v12  ;;  %v4968_v12 = vpack.c.bf16 %v2384_v1, %v2383_v39  ;;  %v3964_v1 = vld [vmem:[#allocation7 + $0x174] sm:$0xf0] }
 0x2cf   :  { %1412 = vrot.lane.b32.xlu0 %v4948_v40, %s4121_s26 }
 0x2d0   :  { %v1856_v52 = vmax.f32 %v1813_v56, 0.0  ;;  %5918 = vst [vmem:[#allocation16_spill] sm:$0xff] %v4968_v12  ;;  %v725_v56 = vadd.f32 %v4695_v54, %v5919_v11 }
 0x2d1   :  { %v1944_v17 = vld [vmem:[#allocation2 + $0x49] sm:$0xff] }
 0x2d2   :  { %1878 = vst [vmem:[#allocation2 + $0x58] sm:$0xff] %v1856_v52  ;;  %v1959_v2 = vpack.c.bf16 %v1944_v17, %v1943_v47  ;;  %v4961_v27 = vpack.c.bf16 %v1856_v52, %v1855_v23  ;;  %v4972_v23 = vpop.permute.xlu1 %1510  ;;  %v4977_v52 = vpop.permute.xlu2 %1518  ;;  %v1071_v5 = vadd.f32 %v4711_v60, %v725_v56  ;;  %v5921_v60 = vld [vmem:[#allocation20_spill] sm:$0xff] }
 0x2d3   :  { %v4979_v62 = vpop.permute.xlu0 %1526  ;;  %v727_v56 = vadd.f32 %v4708_v33, %v5921_v60 }
 0x2d4   :  { %5917 = vst [vmem:[#allocation15_spill] sm:$0xff] %v4961_v27  ;;  %v1251_v13 = vpop.f32.mrf.mxu3  ;;  %2089 = vmatmul.bf16.gmra.mxu2 %v1959_v2  ;;  %2148 = vmatmul.bf16.gmra.mxu3 %v1959_v2 }
 0x2d5   :  { %v4964_v59 = vadd.f32 %v1251_v13, %v1069_v36  ;;  %v1815_v31 = vpop.f32.mrf.mxu1  ;;  %2292 = vmatmul.bf16.gmra.mxu0 %v4961_v27  ;;  %5920 = vst [vmem:[#allocation17_spill] sm:$0xff] %v4979_v62  ;;  %v3763_v36 = vld [vmem:[#allocation7 + $0x170] sm:$0xf]  ;;  %v3921_v13 = vld [vmem:[#allocation7 + $0x24] sm:$0xf] }
 0x2d6   :  { %v1816_v63 = vadd.f32 %v4792_v46, %v1815_v31  ;;  %v3764_v39 = vor.u32 %v3964_v1, %v3763_v36  ;;  %v4995_v1 = vld [vmem:[#allocation8] ss:$0 sm:$0xff] }
 0x2d7   :  { %1414 = vrot.lane.b32.xlu1 %v4964_v59, %s4121_s26 }
 0x2d8   :  { %v1857_v28 = vmax.f32 %v1816_v63, 0.0  ;;  %2585 = vmatmul.bf16.gmra.mxu1 %v4968_v12  ;;  %v3661_v63 = vld [vmem:[#allocation7 + $0x28] sm:$0xf0]  ;;  %2503 = vmatpush.bf16.msra.mxu3 %v3764_v39  ;;  %v1073_v39 = vadd.f32 %v4726_v7, %v727_v56 }
 0x2d9   :  { %v3664_v54 = vor.u32 %v3921_v13, %v3661_v63  ;;  %v1945_v25 = vld [vmem:[#allocation2 + $0x51] sm:$0xff] }
 0x2da   :  { %1879 = vst [vmem:[#allocation2 + $0x60] sm:$0xff] %v1857_v28  ;;  %v4987_v11 = vpop.permute.xlu1 %1516  ;;  %v2386_v33 = vld [vmem:[#allocation2 + $0x55] sm:$0xff] }
 0x2db   :  { %2323 = vmatpush.bf16.msrb.mxu2 %v3664_v54  ;;  %v3980_v54 = vld [vmem:[#allocation7 + $0x1f4] sm:$0xf0] }
 0x2dc   :  { %v1254_v47 = vpop.f32.mrf.mxu3 }
 0x2dd   :  { %v4982_v17 = vadd.f32 %v1254_v47, %v1071_v5  ;;  %v1818_v2 = vpop.f32.mrf.mxu1  ;;  %v4991_v5 = vpop.permute.xlu2 %1524 }
 0x2de   :  { %v1819_v31 = vadd.f32 %v4792_v46, %v1818_v2  ;;  %5922 = vst [vmem:[#allocation18_spill] sm:$0xff] %v4991_v5  ;;  %v5923_v2 = vld [vmem:[#allocation23_spill] sm:$0xff] }
 0x2df   :  { %1416 = vrot.lane.b32.xlu2 %v4982_v17, %s4121_s26  ;;  %v1548_v36 = vmax.f32 %v5923_v2, %v4891_v43  ;;  %v3827_v5 = vld [vmem:[#allocation7 + $0x1f0] sm:$0xf] }
 0x2e0   :  { %v1858_v27 = vmax.f32 %v1819_v31, 0.0  ;;  %v2385_v2 = vld [vmem:[#allocation2 + $0x4d] sm:$0xff]  ;;  %v3828_v26 = vor.u32 %v3980_v54, %v3827_v5  ;;  %v5925_v5 = vld [vmem:[#allocation21_spill] sm:$0xff] }
 0x2e1   :  { %v1389_v47 = vpop.permute.xlu0 %1388  ;;  %v1946_v62 = vld [vmem:[#allocation2 + $0x59] sm:$0xff] }
 0x2e2   :  { %1880 = vst [vmem:[#allocation2 + $0x68] sm:$0xff] %v1858_v27  ;;  %v1448_v13 = vmax.f32 %v4774_v44, %v1389_v47  ;;  %v1960_v63 = vpack.c.bf16 %v1946_v62, %v1945_v25  ;;  %v4998_v31 = vpack.c.bf16 %v1858_v27, %v1857_v28  ;;  %v5006_v27 = vpack.c.bf16 %v2386_v33, %v2385_v2  ;;  %v5010_v7 = vpop.permute.xlu1 %1522  ;;  %v5924_v62 = vld [vmem:[#allocation24_spill] sm:$0xff]  ;;  %v3962_v2 = vld [vmem:[#allocation7 + $0x164] sm:$0xf0] }
 0x2e3   :  { %2787 = vmatpush.bf16.msra.mxu0 %v3828_v26  ;;  %v1549_v56 = vmax.f32 %v5924_v62, %v4881_v38  ;;  %v5926_v47 = vld [vmem:[#allocation40_spill] sm:$0xff] }
 0x2e4   :  { %v1568_v60 = vmax.f32 %v1448_v13, %v1548_v36  ;;  %v1256_v8 = vpop.f32.mrf.mxu3  ;;  %2094 = vmatmul.bf16.gmra.mxu2 %v1960_v63  ;;  %2153 = vmatmul.bf16.gmra.mxu3 %v1960_v63  ;;  %v730_v36 = vadd.f32 %v5926_v47, %v5925_v5 }
 0x2e5   :  { %v5001_v12 = vadd.f32 %v1256_v8, %v1073_v39  ;;  %v1821_v43 = vpop.f32.mrf.mxu1  ;;  %2297 = vmatmul.bf16.gmra.mxu0 %v4998_v31  ;;  %v5927_v39 = vld [vmem:[#allocation27_spill] sm:$0xff] }
 0x2e6   :  { %v1591_v25 = vadd.f32 %v4995_v1, %v1568_v60  ;;  %v1822_v44 = vadd.f32 %v4792_v46, %v1821_v43  ;;  %v1552_v33 = vmax.f32 %v5927_v39, %v4893_v18  ;;  %v3755_v43 = vld [vmem:[#allocation7 + $0x160] sm:$0xf]  ;;  %v5929_v39 = vld [vmem:[#allocation22_spill] sm:$0xff] }
 0x2e7   :  { %1418 = vrot.lane.b32.xlu0 %v5001_v12, %s4121_s26  ;;  %v3756_v38 = vor.u32 %v3962_v2, %v3755_v43 }
 0x2e8   :  { %v1611_v28 = vmax.f32 %v1591_v25, 0.0  ;;  %v1859_v8 = vmax.f32 %v1822_v44, 0.0  ;;  %2590 = vmatmul.bf16.gmra.mxu1 %v5006_v27  ;;  %v1075_v25 = vadd.f32 %v4739_v58, %v730_v36 }
 0x2e9   :  { %v1397_v13 = vpop.permute.xlu2 %1396  ;;  %v1391_v63 = vpop.permute.xlu0 %1390  ;;  %2504 = vmatpush.bf16.msra.mxu3 %v3756_v38  ;;  %v3978_v38 = vld [vmem:[#allocation7 + $0x1e4] sm:$0xf0] }
 0x2ea   :  { %v1631_v60 = vpack.c.bf16 %v1611_v28, %v1611_v28  ;;  %1881 = vst [vmem:[#allocation2 + $0x70] sm:$0xff] %v1859_v8  ;;  %v1452_v26 = vmax.f32 %v4829_v57, %v1397_v13  ;;  %v1449_v54 = vmax.f32 %v4787_v50, %v1391_v63  ;;  %v5928_v63 = vld [vmem:[#allocation25_spill] sm:$0xff] }
 0x2ec   :  { %1652 = vst.msk [vmem:[%s5840_s5] sm:$0xf] %vm1651_vm2, %v1631_v60  ;;  %v1572_v44 = vmax.f32 %v1452_v26, %v1552_v33  ;;  %v1569_v62 = vmax.f32 %v1449_v54, %v1549_v56  ;;  %v1259_v5 = vpop.f32.mrf.mxu3  ;;  %v1550_v56 = vmax.f32 %v5928_v63, %v4919_v4  ;;  %v732_v33 = vadd.f32 %v4736_v30, %v5929_v39  ;;  %v5930_v60 = vld [vmem:[#allocation28_spill] sm:$0xff]  ;;  %v5931_v4 = vld [vmem:[#allocation43_spill] sm:$0xff]  ;;  %v2387_v30 = vld [vmem:[#allocation2 + $0x5d] sm:$0xff] }
 0x2ed   :  { %v5026_v18 = vadd.f32 %v1259_v5, %v1075_v25  ;;  %v1824_v28 = vpop.f32.mrf.mxu1  ;;  %v1553_v26 = vmax.f32 %v5930_v60, %v4938_v29  ;;  %v3819_v25 = vld [vmem:[#allocation7 + $0x1e0] sm:$0xf]  ;;  %v2388_v63 = vld [vmem:[#allocation2 + $0x65] sm:$0xff]  ;;  %v3919_v60 = vld [vmem:[#allocation7 + $0x14] sm:$0xf] }
 0x2ee   :  { %v1595_v57 = vadd.f32 %v4995_v1, %v1572_v44  ;;  %v1592_v50 = vadd.f32 %v4995_v1, %v1569_v62  ;;  %v1825_v47 = vadd.f32 %v4792_v46, %v1824_v28 }
 0x2ef   :  { %1420 = vrot.lane.b32.xlu1 %v5026_v18, %s4121_s26 }
 0x2f0   :  { %v1615_v58 = vmax.f32 %v1595_v57, 0.0  ;;  %v1612_v36 = vmax.f32 %v1592_v50, 0.0  ;;  %v1860_v13 = vmax.f32 %v1825_v47, 0.0  ;;  %v1947_v57 = vld [vmem:[#allocation2 + $0x61] sm:$0xff]  ;;  %v1077_v50 = vadd.f32 %v5931_v4, %v732_v33  ;;  %v3811_v33 = vld [vmem:[#allocation7 + $0x1d0] sm:$0xf] }
 0x2f1   :  { %v1399_v54 = vpop.permute.xlu2 %1398  ;;  %v1393_v43 = vpop.permute.xlu1 %1392  ;;  %v1948_v2 = vld [vmem:[#allocation2 + $0x69] sm:$0xff]  ;;  %v3974_v4 = vld [vmem:[#allocation7 + $0x1c4] sm:$0xf0] }
 0x2f2   :  { %v1635_v44 = vpack.c.bf16 %v1615_v58, %v1615_v58  ;;  %v1632_v62 = vpack.c.bf16 %v1612_v36, %v1612_v36  ;;  %1882 = vst [vmem:[#allocation2 + $0x78] sm:$0xff] %v1860_v13  ;;  %v1453_v5 = vmax.f32 %v4843_v0, %v1399_v54  ;;  %v1450_v28 = vmax.f32 %v4802_v22, %v1393_v43  ;;  %v3653_v0 = vld [vmem:[#allocation7 + $0x18] sm:$0xf0]  ;;  %v3976_v43 = vld [vmem:[#allocation7 + $0x1d4] sm:$0xf0] }
 0x2f3   :  { %v1961_v47 = vpack.c.bf16 %v1948_v2, %v1947_v57  ;;  %v5042_v39 = vpack.c.bf16 %v1860_v13, %v1859_v8  ;;  %v3820_v54 = vor.u32 %v3978_v38, %v3819_v25  ;;  %v3656_v13 = vor.u32 %v3919_v60, %v3653_v0  ;;  %v3803_v57 = vld [vmem:[#allocation7 + $0x1c0] sm:$0xf]  ;;  %v3747_v0 = vld [vmem:[#allocation7 + $0x150] sm:$0xf] }
 0x2f4   :  { %1656 = vst.msk [vmem:[%s5840_s5 + $0x10] sm:$0xf] %vm1651_vm2, %v1635_v44  ;;  %v1573_v29 = vmax.f32 %v1453_v5, %v1553_v26  ;;  %v1570_v58 = vmax.f32 %v1450_v28, %v1550_v56  ;;  %v1261_v36 = vpop.f32.mrf.mxu3  ;;  %v5057_v25 = vpack.c.bf16 %v2388_v63, %v2387_v30  ;;  %v3812_v5 = vor.u32 %v3976_v43, %v3811_v33  ;;  %v3972_v33 = vld [vmem:[#allocation7 + $0x1b4] sm:$0xf0] }
 0x2f5   :  { %1653 = vst.msk [vmem:[%s5840_s5 + $0x4] sm:$0xf] %vm1651_vm2, %v1632_v62  ;;  %v5052_v22 = vadd.f32 %v1261_v36, %v1077_v50  ;;  %2099 = vmatmul.bf16.gmra.mxu2 %v1961_v47  ;;  %2158 = vmatmul.bf16.gmra.mxu3 %v1961_v47  ;;  %v1827_v8 = vpop.f32.mrf.mxu1  ;;  %v5932_v50 = vld [vmem:[#allocation26_spill] sm:$0xff]  ;;  %v3804_v60 = vor.u32 %v3974_v4, %v3803_v57 }
 0x2f6   :  { %v1596_v26 = vadd.f32 %v4995_v1, %v1573_v29  ;;  %v1593_v56 = vadd.f32 %v4995_v1, %v1570_v58  ;;  %v1828_v2 = vadd.f32 %v4792_v46, %v1827_v8  ;;  %2302 = vmatmul.bf16.gmra.mxu0 %v5042_v39  ;;  %2324 = vmatpush.bf16.msrb.mxu2 %v3656_v13  ;;  %v3795_v13 = vld [vmem:[#allocation7 + $0x1b0] sm:$0xf] }
 0x2f7   :  { %1422 = vrot.lane.b32.xlu2 %v5052_v22, %s4121_s26  ;;  %2788 = vmatpush.bf16.msra.mxu0 %v3820_v54  ;;  %v1551_v47 = vmax.f32 %v5932_v50, %v4909_v45  ;;  %v3960_v54 = vld [vmem:[#allocation7 + $0x154] sm:$0xf0]  ;;  %v3787_v50 = vld [vmem:[#allocation7 + $0x1a0] sm:$0xf] }
 0x2f8   :  { %v1616_v38 = vmax.f32 %v1596_v26, 0.0  ;;  %v1613_v44 = vmax.f32 %v1593_v56, 0.0  ;;  %v1861_v62 = vmax.f32 %v1828_v2, 0.0  ;;  %2595 = vmatmul.bf16.gmra.mxu1 %v5057_v25  ;;  %v3748_v8 = vor.u32 %v3960_v54, %v3747_v0  ;;  %v3917_v0 = vld [vmem:[#allocation7 + $0x4] sm:$0xf] }
 0x2f9   :  { %v1395_v28 = vpop.permute.xlu1 %1394  ;;  %v3645_v54 = vld [vmem:[#allocation7 + $0x8] sm:$0xf0] }
 0x2fa   :  { %v1636_v30 = vpack.c.bf16 %v1616_v38, %v1616_v38  ;;  %v1633_v63 = vpack.c.bf16 %v1613_v44, %v1613_v44  ;;  %1883 = vst [vmem:[#allocation2 + $0x80] sm:$0xff] %v1861_v62  ;;  %v1451_v29 = vmax.f32 %v4817_v53, %v1395_v28  ;;  %2505 = vmatpush.bf16.msra.mxu3 %v3748_v8  ;;  %v3739_v44 = vld [vmem:[#allocation7 + $0x140] sm:$0xf] }
 0x2fb   :  { %2789 = vmatpush.bf16.msra.mxu0 %v3812_v5  ;;  %v3796_v38 = vor.u32 %v3972_v33, %v3795_v13  ;;  %v3958_v5 = vld [vmem:[#allocation7 + $0x144] sm:$0xf0]  ;;  %v3648_v13 = vor.u32 %v3917_v0, %v3645_v54  ;;  %v3731_v33 = vld [vmem:[#allocation7 + $0x130] sm:$0xf] }
 0x2fc   :  { %1657 = vst.msk [vmem:[%s5840_s5 + $0x14] sm:$0xf] %vm1651_vm2, %v1636_v30  ;;  %v1571_v58 = vmax.f32 %v1451_v29, %v1551_v47  ;;  %v1264_v36 = vpop.f32.mrf.mxu3  ;;  %v3740_v4 = vor.u32 %v3958_v5, %v3739_v44  ;;  %v3970_v29 = vld [vmem:[#allocation7 + $0x1a4] sm:$0xf0]  ;;  %v3968_v44 = vld [vmem:[#allocation7 + $0x194] sm:$0xf0] }
 0x2fd   :  { %1654 = vst.msk [vmem:[%s5840_s5 + $0x8] sm:$0xf] %vm1651_vm2, %v1633_v63  ;;  %v5075_v45 = vadd.f32 %v1264_v36, %v4766_v49  ;;  %v1830_v53 = vpop.f32.mrf.mxu1  ;;  %v1949_v49 = vld [vmem:[#allocation2 + $0x71] sm:$0xff]  ;;  %2325 = vmatpush.bf16.msrb.mxu2 %v3648_v13 }
 0x2fe   :  { %v1594_v43 = vadd.f32 %v4995_v1, %v1571_v58  ;;  %v1831_v26 = vadd.f32 %v4792_v46, %v1830_v53  ;;  %v2389_v58 = vld [vmem:[#allocation2 + $0x6d] sm:$0xff]  ;;  %v2390_v36 = vld [vmem:[#allocation2 + $0x75] sm:$0xff]  ;;  %2506 = vmatpush.bf16.msra.mxu3 %v3740_v4  ;;  %v3788_v53 = vor.u32 %v3970_v29, %v3787_v50 }
 0x2ff   :  { %1424 = vrot.lane.b32.xlu0 %v5075_v45, %s4121_s26  ;;  %2790 = vmatpush.bf16.msra.mxu0 %v3804_v60  ;;  %v5933_v29 = vld [vmem:[#allocation31_spill] sm:$0xff] }
 0x300   :  { %v1614_v56 = vmax.f32 %v1594_v43, 0.0  ;;  %v1862_v2 = vmax.f32 %v1831_v26, 0.0  ;;  %v3956_v43 = vld [vmem:[#allocation7 + $0x134] sm:$0xf0]  ;;  %v3779_v26 = vld [vmem:[#allocation7 + $0x190] sm:$0xf] }
 0x301   :  { %v1950_v28 = vld [vmem:[#allocation2 + $0x79] sm:$0xff]  ;;  %v5081_v57 = vpop.f32.mrf.mxu0  ;;  %v3780_v5 = vor.u32 %v3968_v44, %v3779_v26 }
 0x302   :  { %v1634_v47 = vpack.c.bf16 %v1614_v56, %v1614_v56  ;;  %1884 = vst [vmem:[#allocation2 + $0x88] sm:$0xff] %v1862_v2  ;;  %v1962_v30 = vpack.c.bf16 %v1950_v28, %v1949_v49  ;;  %v5083_v63 = vpack.c.bf16 %v1862_v2, %v1861_v62  ;;  %v5095_v2 = vpack.c.bf16 %v2390_v36, %v2389_v58  ;;  %v3723_v49 = vld [vmem:[#allocation7 + $0x120] sm:$0xf]  ;;  %v3954_v28 = vld [vmem:[#allocation7 + $0x124] sm:$0xf0] }
 0x303   :  { %2791 = vmatpush.bf16.msra.mxu0 %v3796_v38  ;;  %v3732_v38 = vor.u32 %v3956_v43, %v3731_v33  ;;  %v1556_v58 = vmax.f32 %v5933_v29, %v4953_v21  ;;  %v3707_v44 = vld [vmem:[#allocation7 + $0x100] sm:$0xf] }
 0x304   :  { %1655 = vst.msk [vmem:[%s5840_s5 + $0xc] sm:$0xf] %vm1651_vm2, %v1634_v47  ;;  %v1266_v60 = vpop.f32.mrf.mxu3  ;;  %v3724_v47 = vor.u32 %v3954_v28, %v3723_v49  ;;  %v3950_v49 = vld [vmem:[#allocation7 + $0x104] sm:$0xf0] }
 0x305   :  { %v5090_v8 = vadd.f32 %v1266_v60, %v4779_v20  ;;  %2104 = vmatmul.bf16.gmra.mxu2 %v1962_v30  ;;  %2163 = vmatmul.bf16.gmra.mxu3 %v1962_v30  ;;  %v1833_v62 = vpop.f32.mrf.mxu1  ;;  %v3771_v30 = vld [vmem:[#allocation7 + $0x180] sm:$0xf]  ;;  %v3966_v60 = vld [vmem:[#allocation7 + $0x184] sm:$0xf0] }
 0x306   :  { %v5093_v56 = vadd.f32 %v4792_v46, %v1833_v62  ;;  %2307 = vmatmul.bf16.gmra.mxu0 %v5083_v63  ;;  %2507 = vmatpush.bf16.msra.mxu3 %v3732_v38  ;;  %v3772_v54 = vor.u32 %v3966_v60, %v3771_v30  ;;  %v3952_v62 = vld [vmem:[#allocation7 + $0x114] sm:$0xf0]  ;;  %v3708_v60 = vor.u32 %v3950_v49, %v3707_v44 }
 0x307   :  { %1426 = vrot.lane.b32.xlu1 %v5090_v8, %s4121_s26  ;;  %2792 = vmatpush.bf16.msra.mxu0 %v3788_v53  ;;  %v3715_v53 = vld [vmem:[#allocation7 + $0x110] sm:$0xf] }
 0x308   :  { %v1863_v20 = vmax.f32 %v5093_v56, 0.0  ;;  %2600 = vmatmul.bf16.gmra.mxu1 %v5095_v2  ;;  %v3716_v33 = vor.u32 %v3952_v62, %v3715_v53  ;;  %v2391_v53 = vld [vmem:[#allocation2 + $0x7d] sm:$0xff] }
 0x309   :  { %v1405_v4 = vpop.permute.xlu2 %1404  ;;  %v5102_v50 = vpop.f32.mrf.mxu0 }
 0x30a   :  { %1885 = vst [vmem:[#allocation2 + $0x90] sm:$0xff] %v1863_v20  ;;  %v1456_v36 = vmax.f32 %v4884_v48, %v1405_v4  ;;  %2508 = vmatpush.bf16.msra.mxu3 %v3724_v47  ;;  %v5934_v48 = vld [vmem:[#allocation29_spill] sm:$0xff] }
 0x30b   :  { %2793 = vmatpush.bf16.msra.mxu0 %v3780_v5  ;;  %v1554_v28 = vmax.f32 %v5934_v48, %v4923_v51  ;;  %v1951_v5 = vld [vmem:[#allocation2 + $0x81] sm:$0xff] }
 0x30c   :  { %v1576_v0 = vmax.f32 %v1456_v36, %v1556_v58  ;;  %v5935_v48 = vld [vmem:[#allocation30_spill] sm:$0xff] }
 0x30d   :  { %v1836_v13 = vpop.f32.mrf.mxu1 }
 0x30e   :  { %v1599_v43 = vadd.f32 %v4995_v1, %v1576_v0  ;;  %v1837_v26 = vadd.f32 %v4792_v46, %v1836_v13  ;;  %2509 = vmatpush.bf16.msra.mxu3 %v3716_v33  ;;  %v2392_v0 = vld [vmem:[#allocation2 + $0x85] sm:$0xff] }
 0x30f   :  { %2794 = vmatpush.bf16.msra.mxu0 %v3772_v54 }
 0x310   :  { %v1619_v38 = vmax.f32 %v1599_v43, 0.0  ;;  %v1864_v21 = vmax.f32 %v1837_v26, 0.0 }
 0x311   :  { %v1401_v4 = vpop.permute.xlu0 %1400  ;;  %v1952_v30 = vld [vmem:[#allocation2 + $0x89] sm:$0xff] }
 0x312   :  { %v1639_v29 = vpack.c.bf16 %v1619_v38, %v1619_v38  ;;  %1886 = vst [vmem:[#allocation2 + $0x98] sm:$0xff] %v1864_v21  ;;  %v1454_v47 = vmax.f32 %v4856_v3, %v1401_v4  ;;  %v1963_v58 = vpack.c.bf16 %v1952_v30, %v1951_v5  ;;  %v5114_v36 = vpop.f32.mrf.mxu0  ;;  %v5122_v3 = vpack.c.bf16 %v2392_v0, %v2391_v53 }
 0x313   :  { %2510 = vmatpush.bf16.msra.mxu3 %v3708_v60 }
 0x314   :  { %1660 = vst.msk [vmem:[%s5840_s5 + $0x20] sm:$0xf] %vm1651_vm2, %v1639_v29  ;;  %v1574_v54 = vmax.f32 %v1454_v47, %v1554_v28  ;;  %v1555_v28 = vmax.f32 %v5935_v48, %v4911_v35  ;;  %v3979_v47 = vld [vmem:[#allocation7 + $0x1f4] sm:$0xf] }
 0x315   :  { %2109 = vmatmul.bf16.gmra.mxu2 %v1963_v58  ;;  %2168 = vmatmul.bf16.gmra.mxu3 %v1963_v58  ;;  %v1839_v51 = vpop.f32.mrf.mxu1  ;;  %v3829_v58 = vld [vmem:[#allocation7 + $0x1f8] sm:$0xf0] }
 0x316   :  { %v1597_v62 = vadd.f32 %v4995_v1, %v1574_v54  ;;  %v1840_v13 = vadd.f32 %v4792_v46, %v1839_v51  ;;  %v3832_v60 = vor.u32 %v3979_v47, %v3829_v58 }
 0x317   :  { %v2070_v33 = vpop.f32.mrf.mxu2  ;;  %v5124_v43 = vpop.f32.mrf.mxu3 }
 0x318   :  { %v1617_v26 = vmax.f32 %v1597_v62, 0.0  ;;  %v1865_v38 = vmax.f32 %v1840_v13, 0.0  ;;  %v5127_v21 = vadd.f32 %v5081_v57, %v2070_v33  ;;  %2605 = vmatmul.bf16.gmra.mxu1 %v5122_v3  ;;  %2846 = vmatpush.bf16.msra.mxu2 %v3832_v60 }
 0x319   :  { %v1403_v44 = vpop.permute.xlu1 %1402  ;;  %v1908_v49 = vld [vmem:[#allocation2 + $0x98] sm:$0xf]  ;;  %3994 = vmatpush.bf16.msrb.mxu3 %v3832_v60 }
 0x31a   :  { %v1637_v4 = vpack.c.bf16 %v1617_v26, %v1617_v26  ;;  %1887 = vst [vmem:[#allocation2 + $0xa0] sm:$0xff] %v1865_v38  ;;  %v1455_v5 = vmax.f32 %v4870_v19, %v1403_v44  ;;  %v5135_v30 = vpack.c.bf16 %v1908_v49, %v1863_v20  ;;  %v2275_v29 = vpop.f32.mrf.mxu0  ;;  %v1953_v62 = vld [vmem:[#allocation2 + $0x91] sm:$0xff]  ;;  %v1954_v13 = vld [vmem:[#allocation2 + $0x99] sm:$0xf]  ;;  %v5936_v26 = vld [vmem:[#allocation34_spill] sm:$0xff] }
 0x31b   :  { %v1559_v38 = vmax.f32 %v5936_v26, %v4972_v23  ;;  %v1964_v48 = vpack.c.bf16 %v1954_v13, %v1953_v62  ;;  %v3821_v26 = vld [vmem:[#allocation7 + $0x1e8] sm:$0xf0] }
 0x31c   :  { %1658 = vst.msk [vmem:[%s5840_s5 + $0x18] sm:$0xf] %vm1651_vm2, %v1637_v4  ;;  %v1575_v57 = vmax.f32 %v1455_v5, %v1555_v28  ;;  %2312 = vmatmul.bf16.gmra.mxu0 %v5135_v30  ;;  %v2394_v28 = vld [vmem:[#allocation2 + $0x95] sm:$0xff]  ;;  %v2393_v4 = vld [vmem:[#allocation2 + $0x8d] sm:$0xff] }
 0x31d   :  { %v1842_v35 = vpop.f32.mrf.mxu1 }
 0x31e   :  { %v1598_v0 = vadd.f32 %v4995_v1, %v1575_v57  ;;  %v1843_v19 = vadd.f32 %v4792_v46, %v1842_v35  ;;  %v5157_v57 = vpack.c.bf16 %v2394_v28, %v2393_v4 }
 0x31f   :  { %v2072_v56 = vpop.f32.mrf.mxu2  ;;  %v5144_v20 = vpop.f32.mrf.mxu3 }
 0x320   :  { %v1618_v54 = vmax.f32 %v1598_v0, 0.0  ;;  %v1866_v51 = vmax.f32 %v1843_v19, 0.0  ;;  %v5147_v53 = vadd.f32 %v5102_v50, %v2072_v56  ;;  %v2661_v0 = vld [vmem:[#allocation2 + $0xe] sm:$0xff] }
 0x321   :  { %v1411_v33 = vpop.permute.xlu2 %1410  ;;  %v5937_v19 = vld [vmem:[#allocation32_spill] sm:$0xff] }
 0x322   :  { %v1638_v44 = vpack.c.bf16 %v1618_v54, %v1618_v54  ;;  %1888 = vst [vmem:[#allocation2 + $0xa8] sm:$0xff] %v1866_v51  ;;  %v1459_v46 = vmax.f32 %v4930_v14, %v1411_v33  ;;  %v2278_v49 = vpop.f32.mrf.mxu0  ;;  %v2662_v14 = vld [vmem:[#allocation2 + $0x16] sm:$0xff]  ;;  %v1557_v56 = vmax.f32 %v5937_v19, %v4943_v24  ;;  %v3977_v33 = vld [vmem:[#allocation7 + $0x1e4] sm:$0xf] }
 0x323   :  { %v5168_v62 = vpack.c.bf16 %v2662_v14, %v2661_v0 }
 0x324   :  { %1659 = vst.msk [vmem:[%s5840_s5 + $0x1c] sm:$0xf] %vm1651_vm2, %v1638_v44  ;;  %v1579_v50 = vmax.f32 %v1459_v46, %v1559_v38  ;;  %v3824_v38 = vor.u32 %v3977_v33, %v3821_v26  ;;  %v2663_v33 = vld [vmem:[#allocation2 + $0x1e] sm:$0xff] }
 0x325   :  { %2114 = vmatmul.bf16.gmra.mxu2 %v1964_v48  ;;  %2173 = vmatmul.bf16.gmra.mxu3 %v1964_v48 }
 0x326   :  { %v1602_v5 = vadd.f32 %v4995_v1, %v1579_v50  ;;  %2847 = vmatpush.bf16.msra.mxu2 %v3824_v38  ;;  %3995 = vmatpush.bf16.msrb.mxu3 %v3824_v38  ;;  %v5938_v50 = vld [vmem:[#allocation33_spill] sm:$0xff] }
 0x327   :  { %v2075_v23 = vpop.f32.mrf.mxu2  ;;  %v5159_v47 = vpop.f32.mrf.mxu3  ;;  %v1558_v4 = vmax.f32 %v5938_v50, %v4925_v32 }
 0x328   :  { %v1622_v58 = vmax.f32 %v1602_v5, 0.0  ;;  %v5162_v35 = vadd.f32 %v5114_v36, %v2075_v23  ;;  %2610 = vmatmul.bf16.gmra.mxu1 %v5157_v57 }
 0x329   :  { %v1407_v60 = vpop.permute.xlu0 %1406 }
 0x32a   :  { %v1642_v54 = vpack.c.bf16 %v1622_v58, %v1622_v58  ;;  %v1457_v51 = vmax.f32 %v4898_v6, %v1407_v60  ;;  %v2280_v13 = vpop.f32.mrf.mxu0  ;;  %v2396_v58 = vld [vmem:[#allocation2 + $0xa5] sm:$0xf] }
 0x32c   :  { %1663 = vst.msk [vmem:[%s5840_s5 + $0x2c] sm:$0xf] %vm1651_vm2, %v1642_v54  ;;  %v1577_v36 = vmax.f32 %v1457_v51, %v1557_v56  ;;  %2795 = vmatmul.bf16.vlgmr.msra.gmra.mxu0 %v5168_v62 }
 0x32e   :  { %v1600_v44 = vadd.f32 %v4995_v1, %v1577_v36 }
 0x32f   :  { %v2077_v24 = vpop.f32.mrf.mxu2  ;;  %v5176_v46 = vpop.f32.mrf.mxu3 }
 0x330   :  { %v1620_v6 = vmax.f32 %v1600_v44, 0.0  ;;  %v5178_v48 = vadd.f32 %v2275_v29, %v2077_v24  ;;  %v2395_v29 = vld [vmem:[#allocation2 + $0x9d] sm:$0xff] }
 0x331   :  { %v1409_v28 = vpop.permute.xlu1 %1408  ;;  %v5190_v19 = vpack.c.bf16 %v2396_v58, %v2395_v29 }
 0x332   :  { %v1640_v5 = vpack.c.bf16 %v1620_v6, %v1620_v6  ;;  %v1458_v23 = vmax.f32 %v4914_v16, %v1409_v28  ;;  %v2283_v14 = vpop.f32.mrf.mxu0  ;;  %v2664_v16 = vld [vmem:[#allocation2 + $0x26] sm:$0xff] }
 0x333   :  { %v5200_v44 = vpack.c.bf16 %v2664_v16, %v2663_v33  ;;  %v3813_v16 = vld [vmem:[#allocation7 + $0x1d8] sm:$0xf0] }
 0x334   :  { %1661 = vst.msk [vmem:[%s5840_s5 + $0x24] sm:$0xf] %vm1651_vm2, %v1640_v5  ;;  %v1578_v60 = vmax.f32 %v1458_v23, %v1558_v4  ;;  %v5940_v5 = vld [vmem:[#allocation35_spill] sm:$0xff] }
 0x335   :  { %2326 = vmatmul.bf16.vlgmr.msrb.gmra.mxu2 %v4813_v37  ;;  %2511 = vmatmul.bf16.vlgmr.msra.gmra.mxu3 %v4874_v42  ;;  %v5939_v37 = vld [vmem:[#allocation37_spill] sm:$0xff]  ;;  %v1560_v23 = vmax.f32 %v5940_v5, %v4957_v41 }
 0x336   :  { %v1601_v0 = vadd.f32 %v4995_v1, %v1578_v60  ;;  %v1562_v26 = vmax.f32 %v5939_v37, %v4987_v11 }
 0x337   :  { %v2080_v32 = vpop.f32.mrf.mxu2  ;;  %v5192_v56 = vpop.f32.mrf.mxu3 }
 0x338   :  { %v1621_v54 = vmax.f32 %v1601_v0, 0.0  ;;  %v5194_v51 = vadd.f32 %v2278_v49, %v2080_v32  ;;  %2615 = vmatmul.bf16.gmra.mxu1 %v5190_v19  ;;  %v3975_v32 = vld [vmem:[#allocation7 + $0x1d4] sm:$0xf] }
 0x339   :  { %v1417_v36 = vpop.permute.xlu2 %1416 }
 0x33a   :  { %v1641_v42 = vpack.c.bf16 %v1621_v54, %v1621_v54  ;;  %v1462_v38 = vmax.f32 %v4982_v17, %v1417_v36  ;;  %v2285_v24 = vpop.f32.mrf.mxu0 }
 0x33c   :  { %1662 = vst.msk [vmem:[%s5840_s5 + $0x28] sm:$0xf] %vm1651_vm2, %v1641_v42  ;;  %v1582_v49 = vmax.f32 %v1462_v38, %v1562_v26  ;;  %2800 = vmatmul.bf16.gmra.mxu0 %v5200_v44  ;;  %v2665_v42 = vld [vmem:[#allocation2 + $0x2e] sm:$0xff] }
 0x33d   :  { %v5941_v38 = vld [vmem:[#allocation36_spill] sm:$0xff] }
 0x33e   :  { %v1605_v6 = vadd.f32 %v4995_v1, %v1582_v49  ;;  %v1561_v49 = vmax.f32 %v5941_v38, %v4945_v10 }
 0x33f   :  { %v2082_v28 = vpop.f32.mrf.mxu2  ;;  %v5208_v50 = vpop.f32.mrf.mxu3 }
 0x340   :  { %v1625_v11 = vmax.f32 %v1605_v6, 0.0  ;;  %v5210_v4 = vadd.f32 %v2280_v13, %v2082_v28  ;;  %v3816_v13 = vor.u32 %v3975_v32, %v3813_v16  ;;  %v5942_v32 = vld [vmem:[#allocation41_spill] sm:$0xff] }
 0x341   :  { %v1413_v17 = vpop.permute.xlu0 %1412  ;;  %v1565_v16 = vmax.f32 %v5942_v32, %v5010_v7 }
 0x342   :  { %v1645_v58 = vpack.c.bf16 %v1625_v11, %v1625_v11  ;;  %v1460_v60 = vmax.f32 %v4948_v40, %v1413_v17  ;;  %v2288_v29 = vpop.f32.mrf.mxu0  ;;  %v2666_v40 = vld [vmem:[#allocation2 + $0x36] sm:$0xff]  ;;  %2848 = vmatpush.bf16.msra.mxu2 %v3816_v13  ;;  %3996 = vmatpush.bf16.msrb.mxu3 %v3816_v13 }
 0x343   :  { %v5229_v6 = vpack.c.bf16 %v2666_v40, %v2665_v42 }
 0x344   :  { %1666 = vst.msk [vmem:[%s5840_s5 + $0x38] sm:$0xf] %vm1651_vm2, %v1645_v58  ;;  %v1580_v0 = vmax.f32 %v1460_v60, %v1560_v23  ;;  %v3805_v58 = vld [vmem:[#allocation7 + $0x1c8] sm:$0xf0] }
 0x345   :  { %2331 = vmatmul.bf16.gmra.mxu2 %v4840_v61  ;;  %2516 = vmatmul.bf16.gmra.mxu3 %v4902_v55 }
 0x346   :  { %v1603_v54 = vadd.f32 %v4995_v1, %v1580_v0 }
 0x347   :  { %v2085_v41 = vpop.f32.mrf.mxu2  ;;  %v5222_v36 = vpop.f32.mrf.mxu3 }
 0x348   :  { %v1623_v33 = vmax.f32 %v1603_v54, 0.0  ;;  %v5224_v37 = vadd.f32 %v2283_v14, %v2085_v41 }
 0x349   :  { %v1415_v26 = vpop.permute.xlu1 %1414 }
 0x34a   :  { %v1643_v61 = vpack.c.bf16 %v1623_v33, %v1623_v33  ;;  %v1461_v55 = vmax.f32 %v4964_v59, %v1415_v26  ;;  %v2290_v28 = vpop.f32.mrf.mxu0  ;;  %v3973_v59 = vld [vmem:[#allocation7 + $0x1c4] sm:$0xf]  ;;  %v2668_v26 = vld [vmem:[#allocation2 + $0x46] sm:$0xff] }
 0x34b   :  { %v3808_v0 = vor.u32 %v3973_v59, %v3805_v58 }
 0x34c   :  { %1664 = vst.msk [vmem:[%s5840_s5 + $0x30] sm:$0xf] %vm1651_vm2, %v1643_v61  ;;  %v1581_v11 = vmax.f32 %v1461_v55, %v1561_v49  ;;  %2805 = vmatmul.bf16.gmra.mxu0 %v5229_v6  ;;  %v2667_v49 = vld [vmem:[#allocation2 + $0x3e] sm:$0xff] }
 0x34d   :  { %2849 = vmatpush.bf16.msra.mxu2 %v3808_v0  ;;  %3997 = vmatpush.bf16.msrb.mxu3 %v3808_v0  ;;  %v5943_v61 = vld [vmem:[#allocation38_spill] sm:$0xff] }
 0x34e   :  { %v1604_v14 = vadd.f32 %v4995_v1, %v1581_v11  ;;  %v1563_v55 = vmax.f32 %v5943_v61, %v4977_v52 }
 0x34f   :  { %v2087_v17 = vpop.f32.mrf.mxu2  ;;  %v5237_v5 = vpop.f32.mrf.mxu3 }
 0x350   :  { %v1624_v10 = vmax.f32 %v1604_v14, 0.0  ;;  %v5239_v23 = vadd.f32 %v2285_v24, %v2087_v17 }
 0x351   :  { %v1423_v60 = vpop.permute.xlu2 %1422 }
 0x352   :  { %v1644_v13 = vpack.c.bf16 %v1624_v10, %v1624_v10  ;;  %v1465_v54 = vmax.f32 %v5052_v22, %v1423_v60  ;;  %v2293_v41 = vpop.f32.mrf.mxu0  ;;  %v5944_v60 = vld [vmem:[#allocation39_spill] sm:$0xff] }
 0x353   :  { %v1564_v0 = vmax.f32 %v5944_v60, %v4959_v34  ;;  %v5948_v60 = vld [vmem:[#allocation42_spill] sm:$0xff] }
 0x354   :  { %1665 = vst.msk [vmem:[%s5840_s5 + $0x34] sm:$0xf] %vm1651_vm2, %v1644_v13  ;;  %v1585_v24 = vmax.f32 %v1465_v54, %v1565_v16 }
 0x355   :  { %2336 = vmatmul.bf16.gmra.mxu2 %v4867_v15  ;;  %2521 = vmatmul.bf16.gmra.mxu3 %v4934_v9  ;;  %v5258_v15 = vpack.c.bf16 %v2668_v26, %v2667_v49 }
 0x356   :  { %v1608_v40 = vadd.f32 %v4995_v1, %v1585_v24  ;;  %v5945_v24 = vld [vmem:[#allocation13_spill] sm:$0xff] }
 0x357   :  { %v2090_v33 = vpop.f32.mrf.mxu2  ;;  %v5251_v7 = vpop.f32.mrf.mxu3 }
 0x358   :  { %v1628_v22 = vmax.f32 %v1608_v40, 0.0  ;;  %v5253_v42 = vadd.f32 %v2288_v29, %v2090_v33  ;;  %v5946_v40 = vld [vmem:[#allocation16_spill] sm:$0xff] }
 0x359   :  { %v1419_v38 = vpop.permute.xlu0 %1418  ;;  %v3797_v33 = vld [vmem:[#allocation7 + $0x1b8] sm:$0xf0] }
 0x35a   :  { %v1648_v11 = vpack.c.bf16 %v1628_v22, %v1628_v22  ;;  %v1463_v14 = vmax.f32 %v5001_v12, %v1419_v38  ;;  %v2295_v9 = vpop.f32.mrf.mxu0 }
 0x35c   :  { %1669 = vst.msk [vmem:[%s5840_s5 + $0x44] sm:$0xf] %vm1651_vm2, %v1648_v11  ;;  %v1583_v17 = vmax.f32 %v1463_v14, %v1563_v55  ;;  %2810 = vmatmul.bf16.gmra.mxu0 %v5258_v15  ;;  %v2669_v55 = vld [vmem:[#allocation2 + $0x4e] sm:$0xff] }
 0x35e   :  { %v1606_v29 = vadd.f32 %v4995_v1, %v1583_v17 }
 0x35f   :  { %v2092_v10 = vpop.f32.mrf.mxu2  ;;  %v5266_v59 = vpop.f32.mrf.mxu3 }
 0x360   :  { %v1626_v52 = vmax.f32 %v1606_v29, 0.0  ;;  %v5268_v58 = vadd.f32 %v2290_v28, %v2092_v10  ;;  %v3971_v28 = vld [vmem:[#allocation7 + $0x1b4] sm:$0xf] }
 0x361   :  { %v1421_v12 = vpop.permute.xlu1 %1420  ;;  %v3800_v22 = vor.u32 %v3971_v28, %v3797_v33  ;;  %v2672_v28 = vld [vmem:[#allocation2 + $0x66] sm:$0xff] }
 0x362   :  { %v1646_v32 = vpack.c.bf16 %v1626_v52, %v1626_v52  ;;  %v1464_v16 = vmax.f32 %v5026_v18, %v1421_v12  ;;  %v2298_v13 = vpop.f32.mrf.mxu0  ;;  %v2670_v18 = vld [vmem:[#allocation2 + $0x56] sm:$0xff]  ;;  %v5947_v12 = vld [vmem:[#allocation18_spill] sm:$0xff] }
 0x363   :  { %2850 = vmatpush.bf16.msra.mxu2 %v3800_v22  ;;  %3998 = vmatpush.bf16.msrb.mxu3 %v3800_v22  ;;  %v5284_v14 = vpack.c.bf16 %v2670_v18, %v2669_v55 }
 0x364   :  { %1667 = vst.msk [vmem:[%s5840_s5 + $0x3c] sm:$0xf] %vm1651_vm2, %v1646_v32  ;;  %v1584_v54 = vmax.f32 %v1464_v16, %v1564_v0  ;;  %v1566_v0 = vmax.f32 %v5948_v60, %v5947_v12 }
 0x365   :  { %2341 = vmatmul.bf16.gmra.mxu2 %v5945_v24  ;;  %2526 = vmatmul.bf16.gmra.mxu3 %v5946_v40  ;;  %v5949_v24 = vld [vmem:[#allocation14_spill] sm:$0xff] }
 0x366   :  { %v1607_v26 = vadd.f32 %v4995_v1, %v1584_v54 }
 0x367   :  { %v2095_v34 = vpop.f32.mrf.mxu2  ;;  %v5280_v38 = vpop.f32.mrf.mxu3 }
 0x368   :  { %v1627_v49 = vmax.f32 %v1607_v26, 0.0  ;;  %v5282_v61 = vadd.f32 %v2293_v41, %v2095_v34  ;;  %v5951_v34 = vld [vmem:[#allocation44_spill] sm:$0xff] }
 0x36a   :  { %v1647_v11 = vpack.c.bf16 %v1627_v49, %v1627_v49  ;;  %v2300_v17 = vpop.f32.mrf.mxu0 }
 0x36c   :  { %1668 = vst.msk [vmem:[%s5840_s5 + $0x40] sm:$0xf] %vm1651_vm2, %v1647_v11  ;;  %2815 = vmatmul.bf16.gmra.mxu0 %v5284_v14  ;;  %v3969_v11 = vld [vmem:[#allocation7 + $0x1a4] sm:$0xf] }
 0x36f   :  { %v2097_v29 = vpop.f32.mrf.mxu2  ;;  %v5291_v10 = vpop.f32.mrf.mxu3 }
 0x370   :  { %v5293_v52 = vadd.f32 %v2295_v9, %v2097_v29  ;;  %v5950_v9 = vld [vmem:[#allocation17_spill] sm:$0xff]  ;;  %v3789_v29 = vld [vmem:[#allocation7 + $0x1a8] sm:$0xf0] }
 0x371   :  { %v1425_v41 = vpop.permute.xlu0 %1424  ;;  %v1567_v18 = vmax.f32 %v5951_v34, %v5950_v9  ;;  %v3792_v60 = vor.u32 %v3969_v11, %v3789_v29  ;;  %v2674_v9 = vld [vmem:[#allocation2 + $0x76] sm:$0xff] }
 0x372   :  { %v1466_v32 = vmax.f32 %v5075_v45, %v1425_v41  ;;  %v2671_v45 = vld [vmem:[#allocation2 + $0x5e] sm:$0xff]  ;;  %v3781_v11 = vld [vmem:[#allocation7 + $0x198] sm:$0xf0] }
 0x373   :  { %v2303_v16 = vpop.f32.mrf.mxu0  ;;  %2851 = vmatpush.bf16.msra.mxu2 %v3792_v60  ;;  %3999 = vmatpush.bf16.msrb.mxu3 %v3792_v60 }
 0x374   :  { %v1586_v54 = vmax.f32 %v1466_v32, %v1566_v0 }
 0x375   :  { %2346 = vmatmul.bf16.gmra.mxu2 %v5949_v24  ;;  %2531 = vmatmul.bf16.gmra.mxu3 %v5006_v27  ;;  %v5308_v27 = vpack.c.bf16 %v2672_v28, %v2671_v45  ;;  %v3967_v45 = vld [vmem:[#allocation7 + $0x194] sm:$0xf] }
 0x376   :  { %v1609_v40 = vadd.f32 %v4995_v1, %v1586_v54  ;;  %v3784_v29 = vor.u32 %v3967_v45, %v3781_v11 }
 0x378   :  { %v1629_v33 = vmax.f32 %v1609_v40, 0.0  ;;  %v2100_v26 = vpop.f32.mrf.mxu2  ;;  %v5301_v22 = vpop.f32.mrf.mxu3  ;;  %2852 = vmatpush.bf16.msra.mxu2 %v3784_v29  ;;  %4000 = vmatpush.bf16.msrb.mxu3 %v3784_v29 }
 0x379   :  { %v5305_v49 = vadd.f32 %v2298_v13, %v2100_v26  ;;  %v1427_v55 = vpop.permute.xlu1 %1426 }
 0x37a   :  { %v1649_v41 = vpack.c.bf16 %v1629_v33, %v1629_v33  ;;  %v1467_v12 = vmax.f32 %v5090_v8, %v1427_v55  ;;  %v5952_v33 = vld [vmem:[#allocation15_spill] sm:$0xff] }
 0x37b   :  { %v2305_v13 = vpop.f32.mrf.mxu0  ;;  %v2673_v55 = vld [vmem:[#allocation2 + $0x6e] sm:$0xff] }
 0x37c   :  { %1670 = vst.msk [vmem:[%s5840_s5 + $0x48] sm:$0xf] %vm1651_vm2, %v1649_v41  ;;  %v1587_v0 = vmax.f32 %v1467_v12, %v1567_v18  ;;  %2820 = vmatmul.bf16.gmra.mxu0 %v5308_v27 }
 0x37e   :  { %v1610_v32 = vadd.f32 %v4995_v1, %v1587_v0 }
 0x380   :  { %v1630_v54 = vmax.f32 %v1610_v32, 0.0  ;;  %v2102_v24 = vpop.f32.mrf.mxu2  ;;  %v5316_v40 = vpop.f32.mrf.mxu3 }
 0x381   :  { %v5318_v8 = vadd.f32 %v2300_v17, %v2102_v24  ;;  %v5330_v17 = vpack.c.bf16 %v2674_v9, %v2673_v55  ;;  %v3965_v55 = vld [vmem:[#allocation7 + $0x184] sm:$0xf] }
 0x382   :  { %v1650_v28 = vpack.c.bf16 %v1630_v54, %v1630_v54 }
 0x383   :  { %v2308_v26 = vpop.f32.mrf.mxu0 }
 0x384   :  { %1672 = vst.msk [vmem:[%s5840_s5 + $0x4c] sm:$0x3] %vm1671_vm3, %v1650_v28  ;;  %v2675_v28 = vld [vmem:[#allocation2 + $0x7e] sm:$0xff] }
 0x385   :  { %2351 = vmatmul.bf16.gmra.mxu2 %v5952_v33  ;;  %2536 = vmatmul.bf16.gmra.mxu3 %v5057_v25 }
 0x388   :  { %v2105_v1 = vpop.f32.mrf.mxu2  ;;  %v5326_v34 = vpop.f32.mrf.mxu3 }
 0x389   :  { %v5328_v18 = vadd.f32 %v2303_v16, %v2105_v1  ;;  %v2676_v16 = vld [vmem:[#allocation2 + $0x86] sm:$0xff] }
 0x38a   :  { %v5343_v33 = vpack.c.bf16 %v2676_v16, %v2675_v28 }
 0x38b   :  { %v2310_v60 = vpop.f32.mrf.mxu0 }
 0x38c   :  { %2825 = vmatmul.bf16.gmra.mxu0 %v5330_v17 }
 0x390   :  { %v2107_v41 = vpop.f32.mrf.mxu2  ;;  %v5333_v12 = vpop.f32.mrf.mxu3 }
 0x391   :  { %v5335_v25 = vadd.f32 %v2305_v13, %v2107_v41 }
 0x395   :  { %2356 = vmatmul.bf16.gmra.mxu2 %v4998_v31  ;;  %2541 = vmatmul.bf16.gmra.mxu3 %v5095_v2  ;;  %v3773_v2 = vld [vmem:[#allocation7 + $0x188] sm:$0xf0] }
 0x396   :  { %v3776_v45 = vor.u32 %v3965_v55, %v3773_v2  ;;  %v2680_v55 = vld [vmem:[#allocation2 + $0xa6] sm:$0xf] }
 0x398   :  { %v2110_v0 = vpop.f32.mrf.mxu2  ;;  %v5339_v32 = vpop.f32.mrf.mxu3  ;;  %2853 = vmatpush.bf16.msra.mxu2 %v3776_v45  ;;  %4001 = vmatpush.bf16.msrb.mxu3 %v3776_v45 }
 0x399   :  { %v5341_v54 = vadd.f32 %v2308_v26, %v2110_v0  ;;  %v2313_v24 = vpop.f32.mrf.mxu0  ;;  %v2678_v26 = vld [vmem:[#allocation2 + $0x96] sm:$0xff]  ;;  %v2677_v0 = vld [vmem:[#allocation2 + $0x8e] sm:$0xff] }
 0x39c   :  { %2830 = vmatmul.bf16.gmra.mxu0 %v5343_v33 }
 0x3a0   :  { %v2112_v9 = vpop.f32.mrf.mxu2  ;;  %v5346_v13 = vpop.f32.mrf.mxu3 }
 0x3a1   :  { %5953 = vst [vmem:[#allocation19_spill] sm:$0xff] %v5346_v13  ;;  %v5348_v1 = vadd.f32 %v2310_v60, %v2112_v9  ;;  %v2315_v31 = vpop.f32.mrf.mxu0  ;;  %v5356_v60 = vpack.c.bf16 %v2678_v26, %v2677_v0 }
 0x3a5   :  { %2361 = vmatmul.bf16.gmra.mxu2 %v5042_v39  ;;  %2546 = vmatmul.bf16.gmra.mxu3 %v5122_v3 }
 0x3a8   :  { %v2115_v11 = vpop.f32.mrf.mxu2  ;;  %v5352_v29 = vpop.f32.mrf.mxu3 }
 0x3a9   :  { %v5354_v41 = vadd.f32 %v2313_v24, %v2115_v11  ;;  %v2796_v16 = vpop.f32.mrf.mxu0  ;;  %v2679_v11 = vld [vmem:[#allocation2 + $0x9e] sm:$0xff] }
 0x3aa   :  { %v2690_v0 = vpack.c.bf16 %v2680_v55, %v2679_v11 }
 0x3ac   :  { %2835 = vmatmul.bf16.gmra.mxu0 %v5356_v60 }
 0x3b0   :  { %v2117_v28 = vpop.f32.mrf.mxu2  ;;  %v5359_v9 = vpop.f32.mrf.mxu3 }
 0x3b1   :  { %5954 = vst [vmem:[#allocation20_spill] sm:$0xff] %v5359_v9  ;;  %v5361_v39 = vadd.f32 %v2315_v31, %v2117_v28  ;;  %v2798_v3 = vpop.f32.mrf.mxu0 }
 0x3b5   :  { %2366 = vmatmul.bf16.gmra.mxu2 %v5083_v63  ;;  %2551 = vmatmul.bf16.gmra.mxu3 %v5157_v57 }
 0x3b8   :  { %v5365_v2 = vpop.f32.mrf.mxu2  ;;  %v2512_v24 = vpop.f32.mrf.mxu3 }
 0x3b9   :  { %v2621_v45 = vadd.f32 %v2512_v24, %v5127_v21  ;;  %v2801_v26 = vpop.f32.mrf.mxu0 }
 0x3bb   :  { %v5368_v13 = vadd.f32 %v2796_v16, %v2621_v45 }
 0x3bc   :  { %2840 = vmatmul.bf16.gmra.mxu0 %v2690_v0 }
 0x3bd   :  { %2965 = vrot.lane.b32.xlu1 %v5368_v13, %s4121_s26 }
 0x3c0   :  { %v5372_v31 = vpop.f32.mrf.mxu2  ;;  %v2514_v63 = vpop.f32.mrf.mxu3 }
 0x3c1   :  { %v2623_v57 = vadd.f32 %v2514_v63, %v5147_v53  ;;  %v2803_v28 = vpop.f32.mrf.mxu0 }
 0x3c3   :  { %v5375_v9 = vadd.f32 %v2798_v3, %v2623_v57 }
 0x3c5   :  { %2371 = vmatmul.bf16.gmra.mxu2 %v5135_v30  ;;  %2556 = vmatmul.bf16.gmra.mxu3 %v5190_v19 }
 0x3c6   :  { %2967 = vrot.lane.b32.xlu2 %v5375_v9, %s4121_s26 }
 0x3c8   :  { %v5381_v21 = vpop.f32.mrf.mxu2  ;;  %v2517_v16 = vpop.f32.mrf.mxu3 }
 0x3c9   :  { %v2625_v55 = vadd.f32 %v2517_v16, %v5162_v35  ;;  %v2806_v24 = vpop.f32.mrf.mxu0 }
 0x3cb   :  { %v5384_v45 = vadd.f32 %v2801_v26, %v2625_v55 }
 0x3cd   :  { %2969 = vrot.lane.b32.xlu0 %v5384_v45, %s4121_s26 }
 0x3d0   :  { %v5388_v53 = vpop.f32.mrf.mxu2  ;;  %v2519_v3 = vpop.f32.mrf.mxu3 }
 0x3d1   :  { %v2627_v30 = vadd.f32 %v2519_v3, %v5178_v48  ;;  %v2808_v19 = vpop.f32.mrf.mxu0 }
 0x3d3   :  { %v5391_v11 = vadd.f32 %v2803_v28, %v2627_v30 }
 0x3d5   :  { %2854 = vmatmul.bf16.vlgmr.msra.gmra.mxu2 %v5168_v62  ;;  %2899 = vmatmul.bf16.vlgmr.msrb.gmra.mxu3 %v2690_v0 }
 0x3d6   :  { %2971 = vrot.lane.b32.xlu1 %v5391_v11, %s4121_s26 }
 0x3d8   :  { %v5396_v35 = vpop.f32.mrf.mxu2  ;;  %v2522_v26 = vpop.f32.mrf.mxu3 }
 0x3d9   :  { %v2629_v63 = vadd.f32 %v2522_v26, %v5194_v51  ;;  %v2811_v57 = vpop.f32.mrf.mxu0 }
 0x3db   :  { %v5399_v16 = vadd.f32 %v2806_v24, %v2629_v63 }
 0x3dd   :  { %2973 = vrot.lane.b32.xlu2 %v5399_v16, %s4121_s26 }
 0x3e0   :  { %v5403_v48 = vpop.f32.mrf.mxu2  ;;  %v2524_v28 = vpop.f32.mrf.mxu3 }
 0x3e1   :  { %v2631_v62 = vadd.f32 %v2524_v28, %v5210_v4  ;;  %v2813_v0 = vpop.f32.mrf.mxu0 }
 0x3e3   :  { %v5406_v55 = vadd.f32 %v2808_v19, %v2631_v62 }
 0x3e5   :  { %2859 = vmatmul.bf16.gmra.mxu2 %v5200_v44  ;;  %2975 = vrot.lane.b32.xlu0 %v5406_v55, %s4121_s26 }
 0x3e8   :  { %v5411_v51 = vpop.f32.mrf.mxu2  ;;  %v2527_v24 = vpop.f32.mrf.mxu3 }
 0x3e9   :  { %v2633_v3 = vadd.f32 %v2527_v24, %v5224_v37  ;;  %v2816_v30 = vpop.f32.mrf.mxu0 }
 0x3eb   :  { %v5414_v26 = vadd.f32 %v2811_v57, %v2633_v3 }
 0x3ed   :  { %2977 = vrot.lane.b32.xlu1 %v5414_v26, %s4121_s26 }
 0x3f0   :  { %v5418_v4 = vpop.f32.mrf.mxu2  ;;  %v2529_v19 = vpop.f32.mrf.mxu3 }
 0x3f1   :  { %v2635_v63 = vadd.f32 %v2529_v19, %v5239_v23  ;;  %v2818_v44 = vpop.f32.mrf.mxu0 }
 0x3f3   :  { %v5421_v28 = vadd.f32 %v2813_v0, %v2635_v63 }
 0x3f5   :  { %5955 = vst [vmem:[#allocation23_spill] sm:$0xff] %v5421_v28  ;;  %2864 = vmatmul.bf16.gmra.mxu2 %v5229_v6  ;;  %2979 = vrot.lane.b32.xlu2 %v5421_v28, %s4121_s26 }
 0x3f8   :  { %v5426_v37 = vpop.f32.mrf.mxu2  ;;  %v2532_v57 = vpop.f32.mrf.mxu3 }
 0x3f9   :  { %v2637_v62 = vadd.f32 %v2532_v57, %v5253_v42  ;;  %v2821_v24 = vpop.f32.mrf.mxu0 }
 0x3fb   :  { %v5429_v3 = vadd.f32 %v2816_v30, %v2637_v62 }
 0x3fd   :  { %2981 = vrot.lane.b32.xlu0 %v5429_v3, %s4121_s26 }
 0x400   :  { %v5433_v23 = vpop.f32.mrf.mxu2  ;;  %v2534_v0 = vpop.f32.mrf.mxu3 }
 0x401   :  { %v2639_v19 = vadd.f32 %v2534_v0, %v5268_v58  ;;  %v2823_v63 = vpop.f32.mrf.mxu0 }
 0x403   :  { %v5436_v6 = vadd.f32 %v2818_v44, %v2639_v19 }
 0x405   :  { %5956 = vst [vmem:[#allocation24_spill] sm:$0xff] %v5436_v6  ;;  %2869 = vmatmul.bf16.gmra.mxu2 %v5258_v15  ;;  %2983 = vrot.lane.b32.xlu1 %v5436_v6, %s4121_s26 }
 0x408   :  { %v5441_v42 = vpop.f32.mrf.mxu2  ;;  %v2537_v30 = vpop.f32.mrf.mxu3 }
 0x409   :  { %v2641_v57 = vadd.f32 %v2537_v30, %v5282_v61  ;;  %v2826_v28 = vpop.f32.mrf.mxu0 }
 0x40b   :  { %v5444_v62 = vadd.f32 %v2821_v24, %v2641_v57 }
 0x40d   :  { %5957 = vst [vmem:[#allocation21_spill] sm:$0xff] %v5444_v62  ;;  %2985 = vrot.lane.b32.xlu2 %v5444_v62, %s4121_s26  ;;  %v2571_v62 = vpop.f32.mrf.mxu1 }
 0x410   :  { %v5448_v58 = vpop.f32.mrf.mxu2  ;;  %v2539_v44 = vpop.f32.mrf.mxu3 }
 0x411   :  { %v2643_v0 = vadd.f32 %v2539_v44, %v5293_v52  ;;  %v2828_v19 = vpop.f32.mrf.mxu0 }
 0x413   :  { %v5451_v15 = vadd.f32 %v2823_v63, %v2643_v0 }
 0x415   :  { %5958 = vst [vmem:[#allocation40_spill] sm:$0xff] %v5451_v15  ;;  %2874 = vmatmul.bf16.gmra.mxu2 %v5284_v14  ;;  %2987 = vrot.lane.b32.xlu0 %v5451_v15, %s4121_s26 }
 0x418   :  { %v5456_v61 = vpop.f32.mrf.mxu2  ;;  %v2542_v24 = vpop.f32.mrf.mxu3 }
 0x419   :  { %v2645_v30 = vadd.f32 %v2542_v24, %v5305_v49  ;;  %v2831_v63 = vpop.f32.mrf.mxu0  ;;  %v2573_v24 = vpop.f32.mrf.mxu1 }
 0x41b   :  { %v5459_v57 = vadd.f32 %v2826_v28, %v2645_v30 }
 0x41d   :  { %5959 = vst [vmem:[#allocation27_spill] sm:$0xff] %v5459_v57  ;;  %2989 = vrot.lane.b32.xlu1 %v5459_v57, %s4121_s26 }
 0x420   :  { %v5463_v52 = vpop.f32.mrf.mxu2  ;;  %v2544_v44 = vpop.f32.mrf.mxu3 }
 0x421   :  { %v2647_v14 = vadd.f32 %v2544_v44, %v5318_v8  ;;  %v2833_v57 = vpop.f32.mrf.mxu0  ;;  %v2576_v44 = vpop.f32.mrf.mxu1 }
 0x423   :  { %v5466_v0 = vadd.f32 %v2828_v19, %v2647_v14 }
 0x425   :  { %5960 = vst [vmem:[#allocation25_spill] sm:$0xff] %v5466_v0  ;;  %2879 = vmatmul.bf16.gmra.mxu2 %v5308_v27  ;;  %2991 = vrot.lane.b32.xlu2 %v5466_v0, %s4121_s26 }
 0x428   :  { %v5471_v49 = vpop.f32.mrf.mxu2  ;;  %v2547_v28 = vpop.f32.mrf.mxu3 }
 0x429   :  { %v2649_v30 = vadd.f32 %v2547_v28, %v5328_v18  ;;  %v2836_v0 = vpop.f32.mrf.mxu0 }
 0x42b   :  { %v5474_v6 = vadd.f32 %v2831_v63, %v2649_v30 }
 0x42d   :  { %5961 = vst [vmem:[#allocation22_spill] sm:$0xff] %v5474_v6  ;;  %2993 = vrot.lane.b32.xlu0 %v5474_v6, %s4121_s26  ;;  %v2578_v6 = vpop.f32.mrf.mxu1 }
 0x430   :  { %v5478_v8 = vpop.f32.mrf.mxu2  ;;  %v2549_v19 = vpop.f32.mrf.mxu3 }
 0x431   :  { %v2651_v27 = vadd.f32 %v2549_v19, %v5335_v25  ;;  %v2838_v25 = vpop.f32.mrf.mxu0 }
 0x433   :  { %v5481_v14 = vadd.f32 %v2833_v57, %v2651_v27 }
 0x435   :  { %5962 = vst [vmem:[#allocation28_spill] sm:$0xff] %v5481_v14  ;;  %2884 = vmatmul.bf16.gmra.mxu2 %v5330_v17  ;;  %2995 = vrot.lane.b32.xlu1 %v5481_v14, %s4121_s26 }
 0x438   :  { %v5486_v18 = vpop.f32.mrf.mxu2  ;;  %v2552_v63 = vpop.f32.mrf.mxu3 }
 0x439   :  { %v2653_v28 = vadd.f32 %v2552_v63, %v5341_v54  ;;  %v2581_v54 = vpop.f32.mrf.mxu1  ;;  %v2841_v63 = vpop.f32.mrf.mxu0 }
 0x43b   :  { %v5489_v30 = vadd.f32 %v2836_v0, %v2653_v28 }
 0x43d   :  { %5963 = vst [vmem:[#allocation43_spill] sm:$0xff] %v5489_v30  ;;  %2997 = vrot.lane.b32.xlu2 %v5489_v30, %s4121_s26 }
 0x440   :  { %v5493_v57 = vpop.f32.mrf.mxu2  ;;  %v2554_v19 = vpop.f32.mrf.mxu3 }
 0x441   :  { %v2655_v17 = vadd.f32 %v2554_v19, %v5348_v1  ;;  %v2583_v19 = vpop.f32.mrf.mxu1 }
 0x443   :  { %v5496_v27 = vadd.f32 %v2838_v25, %v2655_v17  ;;  %v2328_v17 = vadd.f32 %v5365_v2, %v5124_v43 }
 0x445   :  { %5964 = vst [vmem:[#allocation26_spill] sm:$0xff] %v5496_v27  ;;  %2889 = vmatmul.bf16.gmra.mxu2 %v5343_v33  ;;  %2999 = vrot.lane.b32.xlu0 %v5496_v27, %s4121_s26  ;;  %v2843_v27 = vpop.f32.mrf.mxu0 }
 0x448   :  { %v5501_v0 = vpop.f32.mrf.mxu2  ;;  %v2557_v28 = vpop.f32.mrf.mxu3 }
 0x449   :  { %v2657_v30 = vadd.f32 %v2557_v28, %v5354_v41  ;;  %v2622_v41 = vadd.f32 %v2571_v62, %v2328_v17  ;;  %v2330_v28 = vadd.f32 %v5372_v31, %v5144_v20  ;;  %v2335_v20 = vadd.f32 %v5388_v53, %v5176_v46 }
 0x44a   :  { %v2340_v46 = vadd.f32 %v5403_v48, %v5208_v50  ;;  %v2345_v50 = vadd.f32 %v5418_v4, %v5237_v5  ;;  %v5560_v48 = vpop.permute.xlu2 %2967 }
 0x44b   :  { %v5504_v14 = vadd.f32 %v2841_v63, %v2657_v30  ;;  %v2624_v43 = vadd.f32 %v2573_v24, %v2330_v28  ;;  %v2628_v31 = vadd.f32 %v2578_v6, %v2335_v20 }
 0x44c   :  { %v2632_v53 = vadd.f32 %v2583_v19, %v2340_v46 }
 0x44d   :  { %5965 = vst [vmem:[#allocation31_spill] sm:$0xff] %v5504_v14  ;;  %3001 = vrot.lane.b32.xlu1 %v5504_v14, %s4121_s26 }
 0x450   :  { %v5508_v1 = vpop.f32.mrf.mxu2  ;;  %v2559_v25 = vpop.f32.mrf.mxu3 }
 0x451   :  { %v2659_v33 = vadd.f32 %v2559_v25, %v5361_v39  ;;  %v2586_v39 = vpop.f32.mrf.mxu1 }
 0x453   :  { %v5513_v15 = vadd.f32 %v2843_v27, %v2659_v33 }
 0x455   :  { %5966 = vst [vmem:[#allocation29_spill] sm:$0xff] %v5513_v15  ;;  %2894 = vmatmul.bf16.gmra.mxu2 %v5356_v60  ;;  %3003 = vrot.lane.b32.xlu2 %v5513_v15, %s4121_s26  ;;  %v2333_v60 = vadd.f32 %v5381_v21, %v5159_v47  ;;  %v2338_v47 = vadd.f32 %v5396_v35, %v5192_v56 }
 0x456   :  { %v2343_v56 = vadd.f32 %v5411_v51, %v5222_v36  ;;  %v2348_v51 = vadd.f32 %v5426_v37, %v5251_v7 }
 0x457   :  { %v2626_v25 = vadd.f32 %v2576_v44, %v2333_v60  ;;  %v2630_v21 = vadd.f32 %v2581_v54, %v2338_v47  ;;  %v2350_v47 = vadd.f32 %v5433_v23, %v5266_v59 }
 0x458   :  { %v2855_v30 = vpop.f32.mrf.mxu2  ;;  %v2634_v54 = vadd.f32 %v2586_v39, %v2343_v56  ;;  %v5568_v39 = vpop.permute.xlu2 %2973 }
 0x459   :  { %v5518_v63 = vadd.f32 %v2855_v30, %v2622_v41  ;;  %v2588_v62 = vpop.f32.mrf.mxu1 }
 0x45b   :  { %3065 = vrot.lane.b32.xlu0 %v5518_v63, %s4121_s26 }
 0x460   :  { %v2857_v2 = vpop.f32.mrf.mxu2  ;;  %v5578_v7 = vpop.permute.xlu2 %2979 }
 0x461   :  { %v5524_v27 = vadd.f32 %v2857_v2, %v2624_v43  ;;  %v2591_v24 = vpop.f32.mrf.mxu1 }
 0x463   :  { %3067 = vrot.lane.b32.xlu1 %v5524_v27, %s4121_s26 }
 0x468   :  { %v2860_v33 = vpop.f32.mrf.mxu2 }
 0x469   :  { %v5530_v17 = vadd.f32 %v2860_v33, %v2626_v25  ;;  %v2593_v43 = vpop.f32.mrf.mxu1  ;;  %v2636_v33 = vadd.f32 %v2588_v62, %v2345_v50  ;;  %v5576_v62 = vpop.permute.xlu1 %2965 }
 0x46a   :  { %v2640_v37 = vadd.f32 %v2593_v43, %v2350_v47  ;;  %v2355_v43 = vadd.f32 %v5448_v58, %v5291_v10 }
 0x46b   :  { %3069 = vrot.lane.b32.xlu2 %v5530_v17, %s4121_s26 }
 0x470   :  { %v2862_v41 = vpop.f32.mrf.mxu2 }
 0x471   :  { %v5536_v30 = vadd.f32 %v2862_v41, %v2628_v31  ;;  %v2596_v35 = vpop.f32.mrf.mxu1  ;;  %v2638_v31 = vadd.f32 %v2591_v24, %v2348_v51  ;;  %v5586_v59 = vpop.permute.xlu1 %2971 }
 0x473   :  { %3071 = vrot.lane.b32.xlu0 %v5536_v30, %s4121_s26 }
 0x478   :  { %v2865_v44 = vpop.f32.mrf.mxu2 }
 0x479   :  { %v5542_v28 = vadd.f32 %v2865_v44, %v2630_v21  ;;  %v2598_v19 = vpop.f32.mrf.mxu1  ;;  %v2970_v21 = vpop.permute.xlu0 %2969 }
 0x47b   :  { %3073 = vrot.lane.b32.xlu1 %v5542_v28, %s4121_s26 }
 0x480   :  { %v2867_v6 = vpop.f32.mrf.mxu2 }
 0x481   :  { %v5548_v2 = vadd.f32 %v2867_v6, %v2632_v53  ;;  %v2601_v5 = vpop.f32.mrf.mxu1  ;;  %v2353_v53 = vadd.f32 %v5441_v42, %v5280_v38  ;;  %v5588_v23 = vpop.permute.xlu0 %2975 }
 0x482   :  { %v5590_v6 = vpop.permute.xlu2 %2985  ;;  %v5598_v42 = vpop.permute.xlu1 %2977 }
 0x483   :  { %3075 = vrot.lane.b32.xlu2 %v5548_v2, %s4121_s26  ;;  %v2642_v56 = vadd.f32 %v2596_v35, %v2353_v53  ;;  %v2358_v35 = vadd.f32 %v5456_v61, %v5301_v22 }
 0x488   :  { %v2870_v60 = vpop.f32.mrf.mxu2 }
 0x489   :  { %v5554_v25 = vadd.f32 %v2870_v60, %v2634_v54  ;;  %v2603_v24 = vpop.f32.mrf.mxu1  ;;  %v5600_v50 = vpop.permute.xlu0 %2981 }
 0x48a   :  { %v5610_v10 = vpop.permute.xlu1 %2983 }
 0x48b   :  { %3077 = vrot.lane.b32.xlu0 %v5554_v25, %s4121_s26 }
 0x490   :  { %v2872_v20 = vpop.f32.mrf.mxu2 }
 0x491   :  { %v5562_v36 = vadd.f32 %v2872_v20, %v2636_v33  ;;  %v2606_v38 = vpop.f32.mrf.mxu1  ;;  %v5602_v33 = vpop.permute.xlu2 %2991  ;;  %v2644_v20 = vadd.f32 %v2598_v19, %v2355_v43  ;;  %v2360_v19 = vadd.f32 %v5463_v52, %v5316_v40 }
 0x492   :  { %v5612_v58 = vpop.permute.xlu0 %2987  ;;  %v5622_v22 = vpop.permute.xlu1 %2989 }
 0x493   :  { %3079 = vrot.lane.b32.xlu1 %v5562_v36, %s4121_s26 }
 0x498   :  { %v2875_v4 = vpop.f32.mrf.mxu2 }
 0x499   :  { %v5570_v41 = vadd.f32 %v2875_v4, %v2638_v31  ;;  %v5614_v4 = vpop.permute.xlu2 %2997  ;;  %v2608_v47 = vpop.f32.mrf.mxu1 }
 0x49b   :  { %3081 = vrot.lane.b32.xlu2 %v5570_v41, %s4121_s26 }
 0x49f   :  { %v5624_v61 = vpop.permute.xlu0 %2993 }
 0x4a0   :  { %v2877_v44 = vpop.f32.mrf.mxu2 }
 0x4a1   :  { %v5580_v46 = vadd.f32 %v2877_v44, %v2640_v37  ;;  %v2646_v37 = vadd.f32 %v2601_v5, %v2358_v35  ;;  %v2611_v43 = vpop.f32.mrf.mxu1  ;;  %v2363_v5 = vadd.f32 %v5471_v49, %v5326_v34  ;;  %v2365_v49 = vadd.f32 %v5478_v8, %v5333_v12 }
 0x4a3   :  { %3083 = vrot.lane.b32.xlu0 %v5580_v46, %s4121_s26 }
 0x4a7   :  { %v5634_v40 = vpop.permute.xlu1 %2995 }
 0x4a8   :  { %v2880_v54 = vpop.f32.mrf.mxu2 }
 0x4a9   :  { %v5592_v60 = vadd.f32 %v2880_v54, %v2642_v56  ;;  %v2648_v54 = vadd.f32 %v2603_v24, %v2360_v19  ;;  %v2650_v24 = vadd.f32 %v2606_v38, %v2363_v5  ;;  %v2652_v5 = vadd.f32 %v2608_v47, %v2365_v49 }
 0x4ab   :  { %3085 = vrot.lane.b32.xlu1 %v5592_v60, %s4121_s26 }
 0x4af   :  { %v5626_v56 = vpop.permute.xlu2 %3003 }
 0x4b0   :  { %v2882_v51 = vpop.f32.mrf.mxu2  ;;  %5967 = vst [vmem:[#allocation30_spill] sm:$0xff] %v5626_v56  ;;  %v5642_v56 = vld [vmem:[#allocation8] ss:$0 sm:$0xff] }
 0x4b1   :  { %v5604_v31 = vadd.f32 %v2882_v51, %v2644_v20 }
 0x4b3   :  { %3087 = vrot.lane.b32.xlu2 %v5604_v31, %s4121_s26 }
 0x4b7   :  { %v5636_v52 = vpop.permute.xlu0 %2999 }
 0x4b8   :  { %v2885_v44 = vpop.f32.mrf.mxu2 }
 0x4b9   :  { %v5616_v53 = vadd.f32 %v2885_v44, %v2646_v37  ;;  %v3027_v37 = vmax.f32 %v5384_v45, %v2970_v21  ;;  %v3025_v21 = vmax.f32 %v5368_v13, %v5576_v62  ;;  %v2373_v13 = vadd.f32 %v5501_v0, %v5352_v29 }
 0x4bb   :  { %3089 = vrot.lane.b32.xlu0 %v5616_v53, %s4121_s26 }
 0x4bf   :  { %v5649_v45 = vpop.permute.xlu1 %3001 }
 0x4c0   :  { %v2887_v20 = vpop.f32.mrf.mxu2 }
 0x4c1   :  { %v5628_v51 = vadd.f32 %v2887_v20, %v2648_v54  ;;  %v2613_v20 = vpop.f32.mrf.mxu1 }
 0x4c3   :  { %3091 = vrot.lane.b32.xlu1 %v5628_v51, %s4121_s26 }
 0x4c5   :  { %v3070_v35 = vpop.permute.xlu2 %3069 }
 0x4c6   :  { %v3127_v44 = vmax.f32 %v5530_v17, %v3070_v35 }
 0x4c8   :  { %v3147_v19 = vmax.f32 %v3027_v37, %v3127_v44  ;;  %v2890_v15 = vpop.f32.mrf.mxu2  ;;  %v2368_v44 = vadd.f32 %v5486_v18, %v5339_v32 }
 0x4c9   :  { %v5640_v54 = vadd.f32 %v2890_v15, %v2650_v24  ;;  %v3026_v24 = vmax.f32 %v5375_v9, %v5560_v48  ;;  %v5969_v48 = vld [vmem:[#allocation20_spill] sm:$0xff] }
 0x4ca   :  { %v3167_v34 = vadd.f32 %v5642_v56, %v3147_v19 }
 0x4cb   :  { %3093 = vrot.lane.b32.xlu2 %v5640_v54, %s4121_s26 }
 0x4cc   :  { %v3187_v14 = vmax.f32 %v3167_v34, 0.0 }
 0x4cd   :  { %v3066_v17 = vpop.permute.xlu0 %3065 }
 0x4ce   :  { %v3207_v15 = vpack.c.bf16 %v3187_v14, %v3187_v14  ;;  %v3125_v38 = vmax.f32 %v5518_v63, %v3066_v17  ;;  %v2616_v14 = vpop.f32.mrf.mxu1  ;;  %v2900_v63 = vpop.f32.mrf.mxu3  ;;  %v2654_v17 = vadd.f32 %v2611_v43, %v2368_v44 }
 0x4cf   :  { %v2658_v49 = vadd.f32 %v2616_v14, %v2373_v13 }
 0x4d0   :  { %3835 = vst.msk [vmem:[%s5840_s5 + $0x58] sm:$0xf] %vm1651_vm2, %v3207_v15  ;;  %v3145_v12 = vmax.f32 %v3025_v21, %v3125_v38  ;;  %v2892_v8 = vpop.f32.mrf.mxu2  ;;  %v5968_v15 = vld [vmem:[#allocation19_spill] sm:$0xff] }
 0x4d1   :  { %v5658_v35 = vadd.f32 %v2892_v8, %v2652_v5  ;;  %v5674_v18 = vadd.f32 %v2900_v63, %v2658_v49  ;;  %v2370_v9 = vadd.f32 %v5493_v57, %v5968_v15 }
 0x4d2   :  { %v3165_v37 = vadd.f32 %v5642_v56, %v3145_v12  ;;  %v3030_v12 = vmax.f32 %v5406_v55, %v5588_v23  ;;  %v3028_v23 = vmax.f32 %v5391_v11, %v5586_v59 }
 0x4d3   :  { %3095 = vrot.lane.b32.xlu0 %v5658_v35, %s4121_s26  ;;  %v2656_v13 = vadd.f32 %v2613_v20, %v2370_v9  ;;  %v3033_v9 = vmax.f32 %v5429_v3, %v5600_v50 }
 0x4d4   :  { %v3185_v62 = vmax.f32 %v3165_v37, 0.0 }
 0x4d5   :  { %v3068_v47 = vpop.permute.xlu1 %3067 }
 0x4d6   :  { %v3205_v19 = vpack.c.bf16 %v3185_v62, %v3185_v62  ;;  %v3126_v34 = vmax.f32 %v5524_v27, %v3068_v47  ;;  %v2375_v27 = vadd.f32 %v5508_v1, %v5969_v48  ;;  %v2618_v5 = vpop.f32.mrf.mxu1  ;;  %v2902_v8 = vpop.f32.mrf.mxu3 }
 0x4d8   :  { %3833 = vst.msk [vmem:[%s5840_s5 + $0x50] sm:$0xf] %vm1651_vm2, %v3205_v19  ;;  %v3146_v32 = vmax.f32 %v3026_v24, %v3126_v34  ;;  %v2895_v29 = vpop.f32.mrf.mxu2  ;;  %v2660_v57 = vadd.f32 %v2618_v5, %v2375_v27 }
 0x4d9   :  { %v5676_v0 = vadd.f32 %v2895_v29, %v2654_v17 }
 0x4da   :  { %v3166_v21 = vadd.f32 %v5642_v56, %v3146_v32  ;;  %v5694_v63 = vadd.f32 %v2902_v8, %v2660_v57  ;;  %v3029_v32 = vmax.f32 %v5399_v16, %v5568_v39 }
 0x4db   :  { %3097 = vrot.lane.b32.xlu1 %v5676_v0, %s4121_s26  ;;  %3101 = vrot.lane.b32.xlu0 %v5674_v18, %s4121_s26 }
 0x4dc   :  { %v3186_v43 = vmax.f32 %v3166_v21, 0.0 }
 0x4dd   :  { %v3076_v38 = vpop.permute.xlu2 %3075 }
 0x4de   :  { %v3206_v37 = vpack.c.bf16 %v3186_v43, %v3186_v43  ;;  %v3130_v44 = vmax.f32 %v5548_v2, %v3076_v38  ;;  %v3031_v38 = vmax.f32 %v5414_v26, %v5598_v42 }
 0x4e0   :  { %3834 = vst.msk [vmem:[%s5840_s5 + $0x54] sm:$0xf] %vm1651_vm2, %v3206_v37  ;;  %v3150_v1 = vmax.f32 %v3030_v12, %v3130_v44  ;;  %v2897_v14 = vpop.f32.mrf.mxu2  ;;  %v5970_v37 = vld [vmem:[#allocation23_spill] sm:$0xff] }
 0x4e1   :  { %v5696_v62 = vadd.f32 %v2897_v14, %v2656_v13  ;;  %v3032_v44 = vmax.f32 %v5970_v37, %v5578_v7  ;;  %v5971_v14 = vld [vmem:[#allocation40_spill] sm:$0xff] }
 0x4e2   :  { %v3170_v47 = vadd.f32 %v5642_v56, %v3150_v1 }
 0x4e3   :  { %3099 = vrot.lane.b32.xlu2 %v5696_v62, %s4121_s26  ;;  %3103 = vrot.lane.b32.xlu1 %v5694_v63, %s4121_s26 }
 0x4e4   :  { %v3190_v55 = vmax.f32 %v3170_v47, 0.0  ;;  %v3036_v47 = vmax.f32 %v5971_v14, %v5612_v58 }
 0x4e5   :  { %v3072_v2 = vpop.permute.xlu0 %3071 }
 0x4e6   :  { %v3210_v20 = vpack.c.bf16 %v3190_v55, %v3190_v55  ;;  %v3128_v24 = vmax.f32 %v5536_v30, %v3072_v2 }
 0x4e8   :  { %3838 = vst.msk [vmem:[%s5840_s5 + $0x64] sm:$0xf] %vm1651_vm2, %v3210_v20  ;;  %v3148_v19 = vmax.f32 %v3028_v23, %v3128_v24  ;;  %v5972_v24 = vld [vmem:[#allocation24_spill] sm:$0xff] }
 0x4ea   :  { %v3168_v34 = vadd.f32 %v5642_v56, %v3148_v19  ;;  %v3034_v19 = vmax.f32 %v5972_v24, %v5610_v10 }
 0x4ec   :  { %v3188_v49 = vmax.f32 %v3168_v34, 0.0 }
 0x4ed   :  { %v3074_v17 = vpop.permute.xlu1 %3073 }
 0x4ee   :  { %v3208_v29 = vpack.c.bf16 %v3188_v49, %v3188_v49  ;;  %v3129_v21 = vmax.f32 %v5542_v28, %v3074_v17 }
 0x4f0   :  { %3836 = vst.msk [vmem:[%s5840_s5 + $0x5c] sm:$0xf] %vm1651_vm2, %v3208_v29  ;;  %v3149_v11 = vmax.f32 %v3029_v32, %v3129_v21  ;;  %v5973_v29 = vld [vmem:[#allocation21_spill] sm:$0xff] }
 0x4f1   :  { %v3035_v21 = vmax.f32 %v5973_v29, %v5590_v6 }
 0x4f2   :  { %v3169_v30 = vadd.f32 %v5642_v56, %v3149_v11 }
 0x4f4   :  { %v3189_v59 = vmax.f32 %v3169_v30, 0.0 }
 0x4f5   :  { %v3082_v15 = vpop.permute.xlu2 %3081 }
 0x4f6   :  { %v3209_v48 = vpack.c.bf16 %v3189_v59, %v3189_v59  ;;  %v3133_v27 = vmax.f32 %v5570_v41, %v3082_v15 }
 0x4f8   :  { %3837 = vst.msk [vmem:[%s5840_s5 + $0x60] sm:$0xf] %vm1651_vm2, %v3209_v48  ;;  %v3153_v16 = vmax.f32 %v3033_v9, %v3133_v27  ;;  %v5974_v9 = vld [vmem:[#allocation22_spill] sm:$0xff] }
 0x4f9   :  { %v3039_v48 = vmax.f32 %v5974_v9, %v5624_v61 }
 0x4fa   :  { %v3173_v28 = vadd.f32 %v5642_v56, %v3153_v16 }
 0x4fc   :  { %v3193_v39 = vmax.f32 %v3173_v28, 0.0 }
 0x4fd   :  { %v3078_v43 = vpop.permute.xlu0 %3077 }
 0x4fe   :  { %v3213_v5 = vpack.c.bf16 %v3193_v39, %v3193_v39  ;;  %v3131_v12 = vmax.f32 %v5554_v25, %v3078_v43  ;;  %v5975_v43 = vld [vmem:[#allocation27_spill] sm:$0xff] }
 0x500   :  { %3841 = vst.msk [vmem:[%s5840_s5 + $0x70] sm:$0xf] %vm1651_vm2, %v3213_v5  ;;  %v3151_v3 = vmax.f32 %v3031_v38, %v3131_v12  ;;  %v3037_v38 = vmax.f32 %v5975_v43, %v5622_v22 }
 0x502   :  { %v3171_v41 = vadd.f32 %v5642_v56, %v3151_v3 }
 0x504   :  { %v3191_v50 = vmax.f32 %v3171_v41, 0.0 }
 0x505   :  { %v3080_v8 = vpop.permute.xlu1 %3079 }
 0x506   :  { %v3211_v57 = vpack.c.bf16 %v3191_v50, %v3191_v50  ;;  %v3132_v13 = vmax.f32 %v5562_v36, %v3080_v8  ;;  %v5976_v50 = vld [vmem:[#allocation25_spill] sm:$0xff] }
 0x507   :  { %v3038_v8 = vmax.f32 %v5976_v50, %v5602_v33 }
 0x508   :  { %3839 = vst.msk [vmem:[%s5840_s5 + $0x68] sm:$0xf] %vm1651_vm2, %v3211_v57  ;;  %v3152_v26 = vmax.f32 %v3032_v44, %v3132_v13 }
 0x50a   :  { %v3172_v25 = vadd.f32 %v5642_v56, %v3152_v26  ;;  %v5977_v26 = vld [vmem:[#allocation26_spill] sm:$0xff] }
 0x50c   :  { %v3192_v42 = vmax.f32 %v3172_v25, 0.0  ;;  %v3042_v25 = vmax.f32 %v5977_v26, %v5636_v52 }
 0x50d   :  { %v3088_v1 = vpop.permute.xlu2 %3087 }
 0x50e   :  { %v3212_v55 = vpack.c.bf16 %v3192_v42, %v3192_v42  ;;  %v3136_v2 = vmax.f32 %v5604_v31, %v3088_v1 }
 0x510   :  { %3840 = vst.msk [vmem:[%s5840_s5 + $0x6c] sm:$0xf] %vm1651_vm2, %v3212_v55  ;;  %v3156_v36 = vmax.f32 %v3036_v47, %v3136_v2  ;;  %v5978_v55 = vld [vmem:[#allocation28_spill] sm:$0xff] }
 0x511   :  { %v3040_v2 = vmax.f32 %v5978_v55, %v5634_v40 }
 0x512   :  { %v3176_v7 = vadd.f32 %v5642_v56, %v3156_v36 }
 0x514   :  { %v3196_v23 = vmax.f32 %v3176_v7, 0.0 }
 0x515   :  { %v3084_v20 = vpop.permute.xlu0 %3083 }
 0x516   :  { %v3216_v34 = vpack.c.bf16 %v3196_v23, %v3196_v23  ;;  %v3134_v49 = vmax.f32 %v5580_v46, %v3084_v20  ;;  %v5979_v20 = vld [vmem:[#allocation43_spill] sm:$0xff] }
 0x517   :  { %v3041_v24 = vmax.f32 %v5979_v20, %v5614_v4 }
 0x518   :  { %3844 = vst.msk [vmem:[%s5840_s5 + $0x7c] sm:$0xf] %vm1651_vm2, %v3216_v34  ;;  %v3154_v31 = vmax.f32 %v3034_v19, %v3134_v49  ;;  %v5980_v49 = vld [vmem:[#allocation31_spill] sm:$0xff] }
 0x519   :  { %v3043_v40 = vmax.f32 %v5980_v49, %v5649_v45  ;;  %v5981_v45 = vld [vmem:[#allocation30_spill] sm:$0xff] }
 0x51a   :  { %v3174_v58 = vadd.f32 %v5642_v56, %v3154_v31 }
 0x51c   :  { %v3194_v17 = vmax.f32 %v3174_v58, 0.0 }
 0x51d   :  { %v3086_v32 = vpop.permute.xlu1 %3085 }
 0x51e   :  { %v3214_v11 = vpack.c.bf16 %v3194_v17, %v3194_v17  ;;  %v3135_v30 = vmax.f32 %v5592_v60, %v3086_v32 }
 0x520   :  { %3842 = vst.msk [vmem:[%s5840_s5 + $0x74] sm:$0xf] %vm1651_vm2, %v3214_v11  ;;  %v3155_v46 = vmax.f32 %v3035_v21, %v3135_v30 }
 0x522   :  { %v3175_v10 = vadd.f32 %v5642_v56, %v3155_v46  ;;  %v5982_v46 = vld [vmem:[#allocation29_spill] sm:$0xff] }
 0x524   :  { %v3195_v59 = vmax.f32 %v3175_v10, 0.0  ;;  %v3044_v10 = vmax.f32 %v5982_v46, %v5981_v45 }
 0x525   :  { %v3094_v15 = vpop.permute.xlu2 %3093 }
 0x526   :  { %v3215_v27 = vpack.c.bf16 %v3195_v59, %v3195_v59  ;;  %v3139_v16 = vmax.f32 %v5640_v54, %v3094_v15 }
 0x528   :  { %3843 = vst.msk [vmem:[%s5840_s5 + $0x78] sm:$0xf] %vm1651_vm2, %v3215_v27  ;;  %v3159_v6 = vmax.f32 %v3039_v48, %v3139_v16 }
 0x52a   :  { %v3179_v60 = vadd.f32 %v5642_v56, %v3159_v6 }
 0x52c   :  { %v3199_v28 = vmax.f32 %v3179_v60, 0.0 }
 0x52d   :  { %v3090_v39 = vpop.permute.xlu0 %3089 }
 0x52e   :  { %v3219_v5 = vpack.c.bf16 %v3199_v28, %v3199_v28  ;;  %v3137_v12 = vmax.f32 %v5616_v53, %v3090_v39 }
 0x530   :  { %3847 = vst.msk [vmem:[%s5840_s5 + $0x88] sm:$0xf] %vm1651_vm2, %v3219_v5  ;;  %v3157_v61 = vmax.f32 %v3037_v38, %v3137_v12 }
 0x532   :  { %v3177_v54 = vadd.f32 %v5642_v56, %v3157_v61 }
 0x534   :  { %v3197_v3 = vmax.f32 %v3177_v54, 0.0 }
 0x535   :  { %v3092_v41 = vpop.permute.xlu1 %3091 }
 0x536   :  { %v3217_v37 = vpack.c.bf16 %v3197_v3, %v3197_v3  ;;  %v3138_v44 = vmax.f32 %v5628_v51, %v3092_v41 }
 0x538   :  { %3845 = vst.msk [vmem:[%s5840_s5 + $0x80] sm:$0xf] %vm1651_vm2, %v3217_v37  ;;  %v3158_v53 = vmax.f32 %v3038_v8, %v3138_v44 }
 0x53a   :  { %v3178_v22 = vadd.f32 %v5642_v56, %v3158_v53 }
 0x53c   :  { %v3198_v57 = vmax.f32 %v3178_v22, 0.0 }
 0x53d   :  { %v3100_v13 = vpop.permute.xlu2 %3099 }
 0x53e   :  { %v3218_v42 = vpack.c.bf16 %v3198_v57, %v3198_v57  ;;  %v3142_v1 = vmax.f32 %v5696_v62, %v3100_v13 }
 0x540   :  { %3846 = vst.msk [vmem:[%s5840_s5 + $0x84] sm:$0xf] %vm1651_vm2, %v3218_v42  ;;  %v3162_v33 = vmax.f32 %v3042_v25, %v3142_v1 }
 0x542   :  { %v3182_v51 = vadd.f32 %v5642_v56, %v3162_v33 }
 0x544   :  { %v3202_v14 = vmax.f32 %v3182_v51, 0.0 }
 0x545   :  { %v3096_v47 = vpop.permute.xlu0 %3095 }
 0x546   :  { %v3222_v36 = vpack.c.bf16 %v3202_v14, %v3202_v14  ;;  %v3140_v7 = vmax.f32 %v5658_v35, %v3096_v47 }
 0x548   :  { %3850 = vst.msk [vmem:[%s5840_s5 + $0x94] sm:$0xf] %vm1651_vm2, %v3222_v36  ;;  %v3160_v52 = vmax.f32 %v3040_v2, %v3140_v7 }
 0x54a   :  { %v3180_v62 = vadd.f32 %v5642_v56, %v3160_v52 }
 0x54c   :  { %v3200_v23 = vmax.f32 %v3180_v62, 0.0 }
 0x54d   :  { %v3098_v19 = vpop.permute.xlu1 %3097  ;;  %v3102_v34 = vpop.permute.xlu0 %3101 }
 0x54e   :  { %v3220_v31 = vpack.c.bf16 %v3200_v23, %v3200_v23  ;;  %v3141_v35 = vmax.f32 %v5676_v0, %v3098_v19  ;;  %v3143_v58 = vmax.f32 %v5674_v18, %v3102_v34 }
 0x550   :  { %3848 = vst.msk [vmem:[%s5840_s5 + $0x8c] sm:$0xf] %vm1651_vm2, %v3220_v31  ;;  %v3161_v17 = vmax.f32 %v3041_v24, %v3141_v35  ;;  %v3163_v32 = vmax.f32 %v3043_v40, %v3143_v58 }
 0x552   :  { %v3181_v29 = vadd.f32 %v5642_v56, %v3161_v17  ;;  %v3183_v4 = vadd.f32 %v5642_v56, %v3163_v32 }
 0x554   :  { %v3201_v21 = vmax.f32 %v3181_v29, 0.0  ;;  %v3203_v11 = vmax.f32 %v3183_v4, 0.0 }
 0x555   :  { %v3104_v30 = vpop.permute.xlu1 %3103 }
 0x556   :  { %v3221_v0 = vpack.c.bf16 %v3201_v21, %v3201_v21  ;;  %v3223_v59 = vpack.c.bf16 %v3203_v11, %v3203_v11  ;;  %v3144_v18 = vmax.f32 %v5694_v63, %v3104_v30 }
 0x558   :  { %3849 = vst.msk [vmem:[%s5840_s5 + $0x90] sm:$0xf] %vm1651_vm2, %v3221_v0  ;;  %v3164_v15 = vmax.f32 %v3044_v10, %v3144_v18 }
 0x559   :  { %3851 = vst.msk [vmem:[%s5840_s5 + $0x98] sm:$0xf] %vm1651_vm2, %v3223_v59 }
 0x55a   :  { %v3184_v9 = vadd.f32 %v5642_v56, %v3164_v15 }
 0x55c   :  { %v3204_v48 = vmax.f32 %v3184_v9, 0.0 }
 0x55e   :  { %v3224_v27 = vpack.c.bf16 %v3204_v48, %v3204_v48 }
 0x560   :  { %3852 = vst.msk [vmem:[%s5840_s5 + $0x9c] sm:$0x3] %vm1671_vm3, %v3224_v27 }
 0x561   :  { %3250 = vsyncpa [#allocation4], 1 }
 0x562   :  { %3251 = vsyncpa [#allocation6], 1 }
 0x563   :  { %3252 = vsyncpa [#allocation9], 1 }

// kernel: net_forward.3
= control target key start
LH: loop header
LB: loop body
LE: loop exit
PB: predicated region body
PF: predicated region fallthrough
CT: control target
= control target key end

     0   :  { %s11453_s0 = inlined_call_operand.vmem [shape: bf16[2,9984], index: 0, kind: input, shape index: {}]   ;;  %s11454_s1 = inlined_call_operand.vmem [shape: bf16[9984,128], index: 1, kind: input, shape index: {}]   ;;  %s11455_s2 = inlined_call_operand.vmem [shape: f32[1,128], index: 2, kind: input, shape index: {}]   ;;  %s11456_s3 = inlined_call_operand.vmem [shape: f32[128,10], index: 3, kind: input, shape index: {}]   ;;  %s11457_s4 = inlined_call_operand.vmem [shape: f32[1,10], index: 4, kind: input, shape index: {}]   ;;  %s11458_s5 = inlined_call_operand.hbm [shape: f32[2,10], index: 5, kind: output, shape index: {}]  }
   0x1   :  { %v8792_v0 = vld [vmem:[%s11454_s1 + $0x38] sm:$0xff]  ;;  %v8791_v4 = vld [vmem:[%s11454_s1 + $0x30] sm:$0xff]  ;;  %v8790_v8 = vld [vmem:[%s11454_s1 + $0x28] sm:$0xff] }
   0x2   :  { %v8800_v1 = vld [vmem:[%s11454_s1 + $0x78] sm:$0xff]  ;;  %5203 = vmatpush.bf16.msra.mxu0 %v8792_v0  ;;  %v8799_v5 = vld [vmem:[%s11454_s1 + $0x70] sm:$0xff]  ;;  %v8798_v9 = vld [vmem:[%s11454_s1 + $0x68] sm:$0xff] }
   0x3   :  { %v8808_v2 = vld [vmem:[%s11454_s1 + $0xb8] sm:$0xff]  ;;  %5216 = vmatpush.bf16.msra.mxu1 %v8800_v1  ;;  %v8807_v6 = vld [vmem:[%s11454_s1 + $0xb0] sm:$0xff]  ;;  %v8806_v10 = vld [vmem:[%s11454_s1 + $0xa8] sm:$0xff] }
   0x4   :  { %v8816_v3 = vld [vmem:[%s11454_s1 + $0xf8] sm:$0xff]  ;;  %5229 = vmatpush.bf16.msra.mxu2 %v8808_v2  ;;  %v8815_v7 = vld [vmem:[%s11454_s1 + $0xf0] sm:$0xff]  ;;  %v8814_v11 = vld [vmem:[%s11454_s1 + $0xe8] sm:$0xff] }
   0x5   :  { %5242 = vmatpush.bf16.msra.mxu3 %v8816_v3  ;;  %v8789_v12 = vld [vmem:[%s11454_s1 + $0x20] sm:$0xff]  ;;  %v8788_v16 = vld [vmem:[%s11454_s1 + $0x18] sm:$0xff]  ;;  %v8787_v21 = vld [vmem:[%s11454_s1 + $0x10] sm:$0xff] }
   0x6   :  { %5204 = vmatpush.bf16.msra.mxu0 %v8791_v4  ;;  %v8797_v13 = vld [vmem:[%s11454_s1 + $0x60] sm:$0xff]  ;;  %v8796_v17 = vld [vmem:[%s11454_s1 + $0x58] sm:$0xff]  ;;  %v8795_v22 = vld [vmem:[%s11454_s1 + $0x50] sm:$0xff] }
   0x7   :  { %5217 = vmatpush.bf16.msra.mxu1 %v8799_v5  ;;  %v8805_v14 = vld [vmem:[%s11454_s1 + $0xa0] sm:$0xff]  ;;  %v8804_v18 = vld [vmem:[%s11454_s1 + $0x98] sm:$0xff]  ;;  %v8803_v23 = vld [vmem:[%s11454_s1 + $0x90] sm:$0xff] }
   0x8   :  { %5230 = vmatpush.bf16.msra.mxu2 %v8807_v6  ;;  %v8813_v15 = vld [vmem:[%s11454_s1 + $0xe0] sm:$0xff]  ;;  %v8812_v19 = vld [vmem:[%s11454_s1 + $0xd8] sm:$0xff]  ;;  %v8811_v24 = vld [vmem:[%s11454_s1 + $0xd0] sm:$0xff] }
   0x9   :  { %5243 = vmatpush.bf16.msra.mxu3 %v8815_v7  ;;  %v21_v20 = vld [vmem:[%s11453_s0] sm:$0xff] }
   0xa   :  { %5205 = vmatpush.bf16.msra.mxu0 %v8790_v8  ;;  %1284 = vst [vmem:[#allocation1] ss:$9 sm:$0xff] %v21_v20 }
   0xb   :  { %5218 = vmatpush.bf16.msra.mxu1 %v8798_v9 }
   0xc   :  { %5231 = vmatpush.bf16.msra.mxu2 %v8806_v10 }
   0xd   :  { %5244 = vmatpush.bf16.msra.mxu3 %v8814_v11 }
   0xe   :  { %5206 = vmatpush.bf16.msra.mxu0 %v8789_v12 }
   0xf   :  { %5219 = vmatpush.bf16.msra.mxu1 %v8797_v13 }
  0x10   :  { %5232 = vmatpush.bf16.msra.mxu2 %v8805_v14 }
  0x11   :  { %5245 = vmatpush.bf16.msra.mxu3 %v8813_v15 }
  0x12   :  { %5207 = vmatpush.bf16.msra.mxu0 %v8788_v16 }
  0x13   :  { %5220 = vmatpush.bf16.msra.mxu1 %v8796_v17 }
  0x14   :  { %5233 = vmatpush.bf16.msra.mxu2 %v8804_v18 }
  0x15   :  { %5246 = vmatpush.bf16.msra.mxu3 %v8812_v19 }
  0x16   :  { %10 = vsyncpa [#allocation3], 0  ;;  %5208 = vmatpush.bf16.msra.mxu0 %v8787_v21  ;;  %v8786_v25 = vld [vmem:[%s11454_s1 + $0x8] sm:$0xff]  ;;  %v8785_v29 = vld [vmem:[%s11454_s1] sm:$0xff]  ;;  %vm6258_vm0 = vcmask 74752   ;;  %s9442_s27 = smov [#allocation2]  }
  0x17   :  { %5221 = vmatpush.bf16.msra.mxu1 %v8795_v22  ;;  %v8794_v26 = vld [vmem:[%s11454_s1 + $0x48] sm:$0xff]  ;;  %v8793_v30 = vld [vmem:[%s11454_s1 + $0x40] sm:$0xff]  ;;  %v8824_v32 = vld [vmem:[%s11454_s1 + $0x138] sm:$0xff]  ;;  %s6280_s30 = sshll.u32 %s11458_s5, 4  ;;  %s6281_s30 = int_to_ptr.hbm [resolvable:$true] %s6280_s30 }
  0x18   :  { %5234 = vmatpush.bf16.msra.mxu2 %v8803_v23  ;;  %v8802_v27 = vld [vmem:[%s11454_s1 + $0x88] sm:$0xff]  ;;  %v8801_v31 = vld [vmem:[%s11454_s1 + $0x80] sm:$0xff]  ;;  %v8832_v33 = vld [vmem:[%s11454_s1 + $0x178] sm:$0xff] }
  0x19   :  { %5247 = vmatpush.bf16.msra.mxu3 %v8811_v24  ;;  %v8810_v28 = vld [vmem:[%s11454_s1 + $0xc8] sm:$0xff]  ;;  %v8840_v34 = vld [vmem:[%s11454_s1 + $0x1b8] sm:$0xff]  ;;  %v8809_v35 = vld [vmem:[%s11454_s1 + $0xc0] sm:$0xff] }
  0x1a   :  { %5209 = vmatpush.bf16.msra.mxu0 %v8786_v25  ;;  %v8848_v36 = vld [vmem:[%s11454_s1 + $0x1f8] sm:$0xff]  ;;  %v1285_v37 = vld [vmem:[#allocation1] sm:$0xff]  ;;  %v8823_v38 = vld [vmem:[%s11454_s1 + $0x130] sm:$0xff] }
  0x1b   :  { %5222 = vmatpush.bf16.msra.mxu1 %v8794_v26  ;;  %v1287_v39 = vld [vmem:[#allocation1 + $0x12] sm:$0xff]  ;;  %v1286_v42 = vld [vmem:[#allocation1 + $0x9] sm:$0xff]  ;;  %v1288_v44 = vld [vmem:[#allocation1 + $0x1b] sm:$0xff] }
  0x1c   :  { %5235 = vmatpush.bf16.msra.mxu2 %v8802_v27  ;;  %v8831_v40 = vld [vmem:[%s11454_s1 + $0x170] sm:$0xff]  ;;  %v8822_v45 = vld [vmem:[%s11454_s1 + $0x128] sm:$0xff]  ;;  %v9608_v51 = vld [vmem:[#allocation1 + $0x3f] sm:$0xff] }
  0x1d   :  { %5248 = vmatpush.bf16.msra.mxu3 %v8810_v28  ;;  %v8839_v41 = vld [vmem:[%s11454_s1 + $0x1b0] sm:$0xff]  ;;  %v8830_v46 = vld [vmem:[%s11454_s1 + $0x168] sm:$0xff]  ;;  %v8821_v54 = vld [vmem:[%s11454_s1 + $0x120] sm:$0xff] }
  0x1e   :  { %5210 = vmatpush.bf16.msra.mxu0 %v8785_v29  ;;  %v8847_v43 = vld [vmem:[%s11454_s1 + $0x1f0] sm:$0xff]  ;;  %v8838_v47 = vld [vmem:[%s11454_s1 + $0x1a8] sm:$0xff]  ;;  %v8829_v55 = vld [vmem:[%s11454_s1 + $0x160] sm:$0xff] }
  0x1f   :  { %5223 = vmatpush.bf16.msra.mxu1 %v8793_v30  ;;  %v8846_v48 = vld [vmem:[%s11454_s1 + $0x1e8] sm:$0xff]  ;;  %v1291_v49 = vld [vmem:[#allocation1 + $0x36] sm:$0xff]  ;;  %v8837_v56 = vld [vmem:[%s11454_s1 + $0x1a0] sm:$0xff] }
  0x20   :  { %5236 = vmatpush.bf16.msra.mxu2 %v8801_v31  ;;  %v1289_v50 = vld [vmem:[#allocation1 + $0x24] sm:$0xff]  ;;  %v1290_v53 = vld [vmem:[#allocation1 + $0x2d] sm:$0xff]  ;;  %v8820_v58 = vld [vmem:[%s11454_s1 + $0x118] sm:$0xff] }
  0x21   :  { %5249 = vmatpush.bf16.msra.mxu3 %v8809_v35  ;;  %5211 = vmatmul.bf16.vlgmr.msra.gmra.mxu0 %v1285_v37  ;;  %v22_v52 = vld [vmem:[%s11453_s0 + $0x8] sm:$0xff]  ;;  %v8845_v57 = vld [vmem:[%s11454_s1 + $0x1e0] sm:$0xff]  ;;  %v8828_v59 = vld [vmem:[%s11454_s1 + $0x158] sm:$0xff] }
  0x22   :  { %5255 = vmatpush.bf16.msrb.mxu0 %v8824_v32  ;;  %5224 = vmatmul.bf16.vlgmr.msra.gmra.mxu1 %v1286_v42  ;;  %1294 = vst [vmem:[#allocation1] ss:$9 sm:$0xff] %v22_v52  ;;  %v8836_v60 = vld [vmem:[%s11454_s1 + $0x198] sm:$0xff]  ;;  %v8819_v62 = vld [vmem:[%s11454_s1 + $0x110] sm:$0xff]  ;;  %v8818_v2 = vld [vmem:[%s11454_s1 + $0x108] sm:$0xff] }
  0x23   :  { %5268 = vmatpush.bf16.msrb.mxu1 %v8832_v33  ;;  %5237 = vmatmul.bf16.vlgmr.msra.gmra.mxu2 %v1287_v39  ;;  %v8844_v61 = vld [vmem:[%s11454_s1 + $0x1d8] sm:$0xff]  ;;  %v8827_v63 = vld [vmem:[%s11454_s1 + $0x150] sm:$0xff]  ;;  %v8826_v3 = vld [vmem:[%s11454_s1 + $0x148] sm:$0xff] }
  0x24   :  { %5281 = vmatpush.bf16.msrb.mxu2 %v8840_v34  ;;  %5250 = vmatmul.bf16.vlgmr.msra.gmra.mxu3 %v1288_v44  ;;  %v8835_v0 = vld [vmem:[%s11454_s1 + $0x190] sm:$0xff]  ;;  %v8834_v4 = vld [vmem:[%s11454_s1 + $0x188] sm:$0xff]  ;;  %v8817_v6 = vld [vmem:[%s11454_s1 + $0x100] sm:$0xff] }
  0x25   :  { %5294 = vmatpush.bf16.msrb.mxu3 %v8848_v36  ;;  %v8843_v1 = vld [vmem:[%s11454_s1 + $0x1d0] sm:$0xff]  ;;  %v8842_v5 = vld [vmem:[%s11454_s1 + $0x1c8] sm:$0xff]  ;;  %v8825_v7 = vld [vmem:[%s11454_s1 + $0x140] sm:$0xff] }
  0x26   :  { %5256 = vmatpush.bf16.msrb.mxu0 %v8823_v38  ;;  %v8833_v8 = vld [vmem:[%s11454_s1 + $0x180] sm:$0xff]  ;;  %v8856_v9 = vld [vmem:[%s11454_s1 + $0x238] sm:$0xff]  ;;  %v8855_v14 = vld [vmem:[%s11454_s1 + $0x230] sm:$0xff] }
  0x27   :  { %5269 = vmatpush.bf16.msrb.mxu1 %v8831_v40  ;;  %v8864_v10 = vld [vmem:[%s11454_s1 + $0x278] sm:$0xff]  ;;  %v8841_v12 = vld [vmem:[%s11454_s1 + $0x1c0] sm:$0xff]  ;;  %v8863_v15 = vld [vmem:[%s11454_s1 + $0x270] sm:$0xff] }
  0x28   :  { %5282 = vmatpush.bf16.msrb.mxu2 %v8839_v41  ;;  %v8872_v11 = vld [vmem:[%s11454_s1 + $0x2b8] sm:$0xff]  ;;  %v8871_v16 = vld [vmem:[%s11454_s1 + $0x2b0] sm:$0xff]  ;;  %v8854_v18 = vld [vmem:[%s11454_s1 + $0x228] sm:$0xff] }
  0x29   :  { %5295 = vmatpush.bf16.msrb.mxu3 %v8847_v43  ;;  %v8880_v13 = vld [vmem:[%s11454_s1 + $0x2f8] sm:$0xff]  ;;  %v8879_v17 = vld [vmem:[%s11454_s1 + $0x2f0] sm:$0xff]  ;;  %v8862_v19 = vld [vmem:[%s11454_s1 + $0x268] sm:$0xff] }
  0x2a   :  { %5257 = vmatpush.bf16.msrb.mxu0 %v8822_v45  ;;  %v8870_v20 = vld [vmem:[%s11454_s1 + $0x2a8] sm:$0xff]  ;;  %v8853_v22 = vld [vmem:[%s11454_s1 + $0x220] sm:$0xff]  ;;  %v8852_v26 = vld [vmem:[%s11454_s1 + $0x218] sm:$0xff] }
  0x2b   :  { %5270 = vmatpush.bf16.msrb.mxu1 %v8830_v46  ;;  %v8878_v21 = vld [vmem:[%s11454_s1 + $0x2e8] sm:$0xff]  ;;  %v8861_v23 = vld [vmem:[%s11454_s1 + $0x260] sm:$0xff]  ;;  %v8860_v27 = vld [vmem:[%s11454_s1 + $0x258] sm:$0xff] }
  0x2c   :  { %5283 = vmatpush.bf16.msrb.mxu2 %v8838_v47  ;;  %v8869_v24 = vld [vmem:[%s11454_s1 + $0x2a0] sm:$0xff]  ;;  %v8868_v28 = vld [vmem:[%s11454_s1 + $0x298] sm:$0xff]  ;;  %v8851_v30 = vld [vmem:[%s11454_s1 + $0x210] sm:$0xff] }
  0x2d   :  { %5296 = vmatpush.bf16.msrb.mxu3 %v8846_v48  ;;  %v8877_v25 = vld [vmem:[%s11454_s1 + $0x2e0] sm:$0xff]  ;;  %v8876_v29 = vld [vmem:[%s11454_s1 + $0x2d8] sm:$0xff]  ;;  %v8859_v31 = vld [vmem:[%s11454_s1 + $0x250] sm:$0xff] }
  0x2e   :  { %5258 = vmatpush.bf16.msrb.mxu0 %v8821_v54  ;;  %v8867_v32 = vld [vmem:[%s11454_s1 + $0x290] sm:$0xff]  ;;  %v8850_v34 = vld [vmem:[%s11454_s1 + $0x208] sm:$0xff]  ;;  %v8849_v38 = vld [vmem:[%s11454_s1 + $0x200] sm:$0xff] }
  0x2f   :  { %5271 = vmatpush.bf16.msrb.mxu1 %v8829_v55  ;;  %v8875_v33 = vld [vmem:[%s11454_s1 + $0x2d0] sm:$0xff]  ;;  %v8858_v35 = vld [vmem:[%s11454_s1 + $0x248] sm:$0xff]  ;;  %v8857_v39 = vld [vmem:[%s11454_s1 + $0x240] sm:$0xff] }
  0x30   :  { %5284 = vmatpush.bf16.msrb.mxu2 %v8837_v56  ;;  %v8866_v36 = vld [vmem:[%s11454_s1 + $0x288] sm:$0xff]  ;;  %v8865_v40 = vld [vmem:[%s11454_s1 + $0x280] sm:$0xff]  ;;  %v8888_v41 = vld [vmem:[%s11454_s1 + $0x338] sm:$0xff] }
  0x31   :  { %5297 = vmatpush.bf16.msrb.mxu3 %v8845_v57  ;;  %v8874_v37 = vld [vmem:[%s11454_s1 + $0x2c8] sm:$0xff]  ;;  %v8896_v42 = vld [vmem:[%s11454_s1 + $0x378] sm:$0xff]  ;;  %v8873_v44 = vld [vmem:[%s11454_s1 + $0x2c0] sm:$0xff] }
  0x32   :  { %5259 = vmatpush.bf16.msrb.mxu0 %v8820_v58  ;;  %v8904_v43 = vld [vmem:[%s11454_s1 + $0x3b8] sm:$0xff]  ;;  %v1295_v45 = vld [vmem:[#allocation1] sm:$0xff]  ;;  %v8887_v48 = vld [vmem:[%s11454_s1 + $0x330] sm:$0xff] }
  0x33   :  { %5272 = vmatpush.bf16.msrb.mxu1 %v8828_v59  ;;  %v8912_v46 = vld [vmem:[%s11454_s1 + $0x3f8] sm:$0xff]  ;;  %v8903_v52 = vld [vmem:[%s11454_s1 + $0x3b0] sm:$0xff]  ;;  %v8886_v54 = vld [vmem:[%s11454_s1 + $0x328] sm:$0xff] }
  0x34   :  { %5285 = vmatpush.bf16.msrb.mxu2 %v8836_v60  ;;  %v1297_v47 = vld [vmem:[#allocation1 + $0x12] sm:$0xff]  ;;  %v8894_v55 = vld [vmem:[%s11454_s1 + $0x368] sm:$0xff]  ;;  %v8885_v58 = vld [vmem:[%s11454_s1 + $0x320] sm:$0xff] }
  0x35   :  { %5298 = vmatpush.bf16.msrb.mxu3 %v8844_v61  ;;  %v8902_v56 = vld [vmem:[%s11454_s1 + $0x3a8] sm:$0xff]  ;;  %v8893_v59 = vld [vmem:[%s11454_s1 + $0x360] sm:$0xff] }
  0x36   :  { %5260 = vmatpush.bf16.msrb.mxu0 %v8819_v62  ;;  %v8910_v57 = vld [vmem:[%s11454_s1 + $0x3e8] sm:$0xff]  ;;  %v8901_v60 = vld [vmem:[%s11454_s1 + $0x3a0] sm:$0xff]  ;;  %v8884_v62 = vld [vmem:[%s11454_s1 + $0x318] sm:$0xff] }
  0x37   :  { %5273 = vmatpush.bf16.msrb.mxu1 %v8827_v63  ;;  %v8909_v61 = vld [vmem:[%s11454_s1 + $0x3e0] sm:$0xff]  ;;  %v8892_v63 = vld [vmem:[%s11454_s1 + $0x358] sm:$0xff] }
  0x38   :  { %5286 = vmatpush.bf16.msrb.mxu2 %v8835_v0  ;;  %v8900_v0 = vld [vmem:[%s11454_s1 + $0x398] sm:$0xff] }
  0x39   :  { %5299 = vmatpush.bf16.msrb.mxu3 %v8843_v1  ;;  %v8908_v1 = vld [vmem:[%s11454_s1 + $0x3d8] sm:$0xff] }
  0x3a   :  { %5261 = vmatpush.bf16.msrb.mxu0 %v8818_v2  ;;  %v8883_v2 = vld [vmem:[%s11454_s1 + $0x310] sm:$0xff] }
  0x3b   :  { %5274 = vmatpush.bf16.msrb.mxu1 %v8826_v3  ;;  %v8891_v3 = vld [vmem:[%s11454_s1 + $0x350] sm:$0xff] }
  0x3c   :  { %5287 = vmatpush.bf16.msrb.mxu2 %v8834_v4  ;;  %v8899_v4 = vld [vmem:[%s11454_s1 + $0x390] sm:$0xff] }
  0x3d   :  { %5300 = vmatpush.bf16.msrb.mxu3 %v8842_v5  ;;  %v8907_v5 = vld [vmem:[%s11454_s1 + $0x3d0] sm:$0xff] }
  0x3e   :  { %5262 = vmatpush.bf16.msrb.mxu0 %v8817_v6  ;;  %v8882_v6 = vld [vmem:[%s11454_s1 + $0x308] sm:$0xff] }
  0x3f   :  { %5275 = vmatpush.bf16.msrb.mxu1 %v8825_v7  ;;  %v8890_v7 = vld [vmem:[%s11454_s1 + $0x348] sm:$0xff] }
  0x40   :  { %5288 = vmatpush.bf16.msrb.mxu2 %v8833_v8  ;;  %v8898_v8 = vld [vmem:[%s11454_s1 + $0x388] sm:$0xff] }
  0x41   :  { %5301 = vmatpush.bf16.msrb.mxu3 %v8841_v12  ;;  %5263 = vmatmul.bf16.vlgmr.msrb.gmra.mxu0 %v1289_v50  ;;  %v8895_v50 = vld [vmem:[%s11454_s1 + $0x370] sm:$0xff]  ;;  %v1302_v12 = vld [vmem:[#allocation1 + $0x3f] sm:$0xff] }
  0x42   :  { %5307 = vmatpush.bf16.msra.mxu0 %v8856_v9  ;;  %5276 = vmatmul.bf16.vlgmr.msrb.gmra.mxu1 %v1290_v53  ;;  %v8911_v53 = vld [vmem:[%s11454_s1 + $0x3f0] sm:$0xff]  ;;  %v1299_v9 = vld [vmem:[#allocation1 + $0x24] sm:$0xff] }
  0x43   :  { %5320 = vmatpush.bf16.msra.mxu1 %v8864_v10  ;;  %5289 = vmatmul.bf16.vlgmr.msrb.gmra.mxu2 %v1291_v49  ;;  %v1296_v49 = vld [vmem:[#allocation1 + $0x9] sm:$0xff]  ;;  %v1301_v10 = vld [vmem:[#allocation1 + $0x36] sm:$0xff] }
  0x44   :  { %5333 = vmatpush.bf16.msra.mxu2 %v8872_v11  ;;  %5302 = vmatmul.bf16.vlgmr.msrb.gmra.mxu3 %v9608_v51  ;;  %v1298_v51 = vld [vmem:[#allocation1 + $0x1b] sm:$0xff]  ;;  %v1300_v11 = vld [vmem:[#allocation1 + $0x2d] sm:$0xff] }
  0x45   :  { %5346 = vmatpush.bf16.msra.mxu3 %v8880_v13  ;;  %v23_v13 = vld [vmem:[%s11453_s0 + $0x10] sm:$0xff] }
  0x46   :  { %5308 = vmatpush.bf16.msra.mxu0 %v8855_v14  ;;  %v8906_v14 = vld [vmem:[%s11454_s1 + $0x3c8] sm:$0xff]  ;;  %1304 = vst [vmem:[#allocation1] ss:$9 sm:$0xff] %v23_v13  ;;  %v8956_v13 = vld [vmem:[%s11454_s1 + $0x558] sm:$0xff] }
  0x47   :  { %5321 = vmatpush.bf16.msra.mxu1 %v8863_v15  ;;  %v8881_v15 = vld [vmem:[%s11454_s1 + $0x300] sm:$0xff] }
  0x48   :  { %5334 = vmatpush.bf16.msra.mxu2 %v8871_v16  ;;  %v8889_v16 = vld [vmem:[%s11454_s1 + $0x340] sm:$0xff] }
  0x49   :  { %5347 = vmatpush.bf16.msra.mxu3 %v8879_v17  ;;  %v8920_v17 = vld [vmem:[%s11454_s1 + $0x438] sm:$0xff] }
  0x4a   :  { %5309 = vmatpush.bf16.msra.mxu0 %v8854_v18  ;;  %v8897_v18 = vld [vmem:[%s11454_s1 + $0x380] sm:$0xff] }
  0x4b   :  { %5322 = vmatpush.bf16.msra.mxu1 %v8862_v19  ;;  %v8928_v19 = vld [vmem:[%s11454_s1 + $0x478] sm:$0xff] }
  0x4c   :  { %5335 = vmatpush.bf16.msra.mxu2 %v8870_v20  ;;  %v8936_v20 = vld [vmem:[%s11454_s1 + $0x4b8] sm:$0xff] }
  0x4d   :  { %5348 = vmatpush.bf16.msra.mxu3 %v8878_v21  ;;  %v8905_v21 = vld [vmem:[%s11454_s1 + $0x3c0] sm:$0xff] }
  0x4e   :  { %5310 = vmatpush.bf16.msra.mxu0 %v8853_v22  ;;  %v8944_v22 = vld [vmem:[%s11454_s1 + $0x4f8] sm:$0xff] }
  0x4f   :  { %5323 = vmatpush.bf16.msra.mxu1 %v8861_v23  ;;  %v8919_v23 = vld [vmem:[%s11454_s1 + $0x430] sm:$0xff] }
  0x50   :  { %5336 = vmatpush.bf16.msra.mxu2 %v8869_v24  ;;  %v8927_v24 = vld [vmem:[%s11454_s1 + $0x470] sm:$0xff] }
  0x51   :  { %5349 = vmatpush.bf16.msra.mxu3 %v8877_v25  ;;  %v8935_v25 = vld [vmem:[%s11454_s1 + $0x4b0] sm:$0xff] }
  0x52   :  { %5311 = vmatpush.bf16.msra.mxu0 %v8852_v26  ;;  %v8943_v26 = vld [vmem:[%s11454_s1 + $0x4f0] sm:$0xff] }
  0x53   :  { %5324 = vmatpush.bf16.msra.mxu1 %v8860_v27  ;;  %v8918_v27 = vld [vmem:[%s11454_s1 + $0x428] sm:$0xff] }
  0x54   :  { %5337 = vmatpush.bf16.msra.mxu2 %v8868_v28  ;;  %v8926_v28 = vld [vmem:[%s11454_s1 + $0x468] sm:$0xff] }
  0x55   :  { %5350 = vmatpush.bf16.msra.mxu3 %v8876_v29  ;;  %v8934_v29 = vld [vmem:[%s11454_s1 + $0x4a8] sm:$0xff] }
  0x56   :  { %5312 = vmatpush.bf16.msra.mxu0 %v8851_v30  ;;  %v8942_v30 = vld [vmem:[%s11454_s1 + $0x4e8] sm:$0xff] }
  0x57   :  { %5325 = vmatpush.bf16.msra.mxu1 %v8859_v31  ;;  %v8917_v31 = vld [vmem:[%s11454_s1 + $0x420] sm:$0xff] }
  0x58   :  { %5338 = vmatpush.bf16.msra.mxu2 %v8867_v32  ;;  %v8925_v32 = vld [vmem:[%s11454_s1 + $0x460] sm:$0xff] }
  0x59   :  { %5351 = vmatpush.bf16.msra.mxu3 %v8875_v33  ;;  %v8933_v33 = vld [vmem:[%s11454_s1 + $0x4a0] sm:$0xff] }
  0x5a   :  { %5313 = vmatpush.bf16.msra.mxu0 %v8850_v34  ;;  %v8941_v34 = vld [vmem:[%s11454_s1 + $0x4e0] sm:$0xff] }
  0x5b   :  { %5326 = vmatpush.bf16.msra.mxu1 %v8858_v35  ;;  %v8916_v35 = vld [vmem:[%s11454_s1 + $0x418] sm:$0xff] }
  0x5c   :  { %5339 = vmatpush.bf16.msra.mxu2 %v8866_v36  ;;  %v8924_v36 = vld [vmem:[%s11454_s1 + $0x458] sm:$0xff] }
  0x5d   :  { %5352 = vmatpush.bf16.msra.mxu3 %v8874_v37  ;;  %v8932_v37 = vld [vmem:[%s11454_s1 + $0x498] sm:$0xff] }
  0x5e   :  { %5314 = vmatpush.bf16.msra.mxu0 %v8849_v38  ;;  %v8940_v38 = vld [vmem:[%s11454_s1 + $0x4d8] sm:$0xff] }
  0x5f   :  { %5327 = vmatpush.bf16.msra.mxu1 %v8857_v39  ;;  %v8915_v39 = vld [vmem:[%s11454_s1 + $0x410] sm:$0xff] }
  0x60   :  { %5340 = vmatpush.bf16.msra.mxu2 %v8865_v40  ;;  %v8923_v40 = vld [vmem:[%s11454_s1 + $0x450] sm:$0xff] }
  0x61   :  { %5353 = vmatpush.bf16.msra.mxu3 %v8873_v44  ;;  %5315 = vmatmul.bf16.vlgmr.msra.gmra.mxu0 %v1295_v45  ;;  %v8922_v44 = vld [vmem:[%s11454_s1 + $0x448] sm:$0xff] }
  0x62   :  { %5359 = vmatpush.bf16.msrb.mxu0 %v8888_v41  ;;  %5328 = vmatmul.bf16.vlgmr.msra.gmra.mxu1 %v1296_v49  ;;  %v8931_v41 = vld [vmem:[%s11454_s1 + $0x490] sm:$0xff]  ;;  %v8930_v45 = vld [vmem:[%s11454_s1 + $0x488] sm:$0xff]  ;;  %v8929_v49 = vld [vmem:[%s11454_s1 + $0x480] sm:$0xff] }
  0x63   :  { %5372 = vmatpush.bf16.msrb.mxu1 %v8896_v42  ;;  %5341 = vmatmul.bf16.vlgmr.msra.gmra.mxu2 %v1297_v47  ;;  %v8939_v42 = vld [vmem:[%s11454_s1 + $0x4d0] sm:$0xff]  ;;  %v8913_v47 = vld [vmem:[%s11454_s1 + $0x400] sm:$0xff] }
  0x64   :  { %5385 = vmatpush.bf16.msrb.mxu2 %v8904_v43  ;;  %5354 = vmatmul.bf16.vlgmr.msra.gmra.mxu3 %v1298_v51  ;;  %v8914_v43 = vld [vmem:[%s11454_s1 + $0x408] sm:$0xff]  ;;  %v8960_v51 = vld [vmem:[%s11454_s1 + $0x578] sm:$0xff] }
  0x65   :  { %5398 = vmatpush.bf16.msrb.mxu3 %v8912_v46  ;;  %v8938_v46 = vld [vmem:[%s11454_s1 + $0x4c8] sm:$0xff] }
  0x66   :  { %5360 = vmatpush.bf16.msrb.mxu0 %v8887_v48  ;;  %v8921_v48 = vld [vmem:[%s11454_s1 + $0x440] sm:$0xff] }
  0x67   :  { %5373 = vmatpush.bf16.msrb.mxu1 %v8895_v50  ;;  %v8952_v50 = vld [vmem:[%s11454_s1 + $0x538] sm:$0xff] }
  0x68   :  { %5386 = vmatpush.bf16.msrb.mxu2 %v8903_v52  ;;  %v8968_v52 = vld [vmem:[%s11454_s1 + $0x5b8] sm:$0xff] }
  0x69   :  { %5399 = vmatpush.bf16.msrb.mxu3 %v8911_v53  ;;  %v8937_v53 = vld [vmem:[%s11454_s1 + $0x4c0] sm:$0xff] }
  0x6a   :  { %5361 = vmatpush.bf16.msrb.mxu0 %v8886_v54  ;;  %v1305_v54 = vld [vmem:[#allocation1] sm:$0xff] }
  0x6b   :  { %5374 = vmatpush.bf16.msrb.mxu1 %v8894_v55  ;;  %v1307_v55 = vld [vmem:[#allocation1 + $0x12] sm:$0xff] }
  0x6c   :  { %5387 = vmatpush.bf16.msrb.mxu2 %v8902_v56  ;;  %v8976_v56 = vld [vmem:[%s11454_s1 + $0x5f8] sm:$0xff] }
  0x6d   :  { %5400 = vmatpush.bf16.msrb.mxu3 %v8910_v57  ;;  %v1306_v57 = vld [vmem:[#allocation1 + $0x9] sm:$0xff] }
  0x6e   :  { %5362 = vmatpush.bf16.msrb.mxu0 %v8885_v58  ;;  %v8951_v58 = vld [vmem:[%s11454_s1 + $0x530] sm:$0xff] }
  0x6f   :  { %5375 = vmatpush.bf16.msrb.mxu1 %v8893_v59  ;;  %v1308_v59 = vld [vmem:[#allocation1 + $0x1b] sm:$0xff] }
  0x70   :  { %5388 = vmatpush.bf16.msrb.mxu2 %v8901_v60  ;;  %v8959_v60 = vld [vmem:[%s11454_s1 + $0x570] sm:$0xff] }
  0x71   :  { %5401 = vmatpush.bf16.msrb.mxu3 %v8909_v61  ;;  %v8967_v61 = vld [vmem:[%s11454_s1 + $0x5b0] sm:$0xff] }
  0x72   :  { %5363 = vmatpush.bf16.msrb.mxu0 %v8884_v62  ;;  %v8975_v62 = vld [vmem:[%s11454_s1 + $0x5f0] sm:$0xff] }
  0x73   :  { %5376 = vmatpush.bf16.msrb.mxu1 %v8892_v63  ;;  %v8950_v63 = vld [vmem:[%s11454_s1 + $0x528] sm:$0xff] }
  0x74   :  { %5389 = vmatpush.bf16.msrb.mxu2 %v8900_v0  ;;  %v8958_v0 = vld [vmem:[%s11454_s1 + $0x568] sm:$0xff] }
  0x75   :  { %5402 = vmatpush.bf16.msrb.mxu3 %v8908_v1  ;;  %v8966_v1 = vld [vmem:[%s11454_s1 + $0x5a8] sm:$0xff] }
  0x76   :  { %5364 = vmatpush.bf16.msrb.mxu0 %v8883_v2  ;;  %v9410_v2 = vld [vmem:[%s11455_s2] ss:$0 sm:$0xff] }
  0x77   :  { %5377 = vmatpush.bf16.msrb.mxu1 %v8891_v3  ;;  %v8974_v3 = vld [vmem:[%s11454_s1 + $0x5e8] sm:$0xff] }
  0x78   :  { %5390 = vmatpush.bf16.msrb.mxu2 %v8899_v4  ;;  %v8949_v4 = vld [vmem:[%s11454_s1 + $0x520] sm:$0xff] }
  0x79   :  { %5403 = vmatpush.bf16.msrb.mxu3 %v8907_v5 }
  0x7a   :  { %5365 = vmatpush.bf16.msrb.mxu0 %v8882_v6  ;;  %v8957_v6 = vld [vmem:[%s11454_s1 + $0x560] sm:$0xff] }
  0x7b   :  { %5378 = vmatpush.bf16.msrb.mxu1 %v8890_v7  ;;  %v8965_v7 = vld [vmem:[%s11454_s1 + $0x5a0] sm:$0xff] }
  0x7c   :  { %5391 = vmatpush.bf16.msrb.mxu2 %v8898_v8 }
  0x7d   :  { %5404 = vmatpush.bf16.msrb.mxu3 %v8906_v14  ;;  %v8964_v14 = vld [vmem:[%s11454_s1 + $0x598] sm:$0xff] }
  0x7e   :  { %5366 = vmatpush.bf16.msrb.mxu0 %v8881_v15  ;;  %v8972_v15 = vld [vmem:[%s11454_s1 + $0x5d8] sm:$0xff] }
  0x7f   :  { %5379 = vmatpush.bf16.msrb.mxu1 %v8889_v16 }
  0x80   :  { %5392 = vmatpush.bf16.msrb.mxu2 %v8897_v18 }
  0x81   :  { %5405 = vmatpush.bf16.msrb.mxu3 %v8905_v21  ;;  %5367 = vmatmul.bf16.vlgmr.msrb.gmra.mxu0 %v1299_v9  ;;  %v8963_v21 = vld [vmem:[%s11454_s1 + $0x590] sm:$0xff] }
  0x82   :  { %5411 = vmatpush.bf16.msra.mxu0 %v8920_v17  ;;  %5380 = vmatmul.bf16.vlgmr.msrb.gmra.mxu1 %v1300_v11  ;;  %v8947_v17 = vld [vmem:[%s11454_s1 + $0x510] sm:$0xff] }
  0x83   :  { %5424 = vmatpush.bf16.msra.mxu1 %v8928_v19  ;;  %5393 = vmatmul.bf16.vlgmr.msrb.gmra.mxu2 %v1301_v10  ;;  %v8973_v10 = vld [vmem:[%s11454_s1 + $0x5e0] sm:$0xff] }
  0x84   :  { %5437 = vmatpush.bf16.msra.mxu2 %v8936_v20  ;;  %5406 = vmatmul.bf16.vlgmr.msrb.gmra.mxu3 %v1302_v12  ;;  %v8948_v12 = vld [vmem:[%s11454_s1 + $0x518] sm:$0xff]  ;;  %v8955_v20 = vld [vmem:[%s11454_s1 + $0x550] sm:$0xff] }
  0x85   :  { %5450 = vmatpush.bf16.msra.mxu3 %v8944_v22 }
  0x86   :  { %5412 = vmatpush.bf16.msra.mxu0 %v8919_v23 }
  0x87   :  { %5425 = vmatpush.bf16.msra.mxu1 %v8927_v24  ;;  %v8971_v24 = vld [vmem:[%s11454_s1 + $0x5d0] sm:$0xff] }
  0x88   :  { %5438 = vmatpush.bf16.msra.mxu2 %v8935_v25 }
  0x89   :  { %5451 = vmatpush.bf16.msra.mxu3 %v8943_v26  ;;  %v8946_v26 = vld [vmem:[%s11454_s1 + $0x508] sm:$0xff] }
  0x8a   :  { %5413 = vmatpush.bf16.msra.mxu0 %v8918_v27  ;;  %v8954_v27 = vld [vmem:[%s11454_s1 + $0x548] sm:$0xff] }
  0x8b   :  { %5426 = vmatpush.bf16.msra.mxu1 %v8926_v28  ;;  %v8962_v28 = vld [vmem:[%s11454_s1 + $0x588] sm:$0xff] }
  0x8c   :  { %5439 = vmatpush.bf16.msra.mxu2 %v8934_v29  ;;  %v1309_v29 = vld [vmem:[#allocation1 + $0x24] sm:$0xff] }
  0x8d   :  { %5452 = vmatpush.bf16.msra.mxu3 %v8942_v30  ;;  %v1311_v30 = vld [vmem:[#allocation1 + $0x36] sm:$0xff] }
  0x8e   :  { %5414 = vmatpush.bf16.msra.mxu0 %v8917_v31  ;;  %v1310_v31 = vld [vmem:[#allocation1 + $0x2d] sm:$0xff] }
  0x8f   :  { %5427 = vmatpush.bf16.msra.mxu1 %v8925_v32  ;;  %v1312_v32 = vld [vmem:[#allocation1 + $0x3f] sm:$0xff] }
  0x90   :  { %5440 = vmatpush.bf16.msra.mxu2 %v8933_v33  ;;  %v24_v33 = vld [vmem:[%s11453_s0 + $0x18] sm:$0xff] }
  0x91   :  { %5453 = vmatpush.bf16.msra.mxu3 %v8941_v34  ;;  %v8970_v34 = vld [vmem:[%s11454_s1 + $0x5c8] sm:$0xff]  ;;  %1314 = vst [vmem:[#allocation1] ss:$9 sm:$0xff] %v24_v33 }
  0x92   :  { %5415 = vmatpush.bf16.msra.mxu0 %v8916_v35  ;;  %v9014_v33 = vld [vmem:[%s11454_s1 + $0x728] sm:$0xff] }
  0x93   :  { %5428 = vmatpush.bf16.msra.mxu1 %v8924_v36  ;;  %v8945_v36 = vld [vmem:[%s11454_s1 + $0x500] sm:$0xff] }
  0x94   :  { %5441 = vmatpush.bf16.msra.mxu2 %v8932_v37  ;;  %v8953_v37 = vld [vmem:[%s11454_s1 + $0x540] sm:$0xff] }
  0x95   :  { %5454 = vmatpush.bf16.msra.mxu3 %v8940_v38  ;;  %v8961_v38 = vld [vmem:[%s11454_s1 + $0x580] sm:$0xff] }
  0x96   :  { %5416 = vmatpush.bf16.msra.mxu0 %v8915_v39  ;;  %v8984_v39 = vld [vmem:[%s11454_s1 + $0x638] sm:$0xff] }
  0x97   :  { %5429 = vmatpush.bf16.msra.mxu1 %v8923_v40  ;;  %v8992_v40 = vld [vmem:[%s11454_s1 + $0x678] sm:$0xff] }
  0x98   :  { %5442 = vmatpush.bf16.msra.mxu2 %v8931_v41 }
  0x99   :  { %5455 = vmatpush.bf16.msra.mxu3 %v8939_v42  ;;  %v9000_v42 = vld [vmem:[%s11454_s1 + $0x6b8] sm:$0xff] }
  0x9a   :  { %5417 = vmatpush.bf16.msra.mxu0 %v8914_v43  ;;  %v8969_v43 = vld [vmem:[%s11454_s1 + $0x5c0] sm:$0xff] }
  0x9b   :  { %5430 = vmatpush.bf16.msra.mxu1 %v8922_v44  ;;  %v9008_v44 = vld [vmem:[%s11454_s1 + $0x6f8] sm:$0xff] }
  0x9c   :  { %5443 = vmatpush.bf16.msra.mxu2 %v8930_v45  ;;  %v8983_v45 = vld [vmem:[%s11454_s1 + $0x630] sm:$0xff] }
  0x9d   :  { %5456 = vmatpush.bf16.msra.mxu3 %v8938_v46  ;;  %v8991_v46 = vld [vmem:[%s11454_s1 + $0x670] sm:$0xff] }
  0x9e   :  { %5418 = vmatpush.bf16.msra.mxu0 %v8913_v47  ;;  %v5212_v5 = vpop.f32.mrf.mxu0  ;;  %v8999_v47 = vld [vmem:[%s11454_s1 + $0x6b0] sm:$0xff] }
  0x9f   :  { %5431 = vmatpush.bf16.msra.mxu1 %v8921_v48  ;;  %v5213_v8 = vadd.f32 %v9410_v2, %v5212_v5  ;;  %v5225_v9 = vpop.f32.mrf.mxu1  ;;  %v9007_v48 = vld [vmem:[%s11454_s1 + $0x6f0] sm:$0xff] }
  0xa0   :  { %5444 = vmatpush.bf16.msra.mxu2 %v8929_v49  ;;  %v8982_v49 = vld [vmem:[%s11454_s1 + $0x628] sm:$0xff]  ;;  %v8995_v5 = vld [vmem:[%s11454_s1 + $0x690] sm:$0xff] }
  0xa1   :  { %5457 = vmatpush.bf16.msra.mxu3 %v8937_v53  ;;  %5419 = vmatmul.bf16.vlgmr.msra.gmra.mxu0 %v1305_v54  ;;  %v5226_v11 = vadd.f32 %v5225_v9, %v5213_v8  ;;  %v8981_v53 = vld [vmem:[%s11454_s1 + $0x620] sm:$0xff] }
  0xa2   :  { %5463 = vmatpush.bf16.msrb.mxu0 %v8952_v50  ;;  %5432 = vmatmul.bf16.vlgmr.msra.gmra.mxu1 %v1306_v57  ;;  %v8990_v50 = vld [vmem:[%s11454_s1 + $0x668] sm:$0xff]  ;;  %v8989_v54 = vld [vmem:[%s11454_s1 + $0x660] sm:$0xff] }
  0xa3   :  { %5476 = vmatpush.bf16.msrb.mxu1 %v8960_v51  ;;  %5445 = vmatmul.bf16.vlgmr.msra.gmra.mxu2 %v1307_v55  ;;  %v8998_v51 = vld [vmem:[%s11454_s1 + $0x6a8] sm:$0xff]  ;;  %v8997_v55 = vld [vmem:[%s11454_s1 + $0x6a0] sm:$0xff] }
  0xa4   :  { %5489 = vmatpush.bf16.msrb.mxu2 %v8968_v52  ;;  %5458 = vmatmul.bf16.vlgmr.msra.gmra.mxu3 %v1308_v59  ;;  %v9006_v52 = vld [vmem:[%s11454_s1 + $0x6e8] sm:$0xff]  ;;  %v9005_v59 = vld [vmem:[%s11454_s1 + $0x6e0] sm:$0xff] }
  0xa5   :  { %5502 = vmatpush.bf16.msrb.mxu3 %v8976_v56 }
  0xa6   :  { %5464 = vmatpush.bf16.msrb.mxu0 %v8951_v58  ;;  %v5238_v16 = vpop.f32.mrf.mxu2  ;;  %v5214_v19 = vpop.f32.mrf.mxu0 }
  0xa7   :  { %5477 = vmatpush.bf16.msrb.mxu1 %v8959_v60  ;;  %v5239_v18 = vadd.f32 %v5238_v16, %v5226_v11  ;;  %v5251_v22 = vpop.f32.mrf.mxu3  ;;  %v5227_v23 = vpop.f32.mrf.mxu1  ;;  %v8980_v60 = vld [vmem:[%s11454_s1 + $0x618] sm:$0xff]  ;;  %v8978_v11 = vld [vmem:[%s11454_s1 + $0x608] sm:$0xff]  ;;  %v8977_v16 = vld [vmem:[%s11454_s1 + $0x600] sm:$0xff] }
  0xa8   :  { %5490 = vmatpush.bf16.msrb.mxu2 %v8967_v61  ;;  %v9001_v23 = vld [vmem:[%s11454_s1 + $0x6c0] sm:$0xff] }
  0xa9   :  { %5503 = vmatpush.bf16.msrb.mxu3 %v8975_v62  ;;  %v5252_v25 = vadd.f32 %v5251_v22, %v5239_v18  ;;  %v8988_v62 = vld [vmem:[%s11454_s1 + $0x658] sm:$0xff]  ;;  %v8993_v18 = vld [vmem:[%s11454_s1 + $0x680] sm:$0xff] }
  0xaa   :  { %5465 = vmatpush.bf16.msrb.mxu0 %v8950_v63  ;;  %v8996_v63 = vld [vmem:[%s11454_s1 + $0x698] sm:$0xff] }
  0xab   :  { %5478 = vmatpush.bf16.msrb.mxu1 %v8958_v0  ;;  %v9032_v22 = vld [vmem:[%s11454_s1 + $0x7b8] sm:$0xff] }
  0xac   :  { %5491 = vmatpush.bf16.msrb.mxu2 %v8966_v1  ;;  %v9004_v1 = vld [vmem:[%s11454_s1 + $0x6d8] sm:$0xff] }
  0xad   :  { %5504 = vmatpush.bf16.msrb.mxu3 %v8974_v3  ;;  %v8979_v3 = vld [vmem:[%s11454_s1 + $0x610] sm:$0xff] }
  0xae   :  { %5466 = vmatpush.bf16.msrb.mxu0 %v8949_v4  ;;  %v5240_v35 = vpop.f32.mrf.mxu2  ;;  %v8987_v4 = vld [vmem:[%s11454_s1 + $0x650] sm:$0xff] }
  0xaf   :  { %5479 = vmatpush.bf16.msrb.mxu1 %v8957_v6  ;;  %v5253_v41 = vpop.f32.mrf.mxu3  ;;  %v9030_v35 = vld [vmem:[%s11454_s1 + $0x7a8] sm:$0xff] }
  0xb0   :  { %5492 = vmatpush.bf16.msrb.mxu2 %v8965_v7  ;;  %v9029_v41 = vld [vmem:[%s11454_s1 + $0x7a0] sm:$0xff] }
  0xb1   :  { %5505 = vmatpush.bf16.msrb.mxu3 %v8973_v10  ;;  %v9003_v10 = vld [vmem:[%s11454_s1 + $0x6d0] sm:$0xff] }
  0xb2   :  { %5467 = vmatpush.bf16.msrb.mxu0 %v8948_v12  ;;  %v8986_v12 = vld [vmem:[%s11454_s1 + $0x648] sm:$0xff] }
  0xb3   :  { %5480 = vmatpush.bf16.msrb.mxu1 %v8956_v13  ;;  %v8994_v13 = vld [vmem:[%s11454_s1 + $0x688] sm:$0xff] }
  0xb4   :  { %5493 = vmatpush.bf16.msrb.mxu2 %v8964_v14 }
  0xb5   :  { %5506 = vmatpush.bf16.msrb.mxu3 %v8972_v15  ;;  %v9002_v15 = vld [vmem:[%s11454_s1 + $0x6c8] sm:$0xff] }
  0xb6   :  { %5468 = vmatpush.bf16.msrb.mxu0 %v8947_v17  ;;  %v8985_v17 = vld [vmem:[%s11454_s1 + $0x640] sm:$0xff] }
  0xb7   :  { %5481 = vmatpush.bf16.msrb.mxu1 %v8955_v20  ;;  %v9016_v20 = vld [vmem:[%s11454_s1 + $0x738] sm:$0xff] }
  0xb8   :  { %5494 = vmatpush.bf16.msrb.mxu2 %v8963_v21  ;;  %v9024_v21 = vld [vmem:[%s11454_s1 + $0x778] sm:$0xff] }
  0xb9   :  { %5507 = vmatpush.bf16.msrb.mxu3 %v8971_v24  ;;  %v1315_v24 = vld [vmem:[#allocation1] sm:$0xff] }
  0xba   :  { %5469 = vmatpush.bf16.msrb.mxu0 %v8946_v26  ;;  %v9040_v26 = vld [vmem:[%s11454_s1 + $0x7f8] sm:$0xff] }
  0xbb   :  { %5482 = vmatpush.bf16.msrb.mxu1 %v8954_v27  ;;  %v1316_v27 = vld [vmem:[#allocation1 + $0x9] sm:$0xff] }
  0xbc   :  { %5495 = vmatpush.bf16.msrb.mxu2 %v8962_v28  ;;  %v9015_v28 = vld [vmem:[%s11454_s1 + $0x730] sm:$0xff] }
  0xbd   :  { %5508 = vmatpush.bf16.msrb.mxu3 %v8970_v34  ;;  %v9022_v34 = vld [vmem:[%s11454_s1 + $0x768] sm:$0xff] }
  0xbe   :  { %5470 = vmatpush.bf16.msrb.mxu0 %v8945_v36  ;;  %v5264_v56 = vpop.f32.mrf.mxu0  ;;  %v9038_v36 = vld [vmem:[%s11454_s1 + $0x7e8] sm:$0xff] }
  0xbf   :  { %5483 = vmatpush.bf16.msrb.mxu1 %v8953_v37  ;;  %v5277_v57 = vpop.f32.mrf.mxu1  ;;  %v5265_v58 = vadd.f32 %v5264_v56, %v5252_v25  ;;  %v1317_v25 = vld [vmem:[#allocation1 + $0x12] sm:$0xff] }
  0xc0   :  { %5496 = vmatpush.bf16.msrb.mxu2 %v8961_v38  ;;  %v9027_v56 = vld [vmem:[%s11454_s1 + $0x790] sm:$0xff] }
  0xc1   :  { %5509 = vmatpush.bf16.msrb.mxu3 %v8969_v43  ;;  %5471 = vmatmul.bf16.vlgmr.msrb.gmra.mxu0 %v1309_v29  ;;  %v5278_v61 = vadd.f32 %v5277_v57, %v5265_v58  ;;  %v1318_v29 = vld [vmem:[#allocation1 + $0x1b] sm:$0xff]  ;;  %v9035_v58 = vld [vmem:[%s11454_s1 + $0x7d0] sm:$0xff] }
  0xc2   :  { %5515 = vmatpush.bf16.msra.mxu0 %v8984_v39  ;;  %5484 = vmatmul.bf16.vlgmr.msrb.gmra.mxu1 %v1310_v31  ;;  %v9031_v31 = vld [vmem:[%s11454_s1 + $0x7b0] sm:$0xff]  ;;  %v9013_v39 = vld [vmem:[%s11454_s1 + $0x720] sm:$0xff] }
  0xc3   :  { %5528 = vmatpush.bf16.msra.mxu1 %v8992_v40  ;;  %5497 = vmatmul.bf16.vlgmr.msrb.gmra.mxu2 %v1311_v30  ;;  %v9023_v30 = vld [vmem:[%s11454_s1 + $0x770] sm:$0xff]  ;;  %v9021_v40 = vld [vmem:[%s11454_s1 + $0x760] sm:$0xff] }
  0xc4   :  { %5541 = vmatpush.bf16.msra.mxu2 %v9000_v42  ;;  %5510 = vmatmul.bf16.vlgmr.msrb.gmra.mxu3 %v1312_v32  ;;  %v9039_v32 = vld [vmem:[%s11454_s1 + $0x7f0] sm:$0xff] }
  0xc5   :  { %5554 = vmatpush.bf16.msra.mxu3 %v9008_v44  ;;  %v9037_v44 = vld [vmem:[%s11454_s1 + $0x7e0] sm:$0xff] }
  0xc6   :  { %5516 = vmatpush.bf16.msra.mxu0 %v8983_v45  ;;  %v5290_v0 = vpop.f32.mrf.mxu2  ;;  %v5266_v7 = vpop.f32.mrf.mxu0  ;;  %v9012_v45 = vld [vmem:[%s11454_s1 + $0x718] sm:$0xff] }
  0xc7   :  { %5529 = vmatpush.bf16.msra.mxu1 %v8991_v46  ;;  %v5291_v2 = vadd.f32 %v5290_v0, %v5278_v61  ;;  %v5303_v6 = vpop.f32.mrf.mxu3  ;;  %v5279_v9 = vpop.f32.mrf.mxu1  ;;  %v9020_v46 = vld [vmem:[%s11454_s1 + $0x758] sm:$0xff]  ;;  %v9026_v61 = vld [vmem:[%s11454_s1 + $0x788] sm:$0xff]  ;;  %v9017_v7 = vld [vmem:[%s11454_s1 + $0x740] sm:$0xff] }
  0xc8   :  { %5542 = vmatpush.bf16.msra.mxu2 %v8999_v47  ;;  %v9028_v47 = vld [vmem:[%s11454_s1 + $0x798] sm:$0xff]  ;;  %v1320_v0 = vld [vmem:[#allocation1 + $0x2d] sm:$0xff] }
  0xc9   :  { %5555 = vmatpush.bf16.msra.mxu3 %v9007_v48  ;;  %v5304_v8 = vadd.f32 %v5303_v6, %v5291_v2  ;;  %v9048_v9 = vld [vmem:[%s11454_s1 + $0x838] sm:$0xff] }
  0xca   :  { %5517 = vmatpush.bf16.msra.mxu0 %v8982_v49 }
  0xcb   :  { %5530 = vmatpush.bf16.msra.mxu1 %v8990_v50  ;;  %v9036_v50 = vld [vmem:[%s11454_s1 + $0x7d8] sm:$0xff] }
  0xcc   :  { %5543 = vmatpush.bf16.msra.mxu2 %v8998_v51 }
  0xcd   :  { %5556 = vmatpush.bf16.msra.mxu3 %v9006_v52 }
  0xce   :  { %5518 = vmatpush.bf16.msra.mxu0 %v8981_v53  ;;  %v5292_v14 = vpop.f32.mrf.mxu2  ;;  %v9011_v53 = vld [vmem:[%s11454_s1 + $0x710] sm:$0xff] }
  0xcf   :  { %5531 = vmatpush.bf16.msra.mxu1 %v8989_v54  ;;  %v5305_v19 = vpop.f32.mrf.mxu3  ;;  %v9047_v14 = vld [vmem:[%s11454_s1 + $0x830] sm:$0xff] }
  0xd0   :  { %5544 = vmatpush.bf16.msra.mxu2 %v8997_v55  ;;  %v9019_v55 = vld [vmem:[%s11454_s1 + $0x750] sm:$0xff]  ;;  %v9054_v19 = vld [vmem:[%s11454_s1 + $0x868] sm:$0xff] }
  0xd1   :  { %5557 = vmatpush.bf16.msra.mxu3 %v9005_v59  ;;  %v9010_v59 = vld [vmem:[%s11454_s1 + $0x708] sm:$0xff] }
  0xd2   :  { %5519 = vmatpush.bf16.msra.mxu0 %v8980_v60  ;;  %v9018_v60 = vld [vmem:[%s11454_s1 + $0x748] sm:$0xff] }
  0xd3   :  { %5532 = vmatpush.bf16.msra.mxu1 %v8988_v62  ;;  %v1319_v62 = vld [vmem:[#allocation1 + $0x24] sm:$0xff] }
  0xd4   :  { %5545 = vmatpush.bf16.msra.mxu2 %v8996_v63  ;;  %v1321_v63 = vld [vmem:[#allocation1 + $0x36] sm:$0xff] }
  0xd5   :  { %5558 = vmatpush.bf16.msra.mxu3 %v9004_v1  ;;  %v1322_v1 = vld [vmem:[#allocation1 + $0x3f] sm:$0xff] }
  0xd6   :  { %5520 = vmatpush.bf16.msra.mxu0 %v8979_v3  ;;  %v25_v3 = vld [vmem:[%s11453_s0 + $0x20] sm:$0xff] }
  0xd7   :  { %5533 = vmatpush.bf16.msra.mxu1 %v8987_v4  ;;  %v9034_v4 = vld [vmem:[%s11454_s1 + $0x7c8] sm:$0xff]  ;;  %1324 = vst [vmem:[#allocation1] ss:$9 sm:$0xff] %v25_v3 }
  0xd8   :  { %5546 = vmatpush.bf16.msra.mxu2 %v8995_v5  ;;  %v9009_v5 = vld [vmem:[%s11454_s1 + $0x700] sm:$0xff]  ;;  %v9086_v3 = vld [vmem:[%s11454_s1 + $0x968] sm:$0xff] }
  0xd9   :  { %5559 = vmatpush.bf16.msra.mxu3 %v9003_v10  ;;  %v9056_v10 = vld [vmem:[%s11454_s1 + $0x878] sm:$0xff] }
  0xda   :  { %5521 = vmatpush.bf16.msra.mxu0 %v8978_v11  ;;  %v9064_v11 = vld [vmem:[%s11454_s1 + $0x8b8] sm:$0xff] }
  0xdb   :  { %5534 = vmatpush.bf16.msra.mxu1 %v8986_v12  ;;  %v9033_v12 = vld [vmem:[%s11454_s1 + $0x7c0] sm:$0xff] }
  0xdc   :  { %5547 = vmatpush.bf16.msra.mxu2 %v8994_v13  ;;  %v9072_v13 = vld [vmem:[%s11454_s1 + $0x8f8] sm:$0xff] }
  0xdd   :  { %5560 = vmatpush.bf16.msra.mxu3 %v9002_v15  ;;  %v9055_v15 = vld [vmem:[%s11454_s1 + $0x870] sm:$0xff] }
  0xde   :  { %5522 = vmatpush.bf16.msra.mxu0 %v8977_v16  ;;  %v5316_v37 = vpop.f32.mrf.mxu0  ;;  %v9063_v16 = vld [vmem:[%s11454_s1 + $0x8b0] sm:$0xff] }
  0xdf   :  { %5535 = vmatpush.bf16.msra.mxu1 %v8985_v17  ;;  %v5317_v38 = vadd.f32 %v5316_v37, %v5304_v8  ;;  %v5329_v42 = vpop.f32.mrf.mxu1  ;;  %v9025_v8 = vld [vmem:[%s11454_s1 + $0x780] sm:$0xff]  ;;  %v9071_v17 = vld [vmem:[%s11454_s1 + $0x8f0] sm:$0xff] }
  0xe0   :  { %5548 = vmatpush.bf16.msra.mxu2 %v8993_v18  ;;  %v9046_v18 = vld [vmem:[%s11454_s1 + $0x828] sm:$0xff] }
  0xe1   :  { %5561 = vmatpush.bf16.msra.mxu3 %v9001_v23  ;;  %5523 = vmatmul.bf16.vlgmr.msra.gmra.mxu0 %v1315_v24  ;;  %v5330_v43 = vadd.f32 %v5329_v42, %v5317_v38  ;;  %v9045_v24 = vld [vmem:[%s11454_s1 + $0x820] sm:$0xff]  ;;  %v9043_v38 = vld [vmem:[%s11454_s1 + $0x810] sm:$0xff] }
  0xe2   :  { %5567 = vmatpush.bf16.msrb.mxu0 %v9016_v20  ;;  %5536 = vmatmul.bf16.vlgmr.msra.gmra.mxu1 %v1316_v27  ;;  %v9062_v20 = vld [vmem:[%s11454_s1 + $0x8a8] sm:$0xff]  ;;  %v9061_v27 = vld [vmem:[%s11454_s1 + $0x8a0] sm:$0xff]  ;;  %v9059_v42 = vld [vmem:[%s11454_s1 + $0x890] sm:$0xff] }
  0xe3   :  { %5580 = vmatpush.bf16.msrb.mxu1 %v9024_v21  ;;  %5549 = vmatmul.bf16.vlgmr.msra.gmra.mxu2 %v1317_v25  ;;  %v9070_v21 = vld [vmem:[%s11454_s1 + $0x8e8] sm:$0xff] }
  0xe4   :  { %5593 = vmatpush.bf16.msrb.mxu2 %v9032_v22  ;;  %5562 = vmatmul.bf16.vlgmr.msra.gmra.mxu3 %v1318_v29  ;;  %v9069_v29 = vld [vmem:[%s11454_s1 + $0x8e0] sm:$0xff] }
  0xe5   :  { %5606 = vmatpush.bf16.msrb.mxu3 %v9040_v26  ;;  %v9053_v26 = vld [vmem:[%s11454_s1 + $0x860] sm:$0xff] }
  0xe6   :  { %5568 = vmatpush.bf16.msrb.mxu0 %v9015_v28  ;;  %v5342_v48 = vpop.f32.mrf.mxu2  ;;  %v5318_v51 = vpop.f32.mrf.mxu0 }
  0xe7   :  { %5581 = vmatpush.bf16.msrb.mxu1 %v9023_v30  ;;  %v5343_v49 = vadd.f32 %v5342_v48, %v5330_v43  ;;  %v5355_v52 = vpop.f32.mrf.mxu3  ;;  %v5331_v57 = vpop.f32.mrf.mxu1  ;;  %v9044_v30 = vld [vmem:[%s11454_s1 + $0x818] sm:$0xff]  ;;  %v9067_v43 = vld [vmem:[%s11454_s1 + $0x8d0] sm:$0xff]  ;;  %v9066_v48 = vld [vmem:[%s11454_s1 + $0x8c8] sm:$0xff] }
  0xe8   :  { %5594 = vmatpush.bf16.msrb.mxu2 %v9031_v31  ;;  %v9052_v31 = vld [vmem:[%s11454_s1 + $0x858] sm:$0xff]  ;;  %v9049_v51 = vld [vmem:[%s11454_s1 + $0x840] sm:$0xff] }
  0xe9   :  { %5607 = vmatpush.bf16.msrb.mxu3 %v9039_v32  ;;  %v5356_v54 = vadd.f32 %v5355_v52, %v5343_v49  ;;  %v9060_v32 = vld [vmem:[%s11454_s1 + $0x898] sm:$0xff]  ;;  %v9057_v52 = vld [vmem:[%s11454_s1 + $0x880] sm:$0xff] }
  0xea   :  { %5569 = vmatpush.bf16.msrb.mxu0 %v9014_v33  ;;  %v1325_v57 = vld [vmem:[#allocation1] sm:$0xff] }
  0xeb   :  { %5582 = vmatpush.bf16.msrb.mxu1 %v9022_v34 }
  0xec   :  { %5595 = vmatpush.bf16.msrb.mxu2 %v9030_v35  ;;  %v9068_v35 = vld [vmem:[%s11454_s1 + $0x8d8] sm:$0xff] }
  0xed   :  { %5608 = vmatpush.bf16.msrb.mxu3 %v9038_v36 }
  0xee   :  { %5570 = vmatpush.bf16.msrb.mxu0 %v9013_v39  ;;  %v5344_v2 = vpop.f32.mrf.mxu2 }
  0xef   :  { %5583 = vmatpush.bf16.msrb.mxu1 %v9021_v40  ;;  %v5357_v6 = vpop.f32.mrf.mxu3  ;;  %v9078_v2 = vld [vmem:[%s11454_s1 + $0x928] sm:$0xff] }
  0xf0   :  { %5596 = vmatpush.bf16.msrb.mxu2 %v9029_v41  ;;  %v9051_v41 = vld [vmem:[%s11454_s1 + $0x850] sm:$0xff] }
  0xf1   :  { %5609 = vmatpush.bf16.msrb.mxu3 %v9037_v44  ;;  %v9042_v44 = vld [vmem:[%s11454_s1 + $0x808] sm:$0xff] }
  0xf2   :  { %5571 = vmatpush.bf16.msrb.mxu0 %v9012_v45  ;;  %v9050_v45 = vld [vmem:[%s11454_s1 + $0x848] sm:$0xff] }
  0xf3   :  { %5584 = vmatpush.bf16.msrb.mxu1 %v9020_v46  ;;  %v9058_v46 = vld [vmem:[%s11454_s1 + $0x888] sm:$0xff] }
  0xf4   :  { %5597 = vmatpush.bf16.msrb.mxu2 %v9028_v47 }
  0xf5   :  { %5610 = vmatpush.bf16.msrb.mxu3 %v9036_v50  ;;  %v9041_v50 = vld [vmem:[%s11454_s1 + $0x800] sm:$0xff] }
  0xf6   :  { %5572 = vmatpush.bf16.msrb.mxu0 %v9011_v53  ;;  %v9080_v53 = vld [vmem:[%s11454_s1 + $0x938] sm:$0xff] }
  0xf7   :  { %5585 = vmatpush.bf16.msrb.mxu1 %v9019_v55  ;;  %v9096_v55 = vld [vmem:[%s11454_s1 + $0x9b8] sm:$0xff] }
  0xf8   :  { %5598 = vmatpush.bf16.msrb.mxu2 %v9027_v56  ;;  %v9065_v56 = vld [vmem:[%s11454_s1 + $0x8c0] sm:$0xff] }
  0xf9   :  { %5611 = vmatpush.bf16.msrb.mxu3 %v9035_v58  ;;  %v1327_v58 = vld [vmem:[#allocation1 + $0x12] sm:$0xff] }
  0xfa   :  { %5573 = vmatpush.bf16.msrb.mxu0 %v9010_v59  ;;  %v9104_v59 = vld [vmem:[%s11454_s1 + $0x9f8] sm:$0xff] }
  0xfb   :  { %5586 = vmatpush.bf16.msrb.mxu1 %v9018_v60  ;;  %v1326_v60 = vld [vmem:[#allocation1 + $0x9] sm:$0xff] }
  0xfc   :  { %5599 = vmatpush.bf16.msrb.mxu2 %v9026_v61  ;;  %v9079_v61 = vld [vmem:[%s11454_s1 + $0x930] sm:$0xff] }
  0xfd   :  { %5612 = vmatpush.bf16.msrb.mxu3 %v9034_v4  ;;  %v9094_v4 = vld [vmem:[%s11454_s1 + $0x9a8] sm:$0xff] }
  0xfe   :  { %5574 = vmatpush.bf16.msrb.mxu0 %v9009_v5  ;;  %v5368_v22 = vpop.f32.mrf.mxu0  ;;  %v9102_v5 = vld [vmem:[%s11454_s1 + $0x9e8] sm:$0xff] }
  0xff   :  { %5587 = vmatpush.bf16.msrb.mxu1 %v9017_v7  ;;  %v5369_v23 = vadd.f32 %v5368_v22, %v5356_v54  ;;  %v5381_v25 = vpop.f32.mrf.mxu1  ;;  %v9088_v54 = vld [vmem:[%s11454_s1 + $0x978] sm:$0xff] }
 0x100   :  { %5600 = vmatpush.bf16.msrb.mxu2 %v9025_v8  ;;  %v9077_v8 = vld [vmem:[%s11454_s1 + $0x920] sm:$0xff] }
 0x101   :  { %5613 = vmatpush.bf16.msrb.mxu3 %v9033_v12  ;;  %5575 = vmatmul.bf16.vlgmr.msrb.gmra.mxu0 %v1319_v62  ;;  %v5382_v28 = vadd.f32 %v5381_v25, %v5369_v23  ;;  %v1328_v62 = vld [vmem:[#allocation1 + $0x1b] sm:$0xff]  ;;  %v9075_v23 = vld [vmem:[%s11454_s1 + $0x910] sm:$0xff] }
 0x102   :  { %5619 = vmatpush.bf16.msra.mxu0 %v9048_v9  ;;  %5588 = vmatmul.bf16.vlgmr.msrb.gmra.mxu1 %v1320_v0  ;;  %v9095_v0 = vld [vmem:[%s11454_s1 + $0x9b0] sm:$0xff] }
 0x103   :  { %5632 = vmatpush.bf16.msra.mxu1 %v9056_v10  ;;  %5601 = vmatmul.bf16.vlgmr.msrb.gmra.mxu2 %v1321_v63  ;;  %v9087_v63 = vld [vmem:[%s11454_s1 + $0x970] sm:$0xff]  ;;  %v9085_v10 = vld [vmem:[%s11454_s1 + $0x960] sm:$0xff] }
 0x104   :  { %5645 = vmatpush.bf16.msra.mxu2 %v9064_v11  ;;  %5614 = vmatmul.bf16.vlgmr.msrb.gmra.mxu3 %v1322_v1  ;;  %v9103_v1 = vld [vmem:[%s11454_s1 + $0x9f0] sm:$0xff]  ;;  %v9093_v11 = vld [vmem:[%s11454_s1 + $0x9a0] sm:$0xff] }
 0x105   :  { %5658 = vmatpush.bf16.msra.mxu3 %v9072_v13  ;;  %v9101_v13 = vld [vmem:[%s11454_s1 + $0x9e0] sm:$0xff]  ;;  %v9083_v25 = vld [vmem:[%s11454_s1 + $0x950] sm:$0xff] }
 0x106   :  { %5620 = vmatpush.bf16.msra.mxu0 %v9047_v14  ;;  %v5394_v33 = vpop.f32.mrf.mxu2  ;;  %v5370_v37 = vpop.f32.mrf.mxu0  ;;  %v9076_v14 = vld [vmem:[%s11454_s1 + $0x918] sm:$0xff] }
 0x107   :  { %5633 = vmatpush.bf16.msra.mxu1 %v9055_v15  ;;  %v5395_v34 = vadd.f32 %v5394_v33, %v5382_v28  ;;  %v5407_v36 = vpop.f32.mrf.mxu3  ;;  %v5383_v39 = vpop.f32.mrf.mxu1  ;;  %v9084_v15 = vld [vmem:[%s11454_s1 + $0x958] sm:$0xff]  ;;  %v9074_v28 = vld [vmem:[%s11454_s1 + $0x908] sm:$0xff] }
 0x108   :  { %5646 = vmatpush.bf16.msra.mxu2 %v9063_v16  ;;  %v9092_v16 = vld [vmem:[%s11454_s1 + $0x998] sm:$0xff]  ;;  %v9098_v37 = vld [vmem:[%s11454_s1 + $0x9c8] sm:$0xff]  ;;  %v9073_v39 = vld [vmem:[%s11454_s1 + $0x900] sm:$0xff] }
 0x109   :  { %5659 = vmatpush.bf16.msra.mxu3 %v9071_v17  ;;  %v5408_v40 = vadd.f32 %v5407_v36, %v5395_v34  ;;  %v1330_v34 = vld [vmem:[#allocation1 + $0x2d] sm:$0xff] }
 0x10a   :  { %5621 = vmatpush.bf16.msra.mxu0 %v9046_v18  ;;  %v26_v36 = vld [vmem:[%s11453_s0 + $0x28] sm:$0xff] }
 0x10b   :  { %5634 = vmatpush.bf16.msra.mxu1 %v9054_v19  ;;  %v9100_v19 = vld [vmem:[%s11454_s1 + $0x9d8] sm:$0xff] }
 0x10c   :  { %5647 = vmatpush.bf16.msra.mxu2 %v9062_v20 }
 0x10d   :  { %5660 = vmatpush.bf16.msra.mxu3 %v9070_v21 }
 0x10e   :  { %5622 = vmatpush.bf16.msra.mxu0 %v9045_v24  ;;  %v5396_v47 = vpop.f32.mrf.mxu2 }
 0x10f   :  { %5635 = vmatpush.bf16.msra.mxu1 %v9053_v26  ;;  %v5409_v49 = vpop.f32.mrf.mxu3  ;;  %v9091_v26 = vld [vmem:[%s11454_s1 + $0x990] sm:$0xff] }
 0x110   :  { %5648 = vmatpush.bf16.msra.mxu2 %v9061_v27  ;;  %v9099_v27 = vld [vmem:[%s11454_s1 + $0x9d0] sm:$0xff] }
 0x111   :  { %5661 = vmatpush.bf16.msra.mxu3 %v9069_v29  ;;  %v9082_v29 = vld [vmem:[%s11454_s1 + $0x948] sm:$0xff]  ;;  %v9111_v47 = vld [vmem:[%s11454_s1 + $0xa30] sm:$0xff] }
 0x112   :  { %5623 = vmatpush.bf16.msra.mxu0 %v9044_v30  ;;  %v9090_v30 = vld [vmem:[%s11454_s1 + $0x988] sm:$0xff]  ;;  %v9127_v49 = vld [vmem:[%s11454_s1 + $0xab0] sm:$0xff] }
 0x113   :  { %5636 = vmatpush.bf16.msra.mxu1 %v9052_v31  ;;  %v1329_v31 = vld [vmem:[#allocation1 + $0x24] sm:$0xff] }
 0x114   :  { %5649 = vmatpush.bf16.msra.mxu2 %v9060_v32  ;;  %v1331_v32 = vld [vmem:[#allocation1 + $0x36] sm:$0xff] }
 0x115   :  { %5662 = vmatpush.bf16.msra.mxu3 %v9068_v35  ;;  %v1332_v35 = vld [vmem:[#allocation1 + $0x3f] sm:$0xff] }
 0x116   :  { %5624 = vmatpush.bf16.msra.mxu0 %v9043_v38  ;;  %1334 = vst [vmem:[#allocation1] ss:$9 sm:$0xff] %v26_v36  ;;  %v9150_v36 = vld [vmem:[%s11454_s1 + $0xb68] sm:$0xff] }
 0x117   :  { %5637 = vmatpush.bf16.msra.mxu1 %v9051_v41  ;;  %v9089_v41 = vld [vmem:[%s11454_s1 + $0x980] sm:$0xff] }
 0x118   :  { %5650 = vmatpush.bf16.msra.mxu2 %v9059_v42  ;;  %v9112_v42 = vld [vmem:[%s11454_s1 + $0xa38] sm:$0xff] }
 0x119   :  { %5663 = vmatpush.bf16.msra.mxu3 %v9067_v43  ;;  %v9120_v43 = vld [vmem:[%s11454_s1 + $0xa78] sm:$0xff] }
 0x11a   :  { %5625 = vmatpush.bf16.msra.mxu0 %v9042_v44  ;;  %v9128_v44 = vld [vmem:[%s11454_s1 + $0xab8] sm:$0xff] }
 0x11b   :  { %5638 = vmatpush.bf16.msra.mxu1 %v9050_v45  ;;  %v9097_v45 = vld [vmem:[%s11454_s1 + $0x9c0] sm:$0xff] }
 0x11c   :  { %5651 = vmatpush.bf16.msra.mxu2 %v9058_v46  ;;  %v9136_v46 = vld [vmem:[%s11454_s1 + $0xaf8] sm:$0xff] }
 0x11d   :  { %5664 = vmatpush.bf16.msra.mxu3 %v9066_v48  ;;  %v9119_v48 = vld [vmem:[%s11454_s1 + $0xa70] sm:$0xff] }
 0x11e   :  { %5626 = vmatpush.bf16.msra.mxu0 %v9041_v50  ;;  %v5420_v6 = vpop.f32.mrf.mxu0  ;;  %v9135_v50 = vld [vmem:[%s11454_s1 + $0xaf0] sm:$0xff] }
 0x11f   :  { %5639 = vmatpush.bf16.msra.mxu1 %v9049_v51  ;;  %v5421_v7 = vadd.f32 %v5420_v6, %v5408_v40  ;;  %v5433_v9 = vpop.f32.mrf.mxu1  ;;  %v9081_v40 = vld [vmem:[%s11454_s1 + $0x940] sm:$0xff]  ;;  %v9110_v51 = vld [vmem:[%s11454_s1 + $0xa28] sm:$0xff] }
 0x120   :  { %5652 = vmatpush.bf16.msra.mxu2 %v9057_v52  ;;  %v9118_v52 = vld [vmem:[%s11454_s1 + $0xa68] sm:$0xff] }
 0x121   :  { %5665 = vmatpush.bf16.msra.mxu3 %v9065_v56  ;;  %5627 = vmatmul.bf16.vlgmr.msra.gmra.mxu0 %v1325_v57  ;;  %v5434_v12 = vadd.f32 %v5433_v9, %v5421_v7  ;;  %v9109_v57 = vld [vmem:[%s11454_s1 + $0xa20] sm:$0xff] }
 0x122   :  { %5671 = vmatpush.bf16.msrb.mxu0 %v9080_v53  ;;  %5640 = vmatmul.bf16.vlgmr.msra.gmra.mxu1 %v1326_v60  ;;  %v9126_v53 = vld [vmem:[%s11454_s1 + $0xaa8] sm:$0xff]  ;;  %v9125_v60 = vld [vmem:[%s11454_s1 + $0xaa0] sm:$0xff] }
 0x123   :  { %5684 = vmatpush.bf16.msrb.mxu1 %v9088_v54  ;;  %5653 = vmatmul.bf16.vlgmr.msra.gmra.mxu2 %v1327_v58  ;;  %v9134_v54 = vld [vmem:[%s11454_s1 + $0xae8] sm:$0xff] }
 0x124   :  { %5697 = vmatpush.bf16.msrb.mxu2 %v9096_v55  ;;  %5666 = vmatmul.bf16.vlgmr.msra.gmra.mxu3 %v1328_v62  ;;  %v9133_v62 = vld [vmem:[%s11454_s1 + $0xae0] sm:$0xff] }
 0x125   :  { %5710 = vmatpush.bf16.msrb.mxu3 %v9104_v59  ;;  %v9117_v59 = vld [vmem:[%s11454_s1 + $0xa60] sm:$0xff] }
 0x126   :  { %5672 = vmatpush.bf16.msrb.mxu0 %v9079_v61  ;;  %v5446_v17 = vpop.f32.mrf.mxu2  ;;  %v5422_v21 = vpop.f32.mrf.mxu0 }
 0x127   :  { %5685 = vmatpush.bf16.msrb.mxu1 %v9087_v63  ;;  %v5447_v18 = vadd.f32 %v5446_v17, %v5434_v12  ;;  %v5459_v20 = vpop.f32.mrf.mxu3  ;;  %v5435_v24 = vpop.f32.mrf.mxu1  ;;  %v9108_v63 = vld [vmem:[%s11454_s1 + $0xa18] sm:$0xff]  ;;  %v9131_v12 = vld [vmem:[%s11454_s1 + $0xad0] sm:$0xff]  ;;  %v9130_v17 = vld [vmem:[%s11454_s1 + $0xac8] sm:$0xff] }
 0x128   :  { %5698 = vmatpush.bf16.msrb.mxu2 %v9095_v0  ;;  %v9116_v0 = vld [vmem:[%s11454_s1 + $0xa58] sm:$0xff]  ;;  %v9121_v21 = vld [vmem:[%s11454_s1 + $0xa80] sm:$0xff] }
 0x129   :  { %5711 = vmatpush.bf16.msrb.mxu3 %v9103_v1  ;;  %v10418_v22 = vadd.f32 %v5459_v20, %v5447_v18  ;;  %v9124_v1 = vld [vmem:[%s11454_s1 + $0xa98] sm:$0xff]  ;;  %v9113_v20 = vld [vmem:[%s11454_s1 + $0xa40] sm:$0xff] }
 0x12a   :  { %5673 = vmatpush.bf16.msrb.mxu0 %v9078_v2  ;;  %v9160_v24 = vld [vmem:[%s11454_s1 + $0xbb8] sm:$0xff] }
 0x12b   :  { %5686 = vmatpush.bf16.msrb.mxu1 %v9086_v3 }
 0x12c   :  { %5699 = vmatpush.bf16.msrb.mxu2 %v9094_v4  ;;  %v9132_v4 = vld [vmem:[%s11454_s1 + $0xad8] sm:$0xff] }
 0x12d   :  { %5712 = vmatpush.bf16.msrb.mxu3 %v9102_v5 }
 0x12e   :  { %5674 = vmatpush.bf16.msrb.mxu0 %v9077_v8  ;;  %v5448_v33 = vpop.f32.mrf.mxu2  ;;  %v9107_v8 = vld [vmem:[%s11454_s1 + $0xa10] sm:$0xff] }
 0x12f   :  { %5687 = vmatpush.bf16.msrb.mxu1 %v9085_v10  ;;  %v5461_v38 = vpop.f32.mrf.mxu3  ;;  %v9115_v10 = vld [vmem:[%s11454_s1 + $0xa50] sm:$0xff] }
 0x130   :  { %5700 = vmatpush.bf16.msrb.mxu2 %v9093_v11  ;;  %v9123_v11 = vld [vmem:[%s11454_s1 + $0xa90] sm:$0xff]  ;;  %v9166_v38 = vld [vmem:[%s11454_s1 + $0xbe8] sm:$0xff] }
 0x131   :  { %5713 = vmatpush.bf16.msrb.mxu3 %v9101_v13  ;;  %v9106_v13 = vld [vmem:[%s11454_s1 + $0xa08] sm:$0xff]  ;;  %v9159_v33 = vld [vmem:[%s11454_s1 + $0xbb0] sm:$0xff] }
 0x132   :  { %5675 = vmatpush.bf16.msrb.mxu0 %v9076_v14  ;;  %v9114_v14 = vld [vmem:[%s11454_s1 + $0xa48] sm:$0xff] }
 0x133   :  { %5688 = vmatpush.bf16.msrb.mxu1 %v9084_v15  ;;  %v9122_v15 = vld [vmem:[%s11454_s1 + $0xa88] sm:$0xff] }
 0x134   :  { %5701 = vmatpush.bf16.msrb.mxu2 %v9092_v16 }
 0x135   :  { %5714 = vmatpush.bf16.msrb.mxu3 %v9100_v19  ;;  %v9105_v19 = vld [vmem:[%s11454_s1 + $0xa00] sm:$0xff] }
 0x136   :  { %5676 = vmatpush.bf16.msrb.mxu0 %v9075_v23  ;;  %v9152_v23 = vld [vmem:[%s11454_s1 + $0xb78] sm:$0xff] }
 0x137   :  { %5689 = vmatpush.bf16.msrb.mxu1 %v9083_v25  ;;  %v9129_v25 = vld [vmem:[%s11454_s1 + $0xac0] sm:$0xff] }
 0x138   :  { %5702 = vmatpush.bf16.msrb.mxu2 %v9091_v26  ;;  %v1335_v26 = vld [vmem:[#allocation1] sm:$0xff] }
 0x139   :  { %5715 = vmatpush.bf16.msrb.mxu3 %v9099_v27  ;;  %v1337_v27 = vld [vmem:[#allocation1 + $0x12] sm:$0xff] }
 0x13a   :  { %5677 = vmatpush.bf16.msrb.mxu0 %v9074_v28  ;;  %v9168_v28 = vld [vmem:[%s11454_s1 + $0xbf8] sm:$0xff] }
 0x13b   :  { %5690 = vmatpush.bf16.msrb.mxu1 %v9082_v29  ;;  %v1336_v29 = vld [vmem:[#allocation1 + $0x9] sm:$0xff] }
 0x13c   :  { %5703 = vmatpush.bf16.msrb.mxu2 %v9090_v30  ;;  %v9143_v30 = vld [vmem:[%s11454_s1 + $0xb30] sm:$0xff] }
 0x13d   :  { %5716 = vmatpush.bf16.msrb.mxu3 %v9098_v37  ;;  %v9158_v37 = vld [vmem:[%s11454_s1 + $0xba8] sm:$0xff] }
 0x13e   :  { %5678 = vmatpush.bf16.msrb.mxu0 %v9073_v39  ;;  %v5472_v55 = vpop.f32.mrf.mxu0 }
 0x13f   :  { %5691 = vmatpush.bf16.msrb.mxu1 %v9081_v40  ;;  %v5473_v56 = vadd.f32 %v5472_v55, %v10418_v22  ;;  %v5485_v58 = vpop.f32.mrf.mxu1  ;;  %v9144_v22 = vld [vmem:[%s11454_s1 + $0xb38] sm:$0xff] }
 0x140   :  { %5704 = vmatpush.bf16.msrb.mxu2 %v9089_v41  ;;  %v9141_v41 = vld [vmem:[%s11454_s1 + $0xb20] sm:$0xff] }
 0x141   :  { %5717 = vmatpush.bf16.msrb.mxu3 %v9097_v45  ;;  %5679 = vmatmul.bf16.vlgmr.msrb.gmra.mxu0 %v1329_v31  ;;  %v5486_v61 = vadd.f32 %v5485_v58, %v5473_v56  ;;  %v1338_v31 = vld [vmem:[#allocation1 + $0x1b] sm:$0xff]  ;;  %v9139_v56 = vld [vmem:[%s11454_s1 + $0xb10] sm:$0xff] }
 0x142   :  { %5723 = vmatpush.bf16.msra.mxu0 %v9112_v42  ;;  %5692 = vmatmul.bf16.vlgmr.msrb.gmra.mxu1 %v1330_v34  ;;  %v9167_v34 = vld [vmem:[%s11454_s1 + $0xbf0] sm:$0xff] }
 0x143   :  { %5736 = vmatpush.bf16.msra.mxu1 %v9120_v43  ;;  %5705 = vmatmul.bf16.vlgmr.msrb.gmra.mxu2 %v1331_v32  ;;  %v9151_v32 = vld [vmem:[%s11454_s1 + $0xb70] sm:$0xff]  ;;  %v9149_v43 = vld [vmem:[%s11454_s1 + $0xb60] sm:$0xff] }
 0x144   :  { %5749 = vmatpush.bf16.msra.mxu2 %v9128_v44  ;;  %5718 = vmatmul.bf16.vlgmr.msrb.gmra.mxu3 %v1332_v35  ;;  %v9142_v35 = vld [vmem:[%s11454_s1 + $0xb28] sm:$0xff]  ;;  %v9157_v44 = vld [vmem:[%s11454_s1 + $0xba0] sm:$0xff]  ;;  %v9147_v58 = vld [vmem:[%s11454_s1 + $0xb50] sm:$0xff] }
 0x145   :  { %5762 = vmatpush.bf16.msra.mxu3 %v9136_v46  ;;  %v9165_v46 = vld [vmem:[%s11454_s1 + $0xbe0] sm:$0xff] }
 0x146   :  { %5724 = vmatpush.bf16.msra.mxu0 %v9111_v47  ;;  %v5498_v2 = vpop.f32.mrf.mxu2  ;;  %v5474_v6 = vpop.f32.mrf.mxu0  ;;  %v9140_v47 = vld [vmem:[%s11454_s1 + $0xb18] sm:$0xff] }
 0x147   :  { %5737 = vmatpush.bf16.msra.mxu1 %v9119_v48  ;;  %v5499_v3 = vadd.f32 %v5498_v2, %v5486_v61  ;;  %v5511_v5 = vpop.f32.mrf.mxu3  ;;  %v5487_v9 = vpop.f32.mrf.mxu1  ;;  %v9148_v48 = vld [vmem:[%s11454_s1 + $0xb58] sm:$0xff]  ;;  %v9138_v61 = vld [vmem:[%s11454_s1 + $0xb08] sm:$0xff] }
 0x148   :  { %5750 = vmatpush.bf16.msra.mxu2 %v9127_v49  ;;  %v9156_v49 = vld [vmem:[%s11454_s1 + $0xb98] sm:$0xff]  ;;  %v9162_v6 = vld [vmem:[%s11454_s1 + $0xbc8] sm:$0xff]  ;;  %v9145_v9 = vld [vmem:[%s11454_s1 + $0xb40] sm:$0xff] }
 0x149   :  { %5763 = vmatpush.bf16.msra.mxu3 %v9135_v50  ;;  %v5512_v7 = vadd.f32 %v5511_v5, %v5499_v3  ;;  %v1340_v3 = vld [vmem:[#allocation1 + $0x2d] sm:$0xff] }
 0x14a   :  { %5725 = vmatpush.bf16.msra.mxu0 %v9110_v51  ;;  %v27_v5 = vld [vmem:[%s11453_s0 + $0x30] sm:$0xff] }
 0x14b   :  { %5738 = vmatpush.bf16.msra.mxu1 %v9118_v52  ;;  %v9164_v52 = vld [vmem:[%s11454_s1 + $0xbd8] sm:$0xff] }
 0x14c   :  { %5751 = vmatpush.bf16.msra.mxu2 %v9126_v53 }
 0x14d   :  { %5764 = vmatpush.bf16.msra.mxu3 %v9134_v54 }
 0x14e   :  { %5726 = vmatpush.bf16.msra.mxu0 %v9109_v57  ;;  %v5500_v16 = vpop.f32.mrf.mxu2 }
 0x14f   :  { %5739 = vmatpush.bf16.msra.mxu1 %v9117_v59  ;;  %v5513_v18 = vpop.f32.mrf.mxu3  ;;  %v9155_v59 = vld [vmem:[%s11454_s1 + $0xb90] sm:$0xff] }
 0x150   :  { %5752 = vmatpush.bf16.msra.mxu2 %v9125_v60  ;;  %v9163_v60 = vld [vmem:[%s11454_s1 + $0xbd0] sm:$0xff] }
 0x151   :  { %5765 = vmatpush.bf16.msra.mxu3 %v9133_v62  ;;  %v9146_v62 = vld [vmem:[%s11454_s1 + $0xb48] sm:$0xff]  ;;  %v9175_v16 = vld [vmem:[%s11454_s1 + $0xc30] sm:$0xff] }
 0x152   :  { %5727 = vmatpush.bf16.msra.mxu0 %v9108_v63  ;;  %v9154_v63 = vld [vmem:[%s11454_s1 + $0xb88] sm:$0xff]  ;;  %v9191_v18 = vld [vmem:[%s11454_s1 + $0xcb0] sm:$0xff] }
 0x153   :  { %5740 = vmatpush.bf16.msra.mxu1 %v9116_v0  ;;  %v1339_v0 = vld [vmem:[#allocation1 + $0x24] sm:$0xff] }
 0x154   :  { %5753 = vmatpush.bf16.msra.mxu2 %v9124_v1  ;;  %v1341_v1 = vld [vmem:[#allocation1 + $0x36] sm:$0xff] }
 0x155   :  { %5766 = vmatpush.bf16.msra.mxu3 %v9132_v4  ;;  %v1342_v4 = vld [vmem:[#allocation1 + $0x3f] sm:$0xff] }
 0x156   :  { %5728 = vmatpush.bf16.msra.mxu0 %v9107_v8  ;;  %1344 = vst [vmem:[#allocation1] ss:$9 sm:$0xff] %v27_v5  ;;  %v9137_v8 = vld [vmem:[%s11454_s1 + $0xb00] sm:$0xff]  ;;  %v9214_v5 = vld [vmem:[%s11454_s1 + $0xd68] sm:$0xff] }
 0x157   :  { %5741 = vmatpush.bf16.msra.mxu1 %v9115_v10  ;;  %v9153_v10 = vld [vmem:[%s11454_s1 + $0xb80] sm:$0xff] }
 0x158   :  { %5754 = vmatpush.bf16.msra.mxu2 %v9123_v11  ;;  %v9176_v11 = vld [vmem:[%s11454_s1 + $0xc38] sm:$0xff] }
 0x159   :  { %5767 = vmatpush.bf16.msra.mxu3 %v9131_v12  ;;  %v9184_v12 = vld [vmem:[%s11454_s1 + $0xc78] sm:$0xff] }
 0x15a   :  { %5729 = vmatpush.bf16.msra.mxu0 %v9106_v13  ;;  %v9192_v13 = vld [vmem:[%s11454_s1 + $0xcb8] sm:$0xff] }
 0x15b   :  { %5742 = vmatpush.bf16.msra.mxu1 %v9114_v14  ;;  %v9161_v14 = vld [vmem:[%s11454_s1 + $0xbc0] sm:$0xff] }
 0x15c   :  { %5755 = vmatpush.bf16.msra.mxu2 %v9122_v15  ;;  %v9200_v15 = vld [vmem:[%s11454_s1 + $0xcf8] sm:$0xff] }
 0x15d   :  { %5768 = vmatpush.bf16.msra.mxu3 %v9130_v17  ;;  %v9183_v17 = vld [vmem:[%s11454_s1 + $0xc70] sm:$0xff] }
 0x15e   :  { %5730 = vmatpush.bf16.msra.mxu0 %v9105_v19  ;;  %v5524_v39 = vpop.f32.mrf.mxu0  ;;  %v9199_v19 = vld [vmem:[%s11454_s1 + $0xcf0] sm:$0xff] }
 0x15f   :  { %5743 = vmatpush.bf16.msra.mxu1 %v9113_v20  ;;  %v5525_v40 = vadd.f32 %v5524_v39, %v5512_v7  ;;  %v5537_v42 = vpop.f32.mrf.mxu1  ;;  %v9174_v20 = vld [vmem:[%s11454_s1 + $0xc28] sm:$0xff] }
 0x160   :  { %5756 = vmatpush.bf16.msra.mxu2 %v9121_v21  ;;  %v9182_v21 = vld [vmem:[%s11454_s1 + $0xc68] sm:$0xff] }
 0x161   :  { %5769 = vmatpush.bf16.msra.mxu3 %v9129_v25  ;;  %5731 = vmatmul.bf16.vlgmr.msra.gmra.mxu0 %v1335_v26  ;;  %v5538_v45 = vadd.f32 %v5537_v42, %v5525_v40  ;;  %v9173_v26 = vld [vmem:[%s11454_s1 + $0xc20] sm:$0xff] }
 0x162   :  { %5775 = vmatpush.bf16.msrb.mxu0 %v9144_v22  ;;  %5744 = vmatmul.bf16.vlgmr.msra.gmra.mxu1 %v1336_v29  ;;  %v9190_v22 = vld [vmem:[%s11454_s1 + $0xca8] sm:$0xff]  ;;  %v9189_v29 = vld [vmem:[%s11454_s1 + $0xca0] sm:$0xff] }
 0x163   :  { %5788 = vmatpush.bf16.msrb.mxu1 %v9152_v23  ;;  %5757 = vmatmul.bf16.vlgmr.msra.gmra.mxu2 %v1337_v27  ;;  %v9198_v23 = vld [vmem:[%s11454_s1 + $0xce8] sm:$0xff] }
 0x164   :  { %5801 = vmatpush.bf16.msrb.mxu2 %v9160_v24  ;;  %5770 = vmatmul.bf16.vlgmr.msra.gmra.mxu3 %v1338_v31  ;;  %v9197_v31 = vld [vmem:[%s11454_s1 + $0xce0] sm:$0xff] }
 0x165   :  { %5814 = vmatpush.bf16.msrb.mxu3 %v9168_v28  ;;  %v9181_v28 = vld [vmem:[%s11454_s1 + $0xc60] sm:$0xff] }
 0x166   :  { %5776 = vmatpush.bf16.msrb.mxu0 %v9143_v30  ;;  %v5550_v50 = vpop.f32.mrf.mxu2  ;;  %v5526_v54 = vpop.f32.mrf.mxu0 }
 0x167   :  { %5789 = vmatpush.bf16.msrb.mxu1 %v9151_v32  ;;  %v5551_v51 = vadd.f32 %v5550_v50, %v5538_v45  ;;  %v5563_v53 = vpop.f32.mrf.mxu3  ;;  %v5539_v57 = vpop.f32.mrf.mxu1  ;;  %v9172_v32 = vld [vmem:[%s11454_s1 + $0xc18] sm:$0xff]  ;;  %v9195_v45 = vld [vmem:[%s11454_s1 + $0xcd0] sm:$0xff]  ;;  %v9194_v50 = vld [vmem:[%s11454_s1 + $0xcc8] sm:$0xff] }
 0x168   :  { %5802 = vmatpush.bf16.msrb.mxu2 %v9159_v33  ;;  %v9180_v33 = vld [vmem:[%s11454_s1 + $0xc58] sm:$0xff]  ;;  %v9185_v54 = vld [vmem:[%s11454_s1 + $0xc80] sm:$0xff] }
 0x169   :  { %5815 = vmatpush.bf16.msrb.mxu3 %v9167_v34  ;;  %v10616_v55 = vadd.f32 %v5563_v53, %v5551_v51  ;;  %v9188_v34 = vld [vmem:[%s11454_s1 + $0xc98] sm:$0xff]  ;;  %v9177_v53 = vld [vmem:[%s11454_s1 + $0xc40] sm:$0xff] }
 0x16a   :  { %5777 = vmatpush.bf16.msrb.mxu0 %v9142_v35  ;;  %v9224_v57 = vld [vmem:[%s11454_s1 + $0xdb8] sm:$0xff] }
 0x16b   :  { %5790 = vmatpush.bf16.msrb.mxu1 %v9150_v36 }
 0x16c   :  { %5803 = vmatpush.bf16.msrb.mxu2 %v9158_v37  ;;  %v9196_v37 = vld [vmem:[%s11454_s1 + $0xcd8] sm:$0xff] }
 0x16d   :  { %5816 = vmatpush.bf16.msrb.mxu3 %v9166_v38 }
 0x16e   :  { %5778 = vmatpush.bf16.msrb.mxu0 %v9141_v41  ;;  %v5552_v2 = vpop.f32.mrf.mxu2  ;;  %v9171_v41 = vld [vmem:[%s11454_s1 + $0xc10] sm:$0xff] }
 0x16f   :  { %5791 = vmatpush.bf16.msrb.mxu1 %v9149_v43  ;;  %v5565_v7 = vpop.f32.mrf.mxu3  ;;  %v9179_v43 = vld [vmem:[%s11454_s1 + $0xc50] sm:$0xff] }
 0x170   :  { %5804 = vmatpush.bf16.msrb.mxu2 %v9157_v44  ;;  %v9187_v44 = vld [vmem:[%s11454_s1 + $0xc90] sm:$0xff]  ;;  %v9230_v7 = vld [vmem:[%s11454_s1 + $0xde8] sm:$0xff] }
 0x171   :  { %5817 = vmatpush.bf16.msrb.mxu3 %v9165_v46  ;;  %v9170_v46 = vld [vmem:[%s11454_s1 + $0xc08] sm:$0xff]  ;;  %v9223_v2 = vld [vmem:[%s11454_s1 + $0xdb0] sm:$0xff] }
 0x172   :  { %5779 = vmatpush.bf16.msrb.mxu0 %v9140_v47  ;;  %v9178_v47 = vld [vmem:[%s11454_s1 + $0xc48] sm:$0xff] }
 0x173   :  { %5792 = vmatpush.bf16.msrb.mxu1 %v9148_v48  ;;  %v9186_v48 = vld [vmem:[%s11454_s1 + $0xc88] sm:$0xff] }
 0x174   :  { %5805 = vmatpush.bf16.msrb.mxu2 %v9156_v49 }
 0x175   :  { %5818 = vmatpush.bf16.msrb.mxu3 %v9164_v52  ;;  %v9169_v52 = vld [vmem:[%s11454_s1 + $0xc00] sm:$0xff] }
 0x176   :  { %5780 = vmatpush.bf16.msrb.mxu0 %v9139_v56  ;;  %v9216_v56 = vld [vmem:[%s11454_s1 + $0xd78] sm:$0xff] }
 0x177   :  { %5793 = vmatpush.bf16.msrb.mxu1 %v9147_v58  ;;  %v9193_v58 = vld [vmem:[%s11454_s1 + $0xcc0] sm:$0xff] }
 0x178   :  { %5806 = vmatpush.bf16.msrb.mxu2 %v9155_v59  ;;  %v1345_v59 = vld [vmem:[#allocation1] sm:$0xff] }
 0x179   :  { %5819 = vmatpush.bf16.msrb.mxu3 %v9163_v60  ;;  %v1347_v60 = vld [vmem:[#allocation1 + $0x12] sm:$0xff] }
 0x17a   :  { %5781 = vmatpush.bf16.msrb.mxu0 %v9138_v61  ;;  %v9232_v61 = vld [vmem:[%s11454_s1 + $0xdf8] sm:$0xff] }
 0x17b   :  { %5794 = vmatpush.bf16.msrb.mxu1 %v9146_v62  ;;  %v1346_v62 = vld [vmem:[#allocation1 + $0x9] sm:$0xff] }
 0x17c   :  { %5807 = vmatpush.bf16.msrb.mxu2 %v9154_v63  ;;  %v9207_v63 = vld [vmem:[%s11454_s1 + $0xd30] sm:$0xff] }
 0x17d   :  { %5820 = vmatpush.bf16.msrb.mxu3 %v9162_v6  ;;  %v9222_v6 = vld [vmem:[%s11454_s1 + $0xda8] sm:$0xff] }
 0x17e   :  { %5782 = vmatpush.bf16.msrb.mxu0 %v9137_v8  ;;  %v5576_v24 = vpop.f32.mrf.mxu0 }
 0x17f   :  { %5795 = vmatpush.bf16.msrb.mxu1 %v9145_v9  ;;  %v5577_v25 = vadd.f32 %v5576_v24, %v10616_v55  ;;  %v5589_v27 = vpop.f32.mrf.mxu1  ;;  %v9208_v55 = vld [vmem:[%s11454_s1 + $0xd38] sm:$0xff] }
 0x180   :  { %5808 = vmatpush.bf16.msrb.mxu2 %v9153_v10  ;;  %v9205_v10 = vld [vmem:[%s11454_s1 + $0xd20] sm:$0xff] }
 0x181   :  { %5821 = vmatpush.bf16.msrb.mxu3 %v9161_v14  ;;  %5783 = vmatmul.bf16.vlgmr.msrb.gmra.mxu0 %v1339_v0  ;;  %v5590_v30 = vadd.f32 %v5589_v27, %v5577_v25  ;;  %v1348_v0 = vld [vmem:[#allocation1 + $0x1b] sm:$0xff]  ;;  %v9203_v25 = vld [vmem:[%s11454_s1 + $0xd10] sm:$0xff] }
 0x182   :  { %5827 = vmatpush.bf16.msra.mxu0 %v9176_v11  ;;  %5796 = vmatmul.bf16.vlgmr.msrb.gmra.mxu1 %v1340_v3  ;;  %v9231_v3 = vld [vmem:[%s11454_s1 + $0xdf0] sm:$0xff] }
 0x183   :  { %5840 = vmatpush.bf16.msra.mxu1 %v9184_v12  ;;  %5809 = vmatmul.bf16.vlgmr.msrb.gmra.mxu2 %v1341_v1  ;;  %v9215_v1 = vld [vmem:[%s11454_s1 + $0xd70] sm:$0xff]  ;;  %v9213_v12 = vld [vmem:[%s11454_s1 + $0xd60] sm:$0xff] }
 0x184   :  { %5853 = vmatpush.bf16.msra.mxu2 %v9192_v13  ;;  %5822 = vmatmul.bf16.vlgmr.msrb.gmra.mxu3 %v1342_v4  ;;  %v9206_v4 = vld [vmem:[%s11454_s1 + $0xd28] sm:$0xff]  ;;  %v9221_v13 = vld [vmem:[%s11454_s1 + $0xda0] sm:$0xff]  ;;  %v9211_v27 = vld [vmem:[%s11454_s1 + $0xd50] sm:$0xff] }
 0x185   :  { %5866 = vmatpush.bf16.msra.mxu3 %v9200_v15  ;;  %v9229_v15 = vld [vmem:[%s11454_s1 + $0xde0] sm:$0xff] }
 0x186   :  { %5828 = vmatpush.bf16.msra.mxu0 %v9175_v16  ;;  %v5602_v35 = vpop.f32.mrf.mxu2  ;;  %v5578_v39 = vpop.f32.mrf.mxu0  ;;  %v9204_v16 = vld [vmem:[%s11454_s1 + $0xd18] sm:$0xff] }
 0x187   :  { %5841 = vmatpush.bf16.msra.mxu1 %v9183_v17  ;;  %v5603_v36 = vadd.f32 %v5602_v35, %v5590_v30  ;;  %v5615_v38 = vpop.f32.mrf.mxu3  ;;  %v5591_v42 = vpop.f32.mrf.mxu1  ;;  %v9212_v17 = vld [vmem:[%s11454_s1 + $0xd58] sm:$0xff]  ;;  %v9202_v30 = vld [vmem:[%s11454_s1 + $0xd08] sm:$0xff] }
 0x188   :  { %5854 = vmatpush.bf16.msra.mxu2 %v9191_v18  ;;  %v9220_v18 = vld [vmem:[%s11454_s1 + $0xd98] sm:$0xff]  ;;  %v9226_v39 = vld [vmem:[%s11454_s1 + $0xdc8] sm:$0xff]  ;;  %v9209_v42 = vld [vmem:[%s11454_s1 + $0xd40] sm:$0xff] }
 0x189   :  { %5867 = vmatpush.bf16.msra.mxu3 %v9199_v19  ;;  %v5616_v40 = vadd.f32 %v5615_v38, %v5603_v36  ;;  %v1350_v36 = vld [vmem:[#allocation1 + $0x2d] sm:$0xff]  ;;  %v28_v38 = vld [vmem:[%s11453_s0 + $0x38] sm:$0xff] }
 0x18a   :  { %5829 = vmatpush.bf16.msra.mxu0 %v9174_v20 }
 0x18b   :  { %5842 = vmatpush.bf16.msra.mxu1 %v9182_v21  ;;  %v9228_v21 = vld [vmem:[%s11454_s1 + $0xdd8] sm:$0xff] }
 0x18c   :  { %5855 = vmatpush.bf16.msra.mxu2 %v9190_v22 }
 0x18d   :  { %5868 = vmatpush.bf16.msra.mxu3 %v9198_v23 }
 0x18e   :  { %5830 = vmatpush.bf16.msra.mxu0 %v9173_v26  ;;  %v5604_v49 = vpop.f32.mrf.mxu2 }
 0x18f   :  { %5843 = vmatpush.bf16.msra.mxu1 %v9181_v28  ;;  %v5617_v51 = vpop.f32.mrf.mxu3  ;;  %v9219_v28 = vld [vmem:[%s11454_s1 + $0xd90] sm:$0xff] }
 0x190   :  { %5856 = vmatpush.bf16.msra.mxu2 %v9189_v29  ;;  %v9227_v29 = vld [vmem:[%s11454_s1 + $0xdd0] sm:$0xff] }
 0x191   :  { %5869 = vmatpush.bf16.msra.mxu3 %v9197_v31  ;;  %v9210_v31 = vld [vmem:[%s11454_s1 + $0xd48] sm:$0xff]  ;;  %v9239_v49 = vld [vmem:[%s11454_s1 + $0xe30] sm:$0xff] }
 0x192   :  { %5831 = vmatpush.bf16.msra.mxu0 %v9172_v32  ;;  %v9218_v32 = vld [vmem:[%s11454_s1 + $0xd88] sm:$0xff]  ;;  %v9255_v51 = vld [vmem:[%s11454_s1 + $0xeb0] sm:$0xff] }
 0x193   :  { %5844 = vmatpush.bf16.msra.mxu1 %v9180_v33  ;;  %v1349_v33 = vld [vmem:[#allocation1 + $0x24] sm:$0xff] }
 0x194   :  { %5857 = vmatpush.bf16.msra.mxu2 %v9188_v34  ;;  %v1351_v34 = vld [vmem:[#allocation1 + $0x36] sm:$0xff] }
 0x195   :  { %5870 = vmatpush.bf16.msra.mxu3 %v9196_v37  ;;  %v1352_v37 = vld [vmem:[#allocation1 + $0x3f] sm:$0xff] }
 0x196   :  { %5832 = vmatpush.bf16.msra.mxu0 %v9171_v41  ;;  %1354 = vst [vmem:[#allocation1] ss:$9 sm:$0xff] %v28_v38  ;;  %v9201_v41 = vld [vmem:[%s11454_s1 + $0xd00] sm:$0xff]  ;;  %v9278_v38 = vld [vmem:[%s11454_s1 + $0xf68] sm:$0xff] }
 0x197   :  { %5845 = vmatpush.bf16.msra.mxu1 %v9179_v43  ;;  %v9217_v43 = vld [vmem:[%s11454_s1 + $0xd80] sm:$0xff] }
 0x198   :  { %5858 = vmatpush.bf16.msra.mxu2 %v9187_v44  ;;  %v9240_v44 = vld [vmem:[%s11454_s1 + $0xe38] sm:$0xff] }
 0x199   :  { %5871 = vmatpush.bf16.msra.mxu3 %v9195_v45  ;;  %v9248_v45 = vld [vmem:[%s11454_s1 + $0xe78] sm:$0xff] }
 0x19a   :  { %5833 = vmatpush.bf16.msra.mxu0 %v9170_v46  ;;  %v9256_v46 = vld [vmem:[%s11454_s1 + $0xeb8] sm:$0xff] }
 0x19b   :  { %5846 = vmatpush.bf16.msra.mxu1 %v9178_v47  ;;  %v9225_v47 = vld [vmem:[%s11454_s1 + $0xdc0] sm:$0xff] }
 0x19c   :  { %5859 = vmatpush.bf16.msra.mxu2 %v9186_v48  ;;  %v9264_v48 = vld [vmem:[%s11454_s1 + $0xef8] sm:$0xff] }
 0x19d   :  { %5872 = vmatpush.bf16.msra.mxu3 %v9194_v50  ;;  %v9247_v50 = vld [vmem:[%s11454_s1 + $0xe70] sm:$0xff] }
 0x19e   :  { %5834 = vmatpush.bf16.msra.mxu0 %v9169_v52  ;;  %v5628_v8 = vpop.f32.mrf.mxu0  ;;  %v9263_v52 = vld [vmem:[%s11454_s1 + $0xef0] sm:$0xff] }
 0x19f   :  { %5847 = vmatpush.bf16.msra.mxu1 %v9177_v53  ;;  %v5629_v9 = vadd.f32 %v5628_v8, %v5616_v40  ;;  %v5641_v11 = vpop.f32.mrf.mxu1  ;;  %v9238_v53 = vld [vmem:[%s11454_s1 + $0xe28] sm:$0xff] }
 0x1a0   :  { %5860 = vmatpush.bf16.msra.mxu2 %v9185_v54  ;;  %v9246_v54 = vld [vmem:[%s11454_s1 + $0xe68] sm:$0xff] }
 0x1a1   :  { %5873 = vmatpush.bf16.msra.mxu3 %v9193_v58  ;;  %5835 = vmatmul.bf16.vlgmr.msra.gmra.mxu0 %v1345_v59  ;;  %v5642_v14 = vadd.f32 %v5641_v11, %v5629_v9  ;;  %v9237_v59 = vld [vmem:[%s11454_s1 + $0xe20] sm:$0xff] }
 0x1a2   :  { %5879 = vmatpush.bf16.msrb.mxu0 %v9208_v55  ;;  %5848 = vmatmul.bf16.vlgmr.msra.gmra.mxu1 %v1346_v62  ;;  %v9254_v55 = vld [vmem:[%s11454_s1 + $0xea8] sm:$0xff]  ;;  %v9253_v62 = vld [vmem:[%s11454_s1 + $0xea0] sm:$0xff] }
 0x1a3   :  { %5892 = vmatpush.bf16.msrb.mxu1 %v9216_v56  ;;  %5861 = vmatmul.bf16.vlgmr.msra.gmra.mxu2 %v1347_v60  ;;  %v9262_v56 = vld [vmem:[%s11454_s1 + $0xee8] sm:$0xff] }
 0x1a4   :  { %5905 = vmatpush.bf16.msrb.mxu2 %v9224_v57  ;;  %5874 = vmatmul.bf16.vlgmr.msra.gmra.mxu3 %v1348_v0  ;;  %v9261_v0 = vld [vmem:[%s11454_s1 + $0xee0] sm:$0xff] }
 0x1a5   :  { %5918 = vmatpush.bf16.msrb.mxu3 %v9232_v61  ;;  %v9245_v61 = vld [vmem:[%s11454_s1 + $0xe60] sm:$0xff] }
 0x1a6   :  { %5880 = vmatpush.bf16.msrb.mxu0 %v9207_v63  ;;  %v5654_v19 = vpop.f32.mrf.mxu2  ;;  %v5630_v23 = vpop.f32.mrf.mxu0 }
 0x1a7   :  { %5893 = vmatpush.bf16.msrb.mxu1 %v9215_v1  ;;  %v5655_v20 = vadd.f32 %v5654_v19, %v5642_v14  ;;  %v5667_v22 = vpop.f32.mrf.mxu3  ;;  %v5643_v26 = vpop.f32.mrf.mxu1  ;;  %v9236_v1 = vld [vmem:[%s11454_s1 + $0xe18] sm:$0xff]  ;;  %v9259_v14 = vld [vmem:[%s11454_s1 + $0xed0] sm:$0xff]  ;;  %v9258_v19 = vld [vmem:[%s11454_s1 + $0xec8] sm:$0xff] }
 0x1a8   :  { %5906 = vmatpush.bf16.msrb.mxu2 %v9223_v2  ;;  %v9244_v2 = vld [vmem:[%s11454_s1 + $0xe58] sm:$0xff]  ;;  %v9249_v23 = vld [vmem:[%s11454_s1 + $0xe80] sm:$0xff] }
 0x1a9   :  { %5919 = vmatpush.bf16.msrb.mxu3 %v9231_v3  ;;  %v10814_v24 = vadd.f32 %v5667_v22, %v5655_v20  ;;  %v9252_v3 = vld [vmem:[%s11454_s1 + $0xe98] sm:$0xff]  ;;  %v9241_v22 = vld [vmem:[%s11454_s1 + $0xe40] sm:$0xff] }
 0x1aa   :  { %5881 = vmatpush.bf16.msrb.mxu0 %v9206_v4  ;;  %v9288_v26 = vld [vmem:[%s11454_s1 + $0xfb8] sm:$0xff] }
 0x1ab   :  { %5894 = vmatpush.bf16.msrb.mxu1 %v9214_v5 }
 0x1ac   :  { %5907 = vmatpush.bf16.msrb.mxu2 %v9222_v6  ;;  %v9260_v6 = vld [vmem:[%s11454_s1 + $0xed8] sm:$0xff] }
 0x1ad   :  { %5920 = vmatpush.bf16.msrb.mxu3 %v9230_v7 }
 0x1ae   :  { %5882 = vmatpush.bf16.msrb.mxu0 %v9205_v10  ;;  %v5656_v35 = vpop.f32.mrf.mxu2  ;;  %v9235_v10 = vld [vmem:[%s11454_s1 + $0xe10] sm:$0xff] }
 0x1af   :  { %5895 = vmatpush.bf16.msrb.mxu1 %v9213_v12  ;;  %v5669_v40 = vpop.f32.mrf.mxu3  ;;  %v9243_v12 = vld [vmem:[%s11454_s1 + $0xe50] sm:$0xff] }
 0x1b0   :  { %5908 = vmatpush.bf16.msrb.mxu2 %v9221_v13  ;;  %v9251_v13 = vld [vmem:[%s11454_s1 + $0xe90] sm:$0xff]  ;;  %v9294_v40 = vld [vmem:[%s11454_s1 + $0xfe8] sm:$0xff] }
 0x1b1   :  { %5921 = vmatpush.bf16.msrb.mxu3 %v9229_v15  ;;  %v9234_v15 = vld [vmem:[%s11454_s1 + $0xe08] sm:$0xff]  ;;  %v9287_v35 = vld [vmem:[%s11454_s1 + $0xfb0] sm:$0xff] }
 0x1b2   :  { %5883 = vmatpush.bf16.msrb.mxu0 %v9204_v16  ;;  %v9242_v16 = vld [vmem:[%s11454_s1 + $0xe48] sm:$0xff] }
 0x1b3   :  { %5896 = vmatpush.bf16.msrb.mxu1 %v9212_v17  ;;  %v9250_v17 = vld [vmem:[%s11454_s1 + $0xe88] sm:$0xff] }
 0x1b4   :  { %5909 = vmatpush.bf16.msrb.mxu2 %v9220_v18 }
 0x1b5   :  { %5922 = vmatpush.bf16.msrb.mxu3 %v9228_v21  ;;  %v9233_v21 = vld [vmem:[%s11454_s1 + $0xe00] sm:$0xff] }
 0x1b6   :  { %5884 = vmatpush.bf16.msrb.mxu0 %v9203_v25  ;;  %v9280_v25 = vld [vmem:[%s11454_s1 + $0xf78] sm:$0xff] }
 0x1b7   :  { %5897 = vmatpush.bf16.msrb.mxu1 %v9211_v27  ;;  %v9257_v27 = vld [vmem:[%s11454_s1 + $0xec0] sm:$0xff] }
 0x1b8   :  { %5910 = vmatpush.bf16.msrb.mxu2 %v9219_v28  ;;  %v1355_v28 = vld [vmem:[#allocation1] sm:$0xff] }
 0x1b9   :  { %5923 = vmatpush.bf16.msrb.mxu3 %v9227_v29  ;;  %v1357_v29 = vld [vmem:[#allocation1 + $0x12] sm:$0xff] }
 0x1ba   :  { %5885 = vmatpush.bf16.msrb.mxu0 %v9202_v30  ;;  %v9296_v30 = vld [vmem:[%s11454_s1 + $0xff8] sm:$0xff] }
 0x1bb   :  { %5898 = vmatpush.bf16.msrb.mxu1 %v9210_v31  ;;  %v1356_v31 = vld [vmem:[#allocation1 + $0x9] sm:$0xff] }
 0x1bc   :  { %5911 = vmatpush.bf16.msrb.mxu2 %v9218_v32  ;;  %v9271_v32 = vld [vmem:[%s11454_s1 + $0xf30] sm:$0xff] }
 0x1bd   :  { %5924 = vmatpush.bf16.msrb.mxu3 %v9226_v39  ;;  %v9286_v39 = vld [vmem:[%s11454_s1 + $0xfa8] sm:$0xff] }
 0x1be   :  { %5886 = vmatpush.bf16.msrb.mxu0 %v9201_v41  ;;  %v5680_v57 = vpop.f32.mrf.mxu0 }
 0x1bf   :  { %5899 = vmatpush.bf16.msrb.mxu1 %v9209_v42  ;;  %v5681_v58 = vadd.f32 %v5680_v57, %v10814_v24  ;;  %v5693_v60 = vpop.f32.mrf.mxu1  ;;  %v9272_v24 = vld [vmem:[%s11454_s1 + $0xf38] sm:$0xff] }
 0x1c0   :  { %5912 = vmatpush.bf16.msrb.mxu2 %v9217_v43  ;;  %v9269_v43 = vld [vmem:[%s11454_s1 + $0xf20] sm:$0xff] }
 0x1c1   :  { %5925 = vmatpush.bf16.msrb.mxu3 %v9225_v47  ;;  %5887 = vmatmul.bf16.vlgmr.msrb.gmra.mxu0 %v1349_v33  ;;  %v5694_v63 = vadd.f32 %v5693_v60, %v5681_v58  ;;  %v1358_v33 = vld [vmem:[#allocation1 + $0x1b] sm:$0xff]  ;;  %v9267_v58 = vld [vmem:[%s11454_s1 + $0xf10] sm:$0xff] }
 0x1c2   :  { %5931 = vmatpush.bf16.msra.mxu0 %v9240_v44  ;;  %5900 = vmatmul.bf16.vlgmr.msrb.gmra.mxu1 %v1350_v36  ;;  %v9295_v36 = vld [vmem:[%s11454_s1 + $0xff0] sm:$0xff] }
 0x1c3   :  { %5944 = vmatpush.bf16.msra.mxu1 %v9248_v45  ;;  %5913 = vmatmul.bf16.vlgmr.msrb.gmra.mxu2 %v1351_v34  ;;  %v9279_v34 = vld [vmem:[%s11454_s1 + $0xf70] sm:$0xff]  ;;  %v9277_v45 = vld [vmem:[%s11454_s1 + $0xf60] sm:$0xff] }
 0x1c4   :  { %5957 = vmatpush.bf16.msra.mxu2 %v9256_v46  ;;  %5926 = vmatmul.bf16.vlgmr.msrb.gmra.mxu3 %v1352_v37  ;;  %v9270_v37 = vld [vmem:[%s11454_s1 + $0xf28] sm:$0xff]  ;;  %v9285_v46 = vld [vmem:[%s11454_s1 + $0xfa0] sm:$0xff]  ;;  %v9275_v60 = vld [vmem:[%s11454_s1 + $0xf50] sm:$0xff] }
 0x1c5   :  { %5970 = vmatpush.bf16.msra.mxu3 %v9264_v48  ;;  %v9293_v48 = vld [vmem:[%s11454_s1 + $0xfe0] sm:$0xff] }
 0x1c6   :  { %5932 = vmatpush.bf16.msra.mxu0 %v9239_v49  ;;  %v5706_v4 = vpop.f32.mrf.mxu2  ;;  %v5682_v8 = vpop.f32.mrf.mxu0  ;;  %v9268_v49 = vld [vmem:[%s11454_s1 + $0xf18] sm:$0xff] }
 0x1c7   :  { %5945 = vmatpush.bf16.msra.mxu1 %v9247_v50  ;;  %v5707_v5 = vadd.f32 %v5706_v4, %v5694_v63  ;;  %v5719_v7 = vpop.f32.mrf.mxu3  ;;  %v5695_v11 = vpop.f32.mrf.mxu1  ;;  %v9276_v50 = vld [vmem:[%s11454_s1 + $0xf58] sm:$0xff]  ;;  %v9266_v63 = vld [vmem:[%s11454_s1 + $0xf08] sm:$0xff] }
 0x1c8   :  { %5958 = vmatpush.bf16.msra.mxu2 %v9255_v51  ;;  %v9284_v51 = vld [vmem:[%s11454_s1 + $0xf98] sm:$0xff]  ;;  %v9290_v8 = vld [vmem:[%s11454_s1 + $0xfc8] sm:$0xff]  ;;  %v9273_v11 = vld [vmem:[%s11454_s1 + $0xf40] sm:$0xff] }
 0x1c9   :  { %5971 = vmatpush.bf16.msra.mxu3 %v9263_v52  ;;  %v5720_v9 = vadd.f32 %v5719_v7, %v5707_v5  ;;  %v1360_v5 = vld [vmem:[#allocation1 + $0x2d] sm:$0xff]  ;;  %v29_v7 = vld [vmem:[%s11453_s0 + $0x40] sm:$0xff] }
 0x1ca   :  { %5933 = vmatpush.bf16.msra.mxu0 %v9238_v53 }
 0x1cb   :  { %5946 = vmatpush.bf16.msra.mxu1 %v9246_v54  ;;  %v9292_v54 = vld [vmem:[%s11454_s1 + $0xfd8] sm:$0xff] }
 0x1cc   :  { %5959 = vmatpush.bf16.msra.mxu2 %v9254_v55 }
 0x1cd   :  { %5972 = vmatpush.bf16.msra.mxu3 %v9262_v56 }
 0x1ce   :  { %5934 = vmatpush.bf16.msra.mxu0 %v9237_v59  ;;  %v5708_v18 = vpop.f32.mrf.mxu2 }
 0x1cf   :  { %5947 = vmatpush.bf16.msra.mxu1 %v9245_v61  ;;  %v5721_v20 = vpop.f32.mrf.mxu3  ;;  %v9283_v61 = vld [vmem:[%s11454_s1 + $0xf90] sm:$0xff] }
 0x1d0   :  { %5960 = vmatpush.bf16.msra.mxu2 %v9253_v62  ;;  %v9291_v62 = vld [vmem:[%s11454_s1 + $0xfd0] sm:$0xff] }
 0x1d1   :  { %5973 = vmatpush.bf16.msra.mxu3 %v9261_v0  ;;  %v9274_v0 = vld [vmem:[%s11454_s1 + $0xf48] sm:$0xff]  ;;  %v9303_v18 = vld [vmem:[%s11454_s1 + $0x1030] sm:$0xff] }
 0x1d2   :  { %5935 = vmatpush.bf16.msra.mxu0 %v9236_v1  ;;  %v9282_v1 = vld [vmem:[%s11454_s1 + $0xf88] sm:$0xff]  ;;  %v9319_v20 = vld [vmem:[%s11454_s1 + $0x10b0] sm:$0xff] }
 0x1d3   :  { %5948 = vmatpush.bf16.msra.mxu1 %v9244_v2  ;;  %v1359_v2 = vld [vmem:[#allocation1 + $0x24] sm:$0xff] }
 0x1d4   :  { %5961 = vmatpush.bf16.msra.mxu2 %v9252_v3  ;;  %v1361_v3 = vld [vmem:[#allocation1 + $0x36] sm:$0xff] }
 0x1d5   :  { %5974 = vmatpush.bf16.msra.mxu3 %v9260_v6  ;;  %v1362_v6 = vld [vmem:[#allocation1 + $0x3f] sm:$0xff] }
 0x1d6   :  { %5936 = vmatpush.bf16.msra.mxu0 %v9235_v10  ;;  %1364 = vst [vmem:[#allocation1] ss:$9 sm:$0xff] %v29_v7  ;;  %v9265_v10 = vld [vmem:[%s11454_s1 + $0xf00] sm:$0xff]  ;;  %v9342_v7 = vld [vmem:[%s11454_s1 + $0x1168] sm:$0xff] }
 0x1d7   :  { %5949 = vmatpush.bf16.msra.mxu1 %v9243_v12  ;;  %v9281_v12 = vld [vmem:[%s11454_s1 + $0xf80] sm:$0xff] }
 0x1d8   :  { %5962 = vmatpush.bf16.msra.mxu2 %v9251_v13  ;;  %v9304_v13 = vld [vmem:[%s11454_s1 + $0x1038] sm:$0xff] }
 0x1d9   :  { %5975 = vmatpush.bf16.msra.mxu3 %v9259_v14  ;;  %v9312_v14 = vld [vmem:[%s11454_s1 + $0x1078] sm:$0xff] }
 0x1da   :  { %5937 = vmatpush.bf16.msra.mxu0 %v9234_v15  ;;  %v9320_v15 = vld [vmem:[%s11454_s1 + $0x10b8] sm:$0xff] }
 0x1db   :  { %5950 = vmatpush.bf16.msra.mxu1 %v9242_v16  ;;  %v9289_v16 = vld [vmem:[%s11454_s1 + $0xfc0] sm:$0xff] }
 0x1dc   :  { %5963 = vmatpush.bf16.msra.mxu2 %v9250_v17  ;;  %v9328_v17 = vld [vmem:[%s11454_s1 + $0x10f8] sm:$0xff] }
 0x1dd   :  { %5976 = vmatpush.bf16.msra.mxu3 %v9258_v19  ;;  %v9311_v19 = vld [vmem:[%s11454_s1 + $0x1070] sm:$0xff] }
 0x1de   :  { %5938 = vmatpush.bf16.msra.mxu0 %v9233_v21  ;;  %v5732_v41 = vpop.f32.mrf.mxu0  ;;  %v9327_v21 = vld [vmem:[%s11454_s1 + $0x10f0] sm:$0xff] }
 0x1df   :  { %5951 = vmatpush.bf16.msra.mxu1 %v9241_v22  ;;  %v5733_v42 = vadd.f32 %v5732_v41, %v5720_v9  ;;  %v5745_v44 = vpop.f32.mrf.mxu1  ;;  %v9302_v22 = vld [vmem:[%s11454_s1 + $0x1028] sm:$0xff] }
 0x1e0   :  { %5964 = vmatpush.bf16.msra.mxu2 %v9249_v23  ;;  %v9310_v23 = vld [vmem:[%s11454_s1 + $0x1068] sm:$0xff] }
 0x1e1   :  { %5977 = vmatpush.bf16.msra.mxu3 %v9257_v27  ;;  %5939 = vmatmul.bf16.vlgmr.msra.gmra.mxu0 %v1355_v28  ;;  %v5746_v47 = vadd.f32 %v5745_v44, %v5733_v42  ;;  %v9301_v28 = vld [vmem:[%s11454_s1 + $0x1020] sm:$0xff] }
 0x1e2   :  { %5983 = vmatpush.bf16.msrb.mxu0 %v9272_v24  ;;  %5952 = vmatmul.bf16.vlgmr.msra.gmra.mxu1 %v1356_v31  ;;  %v9318_v24 = vld [vmem:[%s11454_s1 + $0x10a8] sm:$0xff]  ;;  %v9317_v31 = vld [vmem:[%s11454_s1 + $0x10a0] sm:$0xff] }
 0x1e3   :  { %5996 = vmatpush.bf16.msrb.mxu1 %v9280_v25  ;;  %5965 = vmatmul.bf16.vlgmr.msra.gmra.mxu2 %v1357_v29  ;;  %v9326_v25 = vld [vmem:[%s11454_s1 + $0x10e8] sm:$0xff] }
 0x1e4   :  { %6009 = vmatpush.bf16.msrb.mxu2 %v9288_v26  ;;  %5978 = vmatmul.bf16.vlgmr.msra.gmra.mxu3 %v1358_v33  ;;  %v9325_v33 = vld [vmem:[%s11454_s1 + $0x10e0] sm:$0xff] }
 0x1e5   :  { %6022 = vmatpush.bf16.msrb.mxu3 %v9296_v30  ;;  %v9309_v30 = vld [vmem:[%s11454_s1 + $0x1060] sm:$0xff] }
 0x1e6   :  { %5984 = vmatpush.bf16.msrb.mxu0 %v9271_v32  ;;  %v5758_v52 = vpop.f32.mrf.mxu2  ;;  %v5734_v56 = vpop.f32.mrf.mxu0 }
 0x1e7   :  { %5997 = vmatpush.bf16.msrb.mxu1 %v9279_v34  ;;  %v5759_v53 = vadd.f32 %v5758_v52, %v5746_v47  ;;  %v5771_v55 = vpop.f32.mrf.mxu3  ;;  %v5747_v59 = vpop.f32.mrf.mxu1  ;;  %v9300_v34 = vld [vmem:[%s11454_s1 + $0x1018] sm:$0xff]  ;;  %v9323_v47 = vld [vmem:[%s11454_s1 + $0x10d0] sm:$0xff]  ;;  %v9322_v52 = vld [vmem:[%s11454_s1 + $0x10c8] sm:$0xff] }
 0x1e8   :  { %6010 = vmatpush.bf16.msrb.mxu2 %v9287_v35  ;;  %v9308_v35 = vld [vmem:[%s11454_s1 + $0x1058] sm:$0xff]  ;;  %v9313_v56 = vld [vmem:[%s11454_s1 + $0x1080] sm:$0xff] }
 0x1e9   :  { %6023 = vmatpush.bf16.msrb.mxu3 %v9295_v36  ;;  %v11012_v57 = vadd.f32 %v5771_v55, %v5759_v53  ;;  %v9316_v36 = vld [vmem:[%s11454_s1 + $0x1098] sm:$0xff]  ;;  %v9305_v55 = vld [vmem:[%s11454_s1 + $0x1040] sm:$0xff] }
 0x1ea   :  { %5985 = vmatpush.bf16.msrb.mxu0 %v9270_v37  ;;  %v9352_v59 = vld [vmem:[%s11454_s1 + $0x11b8] sm:$0xff] }
 0x1eb   :  { %5998 = vmatpush.bf16.msrb.mxu1 %v9278_v38 }
 0x1ec   :  { %6011 = vmatpush.bf16.msrb.mxu2 %v9286_v39  ;;  %v9324_v39 = vld [vmem:[%s11454_s1 + $0x10d8] sm:$0xff] }
 0x1ed   :  { %6024 = vmatpush.bf16.msrb.mxu3 %v9294_v40 }
 0x1ee   :  { %5986 = vmatpush.bf16.msrb.mxu0 %v9269_v43  ;;  %v5760_v4 = vpop.f32.mrf.mxu2  ;;  %v9299_v43 = vld [vmem:[%s11454_s1 + $0x1010] sm:$0xff] }
 0x1ef   :  { %5999 = vmatpush.bf16.msrb.mxu1 %v9277_v45  ;;  %v5773_v9 = vpop.f32.mrf.mxu3  ;;  %v9307_v45 = vld [vmem:[%s11454_s1 + $0x1050] sm:$0xff] }
 0x1f0   :  { %6012 = vmatpush.bf16.msrb.mxu2 %v9285_v46  ;;  %v9315_v46 = vld [vmem:[%s11454_s1 + $0x1090] sm:$0xff]  ;;  %v9358_v9 = vld [vmem:[%s11454_s1 + $0x11e8] sm:$0xff] }
 0x1f1   :  { %6025 = vmatpush.bf16.msrb.mxu3 %v9293_v48  ;;  %v9298_v48 = vld [vmem:[%s11454_s1 + $0x1008] sm:$0xff]  ;;  %v9351_v4 = vld [vmem:[%s11454_s1 + $0x11b0] sm:$0xff] }
 0x1f2   :  { %5987 = vmatpush.bf16.msrb.mxu0 %v9268_v49  ;;  %v9306_v49 = vld [vmem:[%s11454_s1 + $0x1048] sm:$0xff] }
 0x1f3   :  { %6000 = vmatpush.bf16.msrb.mxu1 %v9276_v50  ;;  %v9314_v50 = vld [vmem:[%s11454_s1 + $0x1088] sm:$0xff] }
 0x1f4   :  { %6013 = vmatpush.bf16.msrb.mxu2 %v9284_v51 }
 0x1f5   :  { %6026 = vmatpush.bf16.msrb.mxu3 %v9292_v54  ;;  %v9297_v54 = vld [vmem:[%s11454_s1 + $0x1000] sm:$0xff] }
 0x1f6   :  { %5988 = vmatpush.bf16.msrb.mxu0 %v9267_v58  ;;  %v9344_v58 = vld [vmem:[%s11454_s1 + $0x1178] sm:$0xff] }
 0x1f7   :  { %6001 = vmatpush.bf16.msrb.mxu1 %v9275_v60  ;;  %v9321_v60 = vld [vmem:[%s11454_s1 + $0x10c0] sm:$0xff] }
 0x1f8   :  { %6014 = vmatpush.bf16.msrb.mxu2 %v9283_v61  ;;  %v1365_v61 = vld [vmem:[#allocation1] sm:$0xff] }
 0x1f9   :  { %6027 = vmatpush.bf16.msrb.mxu3 %v9291_v62  ;;  %v1367_v62 = vld [vmem:[#allocation1 + $0x12] sm:$0xff] }
 0x1fa   :  { %5989 = vmatpush.bf16.msrb.mxu0 %v9266_v63  ;;  %v9360_v63 = vld [vmem:[%s11454_s1 + $0x11f8] sm:$0xff] }
 0x1fb   :  { %6002 = vmatpush.bf16.msrb.mxu1 %v9274_v0  ;;  %v1366_v0 = vld [vmem:[#allocation1 + $0x9] sm:$0xff] }
 0x1fc   :  { %6015 = vmatpush.bf16.msrb.mxu2 %v9282_v1  ;;  %v9335_v1 = vld [vmem:[%s11454_s1 + $0x1130] sm:$0xff] }
 0x1fd   :  { %6028 = vmatpush.bf16.msrb.mxu3 %v9290_v8  ;;  %v9350_v8 = vld [vmem:[%s11454_s1 + $0x11a8] sm:$0xff] }
 0x1fe   :  { %5990 = vmatpush.bf16.msrb.mxu0 %v9265_v10  ;;  %v5784_v26 = vpop.f32.mrf.mxu0 }
 0x1ff   :  { %6003 = vmatpush.bf16.msrb.mxu1 %v9273_v11  ;;  %v5785_v27 = vadd.f32 %v5784_v26, %v11012_v57  ;;  %v5797_v29 = vpop.f32.mrf.mxu1  ;;  %v9336_v57 = vld [vmem:[%s11454_s1 + $0x1138] sm:$0xff] }
 0x200   :  { %6016 = vmatpush.bf16.msrb.mxu2 %v9281_v12  ;;  %v9333_v12 = vld [vmem:[%s11454_s1 + $0x1120] sm:$0xff] }
 0x201   :  { %6029 = vmatpush.bf16.msrb.mxu3 %v9289_v16  ;;  %5991 = vmatmul.bf16.vlgmr.msrb.gmra.mxu0 %v1359_v2  ;;  %v5798_v32 = vadd.f32 %v5797_v29, %v5785_v27  ;;  %v1368_v2 = vld [vmem:[#allocation1 + $0x1b] sm:$0xff]  ;;  %v9331_v27 = vld [vmem:[%s11454_s1 + $0x1110] sm:$0xff] }
 0x202   :  { %6035 = vmatpush.bf16.msra.mxu0 %v9304_v13  ;;  %6004 = vmatmul.bf16.vlgmr.msrb.gmra.mxu1 %v1360_v5  ;;  %v9359_v5 = vld [vmem:[%s11454_s1 + $0x11f0] sm:$0xff] }
 0x203   :  { %6048 = vmatpush.bf16.msra.mxu1 %v9312_v14  ;;  %6017 = vmatmul.bf16.vlgmr.msrb.gmra.mxu2 %v1361_v3  ;;  %v9343_v3 = vld [vmem:[%s11454_s1 + $0x1170] sm:$0xff]  ;;  %v9341_v14 = vld [vmem:[%s11454_s1 + $0x1160] sm:$0xff] }
 0x204   :  { %6061 = vmatpush.bf16.msra.mxu2 %v9320_v15  ;;  %6030 = vmatmul.bf16.vlgmr.msrb.gmra.mxu3 %v1362_v6  ;;  %v9334_v6 = vld [vmem:[%s11454_s1 + $0x1128] sm:$0xff]  ;;  %v9349_v15 = vld [vmem:[%s11454_s1 + $0x11a0] sm:$0xff]  ;;  %v9339_v29 = vld [vmem:[%s11454_s1 + $0x1150] sm:$0xff] }
 0x205   :  { %6074 = vmatpush.bf16.msra.mxu3 %v9328_v17  ;;  %v9357_v17 = vld [vmem:[%s11454_s1 + $0x11e0] sm:$0xff] }
 0x206   :  { %6036 = vmatpush.bf16.msra.mxu0 %v9303_v18  ;;  %v5810_v37 = vpop.f32.mrf.mxu2  ;;  %v5786_v41 = vpop.f32.mrf.mxu0  ;;  %v9332_v18 = vld [vmem:[%s11454_s1 + $0x1118] sm:$0xff] }
 0x207   :  { %6049 = vmatpush.bf16.msra.mxu1 %v9311_v19  ;;  %v5811_v38 = vadd.f32 %v5810_v37, %v5798_v32  ;;  %v5823_v40 = vpop.f32.mrf.mxu3  ;;  %v5799_v44 = vpop.f32.mrf.mxu1  ;;  %v9340_v19 = vld [vmem:[%s11454_s1 + $0x1158] sm:$0xff]  ;;  %v9330_v32 = vld [vmem:[%s11454_s1 + $0x1108] sm:$0xff] }
 0x208   :  { %6062 = vmatpush.bf16.msra.mxu2 %v9319_v20  ;;  %v9348_v20 = vld [vmem:[%s11454_s1 + $0x1198] sm:$0xff]  ;;  %v9354_v41 = vld [vmem:[%s11454_s1 + $0x11c8] sm:$0xff]  ;;  %v9337_v44 = vld [vmem:[%s11454_s1 + $0x1140] sm:$0xff] }
 0x209   :  { %6075 = vmatpush.bf16.msra.mxu3 %v9327_v21  ;;  %v5824_v42 = vadd.f32 %v5823_v40, %v5811_v38  ;;  %v1370_v38 = vld [vmem:[#allocation1 + $0x2d] sm:$0xff] }
 0x20a   :  { %6037 = vmatpush.bf16.msra.mxu0 %v9302_v22  ;;  %v30_v40 = vld [vmem:[%s11453_s0 + $0x48] sm:$0x3f] }
 0x20b   :  { %6050 = vmatpush.bf16.msra.mxu1 %v9310_v23  ;;  %v9356_v23 = vld [vmem:[%s11454_s1 + $0x11d8] sm:$0xff] }
 0x20c   :  { %6063 = vmatpush.bf16.msra.mxu2 %v9318_v24 }
 0x20d   :  { %6076 = vmatpush.bf16.msra.mxu3 %v9326_v25 }
 0x20e   :  { %6038 = vmatpush.bf16.msra.mxu0 %v9301_v28  ;;  %v5812_v51 = vpop.f32.mrf.mxu2 }
 0x20f   :  { %6051 = vmatpush.bf16.msra.mxu1 %v9309_v30  ;;  %v5825_v53 = vpop.f32.mrf.mxu3  ;;  %v9347_v30 = vld [vmem:[%s11454_s1 + $0x1190] sm:$0xff] }
 0x210   :  { %6064 = vmatpush.bf16.msra.mxu2 %v9317_v31  ;;  %v9355_v31 = vld [vmem:[%s11454_s1 + $0x11d0] sm:$0xff] }
 0x211   :  { %6077 = vmatpush.bf16.msra.mxu3 %v9325_v33  ;;  %v9338_v33 = vld [vmem:[%s11454_s1 + $0x1148] sm:$0xff]  ;;  %v9367_v51 = vld [vmem:[%s11454_s1 + $0x1230] sm:$0xff] }
 0x212   :  { %6039 = vmatpush.bf16.msra.mxu0 %v9300_v34  ;;  %v9346_v34 = vld [vmem:[%s11454_s1 + $0x1188] sm:$0xff]  ;;  %v9383_v53 = vld [vmem:[%s11454_s1 + $0x12b0] sm:$0xff] }
 0x213   :  { %6052 = vmatpush.bf16.msra.mxu1 %v9308_v35  ;;  %v1369_v35 = vld [vmem:[#allocation1 + $0x24] sm:$0xff] }
 0x214   :  { %6065 = vmatpush.bf16.msra.mxu2 %v9316_v36  ;;  %v1371_v36 = vld [vmem:[#allocation1 + $0x36] sm:$0xff] }
 0x215   :  { %6078 = vmatpush.bf16.msra.mxu3 %v9324_v39  ;;  %v1372_v39 = vld [vmem:[#allocation1 + $0x3f] sm:$0xff] }
 0x216   :  { %6040 = vmatpush.bf16.msra.mxu0 %v9299_v43  ;;  %1374 = vst [vmem:[#allocation1] ss:$9 sm:$0xff] %v30_v40  ;;  %v9329_v43 = vld [vmem:[%s11454_s1 + $0x1100] sm:$0xff] }
 0x217   :  { %6053 = vmatpush.bf16.msra.mxu1 %v9307_v45  ;;  %v9345_v45 = vld [vmem:[%s11454_s1 + $0x1180] sm:$0xff] }
 0x218   :  { %6066 = vmatpush.bf16.msra.mxu2 %v9315_v46  ;;  %v9368_v46 = vld [vmem:[%s11454_s1 + $0x1238] sm:$0xff] }
 0x219   :  { %6079 = vmatpush.bf16.msra.mxu3 %v9323_v47  ;;  %v9376_v47 = vld [vmem:[%s11454_s1 + $0x1278] sm:$0xff] }
 0x21a   :  { %6041 = vmatpush.bf16.msra.mxu0 %v9298_v48  ;;  %v9384_v48 = vld [vmem:[%s11454_s1 + $0x12b8] sm:$0xff] }
 0x21b   :  { %6054 = vmatpush.bf16.msra.mxu1 %v9306_v49  ;;  %v9353_v49 = vld [vmem:[%s11454_s1 + $0x11c0] sm:$0xff] }
 0x21c   :  { %6067 = vmatpush.bf16.msra.mxu2 %v9314_v50  ;;  %v9392_v50 = vld [vmem:[%s11454_s1 + $0x12f8] sm:$0xff] }
 0x21d   :  { %6080 = vmatpush.bf16.msra.mxu3 %v9322_v52  ;;  %v9375_v52 = vld [vmem:[%s11454_s1 + $0x1270] sm:$0xff] }
 0x21e   :  { %6042 = vmatpush.bf16.msra.mxu0 %v9297_v54  ;;  %v5836_v10 = vpop.f32.mrf.mxu0  ;;  %v9391_v54 = vld [vmem:[%s11454_s1 + $0x12f0] sm:$0xff] }
 0x21f   :  { %6055 = vmatpush.bf16.msra.mxu1 %v9305_v55  ;;  %v5837_v11 = vadd.f32 %v5836_v10, %v5824_v42  ;;  %v5849_v13 = vpop.f32.mrf.mxu1  ;;  %v9366_v55 = vld [vmem:[%s11454_s1 + $0x1228] sm:$0xff] }
 0x220   :  { %6068 = vmatpush.bf16.msra.mxu2 %v9313_v56  ;;  %v9374_v56 = vld [vmem:[%s11454_s1 + $0x1268] sm:$0xff] }
 0x221   :  { %6081 = vmatpush.bf16.msra.mxu3 %v9321_v60  ;;  %6043 = vmatmul.bf16.vlgmr.msra.gmra.mxu0 %v1365_v61  ;;  %v5850_v16 = vadd.f32 %v5849_v13, %v5837_v11  ;;  %v9365_v61 = vld [vmem:[%s11454_s1 + $0x1220] sm:$0xff] }
 0x222   :  { %6087 = vmatpush.bf16.msrb.mxu0 %v9336_v57  ;;  %6056 = vmatmul.bf16.vlgmr.msra.gmra.mxu1 %v1366_v0  ;;  %v9382_v57 = vld [vmem:[%s11454_s1 + $0x12a8] sm:$0xff]  ;;  %v9381_v0 = vld [vmem:[%s11454_s1 + $0x12a0] sm:$0xff] }
 0x223   :  { %6100 = vmatpush.bf16.msrb.mxu1 %v9344_v58  ;;  %6069 = vmatmul.bf16.vlgmr.msra.gmra.mxu2 %v1367_v62  ;;  %v9390_v58 = vld [vmem:[%s11454_s1 + $0x12e8] sm:$0xff] }
 0x224   :  { %6113 = vmatpush.bf16.msrb.mxu2 %v9352_v59  ;;  %6082 = vmatmul.bf16.vlgmr.msra.gmra.mxu3 %v1368_v2  ;;  %v9389_v2 = vld [vmem:[%s11454_s1 + $0x12e0] sm:$0xff] }
 0x225   :  { %6126 = vmatpush.bf16.msrb.mxu3 %v9360_v63  ;;  %v9373_v63 = vld [vmem:[%s11454_s1 + $0x1260] sm:$0xff] }
 0x226   :  { %6088 = vmatpush.bf16.msrb.mxu0 %v9335_v1  ;;  %v5862_v21 = vpop.f32.mrf.mxu2  ;;  %v5838_v25 = vpop.f32.mrf.mxu0 }
 0x227   :  { %6101 = vmatpush.bf16.msrb.mxu1 %v9343_v3  ;;  %v5863_v22 = vadd.f32 %v5862_v21, %v5850_v16  ;;  %v5875_v24 = vpop.f32.mrf.mxu3  ;;  %v5851_v28 = vpop.f32.mrf.mxu1  ;;  %v9364_v3 = vld [vmem:[%s11454_s1 + $0x1218] sm:$0xff]  ;;  %v9387_v16 = vld [vmem:[%s11454_s1 + $0x12d0] sm:$0xff]  ;;  %v9386_v21 = vld [vmem:[%s11454_s1 + $0x12c8] sm:$0xff] }
 0x228   :  { %6114 = vmatpush.bf16.msrb.mxu2 %v9351_v4  ;;  %v9372_v4 = vld [vmem:[%s11454_s1 + $0x1258] sm:$0xff]  ;;  %v9377_v25 = vld [vmem:[%s11454_s1 + $0x1280] sm:$0xff] }
 0x229   :  { %6127 = vmatpush.bf16.msrb.mxu3 %v9359_v5  ;;  %v11210_v26 = vadd.f32 %v5875_v24, %v5863_v22  ;;  %v9380_v5 = vld [vmem:[%s11454_s1 + $0x1298] sm:$0xff]  ;;  %v9369_v24 = vld [vmem:[%s11454_s1 + $0x1240] sm:$0xff] }
 0x22a   :  { %6089 = vmatpush.bf16.msrb.mxu0 %v9334_v6  ;;  %v9385_v28 = vld [vmem:[%s11454_s1 + $0x12c0] sm:$0xff] }
 0x22b   :  { %6102 = vmatpush.bf16.msrb.mxu1 %v9342_v7 }
 0x22c   :  { %6115 = vmatpush.bf16.msrb.mxu2 %v9350_v8  ;;  %v9388_v8 = vld [vmem:[%s11454_s1 + $0x12d8] sm:$0xff] }
 0x22d   :  { %6128 = vmatpush.bf16.msrb.mxu3 %v9358_v9 }
 0x22e   :  { %6090 = vmatpush.bf16.msrb.mxu0 %v9333_v12  ;;  %v5864_v37 = vpop.f32.mrf.mxu2  ;;  %v9363_v12 = vld [vmem:[%s11454_s1 + $0x1210] sm:$0xff] }
 0x22f   :  { %6103 = vmatpush.bf16.msrb.mxu1 %v9341_v14  ;;  %v5877_v42 = vpop.f32.mrf.mxu3  ;;  %v9371_v14 = vld [vmem:[%s11454_s1 + $0x1250] sm:$0xff] }
 0x230   :  { %6116 = vmatpush.bf16.msrb.mxu2 %v9349_v15  ;;  %v9379_v15 = vld [vmem:[%s11454_s1 + $0x1290] sm:$0xff] }
 0x231   :  { %6129 = vmatpush.bf16.msrb.mxu3 %v9357_v17  ;;  %v9362_v17 = vld [vmem:[%s11454_s1 + $0x1208] sm:$0xff] }
 0x232   :  { %6091 = vmatpush.bf16.msrb.mxu0 %v9332_v18  ;;  %v9370_v18 = vld [vmem:[%s11454_s1 + $0x1248] sm:$0xff] }
 0x233   :  { %6104 = vmatpush.bf16.msrb.mxu1 %v9340_v19  ;;  %v9378_v19 = vld [vmem:[%s11454_s1 + $0x1288] sm:$0xff] }
 0x234   :  { %6117 = vmatpush.bf16.msrb.mxu2 %v9348_v20 }
 0x235   :  { %6130 = vmatpush.bf16.msrb.mxu3 %v9356_v23  ;;  %v9361_v23 = vld [vmem:[%s11454_s1 + $0x1200] sm:$0xff] }
 0x236   :  { %6092 = vmatpush.bf16.msrb.mxu0 %v9331_v27  ;;  %v9408_v27 = vld [vmem:[%s11454_s1 + $0x1378] sm:$0xff] }
 0x237   :  { %6105 = vmatpush.bf16.msrb.mxu1 %v9339_v29  ;;  %v1375_v29 = vld [vmem:[#allocation1] sm:$0xff] }
 0x238   :  { %6118 = vmatpush.bf16.msrb.mxu2 %v9347_v30  ;;  %v1377_v30 = vld [vmem:[#allocation1 + $0x12] sm:$0xff] }
 0x239   :  { %6131 = vmatpush.bf16.msrb.mxu3 %v9355_v31  ;;  %v1376_v31 = vld [vmem:[#allocation1 + $0x9] sm:$0xff] }
 0x23a   :  { %6093 = vmatpush.bf16.msrb.mxu0 %v9330_v32  ;;  %v9399_v32 = vld [vmem:[%s11454_s1 + $0x1330] sm:$0xff] }
 0x23b   :  { %6106 = vmatpush.bf16.msrb.mxu1 %v9338_v33  ;;  %v1378_v33 = vld [vmem:[#allocation1 + $0x1b] sm:$0xff] }
 0x23c   :  { %6119 = vmatpush.bf16.msrb.mxu2 %v9346_v34  ;;  %v9407_v34 = vld [vmem:[%s11454_s1 + $0x1370] sm:$0xff] }
 0x23d   :  { %6132 = vmatpush.bf16.msrb.mxu3 %v9354_v41  ;;  %v9405_v41 = vld [vmem:[%s11454_s1 + $0x1360] sm:$0xff] }
 0x23e   :  { %6094 = vmatpush.bf16.msrb.mxu0 %v9329_v43  ;;  %v5888_v59 = vpop.f32.mrf.mxu0  ;;  %v9396_v43 = vld [vmem:[%s11454_s1 + $0x1318] sm:$0xff] }
 0x23f   :  { %6107 = vmatpush.bf16.msrb.mxu1 %v9337_v44  ;;  %v5889_v60 = vadd.f32 %v5888_v59, %v11210_v26  ;;  %v5901_v62 = vpop.f32.mrf.mxu1  ;;  %v9400_v26 = vld [vmem:[%s11454_s1 + $0x1338] sm:$0xff]  ;;  %v1379_v59 = vld [vmem:[#allocation1 + $0x24] sm:$0xff] }
 0x240   :  { %6120 = vmatpush.bf16.msrb.mxu2 %v9345_v45  ;;  %v9404_v44 = vld [vmem:[%s11454_s1 + $0x1358] sm:$0xff] }
 0x241   :  { %6133 = vmatpush.bf16.msrb.mxu3 %v9353_v49  ;;  %6095 = vmatmul.bf16.vlgmr.msrb.gmra.mxu0 %v1369_v35  ;;  %v5902_v1 = vadd.f32 %v5901_v62, %v5889_v60  ;;  %v9398_v35 = vld [vmem:[%s11454_s1 + $0x1328] sm:$0xff] }
 0x242   :  { %6139 = vmatpush.bf16.msra.mxu0 %v9368_v46  ;;  %6108 = vmatmul.bf16.vlgmr.msrb.gmra.mxu1 %v1370_v38  ;;  %v1380_v60 = vld [vmem:[#allocation1 + $0x2d] sm:$0xff] }
 0x243   :  { %6152 = vmatpush.bf16.msra.mxu1 %v9376_v47  ;;  %6121 = vmatmul.bf16.vlgmr.msrb.gmra.mxu2 %v1371_v36  ;;  %v9406_v36 = vld [vmem:[%s11454_s1 + $0x1368] sm:$0xff] }
 0x244   :  { %6165 = vmatpush.bf16.msra.mxu2 %v9384_v48  ;;  %6134 = vmatmul.bf16.vlgmr.msrb.gmra.mxu3 %v1372_v39  ;;  %v9397_v39 = vld [vmem:[%s11454_s1 + $0x1320] sm:$0xff] }
 0x245   :  { %6178 = vmatpush.bf16.msra.mxu3 %v9392_v50  ;;  %v9395_v50 = vld [vmem:[%s11454_s1 + $0x1310] sm:$0xff] }
 0x246   :  { %6140 = vmatpush.bf16.msra.mxu0 %v9367_v51  ;;  %v5914_v6 = vpop.f32.mrf.mxu2  ;;  %v5890_v10 = vpop.f32.mrf.mxu0 }
 0x247   :  { %6153 = vmatpush.bf16.msra.mxu1 %v9375_v52  ;;  %v5915_v7 = vadd.f32 %v5914_v6, %v5902_v1  ;;  %v5927_v9 = vpop.f32.mrf.mxu3  ;;  %v5903_v13 = vpop.f32.mrf.mxu1  ;;  %v9403_v52 = vld [vmem:[%s11454_s1 + $0x1350] sm:$0xff] }
 0x248   :  { %6166 = vmatpush.bf16.msra.mxu2 %v9383_v53  ;;  %v9394_v53 = vld [vmem:[%s11454_s1 + $0x1308] sm:$0xff] }
 0x249   :  { %6179 = vmatpush.bf16.msra.mxu3 %v9391_v54  ;;  %v5928_v11 = vadd.f32 %v5927_v9, %v5915_v7  ;;  %v9402_v54 = vld [vmem:[%s11454_s1 + $0x1348] sm:$0xff] }
 0x24a   :  { %6141 = vmatpush.bf16.msra.mxu0 %v9366_v55 }
 0x24b   :  { %6154 = vmatpush.bf16.msra.mxu1 %v9374_v56 }
 0x24c   :  { %6167 = vmatpush.bf16.msra.mxu2 %v9382_v57  ;;  %v9393_v57 = vld [vmem:[%s11454_s1 + $0x1300] sm:$0xff] }
 0x24d   :  { %6180 = vmatpush.bf16.msra.mxu3 %v9390_v58  ;;  %v9401_v58 = vld [vmem:[%s11454_s1 + $0x1340] sm:$0xff] }
 0x24e   :  { %6142 = vmatpush.bf16.msra.mxu0 %v9365_v61  ;;  %v5916_v20 = vpop.f32.mrf.mxu2 }
 0x24f   :  { %6155 = vmatpush.bf16.msra.mxu1 %v9373_v63  ;;  %v5929_v22 = vpop.f32.mrf.mxu3  ;;  %v6233_v20 = vld [vmem:[%s11456_s3 + $0x78] sm:$0xff] }
 0x250   :  { %6168 = vmatpush.bf16.msra.mxu2 %v9381_v0  ;;  %v6232_v22 = vld [vmem:[%s11456_s3 + $0x70] sm:$0xff] }
 0x251   :  { %6181 = vmatpush.bf16.msra.mxu3 %v9389_v2 }
 0x252   :  { %6143 = vmatpush.bf16.msra.mxu0 %v9364_v3 }
 0x253   :  { %6156 = vmatpush.bf16.msra.mxu1 %v9372_v4 }
 0x254   :  { %6169 = vmatpush.bf16.msra.mxu2 %v9380_v5 }
 0x255   :  { %6182 = vmatpush.bf16.msra.mxu3 %v9388_v8 }
 0x256   :  { %6144 = vmatpush.bf16.msra.mxu0 %v9363_v12 }
 0x257   :  { %6157 = vmatpush.bf16.msra.mxu1 %v9371_v14 }
 0x258   :  { %6170 = vmatpush.bf16.msra.mxu2 %v9379_v15 }
 0x259   :  { %6183 = vmatpush.bf16.msra.mxu3 %v9387_v16 }
 0x25a   :  { %6145 = vmatpush.bf16.msra.mxu0 %v9362_v17 }
 0x25b   :  { %6158 = vmatpush.bf16.msra.mxu1 %v9370_v18 }
 0x25c   :  { %6171 = vmatpush.bf16.msra.mxu2 %v9378_v19 }
 0x25d   :  { %6184 = vmatpush.bf16.msra.mxu3 %v9386_v21 }
 0x25e   :  { %6146 = vmatpush.bf16.msra.mxu0 %v9361_v23  ;;  %v5940_v37 = vpop.f32.mrf.mxu0 }
 0x25f   :  { %6159 = vmatpush.bf16.msra.mxu1 %v9369_v24  ;;  %v5941_v38 = vadd.f32 %v5940_v37, %v5928_v11  ;;  %v5953_v40 = vpop.f32.mrf.mxu1  ;;  %v6231_v24 = vld [vmem:[%s11456_s3 + $0x68] sm:$0xff] }
 0x260   :  { %6172 = vmatpush.bf16.msra.mxu2 %v9377_v25  ;;  %v6230_v25 = vld [vmem:[%s11456_s3 + $0x60] sm:$0xff]  ;;  %v6223_v37 = vld [vmem:[%s11456_s3 + $0x28] sm:$0xff] }
 0x261   :  { %6185 = vmatpush.bf16.msra.mxu3 %v9385_v28  ;;  %6147 = vmatmul.bf16.vlgmr.msra.gmra.mxu0 %v1375_v29  ;;  %v5954_v42 = vadd.f32 %v5953_v40, %v5941_v38  ;;  %v6229_v29 = vld [vmem:[%s11456_s3 + $0x58] sm:$0xff]  ;;  %v6222_v38 = vld [vmem:[%s11456_s3 + $0x20] sm:$0xff] }
 0x262   :  { %6191 = vmatpush.bf16.msrb.mxu0 %v9400_v26  ;;  %6160 = vmatmul.bf16.vlgmr.msra.gmra.mxu1 %v1376_v31  ;;  %v6227_v31 = vld [vmem:[%s11456_s3 + $0x48] sm:$0xff] }
 0x263   :  { %6204 = vmatpush.bf16.msrb.mxu1 %v9408_v27  ;;  %6173 = vmatmul.bf16.vlgmr.msra.gmra.mxu2 %v1377_v30  ;;  %v6228_v30 = vld [vmem:[%s11456_s3 + $0x50] sm:$0xff] }
 0x264   :  { %6186 = vmatmul.bf16.vlgmr.msra.gmra.mxu3 %v1378_v33  ;;  %6238 = vmatpush.msrb.mxu2 %v6233_v20  ;;  %v6226_v33 = vld [vmem:[%s11456_s3 + $0x40] sm:$0xff] }
 0x266   :  { %6192 = vmatpush.bf16.msrb.mxu0 %v9399_v32  ;;  %v5966_v45 = vpop.f32.mrf.mxu2  ;;  %v5942_v48 = vpop.f32.mrf.mxu0  ;;  %6239 = vmatpush.msrb.mxu2 %v6232_v22 }
 0x267   :  { %6205 = vmatpush.bf16.msrb.mxu1 %v9407_v34  ;;  %v5967_v46 = vadd.f32 %v5966_v45, %v5954_v42  ;;  %v5979_v47 = vpop.f32.mrf.mxu3  ;;  %v5955_v51 = vpop.f32.mrf.mxu1  ;;  %v6218_v45 = vld [vmem:[%s11456_s3] sm:$0xff] }
 0x268   :  { %6240 = vmatpush.msrb.mxu2 %v6231_v24 }
 0x269   :  { %v5980_v49 = vadd.f32 %v5979_v47, %v5967_v46 }
 0x26a   :  { %6193 = vmatpush.bf16.msrb.mxu0 %v9398_v35  ;;  %6241 = vmatpush.msrb.mxu2 %v6230_v25  ;;  %v6225_v35 = vld [vmem:[%s11456_s3 + $0x38] sm:$0xff] }
 0x26b   :  { %6206 = vmatpush.bf16.msrb.mxu1 %v9406_v36  ;;  %v6224_v36 = vld [vmem:[%s11456_s3 + $0x30] sm:$0xff] }
 0x26c   :  { %6242 = vmatpush.msrb.mxu2 %v6229_v29 }
 0x26e   :  { %6194 = vmatpush.bf16.msrb.mxu0 %v9397_v39  ;;  %v5968_v55 = vpop.f32.mrf.mxu2  ;;  %6243 = vmatpush.msrb.mxu2 %v6228_v30  ;;  %v6221_v39 = vld [vmem:[%s11456_s3 + $0x18] sm:$0xff] }
 0x26f   :  { %6207 = vmatpush.bf16.msrb.mxu1 %v9405_v41  ;;  %v5981_v56 = vpop.f32.mrf.mxu3  ;;  %v6220_v41 = vld [vmem:[%s11456_s3 + $0x10] sm:$0xff] }
 0x270   :  { %6244 = vmatpush.msrb.mxu2 %v6227_v31 }
 0x272   :  { %6195 = vmatpush.bf16.msrb.mxu0 %v9396_v43  ;;  %6245 = vmatpush.msrb.mxu2 %v6226_v33 }
 0x273   :  { %6208 = vmatpush.bf16.msrb.mxu1 %v9404_v44  ;;  %v6219_v44 = vld [vmem:[%s11456_s3 + $0x8] sm:$0xff] }
 0x274   :  { %6246 = vmatpush.msrb.mxu2 %v6225_v35 }
 0x276   :  { %6196 = vmatpush.bf16.msrb.mxu0 %v9395_v50  ;;  %6247 = vmatpush.msrb.mxu2 %v6224_v36 }
 0x277   :  { %6209 = vmatpush.bf16.msrb.mxu1 %v9403_v52 }
 0x278   :  { %6248 = vmatpush.msrb.mxu2 %v6223_v37 }
 0x27a   :  { %6197 = vmatpush.bf16.msrb.mxu0 %v9394_v53  ;;  %6249 = vmatpush.msrb.mxu2 %v6222_v38 }
 0x27b   :  { %6210 = vmatpush.bf16.msrb.mxu1 %v9402_v54 }
 0x27c   :  { %6250 = vmatpush.msrb.mxu2 %v6221_v39 }
 0x27e   :  { %6198 = vmatpush.bf16.msrb.mxu0 %v9393_v57  ;;  %v5992_v61 = vpop.f32.mrf.mxu0  ;;  %6251 = vmatpush.msrb.mxu2 %v6220_v41 }
 0x27f   :  { %6211 = vmatpush.bf16.msrb.mxu1 %v9401_v58  ;;  %v5993_v62 = vadd.f32 %v5992_v61, %v5980_v49  ;;  %v6005_v63 = vpop.f32.mrf.mxu1 }
 0x280   :  { %6252 = vmatpush.msrb.mxu2 %v6219_v44 }
 0x281   :  { %6199 = vmatmul.bf16.vlgmr.msrb.gmra.mxu0 %v1379_v59  ;;  %v6006_v0 = vadd.f32 %v6005_v63, %v5993_v62 }
 0x282   :  { %6212 = vmatmul.bf16.vlgmr.msrb.gmra.mxu1 %v1380_v60  ;;  %6253 = vmatpush.msrb.mxu2 %v6218_v45 }
 0x286   :  { %v6018_v1 = vpop.f32.mrf.mxu2  ;;  %v5994_v4 = vpop.f32.mrf.mxu0 }
 0x287   :  { %v6019_v2 = vadd.f32 %v6018_v1, %v6006_v0  ;;  %v6031_v3 = vpop.f32.mrf.mxu3  ;;  %v6007_v6 = vpop.f32.mrf.mxu1  ;;  %v9411_v4 = vld [vmem:[%s11457_s4] ss:$0 sm:$0xff]  ;;  %s6278_s4 = sshll.u32 %s9442_s27, 4  ;;  %s6279_s4 = int_to_ptr.vmem [resolvable:$true] %s6278_s4 }
 0x289   :  { %v6032_v5 = vadd.f32 %v6031_v3, %v6019_v2 }
 0x28e   :  { %v6020_v7 = vpop.f32.mrf.mxu2 }
 0x28f   :  { %v6033_v8 = vpop.f32.mrf.mxu3 }
 0x29e   :  { %v6044_v9 = vpop.f32.mrf.mxu0 }
 0x29f   :  { %v6045_v10 = vadd.f32 %v6044_v9, %v6032_v5  ;;  %v6057_v11 = vpop.f32.mrf.mxu1 }
 0x2a1   :  { %v6058_v12 = vadd.f32 %v6057_v11, %v6045_v10 }
 0x2a6   :  { %v6070_v13 = vpop.f32.mrf.mxu2  ;;  %v6046_v15 = vpop.f32.mrf.mxu0 }
 0x2a7   :  { %v6083_v14 = vpop.f32.mrf.mxu3  ;;  %v6059_v16 = vpop.f32.mrf.mxu1  ;;  %v6071_v42 = vadd.f32 %v6070_v13, %v6058_v12 }
 0x2a9   :  { %v6084_v46 = vadd.f32 %v6083_v14, %v6071_v42 }
 0x2ae   :  { %v6072_v17 = vpop.f32.mrf.mxu2 }
 0x2af   :  { %v6085_v18 = vpop.f32.mrf.mxu3 }
 0x2be   :  { %v6096_v19 = vpop.f32.mrf.mxu0 }
 0x2bf   :  { %v6109_v21 = vpop.f32.mrf.mxu1  ;;  %v6097_v47 = vadd.f32 %v6096_v19, %v6084_v46 }
 0x2c1   :  { %v6110_v52 = vadd.f32 %v6109_v21, %v6097_v47 }
 0x2c6   :  { %v6122_v23 = vpop.f32.mrf.mxu2  ;;  %v6098_v27 = vpop.f32.mrf.mxu0 }
 0x2c7   :  { %v6135_v26 = vpop.f32.mrf.mxu3  ;;  %v6111_v28 = vpop.f32.mrf.mxu1  ;;  %v6123_v53 = vadd.f32 %v6122_v23, %v6110_v52 }
 0x2c9   :  { %v6136_v55 = vadd.f32 %v6135_v26, %v6123_v53 }
 0x2ce   :  { %v6124_v32 = vpop.f32.mrf.mxu2 }
 0x2cf   :  { %v6137_v34 = vpop.f32.mrf.mxu3 }
 0x2de   :  { %v6148_v40 = vpop.f32.mrf.mxu0 }
 0x2df   :  { %v6161_v43 = vpop.f32.mrf.mxu1  ;;  %v6149_v57 = vadd.f32 %v6148_v40, %v6136_v55 }
 0x2e1   :  { %v6162_v58 = vadd.f32 %v6161_v43, %v6149_v57 }
 0x2e6   :  { %v6174_v48 = vpop.f32.mrf.mxu2  ;;  %v6150_v49 = vpop.f32.mrf.mxu0 }
 0x2e7   :  { %v6187_v50 = vpop.f32.mrf.mxu3  ;;  %v6163_v51 = vpop.f32.mrf.mxu1  ;;  %v6175_v59 = vadd.f32 %v6174_v48, %v6162_v58 }
 0x2e9   :  { %v6188_v60 = vadd.f32 %v6187_v50, %v6175_v59 }
 0x2ee   :  { %v6176_v54 = vpop.f32.mrf.mxu2 }
 0x2ef   :  { %v6189_v56 = vpop.f32.mrf.mxu3 }
 0x2fe   :  { %v6200_v61 = vpop.f32.mrf.mxu0 }
 0x2ff   :  { %v6201_v62 = vadd.f32 %v6200_v61, %v6188_v60  ;;  %v6213_v63 = vpop.f32.mrf.mxu1 }
 0x301   :  { %v6214_v0 = vadd.f32 %v6213_v63, %v6201_v62 }
 0x303   :  { %v6217_v1 = vmax.f32 %v6214_v0, 0.0 }
 0x305   :  { %6254 = vmatmul.f32.vlgmr.msrb.gmra.mxu2 %v6217_v1 }
 0x306   :  { %v6202_v2 = vpop.f32.mrf.mxu0 }
 0x307   :  { %v6215_v3 = vpop.f32.mrf.mxu1 }
 0x388   :  { %v6255_v5 = vpop.f32.mrf.mxu2 }
 0x389   :  { %v6256_v6 = vadd.f32 %v9411_v4, %v6255_v5 }
 0x38b   :  { %v6259_v7 = vsel %vm6258_vm0, %v6256_v6, -inf }
 0x38c   :  { %6260 = vmax.xlane.f32.xlu0 %v6259_v7 }
 0x3ff   :  { %v6261_v8 = vpop.xlane.xlu0 %6260 }
 0x400   :  { %v6262_v9 = vsub.f32 %v6256_v6, %v6261_v8 }
 0x402   :  { %v6263_v10 = vmul.f32 1.442695, %v6262_v9 }
 0x404   :  { %9412 = vpow2.f32 %v6263_v10 }
 0x40a   :  { %v9413_v11 = vpop.eup %9412 }
 0x40b   :  { %v6265_v12 = vsel %vm6258_vm0, %v9413_v11, 0.0 }
 0x40c   :  { %6266 = vadd.xlane.f32.xlu0 %v6265_v12 }
 0x47f   :  { %v6267_v13 = vpop.xlane.xlu0 %6266 }
 0x480   :  { %9414 = vlog2.f32 %v6267_v13 }
 0x486   :  { %v9415_v14 = vpop.eup %9414 }
 0x487   :  { %v6269_v15 = vmul.f32 0.6931472, %v9415_v14 }
 0x489   :  { %v6270_v16 = vadd.f32 %v6269_v15, %v6261_v8 }
 0x48b   :  { %v6271_v17 = vsub.f32 %v6256_v6, %v6270_v16 }
 0x48d   :  { %6272 = vst.msk [vmem:[#allocation2] sm:$0x3] %vm6258_vm0, %v6271_v17 }
 0x48e   :  { %6283 = dma.vmem_to_hbm [thread:$0]  %s6279_s4, 32, %s6281_s30, [#allocation3]  }
 0x48f   :  { %9440 = dma.done.wait [#allocation3], 32  }
 0x490   :  { %9441 = vsyncadd [#allocation3], 4294967264 }
 0x491   :  { %6288 = vsyncpa [#allocation3], 1 }

</bundles_post_ra>
